<compile_context>
chip_gen: v7x
topology: tpu7x:2x2x1
jax: 0.10.0
libtpu: 0.0.40
codegen_flags: <defaults>
</compile_context>

<pallas_src>
import functools

import numpy as np
import jax
import jax.numpy as jnp
from jax.experimental import pallas as pl
from jax.experimental.pallas import tpu as pltpu

K = 4  # conv kernel size of every layer


def _out_hw(h, stride):
    return (h + 2 - K) // stride + 1


# ----------------------------------------------------------------------------
# Host-side prep (runs once): weight flattening, gather matrices.
# ----------------------------------------------------------------------------
def _build_gather(h, w, stride):
    """G[(i*4+j), p_out, p_in] = 1 iff output pos p_out reads input pos p_in
    at kernel offset (i, j) (pad=1, zeros outside -> row stays zero)."""
    oh = _out_hw(h, stride)
    ow = _out_hw(w, stride)
    g = np.zeros((K * K, oh * ow, h * w), np.float32)
    for i in range(K):
        for j in range(K):
            for oy in range(oh):
                for ox in range(ow):
                    iy = oy * stride + i - 1
                    ix = ox * stride + j - 1
                    if 0 <= iy < h and 0 <= ix < w:
                        g[i * K + j, oy * ow + ox, iy * w + ix] = 1.0
    return g


def prepare(params, h=32, w=32):
    """Flatten weights for the fused kernel and build per-layer gather mats."""
    (w1, b1), (w2, b2), (w3, b3), (w4, b4), (w5, b5) = params
    ops = {}

    # Layer 1: im2col feature order is channel-major (c*16 + i*4 + j).
    ops["w1"] = jnp.asarray(w1.reshape(64, 3 * K * K).T, jnp.bfloat16)      # (48, 64)

    # Layers 2..5: in-kernel patches are offset-major ((i*4+j)*Cin + c).
    def flat(wl):
        co = wl.shape[0]
        return jnp.asarray(jnp.transpose(wl, (2, 3, 1, 0)).reshape(-1, co),
                           jnp.bfloat16)

    ops["w2"], ops["w3"], ops["w4"] = flat(w2), flat(w3), flat(w4)
    ops["w5"] = jnp.asarray(jnp.transpose(w5, (2, 3, 1, 0)).reshape(1, -1),
                            jnp.float32)                                    # (1, 8192)
    for idx, b in enumerate([b1, b2, b3, b4, b5], start=1):
        ops[f"b{idx}"] = jnp.asarray(b.reshape(1, -1), jnp.float32)

    # Spatial sizes through the network.
    s1 = (_out_hw(h, 2), _out_hw(w, 2))      # 16x16
    s2 = (_out_hw(s1[0], 2), _out_hw(s1[1], 2))  # 8x8
    s3 = (_out_hw(s2[0], 2), _out_hw(s2[1], 2))  # 4x4
    s4 = (_out_hw(s3[0], 1), _out_hw(s3[1], 1))  # 3x3
    ops["g2"] = jnp.asarray(_build_gather(*s1, 2), jnp.bfloat16)  # (16, 64, 256)
    ops["g3"] = jnp.asarray(_build_gather(*s2, 2), jnp.bfloat16)  # (16, 16, 64)
    ops["g4"] = jnp.asarray(_build_gather(*s3, 1), jnp.bfloat16)  # (16, 9, 16)
    ops["g5"] = jnp.asarray(_build_gather(*s4, 2), jnp.bfloat16)  # (16, 1, 9)
    return ops


def _im2col_l1(x):
    """(N,3,H,W) -> (N, OH*OW, 3*K*K) patches, feature order c*16 + i*4 + j."""
    x = jnp.pad(x, ((0, 0), (0, 0), (1, 1), (1, 1)))
    n, c, h, w = x.shape
    oh = (h - K) // 2 + 1
    ow = (w - K) // 2 + 1
    cols = []
    for i in range(K):
        for j in range(K):
            cols.append(x[:, :, i:i + 2 * oh:2, j:j + 2 * ow:2])
    p = jnp.stack(cols, axis=2).reshape(n, c * K * K, oh * ow)
    return jnp.transpose(p, (0, 2, 1))


# ----------------------------------------------------------------------------
# Fused kernel: all five layers for one batch element per grid step.
# ----------------------------------------------------------------------------
def _disc_kernel(p1_ref, w1_ref, w2_ref, w3_ref, w4_ref, w5_ref,
                 b1_ref, b2_ref, b3_ref, b4_ref, b5_ref,
                 g2_ref, g3_ref, g4_ref, g5_ref, o_ref, *, eps):

    def conv(patches_bf16, w_ref, b_ref, do_norm, do_act):
        # MXU matmul in bf16, f32 accumulation.
        y = jnp.dot(patches_bf16, w_ref[...], preferred_element_type=jnp.float32)
        y = y + b_ref[...]
        if do_norm:  # InstanceNorm over spatial positions (rows), one pass.
            p = y.shape[0]
            s = jnp.sum(y, axis=0, keepdims=True)
            sq = jnp.sum(y * y, axis=0, keepdims=True)
            mean = s * (1.0 / p)
            var = jnp.maximum(sq * (1.0 / p) - mean * mean, 0.0)
            y = (y - mean) * jax.lax.rsqrt(var + eps)
        if do_act:   # LeakyReLU(0.2)
            y = jnp.where(y > 0, y, 0.2 * y)
        return y

    def gather_patches(act_f32, g_ref):
        # Build (P_out, 16*Cin) im2col patches with 16 MXU selection matmuls.
        a = act_f32.astype(jnp.bfloat16)
        blocks = [
            jnp.dot(g_ref[idx], a,
                    preferred_element_type=jnp.float32).astype(jnp.bfloat16)
            for idx in range(K * K)
        ]
        return jnp.concatenate(blocks, axis=1)

    # layer 1: conv(3->64, s2) + LeakyReLU (im2col precomputed outside, tiny)
    a1 = conv(p1_ref[0], w1_ref, b1_ref, False, True)                     # (256, 64)
    # layer 2: conv(64->128, s2) + IN + LeakyReLU
    a2 = conv(gather_patches(a1, g2_ref), w2_ref, b2_ref, True, True)     # (64, 128)
    # layer 3: conv(128->256, s2) + IN + LeakyReLU
    a3 = conv(gather_patches(a2, g3_ref), w3_ref, b3_ref, True, True)     # (16, 256)
    # layer 4: conv(256->512, s1) + IN + LeakyReLU
    a4 = conv(gather_patches(a3, g4_ref), w4_ref, b4_ref, True, True)     # (9, 512)
    # layer 5: conv(512->1, s2) as VPU multiply + lane reduce (M=N=1 is MXU-hostile)
    p5 = gather_patches(a4, g5_ref).astype(jnp.float32)                   # (1, 8192)
    y5 = jnp.sum(p5 * w5_ref[...], axis=1, keepdims=True) + b5_ref[...]   # (1, 1)
    # F.avg_pool2d over the 1x1 spatial output + flatten == identity here.
    o_ref[...] = y5.reshape(1, 1, 1).astype(o_ref.dtype)


def discriminator_forward(x, ops, *, eps=1e-5):
    n = x.shape[0]
    assert x.shape[1:] == (3, 32, 32), "prepare() was built for 3x32x32 inputs"
    p1 = _im2col_l1(x).astype(jnp.bfloat16)                  # (N, 256, 48)

    inputs = (p1, ops["w1"], ops["w2"], ops["w3"], ops["w4"], ops["w5"],
              ops["b1"], ops["b2"], ops["b3"], ops["b4"], ops["b5"],
              ops["g2"], ops["g3"], ops["g4"], ops["g5"])

    def const_spec(a):
        return pl.BlockSpec(a.shape, lambda i: (0,) * a.ndim)

    in_specs = [pl.BlockSpec((1, p1.shape[1], p1.shape[2]), lambda i: (i, 0, 0))]
    in_specs += [const_spec(a) for a in inputs[1:]]

    out = pl.pallas_call(
        functools.partial(_disc_kernel, eps=eps),
        out_shape=jax.ShapeDtypeStruct((n, 1, 1), jnp.float32),
        grid=(n,),
        in_specs=in_specs,
        out_specs=pl.BlockSpec((1, 1, 1), lambda i: (i, 0, 0)),
        compiler_params=pltpu.CompilerParams(
            dimension_semantics=("parallel",),   # batch across v7x's 2 TCs
            vmem_limit_bytes=32 << 20,
        ),
    )(*inputs)
    return out.reshape(n, 1)


# ----------------------------------------------------------------------------
# Parameters (deterministic, PyTorch-style layouts) + pure-JAX reference.
# ----------------------------------------------------------------------------
def init_params(key):
    specs = [(64, 3, 4), (128, 64, 4), (256, 128, 4), (512, 256, 4), (1, 512, 4)]
    params = []
    for i, (cout, cin, k) in enumerate(specs):
        wkey, bkey = jax.random.split(jax.random.fold_in(key, i))
        scale = 1.0 / jnp.sqrt(cin * k * k)
        w = jax.random.uniform(wkey, (cout, cin, k, k), jnp.float32, -scale, scale)
        b = jax.random.uniform(bkey, (cout,), jnp.float32, -scale, scale)
        params.append((w, b))
    return params


def reference_forward(x, params):
    def conv(x, w, b, stride):
        y = jax.lax.conv_general_dilated(
            x, w, window_strides=(stride, stride), padding=((1, 1), (1, 1)),
            dimension_numbers=("NCHW", "OIHW", "NCHW"))
        return y + b.reshape(1, -1, 1, 1)

    def inorm(x, eps=1e-5):
        m = jnp.mean(x, axis=(2, 3), keepdims=True)
        v = jnp.mean((x - m) ** 2, axis=(2, 3), keepdims=True)
        return (x - m) * jax.lax.rsqrt(v + eps)

    def lrelu(x):
        return jnp.where(x > 0, x, 0.2 * x)

    (w1, b1), (w2, b2), (w3, b3), (w4, b4), (w5, b5) = params
    x = lrelu(conv(x, w1, b1, 2))
    x = lrelu(inorm(conv(x, w2, b2, 2)))
    x = lrelu(inorm(conv(x, w3, b3, 2)))
    x = lrelu(inorm(conv(x, w4, b4, 1)))
    x = conv(x, w5, b5, 2)
    return jnp.mean(x, axis=(2, 3))


if __name__ == "__main__":
    key = jax.random.PRNGKey(0)
    pkey, xkey = jax.random.split(key)
    params = init_params(pkey)
    ops = prepare(params, 32, 32)

    # Smallest spatial size that survives all five strided 4x4 convs.
    x = jax.random.normal(xkey, (2, 3, 32, 32), jnp.float32)

    fwd = jax.jit(discriminator_forward)
    out = jax.block_until_ready(fwd(x, ops))

    assert out.shape == (2, 1), out.shape
    assert bool(jnp.all(jnp.isfinite(out)))

    # Loose tolerance: bf16 MXU inputs vs f32 reference (accumulation is f32).
    ref = reference_forward(x, params)
    assert jnp.allclose(out, ref, atol=1e-1, rtol=1e-1), (out, ref)

    print("KERNEL_OK")
</pallas_src>

<mosaic_0001>
module attributes {stable_mosaic.version = 11 : i64} {
  func.func @_disc_kernel(%arg0: i32, %arg1: memref<1x256x48xbf16, #tpu.memory_space<vmem>>, %arg2: memref<48x64xbf16, #tpu.memory_space<vmem>>, %arg3: memref<1024x128xbf16, #tpu.memory_space<vmem>>, %arg4: memref<2048x256xbf16, #tpu.memory_space<vmem>>, %arg5: memref<4096x512xbf16, #tpu.memory_space<vmem>>, %arg6: memref<1x8192xf32, #tpu.memory_space<vmem>>, %arg7: memref<1x64xf32, #tpu.memory_space<vmem>>, %arg8: memref<1x128xf32, #tpu.memory_space<vmem>>, %arg9: memref<1x256xf32, #tpu.memory_space<vmem>>, %arg10: memref<1x512xf32, #tpu.memory_space<vmem>>, %arg11: memref<1x1xf32, #tpu.memory_space<vmem>>, %arg12: memref<16x64x256xbf16, #tpu.memory_space<vmem>>, %arg13: memref<16x16x64xbf16, #tpu.memory_space<vmem>>, %arg14: memref<16x9x16xbf16, #tpu.memory_space<vmem>>, %arg15: memref<16x1x9xbf16, #tpu.memory_space<vmem>>, %arg16: memref<1x1x1xf32, #tpu.memory_space<vmem>>) attributes {dimension_semantics = [#tpu.dimension_semantics<parallel>], iteration_bounds = array<i64: 2>, scalar_prefetch = 0 : i64, scratch_operands = 0 : i64, tpu.core_type = #tpu.core_type<tc>, window_params = [{transform_indices = @transform_0, window_bounds = array<i64: 1, 256, 48>}, {pipeline_mode = #tpu.pipeline_mode<synchronous>, transform_indices = @transform_1, window_bounds = array<i64: 48, 64>}, {pipeline_mode = #tpu.pipeline_mode<synchronous>, transform_indices = @transform_2, window_bounds = array<i64: 1024, 128>}, {pipeline_mode = #tpu.pipeline_mode<synchronous>, transform_indices = @transform_3, window_bounds = array<i64: 2048, 256>}, {pipeline_mode = #tpu.pipeline_mode<synchronous>, transform_indices = @transform_4, window_bounds = array<i64: 4096, 512>}, {pipeline_mode = #tpu.pipeline_mode<synchronous>, transform_indices = @transform_5, window_bounds = array<i64: 1, 8192>}, {pipeline_mode = #tpu.pipeline_mode<synchronous>, transform_indices = @transform_6, window_bounds = array<i64: 1, 64>}, {pipeline_mode = #tpu.pipeline_mode<synchronous>, transform_indices = @transform_7, window_bounds = array<i64: 1, 128>}, {pipeline_mode = #tpu.pipeline_mode<synchronous>, transform_indices = @transform_8, window_bounds = array<i64: 1, 256>}, {pipeline_mode = #tpu.pipeline_mode<synchronous>, transform_indices = @transform_9, window_bounds = array<i64: 1, 512>}, {pipeline_mode = #tpu.pipeline_mode<synchronous>, transform_indices = @transform_10, window_bounds = array<i64: 1, 1>}, {pipeline_mode = #tpu.pipeline_mode<synchronous>, transform_indices = @transform_11, window_bounds = array<i64: 16, 64, 256>}, {pipeline_mode = #tpu.pipeline_mode<synchronous>, transform_indices = @transform_12, window_bounds = array<i64: 16, 16, 64>}, {pipeline_mode = #tpu.pipeline_mode<synchronous>, transform_indices = @transform_13, window_bounds = array<i64: 16, 9, 16>}, {pipeline_mode = #tpu.pipeline_mode<synchronous>, transform_indices = @transform_14, window_bounds = array<i64: 16, 1, 9>}, {transform_indices = @transform_15, window_bounds = array<i64: 1, 1, 1>}]} {
    %c0 = arith.constant 0 : index
    %c0_0 = arith.constant 0 : index
    %c0_1 = arith.constant 0 : index
    %0 = vector.load %arg1[%c0, %c0_0, %c0_1] : memref<1x256x48xbf16, #tpu.memory_space<vmem>>, vector<1x256x48xbf16>
    %1 = vector.shape_cast %0 : vector<1x256x48xbf16> to vector<256x48xbf16>
    %c0_2 = arith.constant 0 : index
    %c0_3 = arith.constant 0 : index
    %2 = vector.load %arg2[%c0_2, %c0_3] : memref<48x64xbf16, #tpu.memory_space<vmem>>, vector<48x64xbf16>
    %cst = arith.constant dense<0.000000e+00> : vector<256x64xf32>
    %3 = tpu.matmul %1, %2, %cst {dimension_numbers = #tpu.dot_dimension_numbers<[1], [0], [0], [1], [0, 0, 1, 1], [], []>} : vector<256x48xbf16>, vector<48x64xbf16>, vector<256x64xf32> -> vector<256x64xf32>
    %c0_4 = arith.constant 0 : index
    %c0_5 = arith.constant 0 : index
    %4 = vector.load %arg7[%c0_4, %c0_5] : memref<1x64xf32, #tpu.memory_space<vmem>>, vector<1x64xf32>
    %5 = vector.broadcast %4 : vector<1x64xf32> to vector<256x64xf32>
    %6 = arith.addf %3, %5 : vector<256x64xf32>
    %cst_6 = arith.constant 0.000000e+00 : f32
    %7 = vector.broadcast %cst_6 : f32 to vector<256x64xf32>
    %8 = arith.cmpf ogt, %6, %7 : vector<256x64xf32>
    %cst_7 = arith.constant 2.000000e-01 : f32
    %9 = vector.broadcast %cst_7 : f32 to vector<256x64xf32>
    %10 = arith.mulf %9, %6 : vector<256x64xf32>
    %11 = arith.select %8, %6, %10 : vector<256x64xi1>, vector<256x64xf32>
    %12 = arith.truncf %11 : vector<256x64xf32> to vector<256x64xbf16>
    %c0_8 = arith.constant 0 : index
    %c0_9 = arith.constant 0 : index
    %c0_10 = arith.constant 0 : index
    %13 = vector.load %arg12[%c0_8, %c0_9, %c0_10] : memref<16x64x256xbf16, #tpu.memory_space<vmem>>, vector<1x64x256xbf16>
    %14 = vector.shape_cast %13 : vector<1x64x256xbf16> to vector<64x256xbf16>
    %cst_11 = arith.constant dense<0.000000e+00> : vector<64x64xf32>
    %15 = tpu.matmul %14, %12, %cst_11 {dimension_numbers = #tpu.dot_dimension_numbers<[1], [0], [0], [1], [0, 0, 1, 1], [], []>} : vector<64x256xbf16>, vector<256x64xbf16>, vector<64x64xf32> -> vector<64x64xf32>
    %16 = arith.truncf %15 : vector<64x64xf32> to vector<64x64xbf16>
    %c1 = arith.constant 1 : index
    %c0_12 = arith.constant 0 : index
    %c0_13 = arith.constant 0 : index
    %17 = vector.load %arg12[%c1, %c0_12, %c0_13] : memref<16x64x256xbf16, #tpu.memory_space<vmem>>, vector<1x64x256xbf16>
    %18 = vector.shape_cast %17 : vector<1x64x256xbf16> to vector<64x256xbf16>
    %cst_14 = arith.constant dense<0.000000e+00> : vector<64x64xf32>
    %19 = tpu.matmul %18, %12, %cst_14 {dimension_numbers = #tpu.dot_dimension_numbers<[1], [0], [0], [1], [0, 0, 1, 1], [], []>} : vector<64x256xbf16>, vector<256x64xbf16>, vector<64x64xf32> -> vector<64x64xf32>
    %20 = arith.truncf %19 : vector<64x64xf32> to vector<64x64xbf16>
    %c2 = arith.constant 2 : index
    %c0_15 = arith.constant 0 : index
    %c0_16 = arith.constant 0 : index
    %21 = vector.load %arg12[%c2, %c0_15, %c0_16] : memref<16x64x256xbf16, #tpu.memory_space<vmem>>, vector<1x64x256xbf16>
    %22 = vector.shape_cast %21 : vector<1x64x256xbf16> to vector<64x256xbf16>
    %cst_17 = arith.constant dense<0.000000e+00> : vector<64x64xf32>
    %23 = tpu.matmul %22, %12, %cst_17 {dimension_numbers = #tpu.dot_dimension_numbers<[1], [0], [0], [1], [0, 0, 1, 1], [], []>} : vector<64x256xbf16>, vector<256x64xbf16>, vector<64x64xf32> -> vector<64x64xf32>
    %24 = arith.truncf %23 : vector<64x64xf32> to vector<64x64xbf16>
    %c3 = arith.constant 3 : index
    %c0_18 = arith.constant 0 : index
    %c0_19 = arith.constant 0 : index
    %25 = vector.load %arg12[%c3, %c0_18, %c0_19] : memref<16x64x256xbf16, #tpu.memory_space<vmem>>, vector<1x64x256xbf16>
    %26 = vector.shape_cast %25 : vector<1x64x256xbf16> to vector<64x256xbf16>
    %cst_20 = arith.constant dense<0.000000e+00> : vector<64x64xf32>
    %27 = tpu.matmul %26, %12, %cst_20 {dimension_numbers = #tpu.dot_dimension_numbers<[1], [0], [0], [1], [0, 0, 1, 1], [], []>} : vector<64x256xbf16>, vector<256x64xbf16>, vector<64x64xf32> -> vector<64x64xf32>
    %28 = arith.truncf %27 : vector<64x64xf32> to vector<64x64xbf16>
    %c4 = arith.constant 4 : index
    %c0_21 = arith.constant 0 : index
    %c0_22 = arith.constant 0 : index
    %29 = vector.load %arg12[%c4, %c0_21, %c0_22] : memref<16x64x256xbf16, #tpu.memory_space<vmem>>, vector<1x64x256xbf16>
    %30 = vector.shape_cast %29 : vector<1x64x256xbf16> to vector<64x256xbf16>
    %cst_23 = arith.constant dense<0.000000e+00> : vector<64x64xf32>
    %31 = tpu.matmul %30, %12, %cst_23 {dimension_numbers = #tpu.dot_dimension_numbers<[1], [0], [0], [1], [0, 0, 1, 1], [], []>} : vector<64x256xbf16>, vector<256x64xbf16>, vector<64x64xf32> -> vector<64x64xf32>
    %32 = arith.truncf %31 : vector<64x64xf32> to vector<64x64xbf16>
    %c5 = arith.constant 5 : index
    %c0_24 = arith.constant 0 : index
    %c0_25 = arith.constant 0 : index
    %33 = vector.load %arg12[%c5, %c0_24, %c0_25] : memref<16x64x256xbf16, #tpu.memory_space<vmem>>, vector<1x64x256xbf16>
    %34 = vector.shape_cast %33 : vector<1x64x256xbf16> to vector<64x256xbf16>
    %cst_26 = arith.constant dense<0.000000e+00> : vector<64x64xf32>
    %35 = tpu.matmul %34, %12, %cst_26 {dimension_numbers = #tpu.dot_dimension_numbers<[1], [0], [0], [1], [0, 0, 1, 1], [], []>} : vector<64x256xbf16>, vector<256x64xbf16>, vector<64x64xf32> -> vector<64x64xf32>
    %36 = arith.truncf %35 : vector<64x64xf32> to vector<64x64xbf16>
    %c6 = arith.constant 6 : index
    %c0_27 = arith.constant 0 : index
    %c0_28 = arith.constant 0 : index
    %37 = vector.load %arg12[%c6, %c0_27, %c0_28] : memref<16x64x256xbf16, #tpu.memory_space<vmem>>, vector<1x64x256xbf16>
    %38 = vector.shape_cast %37 : vector<1x64x256xbf16> to vector<64x256xbf16>
    %cst_29 = arith.constant dense<0.000000e+00> : vector<64x64xf32>
    %39 = tpu.matmul %38, %12, %cst_29 {dimension_numbers = #tpu.dot_dimension_numbers<[1], [0], [0], [1], [0, 0, 1, 1], [], []>} : vector<64x256xbf16>, vector<256x64xbf16>, vector<64x64xf32> -> vector<64x64xf32>
    %40 = arith.truncf %39 : vector<64x64xf32> to vector<64x64xbf16>
    %c7 = arith.constant 7 : index
    %c0_30 = arith.constant 0 : index
    %c0_31 = arith.constant 0 : index
    %41 = vector.load %arg12[%c7, %c0_30, %c0_31] : memref<16x64x256xbf16, #tpu.memory_space<vmem>>, vector<1x64x256xbf16>
    %42 = vector.shape_cast %41 : vector<1x64x256xbf16> to vector<64x256xbf16>
    %cst_32 = arith.constant dense<0.000000e+00> : vector<64x64xf32>
    %43 = tpu.matmul %42, %12, %cst_32 {dimension_numbers = #tpu.dot_dimension_numbers<[1], [0], [0], [1], [0, 0, 1, 1], [], []>} : vector<64x256xbf16>, vector<256x64xbf16>, vector<64x64xf32> -> vector<64x64xf32>
    %44 = arith.truncf %43 : vector<64x64xf32> to vector<64x64xbf16>
    %c8 = arith.constant 8 : index
    %c0_33 = arith.constant 0 : index
    %c0_34 = arith.constant 0 : index
    %45 = vector.load %arg12[%c8, %c0_33, %c0_34] : memref<16x64x256xbf16, #tpu.memory_space<vmem>>, vector<1x64x256xbf16>
    %46 = vector.shape_cast %45 : vector<1x64x256xbf16> to vector<64x256xbf16>
    %cst_35 = arith.constant dense<0.000000e+00> : vector<64x64xf32>
    %47 = tpu.matmul %46, %12, %cst_35 {dimension_numbers = #tpu.dot_dimension_numbers<[1], [0], [0], [1], [0, 0, 1, 1], [], []>} : vector<64x256xbf16>, vector<256x64xbf16>, vector<64x64xf32> -> vector<64x64xf32>
    %48 = arith.truncf %47 : vector<64x64xf32> to vector<64x64xbf16>
    %c9 = arith.constant 9 : index
    %c0_36 = arith.constant 0 : index
    %c0_37 = arith.constant 0 : index
    %49 = vector.load %arg12[%c9, %c0_36, %c0_37] : memref<16x64x256xbf16, #tpu.memory_space<vmem>>, vector<1x64x256xbf16>
    %50 = vector.shape_cast %49 : vector<1x64x256xbf16> to vector<64x256xbf16>
    %cst_38 = arith.constant dense<0.000000e+00> : vector<64x64xf32>
    %51 = tpu.matmul %50, %12, %cst_38 {dimension_numbers = #tpu.dot_dimension_numbers<[1], [0], [0], [1], [0, 0, 1, 1], [], []>} : vector<64x256xbf16>, vector<256x64xbf16>, vector<64x64xf32> -> vector<64x64xf32>
    %52 = arith.truncf %51 : vector<64x64xf32> to vector<64x64xbf16>
    %c10 = arith.constant 10 : index
    %c0_39 = arith.constant 0 : index
    %c0_40 = arith.constant 0 : index
    %53 = vector.load %arg12[%c10, %c0_39, %c0_40] : memref<16x64x256xbf16, #tpu.memory_space<vmem>>, vector<1x64x256xbf16>
    %54 = vector.shape_cast %53 : vector<1x64x256xbf16> to vector<64x256xbf16>
    %cst_41 = arith.constant dense<0.000000e+00> : vector<64x64xf32>
    %55 = tpu.matmul %54, %12, %cst_41 {dimension_numbers = #tpu.dot_dimension_numbers<[1], [0], [0], [1], [0, 0, 1, 1], [], []>} : vector<64x256xbf16>, vector<256x64xbf16>, vector<64x64xf32> -> vector<64x64xf32>
    %56 = arith.truncf %55 : vector<64x64xf32> to vector<64x64xbf16>
    %c11 = arith.constant 11 : index
    %c0_42 = arith.constant 0 : index
    %c0_43 = arith.constant 0 : index
    %57 = vector.load %arg12[%c11, %c0_42, %c0_43] : memref<16x64x256xbf16, #tpu.memory_space<vmem>>, vector<1x64x256xbf16>
    %58 = vector.shape_cast %57 : vector<1x64x256xbf16> to vector<64x256xbf16>
    %cst_44 = arith.constant dense<0.000000e+00> : vector<64x64xf32>
    %59 = tpu.matmul %58, %12, %cst_44 {dimension_numbers = #tpu.dot_dimension_numbers<[1], [0], [0], [1], [0, 0, 1, 1], [], []>} : vector<64x256xbf16>, vector<256x64xbf16>, vector<64x64xf32> -> vector<64x64xf32>
    %60 = arith.truncf %59 : vector<64x64xf32> to vector<64x64xbf16>
    %c12 = arith.constant 12 : index
    %c0_45 = arith.constant 0 : index
    %c0_46 = arith.constant 0 : index
    %61 = vector.load %arg12[%c12, %c0_45, %c0_46] : memref<16x64x256xbf16, #tpu.memory_space<vmem>>, vector<1x64x256xbf16>
    %62 = vector.shape_cast %61 : vector<1x64x256xbf16> to vector<64x256xbf16>
    %cst_47 = arith.constant dense<0.000000e+00> : vector<64x64xf32>
    %63 = tpu.matmul %62, %12, %cst_47 {dimension_numbers = #tpu.dot_dimension_numbers<[1], [0], [0], [1], [0, 0, 1, 1], [], []>} : vector<64x256xbf16>, vector<256x64xbf16>, vector<64x64xf32> -> vector<64x64xf32>
    %64 = arith.truncf %63 : vector<64x64xf32> to vector<64x64xbf16>
    %c13 = arith.constant 13 : index
    %c0_48 = arith.constant 0 : index
    %c0_49 = arith.constant 0 : index
    %65 = vector.load %arg12[%c13, %c0_48, %c0_49] : memref<16x64x256xbf16, #tpu.memory_space<vmem>>, vector<1x64x256xbf16>
    %66 = vector.shape_cast %65 : vector<1x64x256xbf16> to vector<64x256xbf16>
    %cst_50 = arith.constant dense<0.000000e+00> : vector<64x64xf32>
    %67 = tpu.matmul %66, %12, %cst_50 {dimension_numbers = #tpu.dot_dimension_numbers<[1], [0], [0], [1], [0, 0, 1, 1], [], []>} : vector<64x256xbf16>, vector<256x64xbf16>, vector<64x64xf32> -> vector<64x64xf32>
    %68 = arith.truncf %67 : vector<64x64xf32> to vector<64x64xbf16>
    %c14 = arith.constant 14 : index
    %c0_51 = arith.constant 0 : index
    %c0_52 = arith.constant 0 : index
    %69 = vector.load %arg12[%c14, %c0_51, %c0_52] : memref<16x64x256xbf16, #tpu.memory_space<vmem>>, vector<1x64x256xbf16>
    %70 = vector.shape_cast %69 : vector<1x64x256xbf16> to vector<64x256xbf16>
    %cst_53 = arith.constant dense<0.000000e+00> : vector<64x64xf32>
    %71 = tpu.matmul %70, %12, %cst_53 {dimension_numbers = #tpu.dot_dimension_numbers<[1], [0], [0], [1], [0, 0, 1, 1], [], []>} : vector<64x256xbf16>, vector<256x64xbf16>, vector<64x64xf32> -> vector<64x64xf32>
    %72 = arith.truncf %71 : vector<64x64xf32> to vector<64x64xbf16>
    %c15 = arith.constant 15 : index
    %c0_54 = arith.constant 0 : index
    %c0_55 = arith.constant 0 : index
    %73 = vector.load %arg12[%c15, %c0_54, %c0_55] : memref<16x64x256xbf16, #tpu.memory_space<vmem>>, vector<1x64x256xbf16>
    %74 = vector.shape_cast %73 : vector<1x64x256xbf16> to vector<64x256xbf16>
    %cst_56 = arith.constant dense<0.000000e+00> : vector<64x64xf32>
    %75 = tpu.matmul %74, %12, %cst_56 {dimension_numbers = #tpu.dot_dimension_numbers<[1], [0], [0], [1], [0, 0, 1, 1], [], []>} : vector<64x256xbf16>, vector<256x64xbf16>, vector<64x64xf32> -> vector<64x64xf32>
    %76 = arith.truncf %75 : vector<64x64xf32> to vector<64x64xbf16>
    %77 = tpu.concatenate %16, %20, %24, %28, %32, %36, %40, %44, %48, %52, %56, %60, %64, %68, %72, %76 in 1 : vector<64x64xbf16>, vector<64x64xbf16>, vector<64x64xbf16>, vector<64x64xbf16>, vector<64x64xbf16>, vector<64x64xbf16>, vector<64x64xbf16>, vector<64x64xbf16>, vector<64x64xbf16>, vector<64x64xbf16>, vector<64x64xbf16>, vector<64x64xbf16>, vector<64x64xbf16>, vector<64x64xbf16>, vector<64x64xbf16>, vector<64x64xbf16> -> vector<64x1024xbf16>
    %c0_57 = arith.constant 0 : index
    %c0_58 = arith.constant 0 : index
    %78 = vector.load %arg3[%c0_57, %c0_58] : memref<1024x128xbf16, #tpu.memory_space<vmem>>, vector<1024x128xbf16>
    %cst_59 = arith.constant dense<0.000000e+00> : vector<64x128xf32>
    %79 = tpu.matmul %77, %78, %cst_59 {dimension_numbers = #tpu.dot_dimension_numbers<[1], [0], [0], [1], [0, 0, 1, 1], [], []>} : vector<64x1024xbf16>, vector<1024x128xbf16>, vector<64x128xf32> -> vector<64x128xf32>
    %c0_60 = arith.constant 0 : index
    %c0_61 = arith.constant 0 : index
    %80 = vector.load %arg8[%c0_60, %c0_61] : memref<1x128xf32, #tpu.memory_space<vmem>>, vector<1x128xf32>
    %81 = vector.broadcast %80 : vector<1x128xf32> to vector<64x128xf32>
    %82 = arith.addf %79, %81 : vector<64x128xf32>
    %cst_62 = arith.constant dense<0.000000e+00> : vector<128xf32>
    %83 = vector.multi_reduction <add>, %82, %cst_62 [0] : vector<64x128xf32> to vector<128xf32>
    %84 = vector.shape_cast %83 : vector<128xf32> to vector<1x128xf32>
    %85 = arith.mulf %82, %82 : vector<64x128xf32>
    %cst_63 = arith.constant dense<0.000000e+00> : vector<128xf32>
    %86 = vector.multi_reduction <add>, %85, %cst_63 [0] : vector<64x128xf32> to vector<128xf32>
    %87 = vector.shape_cast %86 : vector<128xf32> to vector<1x128xf32>
    %cst_64 = arith.constant 1.562500e-02 : f32
    %88 = vector.broadcast %cst_64 : f32 to vector<1x128xf32>
    %89 = arith.mulf %84, %88 : vector<1x128xf32>
    %cst_65 = arith.constant 1.562500e-02 : f32
    %90 = vector.broadcast %cst_65 : f32 to vector<1x128xf32>
    %91 = arith.mulf %87, %90 : vector<1x128xf32>
    %92 = arith.mulf %89, %89 : vector<1x128xf32>
    %93 = arith.subf %91, %92 : vector<1x128xf32>
    %cst_66 = arith.constant 0.000000e+00 : f32
    %94 = vector.broadcast %cst_66 : f32 to vector<1x128xf32>
    %95 = arith.maximumf %93, %94 : vector<1x128xf32>
    %96 = vector.broadcast %89 : vector<1x128xf32> to vector<64x128xf32>
    %97 = arith.subf %82, %96 : vector<64x128xf32>
    %cst_67 = arith.constant 9.99999974E-6 : f32
    %98 = vector.broadcast %cst_67 : f32 to vector<1x128xf32>
    %99 = arith.addf %95, %98 : vector<1x128xf32>
    %100 = math.rsqrt %99 : vector<1x128xf32>
    %101 = vector.broadcast %100 : vector<1x128xf32> to vector<64x128xf32>
    %102 = arith.mulf %97, %101 : vector<64x128xf32>
    %cst_68 = arith.constant 0.000000e+00 : f32
    %103 = vector.broadcast %cst_68 : f32 to vector<64x128xf32>
    %104 = arith.cmpf ogt, %102, %103 : vector<64x128xf32>
    %cst_69 = arith.constant 2.000000e-01 : f32
    %105 = vector.broadcast %cst_69 : f32 to vector<64x128xf32>
    %106 = arith.mulf %105, %102 : vector<64x128xf32>
    %107 = arith.select %104, %102, %106 : vector<64x128xi1>, vector<64x128xf32>
    %108 = arith.truncf %107 : vector<64x128xf32> to vector<64x128xbf16>
    %c0_70 = arith.constant 0 : index
    %c0_71 = arith.constant 0 : index
    %c0_72 = arith.constant 0 : index
    %109 = vector.load %arg13[%c0_70, %c0_71, %c0_72] : memref<16x16x64xbf16, #tpu.memory_space<vmem>>, vector<1x16x64xbf16>
    %110 = vector.shape_cast %109 : vector<1x16x64xbf16> to vector<16x64xbf16>
    %cst_73 = arith.constant dense<0.000000e+00> : vector<16x128xf32>
    %111 = tpu.matmul %110, %108, %cst_73 {dimension_numbers = #tpu.dot_dimension_numbers<[1], [0], [0], [1], [0, 0, 1, 1], [], []>} : vector<16x64xbf16>, vector<64x128xbf16>, vector<16x128xf32> -> vector<16x128xf32>
    %112 = arith.truncf %111 : vector<16x128xf32> to vector<16x128xbf16>
    %c1_74 = arith.constant 1 : index
    %c0_75 = arith.constant 0 : index
    %c0_76 = arith.constant 0 : index
    %113 = vector.load %arg13[%c1_74, %c0_75, %c0_76] : memref<16x16x64xbf16, #tpu.memory_space<vmem>>, vector<1x16x64xbf16>
    %114 = vector.shape_cast %113 : vector<1x16x64xbf16> to vector<16x64xbf16>
    %cst_77 = arith.constant dense<0.000000e+00> : vector<16x128xf32>
    %115 = tpu.matmul %114, %108, %cst_77 {dimension_numbers = #tpu.dot_dimension_numbers<[1], [0], [0], [1], [0, 0, 1, 1], [], []>} : vector<16x64xbf16>, vector<64x128xbf16>, vector<16x128xf32> -> vector<16x128xf32>
    %116 = arith.truncf %115 : vector<16x128xf32> to vector<16x128xbf16>
    %c2_78 = arith.constant 2 : index
    %c0_79 = arith.constant 0 : index
    %c0_80 = arith.constant 0 : index
    %117 = vector.load %arg13[%c2_78, %c0_79, %c0_80] : memref<16x16x64xbf16, #tpu.memory_space<vmem>>, vector<1x16x64xbf16>
    %118 = vector.shape_cast %117 : vector<1x16x64xbf16> to vector<16x64xbf16>
    %cst_81 = arith.constant dense<0.000000e+00> : vector<16x128xf32>
    %119 = tpu.matmul %118, %108, %cst_81 {dimension_numbers = #tpu.dot_dimension_numbers<[1], [0], [0], [1], [0, 0, 1, 1], [], []>} : vector<16x64xbf16>, vector<64x128xbf16>, vector<16x128xf32> -> vector<16x128xf32>
    %120 = arith.truncf %119 : vector<16x128xf32> to vector<16x128xbf16>
    %c3_82 = arith.constant 3 : index
    %c0_83 = arith.constant 0 : index
    %c0_84 = arith.constant 0 : index
    %121 = vector.load %arg13[%c3_82, %c0_83, %c0_84] : memref<16x16x64xbf16, #tpu.memory_space<vmem>>, vector<1x16x64xbf16>
    %122 = vector.shape_cast %121 : vector<1x16x64xbf16> to vector<16x64xbf16>
    %cst_85 = arith.constant dense<0.000000e+00> : vector<16x128xf32>
    %123 = tpu.matmul %122, %108, %cst_85 {dimension_numbers = #tpu.dot_dimension_numbers<[1], [0], [0], [1], [0, 0, 1, 1], [], []>} : vector<16x64xbf16>, vector<64x128xbf16>, vector<16x128xf32> -> vector<16x128xf32>
    %124 = arith.truncf %123 : vector<16x128xf32> to vector<16x128xbf16>
    %c4_86 = arith.constant 4 : index
    %c0_87 = arith.constant 0 : index
    %c0_88 = arith.constant 0 : index
    %125 = vector.load %arg13[%c4_86, %c0_87, %c0_88] : memref<16x16x64xbf16, #tpu.memory_space<vmem>>, vector<1x16x64xbf16>
    %126 = vector.shape_cast %125 : vector<1x16x64xbf16> to vector<16x64xbf16>
    %cst_89 = arith.constant dense<0.000000e+00> : vector<16x128xf32>
    %127 = tpu.matmul %126, %108, %cst_89 {dimension_numbers = #tpu.dot_dimension_numbers<[1], [0], [0], [1], [0, 0, 1, 1], [], []>} : vector<16x64xbf16>, vector<64x128xbf16>, vector<16x128xf32> -> vector<16x128xf32>
    %128 = arith.truncf %127 : vector<16x128xf32> to vector<16x128xbf16>
    %c5_90 = arith.constant 5 : index
    %c0_91 = arith.constant 0 : index
    %c0_92 = arith.constant 0 : index
    %129 = vector.load %arg13[%c5_90, %c0_91, %c0_92] : memref<16x16x64xbf16, #tpu.memory_space<vmem>>, vector<1x16x64xbf16>
    %130 = vector.shape_cast %129 : vector<1x16x64xbf16> to vector<16x64xbf16>
    %cst_93 = arith.constant dense<0.000000e+00> : vector<16x128xf32>
    %131 = tpu.matmul %130, %108, %cst_93 {dimension_numbers = #tpu.dot_dimension_numbers<[1], [0], [0], [1], [0, 0, 1, 1], [], []>} : vector<16x64xbf16>, vector<64x128xbf16>, vector<16x128xf32> -> vector<16x128xf32>
    %132 = arith.truncf %131 : vector<16x128xf32> to vector<16x128xbf16>
    %c6_94 = arith.constant 6 : index
    %c0_95 = arith.constant 0 : index
    %c0_96 = arith.constant 0 : index
    %133 = vector.load %arg13[%c6_94, %c0_95, %c0_96] : memref<16x16x64xbf16, #tpu.memory_space<vmem>>, vector<1x16x64xbf16>
    %134 = vector.shape_cast %133 : vector<1x16x64xbf16> to vector<16x64xbf16>
    %cst_97 = arith.constant dense<0.000000e+00> : vector<16x128xf32>
    %135 = tpu.matmul %134, %108, %cst_97 {dimension_numbers = #tpu.dot_dimension_numbers<[1], [0], [0], [1], [0, 0, 1, 1], [], []>} : vector<16x64xbf16>, vector<64x128xbf16>, vector<16x128xf32> -> vector<16x128xf32>
    %136 = arith.truncf %135 : vector<16x128xf32> to vector<16x128xbf16>
    %c7_98 = arith.constant 7 : index
    %c0_99 = arith.constant 0 : index
    %c0_100 = arith.constant 0 : index
    %137 = vector.load %arg13[%c7_98, %c0_99, %c0_100] : memref<16x16x64xbf16, #tpu.memory_space<vmem>>, vector<1x16x64xbf16>
    %138 = vector.shape_cast %137 : vector<1x16x64xbf16> to vector<16x64xbf16>
    %cst_101 = arith.constant dense<0.000000e+00> : vector<16x128xf32>
    %139 = tpu.matmul %138, %108, %cst_101 {dimension_numbers = #tpu.dot_dimension_numbers<[1], [0], [0], [1], [0, 0, 1, 1], [], []>} : vector<16x64xbf16>, vector<64x128xbf16>, vector<16x128xf32> -> vector<16x128xf32>
    %140 = arith.truncf %139 : vector<16x128xf32> to vector<16x128xbf16>
    %c8_102 = arith.constant 8 : index
    %c0_103 = arith.constant 0 : index
    %c0_104 = arith.constant 0 : index
    %141 = vector.load %arg13[%c8_102, %c0_103, %c0_104] : memref<16x16x64xbf16, #tpu.memory_space<vmem>>, vector<1x16x64xbf16>
    %142 = vector.shape_cast %141 : vector<1x16x64xbf16> to vector<16x64xbf16>
    %cst_105 = arith.constant dense<0.000000e+00> : vector<16x128xf32>
    %143 = tpu.matmul %142, %108, %cst_105 {dimension_numbers = #tpu.dot_dimension_numbers<[1], [0], [0], [1], [0, 0, 1, 1], [], []>} : vector<16x64xbf16>, vector<64x128xbf16>, vector<16x128xf32> -> vector<16x128xf32>
    %144 = arith.truncf %143 : vector<16x128xf32> to vector<16x128xbf16>
    %c9_106 = arith.constant 9 : index
    %c0_107 = arith.constant 0 : index
    %c0_108 = arith.constant 0 : index
    %145 = vector.load %arg13[%c9_106, %c0_107, %c0_108] : memref<16x16x64xbf16, #tpu.memory_space<vmem>>, vector<1x16x64xbf16>
    %146 = vector.shape_cast %145 : vector<1x16x64xbf16> to vector<16x64xbf16>
    %cst_109 = arith.constant dense<0.000000e+00> : vector<16x128xf32>
    %147 = tpu.matmul %146, %108, %cst_109 {dimension_numbers = #tpu.dot_dimension_numbers<[1], [0], [0], [1], [0, 0, 1, 1], [], []>} : vector<16x64xbf16>, vector<64x128xbf16>, vector<16x128xf32> -> vector<16x128xf32>
    %148 = arith.truncf %147 : vector<16x128xf32> to vector<16x128xbf16>
    %c10_110 = arith.constant 10 : index
    %c0_111 = arith.constant 0 : index
    %c0_112 = arith.constant 0 : index
    %149 = vector.load %arg13[%c10_110, %c0_111, %c0_112] : memref<16x16x64xbf16, #tpu.memory_space<vmem>>, vector<1x16x64xbf16>
    %150 = vector.shape_cast %149 : vector<1x16x64xbf16> to vector<16x64xbf16>
    %cst_113 = arith.constant dense<0.000000e+00> : vector<16x128xf32>
    %151 = tpu.matmul %150, %108, %cst_113 {dimension_numbers = #tpu.dot_dimension_numbers<[1], [0], [0], [1], [0, 0, 1, 1], [], []>} : vector<16x64xbf16>, vector<64x128xbf16>, vector<16x128xf32> -> vector<16x128xf32>
    %152 = arith.truncf %151 : vector<16x128xf32> to vector<16x128xbf16>
    %c11_114 = arith.constant 11 : index
    %c0_115 = arith.constant 0 : index
    %c0_116 = arith.constant 0 : index
    %153 = vector.load %arg13[%c11_114, %c0_115, %c0_116] : memref<16x16x64xbf16, #tpu.memory_space<vmem>>, vector<1x16x64xbf16>
    %154 = vector.shape_cast %153 : vector<1x16x64xbf16> to vector<16x64xbf16>
    %cst_117 = arith.constant dense<0.000000e+00> : vector<16x128xf32>
    %155 = tpu.matmul %154, %108, %cst_117 {dimension_numbers = #tpu.dot_dimension_numbers<[1], [0], [0], [1], [0, 0, 1, 1], [], []>} : vector<16x64xbf16>, vector<64x128xbf16>, vector<16x128xf32> -> vector<16x128xf32>
    %156 = arith.truncf %155 : vector<16x128xf32> to vector<16x128xbf16>
    %c12_118 = arith.constant 12 : index
    %c0_119 = arith.constant 0 : index
    %c0_120 = arith.constant 0 : index
    %157 = vector.load %arg13[%c12_118, %c0_119, %c0_120] : memref<16x16x64xbf16, #tpu.memory_space<vmem>>, vector<1x16x64xbf16>
    %158 = vector.shape_cast %157 : vector<1x16x64xbf16> to vector<16x64xbf16>
    %cst_121 = arith.constant dense<0.000000e+00> : vector<16x128xf32>
    %159 = tpu.matmul %158, %108, %cst_121 {dimension_numbers = #tpu.dot_dimension_numbers<[1], [0], [0], [1], [0, 0, 1, 1], [], []>} : vector<16x64xbf16>, vector<64x128xbf16>, vector<16x128xf32> -> vector<16x128xf32>
    %160 = arith.truncf %159 : vector<16x128xf32> to vector<16x128xbf16>
    %c13_122 = arith.constant 13 : index
    %c0_123 = arith.constant 0 : index
    %c0_124 = arith.constant 0 : index
    %161 = vector.load %arg13[%c13_122, %c0_123, %c0_124] : memref<16x16x64xbf16, #tpu.memory_space<vmem>>, vector<1x16x64xbf16>
    %162 = vector.shape_cast %161 : vector<1x16x64xbf16> to vector<16x64xbf16>
    %cst_125 = arith.constant dense<0.000000e+00> : vector<16x128xf32>
    %163 = tpu.matmul %162, %108, %cst_125 {dimension_numbers = #tpu.dot_dimension_numbers<[1], [0], [0], [1], [0, 0, 1, 1], [], []>} : vector<16x64xbf16>, vector<64x128xbf16>, vector<16x128xf32> -> vector<16x128xf32>
    %164 = arith.truncf %163 : vector<16x128xf32> to vector<16x128xbf16>
    %c14_126 = arith.constant 14 : index
    %c0_127 = arith.constant 0 : index
    %c0_128 = arith.constant 0 : index
    %165 = vector.load %arg13[%c14_126, %c0_127, %c0_128] : memref<16x16x64xbf16, #tpu.memory_space<vmem>>, vector<1x16x64xbf16>
    %166 = vector.shape_cast %165 : vector<1x16x64xbf16> to vector<16x64xbf16>
    %cst_129 = arith.constant dense<0.000000e+00> : vector<16x128xf32>
    %167 = tpu.matmul %166, %108, %cst_129 {dimension_numbers = #tpu.dot_dimension_numbers<[1], [0], [0], [1], [0, 0, 1, 1], [], []>} : vector<16x64xbf16>, vector<64x128xbf16>, vector<16x128xf32> -> vector<16x128xf32>
    %168 = arith.truncf %167 : vector<16x128xf32> to vector<16x128xbf16>
    %c15_130 = arith.constant 15 : index
    %c0_131 = arith.constant 0 : index
    %c0_132 = arith.constant 0 : index
    %169 = vector.load %arg13[%c15_130, %c0_131, %c0_132] : memref<16x16x64xbf16, #tpu.memory_space<vmem>>, vector<1x16x64xbf16>
    %170 = vector.shape_cast %169 : vector<1x16x64xbf16> to vector<16x64xbf16>
    %cst_133 = arith.constant dense<0.000000e+00> : vector<16x128xf32>
    %171 = tpu.matmul %170, %108, %cst_133 {dimension_numbers = #tpu.dot_dimension_numbers<[1], [0], [0], [1], [0, 0, 1, 1], [], []>} : vector<16x64xbf16>, vector<64x128xbf16>, vector<16x128xf32> -> vector<16x128xf32>
    %172 = arith.truncf %171 : vector<16x128xf32> to vector<16x128xbf16>
    %173 = tpu.concatenate %112, %116, %120, %124, %128, %132, %136, %140, %144, %148, %152, %156, %160, %164, %168, %172 in 1 : vector<16x128xbf16>, vector<16x128xbf16>, vector<16x128xbf16>, vector<16x128xbf16>, vector<16x128xbf16>, vector<16x128xbf16>, vector<16x128xbf16>, vector<16x128xbf16>, vector<16x128xbf16>, vector<16x128xbf16>, vector<16x128xbf16>, vector<16x128xbf16>, vector<16x128xbf16>, vector<16x128xbf16>, vector<16x128xbf16>, vector<16x128xbf16> -> vector<16x2048xbf16>
    %c0_134 = arith.constant 0 : index
    %c0_135 = arith.constant 0 : index
    %174 = vector.load %arg4[%c0_134, %c0_135] : memref<2048x256xbf16, #tpu.memory_space<vmem>>, vector<2048x256xbf16>
    %cst_136 = arith.constant dense<0.000000e+00> : vector<16x256xf32>
    %175 = tpu.matmul %173, %174, %cst_136 {dimension_numbers = #tpu.dot_dimension_numbers<[1], [0], [0], [1], [0, 0, 1, 1], [], []>} : vector<16x2048xbf16>, vector<2048x256xbf16>, vector<16x256xf32> -> vector<16x256xf32>
    %c0_137 = arith.constant 0 : index
    %c0_138 = arith.constant 0 : index
    %176 = vector.load %arg9[%c0_137, %c0_138] : memref<1x256xf32, #tpu.memory_space<vmem>>, vector<1x256xf32>
    %177 = vector.broadcast %176 : vector<1x256xf32> to vector<16x256xf32>
    %178 = arith.addf %175, %177 : vector<16x256xf32>
    %cst_139 = arith.constant dense<0.000000e+00> : vector<256xf32>
    %179 = vector.multi_reduction <add>, %178, %cst_139 [0] : vector<16x256xf32> to vector<256xf32>
    %180 = vector.shape_cast %179 : vector<256xf32> to vector<1x256xf32>
    %181 = arith.mulf %178, %178 : vector<16x256xf32>
    %cst_140 = arith.constant dense<0.000000e+00> : vector<256xf32>
    %182 = vector.multi_reduction <add>, %181, %cst_140 [0] : vector<16x256xf32> to vector<256xf32>
    %183 = vector.shape_cast %182 : vector<256xf32> to vector<1x256xf32>
    %cst_141 = arith.constant 6.250000e-02 : f32
    %184 = vector.broadcast %cst_141 : f32 to vector<1x256xf32>
    %185 = arith.mulf %180, %184 : vector<1x256xf32>
    %cst_142 = arith.constant 6.250000e-02 : f32
    %186 = vector.broadcast %cst_142 : f32 to vector<1x256xf32>
    %187 = arith.mulf %183, %186 : vector<1x256xf32>
    %188 = arith.mulf %185, %185 : vector<1x256xf32>
    %189 = arith.subf %187, %188 : vector<1x256xf32>
    %cst_143 = arith.constant 0.000000e+00 : f32
    %190 = vector.broadcast %cst_143 : f32 to vector<1x256xf32>
    %191 = arith.maximumf %189, %190 : vector<1x256xf32>
    %192 = vector.broadcast %185 : vector<1x256xf32> to vector<16x256xf32>
    %193 = arith.subf %178, %192 : vector<16x256xf32>
    %cst_144 = arith.constant 9.99999974E-6 : f32
    %194 = vector.broadcast %cst_144 : f32 to vector<1x256xf32>
    %195 = arith.addf %191, %194 : vector<1x256xf32>
    %196 = math.rsqrt %195 : vector<1x256xf32>
    %197 = vector.broadcast %196 : vector<1x256xf32> to vector<16x256xf32>
    %198 = arith.mulf %193, %197 : vector<16x256xf32>
    %cst_145 = arith.constant 0.000000e+00 : f32
    %199 = vector.broadcast %cst_145 : f32 to vector<16x256xf32>
    %200 = arith.cmpf ogt, %198, %199 : vector<16x256xf32>
    %cst_146 = arith.constant 2.000000e-01 : f32
    %201 = vector.broadcast %cst_146 : f32 to vector<16x256xf32>
    %202 = arith.mulf %201, %198 : vector<16x256xf32>
    %203 = arith.select %200, %198, %202 : vector<16x256xi1>, vector<16x256xf32>
    %204 = arith.truncf %203 : vector<16x256xf32> to vector<16x256xbf16>
    %c0_147 = arith.constant 0 : index
    %c0_148 = arith.constant 0 : index
    %c0_149 = arith.constant 0 : index
    %205 = vector.load %arg14[%c0_147, %c0_148, %c0_149] : memref<16x9x16xbf16, #tpu.memory_space<vmem>>, vector<1x9x16xbf16>
    %206 = vector.shape_cast %205 : vector<1x9x16xbf16> to vector<9x16xbf16>
    %cst_150 = arith.constant dense<0.000000e+00> : vector<9x256xf32>
    %207 = tpu.matmul %206, %204, %cst_150 {dimension_numbers = #tpu.dot_dimension_numbers<[1], [0], [0], [1], [0, 0, 1, 1], [], []>} : vector<9x16xbf16>, vector<16x256xbf16>, vector<9x256xf32> -> vector<9x256xf32>
    %208 = arith.truncf %207 : vector<9x256xf32> to vector<9x256xbf16>
    %c1_151 = arith.constant 1 : index
    %c0_152 = arith.constant 0 : index
    %c0_153 = arith.constant 0 : index
    %209 = vector.load %arg14[%c1_151, %c0_152, %c0_153] : memref<16x9x16xbf16, #tpu.memory_space<vmem>>, vector<1x9x16xbf16>
    %210 = vector.shape_cast %209 : vector<1x9x16xbf16> to vector<9x16xbf16>
    %cst_154 = arith.constant dense<0.000000e+00> : vector<9x256xf32>
    %211 = tpu.matmul %210, %204, %cst_154 {dimension_numbers = #tpu.dot_dimension_numbers<[1], [0], [0], [1], [0, 0, 1, 1], [], []>} : vector<9x16xbf16>, vector<16x256xbf16>, vector<9x256xf32> -> vector<9x256xf32>
    %212 = arith.truncf %211 : vector<9x256xf32> to vector<9x256xbf16>
    %c2_155 = arith.constant 2 : index
    %c0_156 = arith.constant 0 : index
    %c0_157 = arith.constant 0 : index
    %213 = vector.load %arg14[%c2_155, %c0_156, %c0_157] : memref<16x9x16xbf16, #tpu.memory_space<vmem>>, vector<1x9x16xbf16>
    %214 = vector.shape_cast %213 : vector<1x9x16xbf16> to vector<9x16xbf16>
    %cst_158 = arith.constant dense<0.000000e+00> : vector<9x256xf32>
    %215 = tpu.matmul %214, %204, %cst_158 {dimension_numbers = #tpu.dot_dimension_numbers<[1], [0], [0], [1], [0, 0, 1, 1], [], []>} : vector<9x16xbf16>, vector<16x256xbf16>, vector<9x256xf32> -> vector<9x256xf32>
    %216 = arith.truncf %215 : vector<9x256xf32> to vector<9x256xbf16>
    %c3_159 = arith.constant 3 : index
    %c0_160 = arith.constant 0 : index
    %c0_161 = arith.constant 0 : index
    %217 = vector.load %arg14[%c3_159, %c0_160, %c0_161] : memref<16x9x16xbf16, #tpu.memory_space<vmem>>, vector<1x9x16xbf16>
    %218 = vector.shape_cast %217 : vector<1x9x16xbf16> to vector<9x16xbf16>
    %cst_162 = arith.constant dense<0.000000e+00> : vector<9x256xf32>
    %219 = tpu.matmul %218, %204, %cst_162 {dimension_numbers = #tpu.dot_dimension_numbers<[1], [0], [0], [1], [0, 0, 1, 1], [], []>} : vector<9x16xbf16>, vector<16x256xbf16>, vector<9x256xf32> -> vector<9x256xf32>
    %220 = arith.truncf %219 : vector<9x256xf32> to vector<9x256xbf16>
    %c4_163 = arith.constant 4 : index
    %c0_164 = arith.constant 0 : index
    %c0_165 = arith.constant 0 : index
    %221 = vector.load %arg14[%c4_163, %c0_164, %c0_165] : memref<16x9x16xbf16, #tpu.memory_space<vmem>>, vector<1x9x16xbf16>
    %222 = vector.shape_cast %221 : vector<1x9x16xbf16> to vector<9x16xbf16>
    %cst_166 = arith.constant dense<0.000000e+00> : vector<9x256xf32>
    %223 = tpu.matmul %222, %204, %cst_166 {dimension_numbers = #tpu.dot_dimension_numbers<[1], [0], [0], [1], [0, 0, 1, 1], [], []>} : vector<9x16xbf16>, vector<16x256xbf16>, vector<9x256xf32> -> vector<9x256xf32>
    %224 = arith.truncf %223 : vector<9x256xf32> to vector<9x256xbf16>
    %c5_167 = arith.constant 5 : index
    %c0_168 = arith.constant 0 : index
    %c0_169 = arith.constant 0 : index
    %225 = vector.load %arg14[%c5_167, %c0_168, %c0_169] : memref<16x9x16xbf16, #tpu.memory_space<vmem>>, vector<1x9x16xbf16>
    %226 = vector.shape_cast %225 : vector<1x9x16xbf16> to vector<9x16xbf16>
    %cst_170 = arith.constant dense<0.000000e+00> : vector<9x256xf32>
    %227 = tpu.matmul %226, %204, %cst_170 {dimension_numbers = #tpu.dot_dimension_numbers<[1], [0], [0], [1], [0, 0, 1, 1], [], []>} : vector<9x16xbf16>, vector<16x256xbf16>, vector<9x256xf32> -> vector<9x256xf32>
    %228 = arith.truncf %227 : vector<9x256xf32> to vector<9x256xbf16>
    %c6_171 = arith.constant 6 : index
    %c0_172 = arith.constant 0 : index
    %c0_173 = arith.constant 0 : index
    %229 = vector.load %arg14[%c6_171, %c0_172, %c0_173] : memref<16x9x16xbf16, #tpu.memory_space<vmem>>, vector<1x9x16xbf16>
    %230 = vector.shape_cast %229 : vector<1x9x16xbf16> to vector<9x16xbf16>
    %cst_174 = arith.constant dense<0.000000e+00> : vector<9x256xf32>
    %231 = tpu.matmul %230, %204, %cst_174 {dimension_numbers = #tpu.dot_dimension_numbers<[1], [0], [0], [1], [0, 0, 1, 1], [], []>} : vector<9x16xbf16>, vector<16x256xbf16>, vector<9x256xf32> -> vector<9x256xf32>
    %232 = arith.truncf %231 : vector<9x256xf32> to vector<9x256xbf16>
    %c7_175 = arith.constant 7 : index
    %c0_176 = arith.constant 0 : index
    %c0_177 = arith.constant 0 : index
    %233 = vector.load %arg14[%c7_175, %c0_176, %c0_177] : memref<16x9x16xbf16, #tpu.memory_space<vmem>>, vector<1x9x16xbf16>
    %234 = vector.shape_cast %233 : vector<1x9x16xbf16> to vector<9x16xbf16>
    %cst_178 = arith.constant dense<0.000000e+00> : vector<9x256xf32>
    %235 = tpu.matmul %234, %204, %cst_178 {dimension_numbers = #tpu.dot_dimension_numbers<[1], [0], [0], [1], [0, 0, 1, 1], [], []>} : vector<9x16xbf16>, vector<16x256xbf16>, vector<9x256xf32> -> vector<9x256xf32>
    %236 = arith.truncf %235 : vector<9x256xf32> to vector<9x256xbf16>
    %c8_179 = arith.constant 8 : index
    %c0_180 = arith.constant 0 : index
    %c0_181 = arith.constant 0 : index
    %237 = vector.load %arg14[%c8_179, %c0_180, %c0_181] : memref<16x9x16xbf16, #tpu.memory_space<vmem>>, vector<1x9x16xbf16>
    %238 = vector.shape_cast %237 : vector<1x9x16xbf16> to vector<9x16xbf16>
    %cst_182 = arith.constant dense<0.000000e+00> : vector<9x256xf32>
    %239 = tpu.matmul %238, %204, %cst_182 {dimension_numbers = #tpu.dot_dimension_numbers<[1], [0], [0], [1], [0, 0, 1, 1], [], []>} : vector<9x16xbf16>, vector<16x256xbf16>, vector<9x256xf32> -> vector<9x256xf32>
    %240 = arith.truncf %239 : vector<9x256xf32> to vector<9x256xbf16>
    %c9_183 = arith.constant 9 : index
    %c0_184 = arith.constant 0 : index
    %c0_185 = arith.constant 0 : index
    %241 = vector.load %arg14[%c9_183, %c0_184, %c0_185] : memref<16x9x16xbf16, #tpu.memory_space<vmem>>, vector<1x9x16xbf16>
    %242 = vector.shape_cast %241 : vector<1x9x16xbf16> to vector<9x16xbf16>
    %cst_186 = arith.constant dense<0.000000e+00> : vector<9x256xf32>
    %243 = tpu.matmul %242, %204, %cst_186 {dimension_numbers = #tpu.dot_dimension_numbers<[1], [0], [0], [1], [0, 0, 1, 1], [], []>} : vector<9x16xbf16>, vector<16x256xbf16>, vector<9x256xf32> -> vector<9x256xf32>
    %244 = arith.truncf %243 : vector<9x256xf32> to vector<9x256xbf16>
    %c10_187 = arith.constant 10 : index
    %c0_188 = arith.constant 0 : index
    %c0_189 = arith.constant 0 : index
    %245 = vector.load %arg14[%c10_187, %c0_188, %c0_189] : memref<16x9x16xbf16, #tpu.memory_space<vmem>>, vector<1x9x16xbf16>
    %246 = vector.shape_cast %245 : vector<1x9x16xbf16> to vector<9x16xbf16>
    %cst_190 = arith.constant dense<0.000000e+00> : vector<9x256xf32>
    %247 = tpu.matmul %246, %204, %cst_190 {dimension_numbers = #tpu.dot_dimension_numbers<[1], [0], [0], [1], [0, 0, 1, 1], [], []>} : vector<9x16xbf16>, vector<16x256xbf16>, vector<9x256xf32> -> vector<9x256xf32>
    %248 = arith.truncf %247 : vector<9x256xf32> to vector<9x256xbf16>
    %c11_191 = arith.constant 11 : index
    %c0_192 = arith.constant 0 : index
    %c0_193 = arith.constant 0 : index
    %249 = vector.load %arg14[%c11_191, %c0_192, %c0_193] : memref<16x9x16xbf16, #tpu.memory_space<vmem>>, vector<1x9x16xbf16>
    %250 = vector.shape_cast %249 : vector<1x9x16xbf16> to vector<9x16xbf16>
    %cst_194 = arith.constant dense<0.000000e+00> : vector<9x256xf32>
    %251 = tpu.matmul %250, %204, %cst_194 {dimension_numbers = #tpu.dot_dimension_numbers<[1], [0], [0], [1], [0, 0, 1, 1], [], []>} : vector<9x16xbf16>, vector<16x256xbf16>, vector<9x256xf32> -> vector<9x256xf32>
    %252 = arith.truncf %251 : vector<9x256xf32> to vector<9x256xbf16>
    %c12_195 = arith.constant 12 : index
    %c0_196 = arith.constant 0 : index
    %c0_197 = arith.constant 0 : index
    %253 = vector.load %arg14[%c12_195, %c0_196, %c0_197] : memref<16x9x16xbf16, #tpu.memory_space<vmem>>, vector<1x9x16xbf16>
    %254 = vector.shape_cast %253 : vector<1x9x16xbf16> to vector<9x16xbf16>
    %cst_198 = arith.constant dense<0.000000e+00> : vector<9x256xf32>
    %255 = tpu.matmul %254, %204, %cst_198 {dimension_numbers = #tpu.dot_dimension_numbers<[1], [0], [0], [1], [0, 0, 1, 1], [], []>} : vector<9x16xbf16>, vector<16x256xbf16>, vector<9x256xf32> -> vector<9x256xf32>
    %256 = arith.truncf %255 : vector<9x256xf32> to vector<9x256xbf16>
    %c13_199 = arith.constant 13 : index
    %c0_200 = arith.constant 0 : index
    %c0_201 = arith.constant 0 : index
    %257 = vector.load %arg14[%c13_199, %c0_200, %c0_201] : memref<16x9x16xbf16, #tpu.memory_space<vmem>>, vector<1x9x16xbf16>
    %258 = vector.shape_cast %257 : vector<1x9x16xbf16> to vector<9x16xbf16>
    %cst_202 = arith.constant dense<0.000000e+00> : vector<9x256xf32>
    %259 = tpu.matmul %258, %204, %cst_202 {dimension_numbers = #tpu.dot_dimension_numbers<[1], [0], [0], [1], [0, 0, 1, 1], [], []>} : vector<9x16xbf16>, vector<16x256xbf16>, vector<9x256xf32> -> vector<9x256xf32>
    %260 = arith.truncf %259 : vector<9x256xf32> to vector<9x256xbf16>
    %c14_203 = arith.constant 14 : index
    %c0_204 = arith.constant 0 : index
    %c0_205 = arith.constant 0 : index
    %261 = vector.load %arg14[%c14_203, %c0_204, %c0_205] : memref<16x9x16xbf16, #tpu.memory_space<vmem>>, vector<1x9x16xbf16>
    %262 = vector.shape_cast %261 : vector<1x9x16xbf16> to vector<9x16xbf16>
    %cst_206 = arith.constant dense<0.000000e+00> : vector<9x256xf32>
    %263 = tpu.matmul %262, %204, %cst_206 {dimension_numbers = #tpu.dot_dimension_numbers<[1], [0], [0], [1], [0, 0, 1, 1], [], []>} : vector<9x16xbf16>, vector<16x256xbf16>, vector<9x256xf32> -> vector<9x256xf32>
    %264 = arith.truncf %263 : vector<9x256xf32> to vector<9x256xbf16>
    %c15_207 = arith.constant 15 : index
    %c0_208 = arith.constant 0 : index
    %c0_209 = arith.constant 0 : index
    %265 = vector.load %arg14[%c15_207, %c0_208, %c0_209] : memref<16x9x16xbf16, #tpu.memory_space<vmem>>, vector<1x9x16xbf16>
    %266 = vector.shape_cast %265 : vector<1x9x16xbf16> to vector<9x16xbf16>
    %cst_210 = arith.constant dense<0.000000e+00> : vector<9x256xf32>
    %267 = tpu.matmul %266, %204, %cst_210 {dimension_numbers = #tpu.dot_dimension_numbers<[1], [0], [0], [1], [0, 0, 1, 1], [], []>} : vector<9x16xbf16>, vector<16x256xbf16>, vector<9x256xf32> -> vector<9x256xf32>
    %268 = arith.truncf %267 : vector<9x256xf32> to vector<9x256xbf16>
    %269 = tpu.concatenate %208, %212, %216, %220, %224, %228, %232, %236, %240, %244, %248, %252, %256, %260, %264, %268 in 1 : vector<9x256xbf16>, vector<9x256xbf16>, vector<9x256xbf16>, vector<9x256xbf16>, vector<9x256xbf16>, vector<9x256xbf16>, vector<9x256xbf16>, vector<9x256xbf16>, vector<9x256xbf16>, vector<9x256xbf16>, vector<9x256xbf16>, vector<9x256xbf16>, vector<9x256xbf16>, vector<9x256xbf16>, vector<9x256xbf16>, vector<9x256xbf16> -> vector<9x4096xbf16>
    %c0_211 = arith.constant 0 : index
    %c0_212 = arith.constant 0 : index
    %270 = vector.load %arg5[%c0_211, %c0_212] : memref<4096x512xbf16, #tpu.memory_space<vmem>>, vector<4096x512xbf16>
    %cst_213 = arith.constant dense<0.000000e+00> : vector<9x512xf32>
    %271 = tpu.matmul %269, %270, %cst_213 {dimension_numbers = #tpu.dot_dimension_numbers<[1], [0], [0], [1], [0, 0, 1, 1], [], []>} : vector<9x4096xbf16>, vector<4096x512xbf16>, vector<9x512xf32> -> vector<9x512xf32>
    %c0_214 = arith.constant 0 : index
    %c0_215 = arith.constant 0 : index
    %272 = vector.load %arg10[%c0_214, %c0_215] : memref<1x512xf32, #tpu.memory_space<vmem>>, vector<1x512xf32>
    %273 = vector.broadcast %272 : vector<1x512xf32> to vector<9x512xf32>
    %274 = arith.addf %271, %273 : vector<9x512xf32>
    %cst_216 = arith.constant dense<0.000000e+00> : vector<512xf32>
    %275 = vector.multi_reduction <add>, %274, %cst_216 [0] : vector<9x512xf32> to vector<512xf32>
    %276 = vector.shape_cast %275 : vector<512xf32> to vector<1x512xf32>
    %277 = arith.mulf %274, %274 : vector<9x512xf32>
    %cst_217 = arith.constant dense<0.000000e+00> : vector<512xf32>
    %278 = vector.multi_reduction <add>, %277, %cst_217 [0] : vector<9x512xf32> to vector<512xf32>
    %279 = vector.shape_cast %278 : vector<512xf32> to vector<1x512xf32>
    %cst_218 = arith.constant 0.111111112 : f32
    %280 = vector.broadcast %cst_218 : f32 to vector<1x512xf32>
    %281 = arith.mulf %276, %280 : vector<1x512xf32>
    %cst_219 = arith.constant 0.111111112 : f32
    %282 = vector.broadcast %cst_219 : f32 to vector<1x512xf32>
    %283 = arith.mulf %279, %282 : vector<1x512xf32>
    %284 = arith.mulf %281, %281 : vector<1x512xf32>
    %285 = arith.subf %283, %284 : vector<1x512xf32>
    %cst_220 = arith.constant 0.000000e+00 : f32
    %286 = vector.broadcast %cst_220 : f32 to vector<1x512xf32>
    %287 = arith.maximumf %285, %286 : vector<1x512xf32>
    %288 = vector.broadcast %281 : vector<1x512xf32> to vector<9x512xf32>
    %289 = arith.subf %274, %288 : vector<9x512xf32>
    %cst_221 = arith.constant 9.99999974E-6 : f32
    %290 = vector.broadcast %cst_221 : f32 to vector<1x512xf32>
    %291 = arith.addf %287, %290 : vector<1x512xf32>
    %292 = math.rsqrt %291 : vector<1x512xf32>
    %293 = vector.broadcast %292 : vector<1x512xf32> to vector<9x512xf32>
    %294 = arith.mulf %289, %293 : vector<9x512xf32>
    %cst_222 = arith.constant 0.000000e+00 : f32
    %295 = vector.broadcast %cst_222 : f32 to vector<9x512xf32>
    %296 = arith.cmpf ogt, %294, %295 : vector<9x512xf32>
    %cst_223 = arith.constant 2.000000e-01 : f32
    %297 = vector.broadcast %cst_223 : f32 to vector<9x512xf32>
    %298 = arith.mulf %297, %294 : vector<9x512xf32>
    %299 = arith.select %296, %294, %298 : vector<9x512xi1>, vector<9x512xf32>
    %300 = arith.truncf %299 : vector<9x512xf32> to vector<9x512xbf16>
    %c0_224 = arith.constant 0 : index
    %c0_225 = arith.constant 0 : index
    %c0_226 = arith.constant 0 : index
    %301 = vector.load %arg15[%c0_224, %c0_225, %c0_226] : memref<16x1x9xbf16, #tpu.memory_space<vmem>>, vector<1x1x9xbf16>
    %302 = vector.shape_cast %301 : vector<1x1x9xbf16> to vector<1x9xbf16>
    %cst_227 = arith.constant dense<0.000000e+00> : vector<1x512xf32>
    %303 = tpu.matmul %302, %300, %cst_227 {dimension_numbers = #tpu.dot_dimension_numbers<[1], [0], [0], [1], [0, 0, 1, 1], [], []>} : vector<1x9xbf16>, vector<9x512xbf16>, vector<1x512xf32> -> vector<1x512xf32>
    %304 = arith.truncf %303 : vector<1x512xf32> to vector<1x512xbf16>
    %c1_228 = arith.constant 1 : index
    %c0_229 = arith.constant 0 : index
    %c0_230 = arith.constant 0 : index
    %305 = vector.load %arg15[%c1_228, %c0_229, %c0_230] : memref<16x1x9xbf16, #tpu.memory_space<vmem>>, vector<1x1x9xbf16>
    %306 = vector.shape_cast %305 : vector<1x1x9xbf16> to vector<1x9xbf16>
    %cst_231 = arith.constant dense<0.000000e+00> : vector<1x512xf32>
    %307 = tpu.matmul %306, %300, %cst_231 {dimension_numbers = #tpu.dot_dimension_numbers<[1], [0], [0], [1], [0, 0, 1, 1], [], []>} : vector<1x9xbf16>, vector<9x512xbf16>, vector<1x512xf32> -> vector<1x512xf32>
    %308 = arith.truncf %307 : vector<1x512xf32> to vector<1x512xbf16>
    %c2_232 = arith.constant 2 : index
    %c0_233 = arith.constant 0 : index
    %c0_234 = arith.constant 0 : index
    %309 = vector.load %arg15[%c2_232, %c0_233, %c0_234] : memref<16x1x9xbf16, #tpu.memory_space<vmem>>, vector<1x1x9xbf16>
    %310 = vector.shape_cast %309 : vector<1x1x9xbf16> to vector<1x9xbf16>
    %cst_235 = arith.constant dense<0.000000e+00> : vector<1x512xf32>
    %311 = tpu.matmul %310, %300, %cst_235 {dimension_numbers = #tpu.dot_dimension_numbers<[1], [0], [0], [1], [0, 0, 1, 1], [], []>} : vector<1x9xbf16>, vector<9x512xbf16>, vector<1x512xf32> -> vector<1x512xf32>
    %312 = arith.truncf %311 : vector<1x512xf32> to vector<1x512xbf16>
    %c3_236 = arith.constant 3 : index
    %c0_237 = arith.constant 0 : index
    %c0_238 = arith.constant 0 : index
    %313 = vector.load %arg15[%c3_236, %c0_237, %c0_238] : memref<16x1x9xbf16, #tpu.memory_space<vmem>>, vector<1x1x9xbf16>
    %314 = vector.shape_cast %313 : vector<1x1x9xbf16> to vector<1x9xbf16>
    %cst_239 = arith.constant dense<0.000000e+00> : vector<1x512xf32>
    %315 = tpu.matmul %314, %300, %cst_239 {dimension_numbers = #tpu.dot_dimension_numbers<[1], [0], [0], [1], [0, 0, 1, 1], [], []>} : vector<1x9xbf16>, vector<9x512xbf16>, vector<1x512xf32> -> vector<1x512xf32>
    %316 = arith.truncf %315 : vector<1x512xf32> to vector<1x512xbf16>
    %c4_240 = arith.constant 4 : index
    %c0_241 = arith.constant 0 : index
    %c0_242 = arith.constant 0 : index
    %317 = vector.load %arg15[%c4_240, %c0_241, %c0_242] : memref<16x1x9xbf16, #tpu.memory_space<vmem>>, vector<1x1x9xbf16>
    %318 = vector.shape_cast %317 : vector<1x1x9xbf16> to vector<1x9xbf16>
    %cst_243 = arith.constant dense<0.000000e+00> : vector<1x512xf32>
    %319 = tpu.matmul %318, %300, %cst_243 {dimension_numbers = #tpu.dot_dimension_numbers<[1], [0], [0], [1], [0, 0, 1, 1], [], []>} : vector<1x9xbf16>, vector<9x512xbf16>, vector<1x512xf32> -> vector<1x512xf32>
    %320 = arith.truncf %319 : vector<1x512xf32> to vector<1x512xbf16>
    %c5_244 = arith.constant 5 : index
    %c0_245 = arith.constant 0 : index
    %c0_246 = arith.constant 0 : index
    %321 = vector.load %arg15[%c5_244, %c0_245, %c0_246] : memref<16x1x9xbf16, #tpu.memory_space<vmem>>, vector<1x1x9xbf16>
    %322 = vector.shape_cast %321 : vector<1x1x9xbf16> to vector<1x9xbf16>
    %cst_247 = arith.constant dense<0.000000e+00> : vector<1x512xf32>
    %323 = tpu.matmul %322, %300, %cst_247 {dimension_numbers = #tpu.dot_dimension_numbers<[1], [0], [0], [1], [0, 0, 1, 1], [], []>} : vector<1x9xbf16>, vector<9x512xbf16>, vector<1x512xf32> -> vector<1x512xf32>
    %324 = arith.truncf %323 : vector<1x512xf32> to vector<1x512xbf16>
    %c6_248 = arith.constant 6 : index
    %c0_249 = arith.constant 0 : index
    %c0_250 = arith.constant 0 : index
    %325 = vector.load %arg15[%c6_248, %c0_249, %c0_250] : memref<16x1x9xbf16, #tpu.memory_space<vmem>>, vector<1x1x9xbf16>
    %326 = vector.shape_cast %325 : vector<1x1x9xbf16> to vector<1x9xbf16>
    %cst_251 = arith.constant dense<0.000000e+00> : vector<1x512xf32>
    %327 = tpu.matmul %326, %300, %cst_251 {dimension_numbers = #tpu.dot_dimension_numbers<[1], [0], [0], [1], [0, 0, 1, 1], [], []>} : vector<1x9xbf16>, vector<9x512xbf16>, vector<1x512xf32> -> vector<1x512xf32>
    %328 = arith.truncf %327 : vector<1x512xf32> to vector<1x512xbf16>
    %c7_252 = arith.constant 7 : index
    %c0_253 = arith.constant 0 : index
    %c0_254 = arith.constant 0 : index
    %329 = vector.load %arg15[%c7_252, %c0_253, %c0_254] : memref<16x1x9xbf16, #tpu.memory_space<vmem>>, vector<1x1x9xbf16>
    %330 = vector.shape_cast %329 : vector<1x1x9xbf16> to vector<1x9xbf16>
    %cst_255 = arith.constant dense<0.000000e+00> : vector<1x512xf32>
    %331 = tpu.matmul %330, %300, %cst_255 {dimension_numbers = #tpu.dot_dimension_numbers<[1], [0], [0], [1], [0, 0, 1, 1], [], []>} : vector<1x9xbf16>, vector<9x512xbf16>, vector<1x512xf32> -> vector<1x512xf32>
    %332 = arith.truncf %331 : vector<1x512xf32> to vector<1x512xbf16>
    %c8_256 = arith.constant 8 : index
    %c0_257 = arith.constant 0 : index
    %c0_258 = arith.constant 0 : index
    %333 = vector.load %arg15[%c8_256, %c0_257, %c0_258] : memref<16x1x9xbf16, #tpu.memory_space<vmem>>, vector<1x1x9xbf16>
    %334 = vector.shape_cast %333 : vector<1x1x9xbf16> to vector<1x9xbf16>
    %cst_259 = arith.constant dense<0.000000e+00> : vector<1x512xf32>
    %335 = tpu.matmul %334, %300, %cst_259 {dimension_numbers = #tpu.dot_dimension_numbers<[1], [0], [0], [1], [0, 0, 1, 1], [], []>} : vector<1x9xbf16>, vector<9x512xbf16>, vector<1x512xf32> -> vector<1x512xf32>
    %336 = arith.truncf %335 : vector<1x512xf32> to vector<1x512xbf16>
    %c9_260 = arith.constant 9 : index
    %c0_261 = arith.constant 0 : index
    %c0_262 = arith.constant 0 : index
    %337 = vector.load %arg15[%c9_260, %c0_261, %c0_262] : memref<16x1x9xbf16, #tpu.memory_space<vmem>>, vector<1x1x9xbf16>
    %338 = vector.shape_cast %337 : vector<1x1x9xbf16> to vector<1x9xbf16>
    %cst_263 = arith.constant dense<0.000000e+00> : vector<1x512xf32>
    %339 = tpu.matmul %338, %300, %cst_263 {dimension_numbers = #tpu.dot_dimension_numbers<[1], [0], [0], [1], [0, 0, 1, 1], [], []>} : vector<1x9xbf16>, vector<9x512xbf16>, vector<1x512xf32> -> vector<1x512xf32>
    %340 = arith.truncf %339 : vector<1x512xf32> to vector<1x512xbf16>
    %c10_264 = arith.constant 10 : index
    %c0_265 = arith.constant 0 : index
    %c0_266 = arith.constant 0 : index
    %341 = vector.load %arg15[%c10_264, %c0_265, %c0_266] : memref<16x1x9xbf16, #tpu.memory_space<vmem>>, vector<1x1x9xbf16>
    %342 = vector.shape_cast %341 : vector<1x1x9xbf16> to vector<1x9xbf16>
    %cst_267 = arith.constant dense<0.000000e+00> : vector<1x512xf32>
    %343 = tpu.matmul %342, %300, %cst_267 {dimension_numbers = #tpu.dot_dimension_numbers<[1], [0], [0], [1], [0, 0, 1, 1], [], []>} : vector<1x9xbf16>, vector<9x512xbf16>, vector<1x512xf32> -> vector<1x512xf32>
    %344 = arith.truncf %343 : vector<1x512xf32> to vector<1x512xbf16>
    %c11_268 = arith.constant 11 : index
    %c0_269 = arith.constant 0 : index
    %c0_270 = arith.constant 0 : index
    %345 = vector.load %arg15[%c11_268, %c0_269, %c0_270] : memref<16x1x9xbf16, #tpu.memory_space<vmem>>, vector<1x1x9xbf16>
    %346 = vector.shape_cast %345 : vector<1x1x9xbf16> to vector<1x9xbf16>
    %cst_271 = arith.constant dense<0.000000e+00> : vector<1x512xf32>
    %347 = tpu.matmul %346, %300, %cst_271 {dimension_numbers = #tpu.dot_dimension_numbers<[1], [0], [0], [1], [0, 0, 1, 1], [], []>} : vector<1x9xbf16>, vector<9x512xbf16>, vector<1x512xf32> -> vector<1x512xf32>
    %348 = arith.truncf %347 : vector<1x512xf32> to vector<1x512xbf16>
    %c12_272 = arith.constant 12 : index
    %c0_273 = arith.constant 0 : index
    %c0_274 = arith.constant 0 : index
    %349 = vector.load %arg15[%c12_272, %c0_273, %c0_274] : memref<16x1x9xbf16, #tpu.memory_space<vmem>>, vector<1x1x9xbf16>
    %350 = vector.shape_cast %349 : vector<1x1x9xbf16> to vector<1x9xbf16>
    %cst_275 = arith.constant dense<0.000000e+00> : vector<1x512xf32>
    %351 = tpu.matmul %350, %300, %cst_275 {dimension_numbers = #tpu.dot_dimension_numbers<[1], [0], [0], [1], [0, 0, 1, 1], [], []>} : vector<1x9xbf16>, vector<9x512xbf16>, vector<1x512xf32> -> vector<1x512xf32>
    %352 = arith.truncf %351 : vector<1x512xf32> to vector<1x512xbf16>
    %c13_276 = arith.constant 13 : index
    %c0_277 = arith.constant 0 : index
    %c0_278 = arith.constant 0 : index
    %353 = vector.load %arg15[%c13_276, %c0_277, %c0_278] : memref<16x1x9xbf16, #tpu.memory_space<vmem>>, vector<1x1x9xbf16>
    %354 = vector.shape_cast %353 : vector<1x1x9xbf16> to vector<1x9xbf16>
    %cst_279 = arith.constant dense<0.000000e+00> : vector<1x512xf32>
    %355 = tpu.matmul %354, %300, %cst_279 {dimension_numbers = #tpu.dot_dimension_numbers<[1], [0], [0], [1], [0, 0, 1, 1], [], []>} : vector<1x9xbf16>, vector<9x512xbf16>, vector<1x512xf32> -> vector<1x512xf32>
    %356 = arith.truncf %355 : vector<1x512xf32> to vector<1x512xbf16>
    %c14_280 = arith.constant 14 : index
    %c0_281 = arith.constant 0 : index
    %c0_282 = arith.constant 0 : index
    %357 = vector.load %arg15[%c14_280, %c0_281, %c0_282] : memref<16x1x9xbf16, #tpu.memory_space<vmem>>, vector<1x1x9xbf16>
    %358 = vector.shape_cast %357 : vector<1x1x9xbf16> to vector<1x9xbf16>
    %cst_283 = arith.constant dense<0.000000e+00> : vector<1x512xf32>
    %359 = tpu.matmul %358, %300, %cst_283 {dimension_numbers = #tpu.dot_dimension_numbers<[1], [0], [0], [1], [0, 0, 1, 1], [], []>} : vector<1x9xbf16>, vector<9x512xbf16>, vector<1x512xf32> -> vector<1x512xf32>
    %360 = arith.truncf %359 : vector<1x512xf32> to vector<1x512xbf16>
    %c15_284 = arith.constant 15 : index
    %c0_285 = arith.constant 0 : index
    %c0_286 = arith.constant 0 : index
    %361 = vector.load %arg15[%c15_284, %c0_285, %c0_286] : memref<16x1x9xbf16, #tpu.memory_space<vmem>>, vector<1x1x9xbf16>
    %362 = vector.shape_cast %361 : vector<1x1x9xbf16> to vector<1x9xbf16>
    %cst_287 = arith.constant dense<0.000000e+00> : vector<1x512xf32>
    %363 = tpu.matmul %362, %300, %cst_287 {dimension_numbers = #tpu.dot_dimension_numbers<[1], [0], [0], [1], [0, 0, 1, 1], [], []>} : vector<1x9xbf16>, vector<9x512xbf16>, vector<1x512xf32> -> vector<1x512xf32>
    %364 = arith.truncf %363 : vector<1x512xf32> to vector<1x512xbf16>
    %365 = tpu.concatenate %304, %308, %312, %316, %320, %324, %328, %332, %336, %340, %344, %348, %352, %356, %360, %364 in 1 : vector<1x512xbf16>, vector<1x512xbf16>, vector<1x512xbf16>, vector<1x512xbf16>, vector<1x512xbf16>, vector<1x512xbf16>, vector<1x512xbf16>, vector<1x512xbf16>, vector<1x512xbf16>, vector<1x512xbf16>, vector<1x512xbf16>, vector<1x512xbf16>, vector<1x512xbf16>, vector<1x512xbf16>, vector<1x512xbf16>, vector<1x512xbf16> -> vector<1x8192xbf16>
    %366 = arith.extf %365 : vector<1x8192xbf16> to vector<1x8192xf32>
    %c0_288 = arith.constant 0 : index
    %c0_289 = arith.constant 0 : index
    %367 = vector.load %arg6[%c0_288, %c0_289] : memref<1x8192xf32, #tpu.memory_space<vmem>>, vector<1x8192xf32>
    %368 = arith.mulf %366, %367 : vector<1x8192xf32>
    %cst_290 = arith.constant dense<0.000000e+00> : vector<1xf32>
    %369 = vector.multi_reduction <add>, %368, %cst_290 [1] : vector<1x8192xf32> to vector<1xf32>
    %370 = vector.shape_cast %369 : vector<1xf32> to vector<1x1xf32>
    %c0_291 = arith.constant 0 : index
    %c0_292 = arith.constant 0 : index
    %371 = vector.load %arg11[%c0_291, %c0_292] : memref<1x1xf32, #tpu.memory_space<vmem>>, vector<1x1xf32>
    %372 = arith.addf %370, %371 : vector<1x1xf32>
    %373 = vector.shape_cast %372 : vector<1x1xf32> to vector<1x1x1xf32>
    %c0_293 = arith.constant 0 : index
    %c0_294 = arith.constant 0 : index
    %c0_295 = arith.constant 0 : index
    %374 = vector.load %arg16[%c0_293, %c0_294, %c0_295] : memref<1x1x1xf32, #tpu.memory_space<vmem>>, vector<1x1x1xf32>
    tpu.vector_store %arg16[%c0_293, %c0_294, %c0_295], %373 {strides = array<i32>} : memref<1x1x1xf32, #tpu.memory_space<vmem>>, vector<1x1x1xf32>,
    return
  }
  func.func @transform_0(%arg0: i32) -> (i32, i32, i32) {
    %c0_i32 = arith.constant 0 : i32
    %c0_i32_0 = arith.constant 0 : i32
    %c0_i32_1 = arith.constant 0 : i32
    return %arg0, %c0_i32, %c0_i32_0 : i32, i32, i32
  }
  func.func @transform_1(%arg0: i32) -> (i32, i32) {
    %c0_i32 = arith.constant 0 : i32
    %c0_i32_0 = arith.constant 0 : i32
    %c0_i32_1 = arith.constant 0 : i32
    return %c0_i32, %c0_i32_0 : i32, i32
  }
  func.func @transform_2(%arg0: i32) -> (i32, i32) {
    %c0_i32 = arith.constant 0 : i32
    %c0_i32_0 = arith.constant 0 : i32
    %c0_i32_1 = arith.constant 0 : i32
    return %c0_i32, %c0_i32_0 : i32, i32
  }
  func.func @transform_3(%arg0: i32) -> (i32, i32) {
    %c0_i32 = arith.constant 0 : i32
    %c0_i32_0 = arith.constant 0 : i32
    %c0_i32_1 = arith.constant 0 : i32
    return %c0_i32, %c0_i32_0 : i32, i32
  }
  func.func @transform_4(%arg0: i32) -> (i32, i32) {
    %c0_i32 = arith.constant 0 : i32
    %c0_i32_0 = arith.constant 0 : i32
    %c0_i32_1 = arith.constant 0 : i32
    return %c0_i32, %c0_i32_0 : i32, i32
  }
  func.func @transform_5(%arg0: i32) -> (i32, i32) {
    %c0_i32 = arith.constant 0 : i32
    %c0_i32_0 = arith.constant 0 : i32
    %c0_i32_1 = arith.constant 0 : i32
    return %c0_i32, %c0_i32_0 : i32, i32
  }
  func.func @transform_6(%arg0: i32) -> (i32, i32) {
    %c0_i32 = arith.constant 0 : i32
    %c0_i32_0 = arith.constant 0 : i32
    %c0_i32_1 = arith.constant 0 : i32
    return %c0_i32, %c0_i32_0 : i32, i32
  }
  func.func @transform_7(%arg0: i32) -> (i32, i32) {
    %c0_i32 = arith.constant 0 : i32
    %c0_i32_0 = arith.constant 0 : i32
    %c0_i32_1 = arith.constant 0 : i32
    return %c0_i32, %c0_i32_0 : i32, i32
  }
  func.func @transform_8(%arg0: i32) -> (i32, i32) {
    %c0_i32 = arith.constant 0 : i32
    %c0_i32_0 = arith.constant 0 : i32
    %c0_i32_1 = arith.constant 0 : i32
    return %c0_i32, %c0_i32_0 : i32, i32
  }
  func.func @transform_9(%arg0: i32) -> (i32, i32) {
    %c0_i32 = arith.constant 0 : i32
    %c0_i32_0 = arith.constant 0 : i32
    %c0_i32_1 = arith.constant 0 : i32
    return %c0_i32, %c0_i32_0 : i32, i32
  }
  func.func @transform_10(%arg0: i32) -> (i32, i32) {
    %c0_i32 = arith.constant 0 : i32
    %c0_i32_0 = arith.constant 0 : i32
    %c0_i32_1 = arith.constant 0 : i32
    return %c0_i32, %c0_i32_0 : i32, i32
  }
  func.func @transform_11(%arg0: i32) -> (i32, i32, i32) {
    %c0_i32 = arith.constant 0 : i32
    %c0_i32_0 = arith.constant 0 : i32
    %c0_i32_1 = arith.constant 0 : i32
    %c0_i32_2 = arith.constant 0 : i32
    return %c0_i32, %c0_i32_0, %c0_i32_1 : i32, i32, i32
  }
  func.func @transform_12(%arg0: i32) -> (i32, i32, i32) {
    %c0_i32 = arith.constant 0 : i32
    %c0_i32_0 = arith.constant 0 : i32
    %c0_i32_1 = arith.constant 0 : i32
    %c0_i32_2 = arith.constant 0 : i32
    return %c0_i32, %c0_i32_0, %c0_i32_1 : i32, i32, i32
  }
  func.func @transform_13(%arg0: i32) -> (i32, i32, i32) {
    %c0_i32 = arith.constant 0 : i32
    %c0_i32_0 = arith.constant 0 : i32
    %c0_i32_1 = arith.constant 0 : i32
    %c0_i32_2 = arith.constant 0 : i32
    return %c0_i32, %c0_i32_0, %c0_i32_1 : i32, i32, i32
  }
  func.func @transform_14(%arg0: i32) -> (i32, i32, i32) {
    %c0_i32 = arith.constant 0 : i32
    %c0_i32_0 = arith.constant 0 : i32
    %c0_i32_1 = arith.constant 0 : i32
    %c0_i32_2 = arith.constant 0 : i32
    return %c0_i32, %c0_i32_0, %c0_i32_1 : i32, i32, i32
  }
  func.func @transform_15(%arg0: i32) -> (i32, i32, i32) {
    %c0_i32 = arith.constant 0 : i32
    %c0_i32_0 = arith.constant 0 : i32
    %c0_i32_1 = arith.constant 0 : i32
    return %arg0, %c0_i32, %c0_i32_0 : i32, i32, i32
  }
}

</mosaic_0001>

<bundles_post_ra>
// kernel: discriminator_forward.1
= control target key start
LH: loop header
LB: loop body
LE: loop exit
PB: predicated region body
PF: predicated region fallthrough
CT: control target
= control target key end

     0   :  { %s25702_s0 = inlined_call_operand.vmem [shape: bf16[2,256,48], index: 0, kind: input, shape index: {}]   ;;  %s25703_s1 = inlined_call_operand.hbm [shape: bf16[48,64], index: 1, kind: input, shape index: {}]   ;;  %s25704_s2 = inlined_call_operand.hbm [shape: bf16[1024,128], index: 2, kind: input, shape index: {}]   ;;  %s25705_s3 = inlined_call_operand.hbm [shape: bf16[2048,256], index: 3, kind: input, shape index: {}]   ;;  %s25706_s4 = inlined_call_operand.hbm [shape: bf16[4096,512], index: 4, kind: input, shape index: {}]   ;;  %s25707_s5 = inlined_call_operand.hbm [shape: f32[1,8192], index: 5, kind: input, shape index: {}]   ;;  %s25708_s6 = inlined_call_operand.hbm [shape: f32[1,64], index: 6, kind: input, shape index: {}]   ;;  %s25709_s7 = inlined_call_operand.hbm [shape: f32[1,128], index: 7, kind: input, shape index: {}]   ;;  %s25710_s8 = inlined_call_operand.hbm [shape: f32[1,256], index: 8, kind: input, shape index: {}]   ;;  %s25711_s9 = inlined_call_operand.hbm [shape: f32[1,512], index: 9, kind: input, shape index: {}]   ;;  %s25712_s10 = inlined_call_operand.<no memory space> [shape: f32[1,1], index: 10, kind: input, shape index: {}]   ;;  %s25713_s11 = inlined_call_operand.hbm [shape: bf16[16,64,256], index: 11, kind: input, shape index: {}]   ;;  %s25714_s12 = inlined_call_operand.hbm [shape: bf16[16,16,64], index: 12, kind: input, shape index: {}]   ;;  %s25715_s13 = inlined_call_operand.vmem [shape: bf16[16,9,16], index: 13, kind: input, shape index: {}]   ;;  %s25716_s14 = inlined_call_operand.vmem [shape: bf16[16,1,9], index: 14, kind: input, shape index: {}]   ;;  %s25717_s15 = inlined_call_operand.vmem [shape: f32[2,1,1], index: 15, kind: output, shape index: {}]  }
   0x1   :  { %25742 = sst [smem:[#allocation41_spill]] %s25704_s2  ;;  %v20_v0 = vstv %s25712_s10 }
   0x2   :  { %25743 = sst [smem:[#allocation42_spill]] %s25716_s14  ;;  %21 = vst [vmem:[#allocation2] sm:$0x1] %v20_v0 }
   0x3   :  { %25744 = sst [smem:[#allocation43_spill]] %s25717_s15 }
   0x4   :  { %22 = vsyncpa [#allocation4], 0 }
   0x5   :  { %23 = vsyncpa [#allocation6], 0 }
   0x6   :  { %24 = vsyncpa [#allocation9], 0 }
   0x7   :  { %25 = vsyncpa [#allocation12], 0 }
   0x8   :  { %26 = vsyncpa [#allocation15], 0 }
   0x9   :  { %27 = vsyncpa [#allocation18], 0  ;;  %s23485_s20 = smov 0  }
   0xa LB: > { %25745 = sst [smem:[#allocation26_spill]] %s23378_s20  ;;  %s23491_s21 = sadd.s32 4294967295, %s23378_s20   ;;  %s23378_s20 = sphi %s23485_s20, %s33_s20  }
   0xb   : > { %p17700_p0 = scmp.ge.s32.totalorder %s23378_s20, 1  ;;  %p384_p1 = scmp.lt.s32.totalorder %s23378_s20, 3 }
   0xc   : > { %p25724_p2 = scmp.eq.s32.totalorder %s23491_s21, 0  ;;  %s23380_s22 = smov [#allocation5]  }
   0xd   : > { %p23496_p3 = pnand %p17700_p0, %p384_p1  ;;  %s409_s23 = sshll.u32 %s23380_s22, 4  ;;  %s23500_s23 = int_to_ptr.vmem [resolvable:$true] %s409_s23 }
   0xe   : > { %s23381_s24 = smov [#allocation8]   ;;  %s23382_s27 = smov [#allocation11]  }
   0xf   : > { %s25746_s10 = scalar_select %p23496_p3, 1, 0 }
  0x10   : > { %p20713_p4 = pneg %p23496_p3  ;;  %s435_s25 = sshll.u32 %s23381_s24, 4  ;;  %s23504_s25 = int_to_ptr.vmem [resolvable:$true] %s435_s25 }
  0x11   : > { %s23512_s28 = sshll.u32 %s23382_s27, 4  ;;  %s25748_s2 = sld [smem:[#allocation41_spill]]  ;;  %s461_s28 = int_to_ptr.vmem [resolvable:$true] %s23512_s28 }
  0x12   : > { %p23508_p5 = pnand %p25724_p2, %p20713_p4 }
  0x14   : > { %p23522_p7 = pneg %p23508_p5 }
  0x17   : > { %s23040_s16 = scalar_lea.hbm %s25748_s2, 8192 }
  0x18   : > { %p23041_p6 = scmp.ne.s32.totalorder %s25748_s2, %s23040_s16  ;;  %p23047_p10 = scmp.lt.u32.totalorder %s23040_s16, %s25748_s2 }
  0x1a   : > { %p23043_p8 = pnand %p23522_p7, %p23041_p6 }
  0x1c   : > { %p23044_p9 = pneg %p23043_p8 }
  0x1e   : > { %p23049_p11 = pnand %p23047_p10, %p23044_p9 }
  0x20   : > { %23052 = shalt.err (!%p23049_p11)
}
  0x21   : > { %s23053_s27 = scalar_lea.vmem %s23500_s23, 8192  ;;  %p23061_p1 = scmp.lt.s32.totalorder %s23500_s23, %s23500_s23 }
  0x22   : > { %p23054_p12 = scmp.ne.s32.totalorder %s23500_s23, %s23053_s27  ;;  %p23062_p4 = scmp.lt.s32.totalorder %s23053_s27, %s23053_s27 }
  0x24   : > { %p23056_p13 = pnand %p23054_p12, %p23522_p7  ;;  %p23063_p6 = por %p23062_p4, %p23061_p1 }
  0x26   : > { %p23057_p0 = pneg %p23056_p13 }
  0x28   : > { %p23064_p8 = pnand %p23063_p6, %p23057_p0 }
  0x2a   : > { %23067 = shalt.err (!%p23064_p8)
}
  0x2b   : > { %s25720_s29 = smov 64   ;;  %s25722_s30 = smov 4  }
  0x2c   : > { %20719 = dma.hbm_to_vmem [thread:$0]  (!%p23508_p5), %s25748_s2, 8192, %s23500_s23, [#allocation6], %s25720_s29, %s25720_s29, %s25722_s30  }
  0x2d   : > { %s23068_s24 = scalar_lea.hbm %s25706_s4, 131072 }
  0x2e   : > { %p23069_p9 = scmp.ne.s32.totalorder %s25706_s4, %s23068_s24  ;;  %p23075_p12 = scmp.lt.u32.totalorder %s23068_s24, %s25706_s4 }
  0x30   : > { %p23071_p10 = pnand %p23069_p9, %p23522_p7 }
  0x32   : > { %p23072_p11 = pneg %p23071_p10 }
  0x34   : > { %p23077_p13 = pnand %p23075_p12, %p23072_p11 }
  0x36   : > { %23080 = shalt.err (!%p23077_p13)
}
  0x37   : > { %s23081_s23 = scalar_lea.vmem %s23504_s25, 131072  ;;  %p23089_p6 = scmp.lt.s32.totalorder %s23504_s25, %s23504_s25 }
  0x38   : > { %p23082_p0 = scmp.ne.s32.totalorder %s23504_s25, %s23081_s23  ;;  %p23090_p8 = scmp.lt.s32.totalorder %s23081_s23, %s23081_s23 }
  0x3a   : > { %p23084_p1 = pnand %p23082_p0, %p23522_p7  ;;  %p23091_p9 = por %p23090_p8, %p23089_p6 }
  0x3c   : > { %p23085_p4 = pneg %p23084_p1 }
  0x3e   : > { %p23092_p10 = pnand %p23091_p9, %p23085_p4 }
  0x40   : > { %23095 = shalt.err (!%p23092_p10)
}
  0x41   : > { %s23385_s20 = smov 256   ;;  %s23386_s14 = smov 16  }
  0x42   : > { %20725 = dma.hbm_to_vmem [thread:$0]  (!%p23508_p5), %s25706_s4, 131072, %s23504_s25, [#allocation9], %s23385_s20, %s23385_s20, %s23386_s14  }
  0x43   : > { %s23387_s17 = smov [#allocation14]   ;;  %s23096_s27 = scalar_lea.hbm %s25708_s6, 16 }
  0x44   : > { %s482_s18 = sshll.u32 %s23387_s17, 4  ;;  %p23097_p11 = scmp.ne.s32.totalorder %s25708_s6, %s23096_s27  ;;  %s483_s18 = int_to_ptr.vmem [resolvable:$true] %s482_s18 }
  0x45   : > { %p23103_p0 = scmp.lt.u32.totalorder %s23096_s27, %s25708_s6 }
  0x46   : > { %p23099_p12 = pnand %p23097_p11, %p23522_p7 }
  0x48   : > { %p23100_p13 = pneg %p23099_p12 }
  0x4a   : > { %p23105_p1 = pnand %p23103_p0, %p23100_p13 }
  0x4c   : > { %23108 = shalt.err (!%p23105_p1)
}
  0x4d   : > { %s23109_s25 = scalar_lea.vmem %s461_s28, 16  ;;  %s23116_s20 = scalar_lea.vmem %s461_s28, 32 }
  0x4e   : > { %p23110_p4 = scmp.ne.s32.totalorder %s461_s28, %s23109_s25  ;;  %p23117_p9 = scmp.lt.s32.totalorder %s461_s28, %s461_s28 }
  0x4f   : > { %p23118_p10 = scmp.lt.s32.totalorder %s23116_s20, %s23109_s25 }
  0x50   : > { %p23112_p6 = pnand %p23110_p4, %p23522_p7 }
  0x51   : > { %p23119_p2 = por %p23118_p10, %p23117_p9 }
  0x52   : > { %p23113_p8 = pneg %p23112_p6 }
  0x54   : > { %p23120_p3 = pnand %p23119_p2, %p23113_p8 }
  0x56   : > { %23123 = shalt.err (!%p23120_p3)
}
  0x57   : > { %20731 = dma.hbm_to_vmem [thread:$0]  (!%p23508_p5), %s25708_s6, 16, %s461_s28, [#allocation12]  }
  0x58   : > { %s23124_s15 = scalar_lea.hbm %s25710_s8, 32 }
  0x59   : > { %p23125_p11 = scmp.ne.s32.totalorder %s25710_s8, %s23124_s15  ;;  %p23131_p3 = scmp.lt.u32.totalorder %s23124_s15, %s25710_s8 }
  0x5b   : > { %p23127_p12 = pnand %p23125_p11, %p23522_p7 }
  0x5d   : > { %p23128_p2 = pneg %p23127_p12 }
  0x5f   : > { %p23133_p13 = pnand %p23131_p3, %p23128_p2 }
  0x61   : > { %23136 = shalt.err (!%p23133_p13)
}
  0x62   : > { %s23137_s27 = scalar_lea.vmem %s483_s18, 32  ;;  %p23145_p6 = scmp.lt.s32.totalorder %s483_s18, %s483_s18 }
  0x63   : > { %p23138_p0 = scmp.ne.s32.totalorder %s483_s18, %s23137_s27  ;;  %p23146_p8 = scmp.lt.s32.totalorder %s23137_s27, %s23137_s27 }
  0x65   : > { %p23140_p1 = pnand %p23138_p0, %p23522_p7  ;;  %p23147_p9 = por %p23146_p8, %p23145_p6 }
  0x67   : > { %p23141_p4 = pneg %p23140_p1 }
  0x69   : > { %p23148_p10 = pnand %p23147_p9, %p23141_p4 }
  0x6b   : > { %23151 = shalt.err (!%p23148_p10)
}
  0x6c   : > { %20737 = dma.hbm_to_vmem [thread:$0]  (!%p23508_p5), %s25710_s8, 32, %s483_s18, [#allocation15]  }
  0x6d   : > { %s23388_s25 = smov [#allocation17]   ;;  %s23389_s29 = smov [#allocation3]  }
  0x6e   : > { %s506_s20 = sshll.u32 %s23388_s25, 4  ;;  %s396_s14 = sshll.u32 %s23389_s29, 4  ;;  %s507_s20 = int_to_ptr.vmem [resolvable:$true] %s506_s20  ;;  %s397_s14 = int_to_ptr.vmem [resolvable:$true] %s396_s14 }
  0x6f   : > { %s23152_s15 = scalar_lea.hbm %s25713_s11, 16384 }
  0x70   : > { %p23153_p11 = scmp.ne.s32.totalorder %s25713_s11, %s23152_s15  ;;  %p23159_p3 = scmp.lt.u32.totalorder %s23152_s15, %s25713_s11 }
  0x72   : > { %p23155_p12 = pnand %p23153_p11, %p23522_p7 }
  0x74   : > { %p23156_p2 = pneg %p23155_p12 }
  0x76   : > { %p23161_p13 = pnand %p23159_p3, %p23156_p2 }
  0x78   : > { %23164 = shalt.err (!%p23161_p13)
}
  0x79   : > { %s23165_s18 = scalar_lea.vmem %s507_s20, 16384  ;;  %p23173_p6 = scmp.lt.s32.totalorder %s507_s20, %s507_s20 }
  0x7a   : > { %p23166_p0 = scmp.ne.s32.totalorder %s507_s20, %s23165_s18  ;;  %p23174_p8 = scmp.lt.s32.totalorder %s23165_s18, %s23165_s18 }
  0x7c   : > { %p23168_p1 = pnand %p23166_p0, %p23522_p7  ;;  %p23175_p9 = por %p23174_p8, %p23173_p6 }
  0x7e   : > { %p23169_p4 = pneg %p23168_p1 }
  0x80   : > { %p23176_p10 = pnand %p23175_p9, %p23169_p4 }
  0x82   : > { %23179 = shalt.err (!%p23176_p10)
}
  0x83   : > { %s25726_s27 = smov 128   ;;  %s25727_s28 = smov 8  }
  0x84   : > { %20743 = dma.hbm_to_vmem [thread:$0]  (!%p23508_p5), %s25713_s11, 16384, %s507_s20, [#allocation18], %s25726_s27, %s25726_s27, %s25727_s28  }
  0x85   : > { %s23180_s30 = scalar_lea.hbm %s25703_s1, 384 }
  0x86   : > { %p23181_p11 = scmp.ne.s32.totalorder %s25703_s1, %s23180_s30  ;;  %p23187_p3 = scmp.lt.u32.totalorder %s23180_s30, %s25703_s1 }
  0x88   : > { %p23183_p12 = pnand %p23181_p11, %p23522_p7 }
  0x8a   : > { %p23184_p2 = pneg %p23183_p12 }
  0x8c   : > { %p23189_p13 = pnand %p23187_p3, %p23184_p2 }
  0x8e   : > { %23192 = shalt.err (!%p23189_p13)
}
  0x8f   : > { %s23193_s24 = scalar_lea.vmem %s397_s14, 384  ;;  %p23201_p6 = scmp.lt.s32.totalorder %s397_s14, %s397_s14 }
  0x90   : > { %p23194_p0 = scmp.ne.s32.totalorder %s397_s14, %s23193_s24  ;;  %p23202_p8 = scmp.lt.s32.totalorder %s23193_s24, %s23193_s24 }
  0x92   : > { %p23196_p1 = pnand %p23194_p0, %p23522_p7  ;;  %p23203_p9 = por %p23202_p8, %p23201_p6 }
  0x94   : > { %p23197_p4 = pneg %p23196_p1 }
  0x96   : > { %p23204_p10 = pnand %p23203_p9, %p23197_p4 }
  0x98   : > { %23207 = shalt.err (!%p23204_p10)
}
  0x99   : > { %s25750_s20 = smov 4   ;;  %s25751_s18 = smov 64  }
  0x9a   : > { %20716 = dma.hbm_to_vmem [thread:$0]  (!%p23508_p5), %s25703_s1, 384, %s397_s14, [#allocation4], %s25751_s18, %s25751_s18, %s25750_s20  }
  0x9b   : > { %s23392_s29 = smov [#allocation7]   ;;  %s23393_s30 = smov [#allocation10]  }
  0x9c   : > { %s422_s2 = sshll.u32 %s23392_s29, 4  ;;  %s449_s15 = sshll.u32 %s23393_s30, 4  ;;  %s423_s2 = int_to_ptr.vmem [resolvable:$true] %s422_s2  ;;  %s450_s15 = int_to_ptr.vmem [resolvable:$true] %s449_s15 }
  0x9d   : > { %s23208_s22 = scalar_lea.hbm %s25705_s3, 32768 }
  0x9e   : > { %p23209_p11 = scmp.ne.s32.totalorder %s25705_s3, %s23208_s22  ;;  %p23215_p3 = scmp.lt.u32.totalorder %s23208_s22, %s25705_s3 }
  0xa0   : > { %p23211_p12 = pnand %p23209_p11, %p23522_p7 }
  0xa2   : > { %p23212_p2 = pneg %p23211_p12 }
  0xa4   : > { %p23217_p13 = pnand %p23215_p3, %p23212_p2 }
  0xa6   : > { %23220 = shalt.err (!%p23217_p13)
}
  0xa7   : > { %s23221_s14 = scalar_lea.vmem %s423_s2, 32768  ;;  %p23229_p6 = scmp.lt.s32.totalorder %s423_s2, %s423_s2 }
  0xa8   : > { %p23222_p0 = scmp.ne.s32.totalorder %s423_s2, %s23221_s14  ;;  %p23230_p8 = scmp.lt.s32.totalorder %s23221_s14, %s23221_s14 }
  0xaa   : > { %p23224_p1 = pnand %p23222_p0, %p23522_p7  ;;  %p23231_p9 = por %p23230_p8, %p23229_p6 }
  0xac   : > { %p23225_p4 = pneg %p23224_p1 }
  0xae   : > { %p23232_p10 = pnand %p23231_p9, %p23225_p4 }
  0xb0   : > { %23235 = shalt.err (!%p23232_p10)
}
  0xb1   : > { %s25752_s27 = smov 8   ;;  %s25753_s25 = smov 128  }
  0xb2   : > { %20722 = dma.hbm_to_vmem [thread:$0]  (!%p23508_p5), %s25705_s3, 32768, %s423_s2, [#allocation6], %s25753_s25, %s25753_s25, %s25752_s27  }
  0xb3   : > { %s23236_s17 = scalar_lea.hbm %s25707_s5, 1024 }
  0xb4   : > { %p23237_p11 = scmp.ne.s32.totalorder %s25707_s5, %s23236_s17  ;;  %p23243_p3 = scmp.lt.u32.totalorder %s23236_s17, %s25707_s5 }
  0xb6   : > { %p23239_p12 = pnand %p23237_p11, %p23522_p7 }
  0xb8   : > { %p23240_p2 = pneg %p23239_p12 }
  0xba   : > { %p23245_p13 = pnand %p23243_p3, %p23240_p2 }
  0xbc   : > { %23248 = shalt.err (!%p23245_p13)
}
  0xbd   : > { %s23249_s28 = scalar_lea.vmem %s450_s15, 1024  ;;  %p23257_p6 = scmp.lt.s32.totalorder %s450_s15, %s450_s15 }
  0xbe   : > { %p23250_p0 = scmp.ne.s32.totalorder %s450_s15, %s23249_s28  ;;  %p23258_p8 = scmp.lt.s32.totalorder %s23249_s28, %s23249_s28 }
  0xc0   : > { %p23252_p1 = pnand %p23250_p0, %p23522_p7  ;;  %p23259_p9 = por %p23258_p8, %p23257_p6 }
  0xc2   : > { %p23253_p4 = pneg %p23252_p1 }
  0xc4   : > { %p23260_p10 = pnand %p23259_p9, %p23253_p4 }
  0xc6   : > { %23263 = shalt.err (!%p23260_p10)
}
  0xc7   : > { %20728 = dma.hbm_to_vmem [thread:$0]  (!%p23508_p5), %s25707_s5, 1024, %s450_s15, [#allocation9]  }
  0xc8   : > { %s23394_s25 = smov [#allocation13]   ;;  %s23395_s30 = smov [#allocation16]  }
  0xc9   : > { %s471_s29 = sshll.u32 %s23394_s25, 4  ;;  %s493_s16 = sshll.u32 %s23395_s30, 4  ;;  %s472_s29 = int_to_ptr.vmem [resolvable:$true] %s471_s29  ;;  %s494_s16 = int_to_ptr.vmem [resolvable:$true] %s493_s16 }
  0xca   : > { %s23264_s24 = scalar_lea.hbm %s25709_s7, 16 }
  0xcb   : > { %p23265_p11 = scmp.ne.s32.totalorder %s25709_s7, %s23264_s24  ;;  %p23271_p3 = scmp.lt.u32.totalorder %s23264_s24, %s25709_s7 }
  0xcd   : > { %p23267_p12 = pnand %p23265_p11, %p23522_p7 }
  0xcf   : > { %p23268_p2 = pneg %p23267_p12 }
  0xd1   : > { %p23273_p13 = pnand %p23271_p3, %p23268_p2 }
  0xd3   : > { %23276 = shalt.err (!%p23273_p13)
}
  0xd4   : > { %s23277_s15 = scalar_lea.vmem %s472_s29, 16  ;;  %s23284_s27 = scalar_lea.vmem %s472_s29, 32 }
  0xd5   : > { %p23278_p0 = scmp.ne.s32.totalorder %s472_s29, %s23277_s15  ;;  %p23285_p6 = scmp.lt.s32.totalorder %s472_s29, %s472_s29 }
  0xd6   : > { %p23286_p8 = scmp.lt.s32.totalorder %s23284_s27, %s23277_s15 }
  0xd7   : > { %p23280_p1 = pnand %p23278_p0, %p23522_p7 }
  0xd8   : > { %p23287_p9 = por %p23286_p8, %p23285_p6 }
  0xd9   : > { %p23281_p4 = pneg %p23280_p1 }
  0xdb   : > { %p23288_p10 = pnand %p23287_p9, %p23281_p4 }
  0xdd   : > { %23291 = shalt.err (!%p23288_p10)
}
  0xde   : > { %20734 = dma.hbm_to_vmem [thread:$0]  (!%p23508_p5), %s25709_s7, 16, %s472_s29, [#allocation12]  }
  0xdf   : > { %s23292_s24 = scalar_lea.hbm %s25711_s9, 64 }
  0xe0   : > { %p23293_p11 = scmp.ne.s32.totalorder %s25711_s9, %s23292_s24  ;;  %p23299_p3 = scmp.lt.u32.totalorder %s23292_s24, %s25711_s9 }
  0xe2   : > { %p23295_p12 = pnand %p23293_p11, %p23522_p7 }
  0xe4   : > { %p23296_p2 = pneg %p23295_p12 }
  0xe6   : > { %p23301_p13 = pnand %p23299_p3, %p23296_p2 }
  0xe8   : > { %23304 = shalt.err (!%p23301_p13)
}
  0xe9   : > { %s23305_s15 = scalar_lea.vmem %s494_s16, 64  ;;  %p23313_p6 = scmp.lt.s32.totalorder %s494_s16, %s494_s16 }
  0xea   : > { %p23306_p0 = scmp.ne.s32.totalorder %s494_s16, %s23305_s15  ;;  %p23314_p8 = scmp.lt.s32.totalorder %s23305_s15, %s23305_s15 }
  0xec   : > { %p23308_p1 = pnand %p23306_p0, %p23522_p7  ;;  %p23315_p9 = por %p23314_p8, %p23313_p6 }
  0xee   : > { %p23309_p4 = pneg %p23308_p1 }
  0xf0   : > { %p23316_p10 = pnand %p23315_p9, %p23309_p4 }
  0xf2   : > { %23319 = shalt.err (!%p23316_p10)
}
  0xf3   : > { %20740 = dma.hbm_to_vmem [thread:$0]  (!%p23508_p5), %s25711_s9, 64, %s494_s16, [#allocation15]  }
  0xf4   : > { %s23396_s25 = smov [#allocation19]   ;;  %s23320_s24 = scalar_lea.hbm %s25714_s12, 2048 }
  0xf5   : > { %s519_s30 = sshll.u32 %s23396_s25, 4  ;;  %p23321_p11 = scmp.ne.s32.totalorder %s25714_s12, %s23320_s24  ;;  %s520_s30 = int_to_ptr.vmem [resolvable:$true] %s519_s30 }
  0xf6   : > { %p23327_p3 = scmp.lt.u32.totalorder %s23320_s24, %s25714_s12 }
  0xf7   : > { %p23323_p12 = pnand %p23321_p11, %p23522_p7 }
  0xf9   : > { %p23324_p2 = pneg %p23323_p12 }
  0xfb   : > { %p23329_p13 = pnand %p23327_p3, %p23324_p2 }
  0xfd   : > { %23332 = shalt.err (!%p23329_p13)
}
  0xfe   : > { %s23333_s16 = scalar_lea.vmem %s520_s30, 2048  ;;  %p23341_p6 = scmp.lt.s32.totalorder %s520_s30, %s520_s30 }
  0xff   : > { %p23334_p0 = scmp.ne.s32.totalorder %s520_s30, %s23333_s16  ;;  %p23342_p8 = scmp.lt.s32.totalorder %s23333_s16, %s23333_s16 }
 0x101   : > { %p23336_p1 = pnand %p23334_p0, %p23522_p7  ;;  %p23343_p9 = por %p23342_p8, %p23341_p6 }
 0x103   : > { %p23337_p4 = pneg %p23336_p1 }
 0x105   : > { %p23344_p10 = pnand %p23343_p9, %p23337_p4 }
 0x107   : > { %23347 = shalt.err (!%p23344_p10)
}
 0x108   : > { %20746 = dma.hbm_to_vmem [thread:$0]  (!%p23508_p5), %s25714_s12, 2048, %s520_s30, [#allocation18], %s25751_s18, %s25751_s18, %s25750_s20  }
 0x109   : > { %p25754_p11 = scmp.ne.s32.totalorder %s25746_s10, 0 }
 0x10b   : > { %549 = sbr.rel (%p25754_p11) target bundleno = 4446 (0x115e), region = 80 }
 0x112   : > { %p25755_p7 = scmp.eq.s32.totalorder %s23491_s21, 0 }
 0x114   : > { %23353 = dma.done.wait (%p25755_p7), [#allocation4], 384   ;;  %p25756_p12 = pmov %p25755_p7 }
 0x115   : > { %p25757_p2 = pmov %p25755_p7 }
 0x116   : > { %23355 = vsyncadd (%p25756_p12), [#allocation4], 4294966912 }
 0x117   : > { %23357 = dma.done.wait (%p25757_p2), [#allocation6], 40960   ;;  %p25758_p3 = pmov %p25757_p2 }
 0x118   : > { %p25759_p13 = pmov %p25757_p2 }
 0x119   : > { %23359 = vsyncadd (%p25758_p3), [#allocation6], 4294926336 }
 0x11a   : > { %23361 = dma.done.wait (%p25759_p13), [#allocation9], 132096   ;;  %p25760_p5 = pmov %p25757_p2 }
 0x11b   : > { %p25761_p0 = pmov %p25757_p2 }
 0x11c   : > { %23363 = vsyncadd (%p25760_p5), [#allocation9], 4294835200 }
 0x11d   : > { %23365 = dma.done.wait (%p25761_p0), [#allocation12], 32   ;;  %p25762_p1 = pmov %p25761_p0 }
 0x11e   : > { %p25763_p4 = pmov %p25761_p0 }
 0x11f   : > { %23367 = vsyncadd (%p25762_p1), [#allocation12], 4294967264 }
 0x120   : > { %23369 = dma.done.wait (%p25763_p4), [#allocation15], 96   ;;  %p25764_p6 = pmov %p25761_p0 }
 0x121   : > { %p25765_p8 = pmov %p25761_p0 }
 0x122   : > { %23371 = vsyncadd (%p25764_p6), [#allocation15], 4294967200 }
 0x123   : > { %23373 = dma.done.wait (%p25765_p8), [#allocation18], 18432   ;;  %p25766_p9 = pmov %p25761_p0 }
 0x124   : > { %p635_p10 = scmp.lt.s32.totalorder %s23491_s21, 1  ;;  %v20799_v1 = vld [vmem:[#allocation3] sm:$0xff]   ;;  %v20800_v2 = vld [vmem:[#allocation3 + $0x8] sm:$0xff]   ;;  %vm787_vm0 = vcmask 392192   ;;  %v20801_v4 = vld [vmem:[#allocation3 + $0x10] sm:$0xff]   ;;  %s23397_s18 = smov 64  }
 0x125   : > { %23375 = vsyncadd (%p25766_p9), [#allocation18], 4294948864  ;;  %20279 = vmatprep.subr.bf16.mxu0 %v20799_v1  ;;  %v20820_v20 = vld [vmem:[#allocation17 + $0x4] ss:$8 sps:$4 sm:$0xff]   ;;  %v23812_v22 = vld [vmem:[#allocation11] ss:$0 sm:$0xff] }
 0x126   : > { %s25843_s21 = smov (!%p635_p10, %s23491_s21), 1  ;;  %20280 = vmatpush3.bf16.msra.mxu0 %v20799_v1  ;;  %v20823_v21 = vld [vmem:[#allocation17 + $0x84] ss:$8 sps:$4 sm:$0xff]   ;;  %1189 = vmatprep.mubr.bf16.mxu1 %v20820_v20  ;;  %s25840_s19 = sld [smem:[#allocation43_spill]] }
 0x127   : > { %s19379_s10 = sshll.u32 %s25843_s21, 7  ;;  %20281 = vmatprep.subr.bf16.mxu0 %v20800_v2 }
 0x128   : > { %s23778_s20 = scalar_lea.vmem %s25702_s0, %s19379_s10 }
 0x129   : > { %v20802_v3 = vld [vmem:[%s23778_s20] sm:$0xff]   ;;  %v20803_v5 = vld [vmem:[%s23778_s20 + $0x8] sm:$0xff]   ;;  %v20804_v6 = vld [vmem:[%s23778_s20 + $0x10] sm:$0xff]  }
 0x12a   : > { %20285 = vmatprep.mubr.msk.bf16.mxu0 %vm787_vm0, %v20802_v3  ;;  %20282 = vmatpush3.bf16.msra.mxu0 %v20800_v2  ;;  %v20805_v7 = vld [vmem:[%s23778_s20 + $0x18] sm:$0xff]   ;;  %v20806_v8 = vld [vmem:[%s23778_s20 + $0x20] sm:$0xff]   ;;  %v20807_v9 = vld [vmem:[%s23778_s20 + $0x28] sm:$0xff]  }
 0x12b   : > { %20283 = vmatprep.subr.bf16.mxu0 %v20801_v4  ;;  %v20808_v10 = vld [vmem:[%s23778_s20 + $0x30] sm:$0xff]   ;;  %v20809_v11 = vld [vmem:[%s23778_s20 + $0x38] sm:$0xff]   ;;  %v20810_v12 = vld [vmem:[%s23778_s20 + $0x40] sm:$0xff]  }
 0x12c   : > { %v20811_v13 = vld [vmem:[%s23778_s20 + $0x48] sm:$0xff]   ;;  %v20812_v14 = vld [vmem:[%s23778_s20 + $0x50] sm:$0xff]   ;;  %v20813_v15 = vld [vmem:[%s23778_s20 + $0x58] sm:$0xff]  }
 0x12d   : > { %v20814_v16 = vld [vmem:[%s23778_s20 + $0x60] sm:$0xff]   ;;  %v20815_v17 = vld [vmem:[%s23778_s20 + $0x68] sm:$0xff]   ;;  %v20816_v18 = vld [vmem:[%s23778_s20 + $0x70] sm:$0xff]  }
 0x12e   : > { %20284 = vmatpush3.bf16.msra.mxu0 %v20801_v4  ;;  %v20817_v19 = vld [vmem:[%s23778_s20 + $0x78] sm:$0xff]   ;;  %s25838_s20 = sld [smem:[#allocation42_spill]] }
 0x131   : > { %20286 = vmatmul.mubr.msk.bf16.vlgmr.msra.gmra.mrb[0].mxu0 %vm787_vm0, %v20803_v5 }
 0x132   : > { %20289 = vmatprep.mubr.msk.bf16.mxu0 %vm787_vm0, %v20804_v6 }
 0x139   : > { %20290 = vmatmul.mubr.msk.bf16.gmra.mrb[4].mxu0 %vm787_vm0, %v20805_v7 }
 0x13a   : > { %20293 = vmatprep.mubr.msk.bf16.mxu0 %vm787_vm0, %v20806_v8 }
 0x141   : > { %20294 = vmatmul.mubr.msk.bf16.gmra.mrb[8].mxu0 %vm787_vm0, %v20807_v9 }
 0x142   : > { %20297 = vmatprep.mubr.msk.bf16.mxu0 %vm787_vm0, %v20808_v10 }
 0x149   : > { %20298 = vmatmul.mubr.msk.bf16.gmra.mrb[12].mxu0 %vm787_vm0, %v20809_v11 }
 0x14a   : > { %20301 = vmatprep.mubr.msk.bf16.mxu0 %vm787_vm0, %v20810_v12 }
 0x151   : > { %20302 = vmatmul.mubr.msk.bf16.gmra.mrb[16].mxu0 %vm787_vm0, %v20811_v13 }
 0x152   : > { %20305 = vmatprep.mubr.msk.bf16.mxu0 %vm787_vm0, %v20812_v14 }
 0x159   : > { %20306 = vmatmul.mubr.msk.bf16.gmra.mrb[20].mxu0 %vm787_vm0, %v20813_v15 }
 0x15a   : > { %20309 = vmatprep.mubr.msk.bf16.mxu0 %vm787_vm0, %v20814_v16 }
 0x161   : > { %20310 = vmatmul.mubr.msk.bf16.gmra.mrb[24].mxu0 %vm787_vm0, %v20815_v17 }
 0x162   : > { %20313 = vmatprep.mubr.msk.bf16.mxu0 %vm787_vm0, %v20816_v18 }
 0x169   : > { %20314 = vmatmul.mubr.msk.bf16.gmra.mrb[28].mxu0 %vm787_vm0, %v20817_v19 }
 0x16a   : > { %1425 = vmatprep.mubr.bf16.mxu0 %v20823_v21 }
 0x204   : > { %v20287_v23 = vpop.f32.mrb[0].mxu0 }
 0x205   : > { %v879_v24 = vadd.f32 %v20287_v23, %v23812_v22  ;;  %v870_v25 = vpop.f32.mrb[1].mxu0 }
 0x206   : > { %v871_v26 = vadd.f32 %v23812_v22, %v870_v25  ;;  %v20288_v27 = vpop.f32.mrb[2].mxu0 }
 0x207   : > { %vm999_vm1 = vcmp.gt.f32.partialorder %v879_v24, 0.0  ;;  %v1031_v28 = vmul.f32 0.2, %v879_v24  ;;  %v882_v29 = vadd.f32 %v20288_v27, %v23812_v22  ;;  %v873_v30 = vpop.f32.mrb[3].mxu0 }
 0x208   : > { %vm997_vm2 = vcmp.gt.f32.partialorder %v871_v26, 0.0  ;;  %v1029_v31 = vmul.f32 0.2, %v871_v26  ;;  %v874_v32 = vadd.f32 %v23812_v22, %v873_v30 }
 0x209   : > { %vm1000_vm3 = vcmp.gt.f32.partialorder %v882_v29, 0.0  ;;  %v1032_v33 = vmul.f32 0.2, %v882_v29  ;;  %v1063_v35 = vsel %vm999_vm1, %v879_v24, %v1031_v28 }
 0x20a   : > { %vm998_vm4 = vcmp.gt.f32.partialorder %v874_v32, 0.0  ;;  %v1030_v34 = vmul.f32 0.2, %v874_v32  ;;  %v1061_v37 = vsel %vm997_vm2, %v871_v26, %v1029_v31 }
 0x20b   : > { %v1064_v36 = vsel %vm1000_vm3, %v882_v29, %v1032_v33 }
 0x20c   : > { %v23818_v38 = vpack.c.bf16 %v1064_v36, %v1063_v35  ;;  %v1062_v39 = vsel %vm998_vm4, %v874_v32, %v1030_v34  ;;  %v20291_v40 = vpop.f32.mrb[4].mxu0 }
 0x20d   : > { %v23820_v41 = vpack.c.bf16 %v1062_v39, %v1061_v37  ;;  %v895_v42 = vadd.f32 %v20291_v40, %v23812_v22  ;;  %v886_v43 = vpop.f32.mrb[5].mxu0 }
 0x20e   : > { %v887_v44 = vadd.f32 %v23812_v22, %v886_v43  ;;  %v20292_v45 = vpop.f32.mrb[6].mxu0 }
 0x20f   : > { %vm1003_vm5 = vcmp.gt.f32.partialorder %v895_v42, 0.0  ;;  %v1035_v46 = vmul.f32 0.2, %v895_v42  ;;  %v898_v47 = vadd.f32 %v20292_v45, %v23812_v22  ;;  %v889_v48 = vpop.f32.mrb[7].mxu0 }
 0x210   : > { %vm1001_vm6 = vcmp.gt.f32.partialorder %v887_v44, 0.0  ;;  %v1033_v49 = vmul.f32 0.2, %v887_v44  ;;  %v890_v50 = vadd.f32 %v23812_v22, %v889_v48 }
 0x211   : > { %vm1004_vm7 = vcmp.gt.f32.partialorder %v898_v47, 0.0  ;;  %v1036_v51 = vmul.f32 0.2, %v898_v47  ;;  %v1067_v53 = vsel %vm1003_vm5, %v895_v42, %v1035_v46 }
 0x212   : > { %vm1002_vm8 = vcmp.gt.f32.partialorder %v890_v50, 0.0  ;;  %v1034_v52 = vmul.f32 0.2, %v890_v50  ;;  %v1065_v55 = vsel %vm1001_vm6, %v887_v44, %v1033_v49 }
 0x213   : > { %v1068_v54 = vsel %vm1004_vm7, %v898_v47, %v1036_v51 }
 0x214   : > { %v23826_v56 = vpack.c.bf16 %v1068_v54, %v1067_v53  ;;  %v1066_v57 = vsel %vm1002_vm8, %v890_v50, %v1034_v52  ;;  %v20295_v58 = vpop.f32.mrb[8].mxu0 }
 0x215   : > { %v23828_v59 = vpack.c.bf16 %v1066_v57, %v1065_v55  ;;  %v911_v60 = vadd.f32 %v20295_v58, %v23812_v22  ;;  %v902_v61 = vpop.f32.mrb[9].mxu0 }
 0x216   : > { %v903_v62 = vadd.f32 %v23812_v22, %v902_v61  ;;  %v20296_v63 = vpop.f32.mrb[10].mxu0 }
 0x217   : > { %vm1007_vm9 = vcmp.gt.f32.partialorder %v911_v60, 0.0  ;;  %v1039_v0 = vmul.f32 0.2, %v911_v60  ;;  %v914_v1 = vadd.f32 %v20296_v63, %v23812_v22  ;;  %v905_v2 = vpop.f32.mrb[11].mxu0 }
 0x218   : > { %vm1005_vm10 = vcmp.gt.f32.partialorder %v903_v62, 0.0  ;;  %v1037_v3 = vmul.f32 0.2, %v903_v62  ;;  %v906_v4 = vadd.f32 %v23812_v22, %v905_v2 }
 0x219   : > { %vm1008_vm11 = vcmp.gt.f32.partialorder %v914_v1, 0.0  ;;  %v1040_v5 = vmul.f32 0.2, %v914_v1  ;;  %v1071_v7 = vsel %vm1007_vm9, %v911_v60, %v1039_v0 }
 0x21a   : > { %vm1006_vm12 = vcmp.gt.f32.partialorder %v906_v4, 0.0  ;;  %v1038_v6 = vmul.f32 0.2, %v906_v4  ;;  %v1069_v9 = vsel %vm1005_vm10, %v903_v62, %v1037_v3 }
 0x21b   : > { %v1072_v8 = vsel %vm1008_vm11, %v914_v1, %v1040_v5 }
 0x21c   : > { %v23834_v10 = vpack.c.bf16 %v1072_v8, %v1071_v7  ;;  %v1070_v11 = vsel %vm1006_vm12, %v906_v4, %v1038_v6  ;;  %v20299_v12 = vpop.f32.mrb[12].mxu0 }
 0x21d   : > { %v23836_v13 = vpack.c.bf16 %v1070_v11, %v1069_v9  ;;  %v927_v14 = vadd.f32 %v20299_v12, %v23812_v22  ;;  %v918_v15 = vpop.f32.mrb[13].mxu0 }
 0x21e   : > { %v919_v16 = vadd.f32 %v23812_v22, %v918_v15  ;;  %v20300_v17 = vpop.f32.mrb[14].mxu0 }
 0x21f   : > { %vm1011_vm13 = vcmp.gt.f32.partialorder %v927_v14, 0.0  ;;  %v1043_v18 = vmul.f32 0.2, %v927_v14  ;;  %v930_v19 = vadd.f32 %v20300_v17, %v23812_v22  ;;  %v921_v20 = vpop.f32.mrb[15].mxu0 }
 0x220   : > { %vm1009_vm14 = vcmp.gt.f32.partialorder %v919_v16, 0.0  ;;  %v1041_v21 = vmul.f32 0.2, %v919_v16  ;;  %v922_v23 = vadd.f32 %v23812_v22, %v921_v20 }
 0x221   : > { %vm1012_vm15 = vcmp.gt.f32.partialorder %v930_v19, 0.0  ;;  %v1044_v24 = vmul.f32 0.2, %v930_v19  ;;  %v1075_v26 = vsel %vm1011_vm13, %v927_v14, %v1043_v18 }
 0x222   : > { %vm1010_vm0 = vcmp.gt.f32.partialorder %v922_v23, 0.0  ;;  %v1042_v25 = vmul.f32 0.2, %v922_v23  ;;  %v1073_v28 = vsel %vm1009_vm14, %v919_v16, %v1041_v21 }
 0x223   : > { %v1076_v27 = vsel %vm1012_vm15, %v930_v19, %v1044_v24 }
 0x224   : > { %v23842_v29 = vpack.c.bf16 %v1076_v27, %v1075_v26  ;;  %v1074_v30 = vsel %vm1010_vm0, %v922_v23, %v1042_v25  ;;  %v20303_v31 = vpop.f32.mrb[16].mxu0 }
 0x225   : > { %v23844_v32 = vpack.c.bf16 %v1074_v30, %v1073_v28  ;;  %v943_v33 = vadd.f32 %v20303_v31, %v23812_v22  ;;  %v934_v34 = vpop.f32.mrb[17].mxu0 }
 0x226   : > { %v935_v35 = vadd.f32 %v23812_v22, %v934_v34  ;;  %v20304_v36 = vpop.f32.mrb[18].mxu0 }
 0x227   : > { %vm1015_vm1 = vcmp.gt.f32.partialorder %v943_v33, 0.0  ;;  %v1047_v37 = vmul.f32 0.2, %v943_v33  ;;  %v946_v39 = vadd.f32 %v20304_v36, %v23812_v22  ;;  %v937_v40 = vpop.f32.mrb[19].mxu0 }
 0x228   : > { %vm1013_vm2 = vcmp.gt.f32.partialorder %v935_v35, 0.0  ;;  %v1045_v42 = vmul.f32 0.2, %v935_v35  ;;  %v938_v43 = vadd.f32 %v23812_v22, %v937_v40 }
 0x229   : > { %vm1016_vm3 = vcmp.gt.f32.partialorder %v946_v39, 0.0  ;;  %v1048_v44 = vmul.f32 0.2, %v946_v39  ;;  %v1079_v46 = vsel %vm1015_vm1, %v943_v33, %v1047_v37  ;;  %vm3092_vm1 = vcmask 523264  }
 0x22a   : > { %vm1014_vm4 = vcmp.gt.f32.partialorder %v938_v43, 0.0  ;;  %v1046_v45 = vmul.f32 0.2, %v938_v43  ;;  %v1077_v48 = vsel %vm1013_vm2, %v935_v35, %v1045_v42  ;;  %vm23399_vm2 = vmmov 0  }
 0x22b   : > { %v1080_v47 = vsel %vm1016_vm3, %v946_v39, %v1048_v44 }
 0x22c   : > { %v23850_v49 = vpack.c.bf16 %v1080_v47, %v1079_v46  ;;  %v1078_v50 = vsel %vm1014_vm4, %v938_v43, %v1046_v45  ;;  %v20307_v51 = vpop.f32.mrb[20].mxu0 }
 0x22d   : > { %v23852_v52 = vpack.c.bf16 %v1078_v50, %v1077_v48  ;;  %v959_v53 = vadd.f32 %v20307_v51, %v23812_v22  ;;  %v950_v54 = vpop.f32.mrb[21].mxu0  ;;  %v20818_v51 = vld [vmem:[#allocation17] ss:$8 sps:$4 sm:$0xff]  }
 0x22e   : > { %v951_v55 = vadd.f32 %v23812_v22, %v950_v54  ;;  %v20308_v57 = vpop.f32.mrb[22].mxu0  ;;  %v20824_v54 = vld [vmem:[#allocation17 + $0x14] ss:$8 sps:$4 sm:$0xff]  }
 0x22f   : > { %vm1019_vm5 = vcmp.gt.f32.partialorder %v959_v53, 0.0  ;;  %v1051_v58 = vmul.f32 0.2, %v959_v53  ;;  %v962_v60 = vadd.f32 %v20308_v57, %v23812_v22  ;;  %v953_v61 = vpop.f32.mrb[23].mxu0  ;;  %19399 = vmatprep.subr.bf16.mxu1 %v23852_v52  ;;  %19479 = vmatprep.subr.bf16.mxu0 %v23852_v52  ;;  %v20826_v57 = vld [vmem:[#allocation17 + $0x10] ss:$8 sps:$4 sm:$0xff]  }
 0x230   : > { %vm1017_vm6 = vcmp.gt.f32.partialorder %v951_v55, 0.0  ;;  %v1049_v62 = vmul.f32 0.2, %v951_v55  ;;  %v954_v63 = vadd.f32 %v23812_v22, %v953_v61  ;;  %19400 = vmatpush3.bf16.msra.mxu1 %v23820_v41  ;;  %19480 = vmatpush3.bf16.msra.mxu0 %v23820_v41  ;;  %v20833_v61 = vld [vmem:[#allocation17 + $0xa4] ss:$8 sps:$4 sm:$0xff]  }
 0x231   : > { %vm1020_vm7 = vcmp.gt.f32.partialorder %v962_v60, 0.0  ;;  %v1052_v0 = vmul.f32 0.2, %v962_v60  ;;  %19401 = vmatprep.subr.bf16.mxu1 %v23850_v49  ;;  %19481 = vmatprep.subr.bf16.mxu0 %v23850_v49  ;;  %v1083_v2 = vsel %vm1019_vm5, %v959_v53, %v1051_v58  ;;  %v20821_v53 = vld [vmem:[#allocation17 + $0x80] ss:$8 sps:$4 sm:$0xff]  }
 0x232   : > { %vm1018_vm8 = vcmp.gt.f32.partialorder %v954_v63, 0.0  ;;  %v1050_v1 = vmul.f32 0.2, %v954_v63  ;;  %v1081_v4 = vsel %vm1017_vm6, %v951_v55, %v1049_v62  ;;  %v20827_v55 = vld [vmem:[#allocation17 + $0x94] ss:$8 sps:$4 sm:$0xff]  }
 0x233   : > { %v1084_v3 = vsel %vm1020_vm7, %v962_v60, %v1052_v0  ;;  %v20829_v58 = vld [vmem:[#allocation17 + $0x90] ss:$8 sps:$4 sm:$0xff]   ;;  %v20830_v60 = vld [vmem:[#allocation17 + $0x24] ss:$8 sps:$4 sm:$0xff]   ;;  %v20832_v62 = vld [vmem:[#allocation17 + $0x20] ss:$8 sps:$4 sm:$0xff]  }
 0x234   : > { %v23865_v5 = vpack.c.bf16 %v1084_v3, %v1083_v2  ;;  %v1082_v6 = vsel %vm1018_vm8, %v954_v63, %v1050_v1  ;;  %v20311_v7 = vpop.f32.mrb[24].mxu0  ;;  %19402 = vmatpush3.bf16.msra.mxu1 %v23818_v38  ;;  %19482 = vmatpush3.bf16.msra.mxu0 %v23818_v38  ;;  %v20835_v63 = vld [vmem:[#allocation17 + $0xa0] ss:$8 sps:$4 sm:$0xff]   ;;  %v20836_v0 = vld [vmem:[#allocation17 + $0x34] ss:$8 sps:$4 sm:$0xff]  }
 0x235   : > { %v23869_v8 = vpack.c.bf16 %v1082_v6, %v1081_v4  ;;  %v975_v9 = vadd.f32 %v20311_v7, %v23812_v22  ;;  %v966_v11 = vpop.f32.mrb[25].mxu0  ;;  %v20839_v1 = vld [vmem:[#allocation17 + $0xb4] ss:$8 sps:$4 sm:$0xff]   ;;  %v20838_v2 = vld [vmem:[#allocation17 + $0x30] ss:$8 sps:$4 sm:$0xff]  }
 0x236   : > { %v967_v12 = vadd.f32 %v23812_v22, %v966_v11  ;;  %v20312_v14 = vpop.f32.mrb[26].mxu0  ;;  %v20841_v3 = vld [vmem:[#allocation17 + $0xb0] ss:$8 sps:$4 sm:$0xff]   ;;  %v20844_v4 = vld [vmem:[#allocation17 + $0x44] ss:$8 sps:$4 sm:$0xff]  }
 0x237   : > { %vm1023_vm9 = vcmp.gt.f32.partialorder %v975_v9, 0.0  ;;  %v1055_v15 = vmul.f32 0.2, %v975_v9  ;;  %v978_v16 = vadd.f32 %v20312_v14, %v23812_v22  ;;  %v969_v17 = vpop.f32.mrb[27].mxu0  ;;  %19403 = vmatprep.subr.bf16.mxu1 %v23869_v8  ;;  %19483 = vmatprep.subr.bf16.mxu0 %v23869_v8  ;;  %v20847_v6 = vld [vmem:[#allocation17 + $0x104] ss:$8 sps:$4 sm:$0xff]  }
 0x238   : > { %vm1021_vm10 = vcmp.gt.f32.partialorder %v967_v12, 0.0  ;;  %v1053_v18 = vmul.f32 0.2, %v967_v12  ;;  %v970_v19 = vadd.f32 %v23812_v22, %v969_v17  ;;  %19404 = vmatpush3.bf16.msra.mxu1 %v23828_v59  ;;  %19484 = vmatpush3.bf16.msra.mxu0 %v23828_v59  ;;  %v20842_v7 = vld [vmem:[#allocation17 + $0x40] ss:$8 sps:$4 sm:$0xff]  }
 0x239   : > { %vm1024_vm11 = vcmp.gt.f32.partialorder %v978_v16, 0.0  ;;  %v1056_v20 = vmul.f32 0.2, %v978_v16  ;;  %19405 = vmatprep.subr.bf16.mxu1 %v23865_v5  ;;  %19485 = vmatprep.subr.bf16.mxu0 %v23865_v5  ;;  %v1087_v23 = vsel %vm1023_vm9, %v975_v9, %v1055_v15  ;;  %v20845_v9 = vld [vmem:[#allocation17 + $0x100] ss:$8 sps:$4 sm:$0xff]  }
 0x23a   : > { %vm1022_vm12 = vcmp.gt.f32.partialorder %v970_v19, 0.0  ;;  %v1054_v21 = vmul.f32 0.2, %v970_v19  ;;  %v1085_v25 = vsel %vm1021_vm10, %v967_v12, %v1053_v18  ;;  %v20848_v11 = vld [vmem:[#allocation17 + $0x54] ss:$8 sps:$4 sm:$0xff]  }
 0x23b   : > { %v1088_v24 = vsel %vm1024_vm11, %v978_v16, %v1056_v20  ;;  %v20851_v12 = vld [vmem:[#allocation17 + $0x114] ss:$8 sps:$4 sm:$0xff]   ;;  %v20850_v14 = vld [vmem:[#allocation17 + $0x50] ss:$8 sps:$4 sm:$0xff]   ;;  %v20854_v16 = vld [vmem:[#allocation17 + $0x64] ss:$8 sps:$4 sm:$0xff]  }
 0x23c   : > { %v23882_v26 = vpack.c.bf16 %v1088_v24, %v1087_v23  ;;  %v1086_v27 = vsel %vm1022_vm12, %v970_v19, %v1054_v21  ;;  %v20315_v28 = vpop.f32.mrb[28].mxu0  ;;  %19406 = vmatpush3.bf16.msra.mxu1 %v23826_v56  ;;  %19486 = vmatpush3.bf16.msra.mxu0 %v23826_v56  ;;  %v20853_v15 = vld [vmem:[#allocation17 + $0x110] ss:$8 sps:$4 sm:$0xff]   ;;  %v20857_v17 = vld [vmem:[#allocation17 + $0x124] ss:$8 sps:$4 sm:$0xff]  }
 0x23d   : > { %v23886_v30 = vpack.c.bf16 %v1086_v27, %v1085_v25  ;;  %v991_v31 = vadd.f32 %v20315_v28, %v23812_v22  ;;  %v982_v33 = vpop.f32.mrb[29].mxu0  ;;  %v20856_v18 = vld [vmem:[#allocation17 + $0x60] ss:$8 sps:$4 sm:$0xff]   ;;  %v20860_v20 = vld [vmem:[#allocation17 + $0x74] ss:$8 sps:$4 sm:$0xff]  }
 0x23e   : > { %v983_v34 = vadd.f32 %v23812_v22, %v982_v33  ;;  %v20316_v35 = vpop.f32.mrb[30].mxu0  ;;  %v20859_v19 = vld [vmem:[#allocation17 + $0x120] ss:$8 sps:$4 sm:$0xff]   ;;  %v20863_v21 = vld [vmem:[#allocation17 + $0x134] ss:$8 sps:$4 sm:$0xff]  }
 0x23f   : > { %vm1027_vm13 = vcmp.gt.f32.partialorder %v991_v31, 0.0  ;;  %v1059_v36 = vmul.f32 0.2, %v991_v31  ;;  %v994_v37 = vadd.f32 %v20316_v35, %v23812_v22  ;;  %v985_v39 = vpop.f32.mrb[31].mxu0  ;;  %19407 = vmatprep.subr.bf16.mxu1 %v23886_v30  ;;  %19487 = vmatprep.subr.bf16.mxu0 %v23886_v30  ;;  %v20862_v23 = vld [vmem:[#allocation17 + $0x70] ss:$8 sps:$4 sm:$0xff]  }
 0x240   : > { %vm1025_vm14 = vcmp.gt.f32.partialorder %v983_v34, 0.0  ;;  %v1057_v40 = vmul.f32 0.2, %v983_v34  ;;  %v986_v42 = vadd.f32 %v23812_v22, %v985_v39  ;;  %19408 = vmatpush3.bf16.msra.mxu1 %v23836_v13  ;;  %19488 = vmatpush3.bf16.msra.mxu0 %v23836_v13  ;;  %v20865_v24 = vld [vmem:[#allocation17 + $0x130] ss:$8 sps:$4 sm:$0xff]  }
 0x241   : > { %vm1028_vm15 = vcmp.gt.f32.partialorder %v994_v37, 0.0  ;;  %v1060_v43 = vmul.f32 0.2, %v994_v37  ;;  %19409 = vmatprep.subr.bf16.mxu1 %v23882_v26  ;;  %19489 = vmatprep.subr.bf16.mxu0 %v23882_v26  ;;  %v1091_v45 = vsel %vm1027_vm13, %v991_v31, %v1059_v36  ;;  %v20868_v25 = vld [vmem:[#allocation17 + $0xc4] ss:$8 sps:$4 sm:$0xff]  }
 0x242   : > { %vm1026_vm0 = vcmp.gt.f32.partialorder %v986_v42, 0.0  ;;  %v1058_v44 = vmul.f32 0.2, %v986_v42  ;;  %v1089_v47 = vsel %vm1025_vm14, %v983_v34, %v1057_v40  ;;  %v20871_v27 = vld [vmem:[#allocation17 + $0x184] ss:$8 sps:$4 sm:$0xff]  }
 0x243   : > { %v1092_v46 = vsel %vm1028_vm15, %v994_v37, %v1060_v43  ;;  %v20866_v28 = vld [vmem:[#allocation17 + $0xc0] ss:$8 sps:$4 sm:$0xff]   ;;  %v20872_v33 = vld [vmem:[#allocation17 + $0xd4] ss:$8 sps:$4 sm:$0xff]   ;;  %v20874_v35 = vld [vmem:[#allocation17 + $0xd0] ss:$8 sps:$4 sm:$0xff]  }
 0x244   : > { %v23899_v48 = vpack.c.bf16 %v1092_v46, %v1091_v45  ;;  %v1090_v50 = vsel %vm1026_vm0, %v986_v42, %v1058_v44  ;;  %19410 = vmatpush3.bf16.msra.mxu1 %v23834_v10  ;;  %19490 = vmatpush3.bf16.msra.mxu0 %v23834_v10  ;;  %v20869_v31 = vld [vmem:[#allocation17 + $0x180] ss:$8 sps:$4 sm:$0xff]   ;;  %v20875_v34 = vld [vmem:[#allocation17 + $0x194] ss:$8 sps:$4 sm:$0xff]   ;;  %v20877_v36 = vld [vmem:[#allocation17 + $0x190] ss:$8 sps:$4 sm:$0xff]  }
 0x245   : > { %v23903_v22 = vpack.c.bf16 %v1090_v50, %v1089_v47  ;;  %v20878_v37 = vld [vmem:[#allocation17 + $0xe4] ss:$8 sps:$4 sm:$0xff]   ;;  %v20880_v40 = vld [vmem:[#allocation17 + $0xe0] ss:$8 sps:$4 sm:$0xff]   ;;  %v20884_v43 = vld [vmem:[#allocation17 + $0xf4] ss:$8 sps:$4 sm:$0xff]  }
 0x246   : > { %v20881_v39 = vld [vmem:[#allocation17 + $0x1a4] ss:$8 sps:$4 sm:$0xff]   ;;  %v20883_v42 = vld [vmem:[#allocation17 + $0x1a0] ss:$8 sps:$4 sm:$0xff]   ;;  %v20887_v44 = vld [vmem:[#allocation17 + $0x1b4] ss:$8 sps:$4 sm:$0xff]  }
 0x247   : > { %19411 = vmatprep.subr.bf16.mxu1 %v23903_v22  ;;  %19491 = vmatprep.subr.bf16.mxu0 %v23903_v22  ;;  %v20886_v45 = vld [vmem:[#allocation17 + $0xf0] ss:$8 sps:$4 sm:$0xff]   ;;  %v20892_v47 = vld [vmem:[#allocation17 + $0x144] ss:$8 sps:$4 sm:$0xff]   ;;  %vm6899_vm15 = vcmask 130048   ;;  %vm15330_vm0 = vcmask 1040384  }
 0x248   : > { %19412 = vmatpush3.bf16.msra.mxu1 %v23844_v32  ;;  %19492 = vmatpush3.bf16.msra.mxu0 %v23844_v32  ;;  %v20889_v46 = vld [vmem:[#allocation17 + $0x1b0] ss:$8 sps:$4 sm:$0xff]   ;;  %v20895_v50 = vld [vmem:[#allocation17 + $0x204] ss:$8 sps:$4 sm:$0xff]  }
 0x249   : > { %19413 = vmatprep.subr.bf16.mxu1 %v23899_v48  ;;  %19493 = vmatprep.subr.bf16.mxu0 %v23899_v48 }
 0x24c   : > { %19414 = vmatpush3.bf16.msra.mxu1 %v23842_v29  ;;  %19494 = vmatpush3.bf16.msra.mxu0 %v23842_v29 }
 0x24d   : > { %19439 = vmatprep.subr.bf16.mxu1 %v23852_v52  ;;  %19559 = vmatprep.subr.bf16.mxu0 %v23852_v52 }
 0x24f   : > { %1190 = vmatmul.mubr.bf16.vlgmr.msra.gmra.mrb[0].mxu1 %v20818_v51  ;;  %1426 = vmatmul.mubr.bf16.vlgmr.msra.gmra.mrb[32].mxu0 %v20821_v53  ;;  %v20890_v51 = vld [vmem:[#allocation17 + $0x140] ss:$8 sps:$4 sm:$0xff]  }
 0x250   : > { %19440 = vmatpush3.bf16.msra.mxu1 %v23820_v41  ;;  %19560 = vmatpush3.bf16.msra.mxu0 %v23820_v41  ;;  %v20893_v53 = vld [vmem:[#allocation17 + $0x200] ss:$8 sps:$4 sm:$0xff]  }
 0x251   : > { %19441 = vmatprep.subr.bf16.mxu1 %v23850_v49  ;;  %19561 = vmatprep.subr.bf16.mxu0 %v23850_v49 }
 0x252   : > { %1197 = vmatprep.mubr.bf16.mxu1 %v20824_v54  ;;  %1433 = vmatprep.mubr.bf16.mxu0 %v20827_v55  ;;  %v20896_v54 = vld [vmem:[#allocation17 + $0x154] ss:$8 sps:$4 sm:$0xff]  }
 0x253   : > { %v20899_v55 = vld [vmem:[#allocation17 + $0x214] ss:$8 sps:$4 sm:$0xff]  }
 0x254   : > { %19442 = vmatpush3.bf16.msra.mxu1 %v23818_v38  ;;  %19562 = vmatpush3.bf16.msra.mxu0 %v23818_v38 }
 0x255   : > { %19443 = vmatprep.subr.bf16.mxu1 %v23869_v8  ;;  %19563 = vmatprep.subr.bf16.mxu0 %v23869_v8 }
 0x257   : > { %1198 = vmatmul.mubr.bf16.gmra.mrb[4].mxu1 %v20826_v57  ;;  %1434 = vmatmul.mubr.bf16.gmra.mrb[36].mxu0 %v20829_v58  ;;  %v20898_v57 = vld [vmem:[#allocation17 + $0x150] ss:$8 sps:$4 sm:$0xff]  }
 0x258   : > { %19444 = vmatpush3.bf16.msra.mxu1 %v23828_v59  ;;  %19564 = vmatpush3.bf16.msra.mxu0 %v23828_v59  ;;  %v20901_v58 = vld [vmem:[#allocation17 + $0x210] ss:$8 sps:$4 sm:$0xff]  }
 0x259   : > { %19445 = vmatprep.subr.bf16.mxu1 %v23865_v5  ;;  %19565 = vmatprep.subr.bf16.mxu0 %v23865_v5 }
 0x25a   : > { %1205 = vmatprep.mubr.bf16.mxu1 %v20830_v60  ;;  %1441 = vmatprep.mubr.bf16.mxu0 %v20833_v61  ;;  %v20902_v60 = vld [vmem:[#allocation17 + $0x164] ss:$8 sps:$4 sm:$0xff]  }
 0x25b   : > { %v20905_v61 = vld [vmem:[#allocation17 + $0x224] ss:$8 sps:$4 sm:$0xff]  }
 0x25c   : > { %19446 = vmatpush3.bf16.msra.mxu1 %v23826_v56  ;;  %19566 = vmatpush3.bf16.msra.mxu0 %v23826_v56 }
 0x25d   : > { %19447 = vmatprep.subr.bf16.mxu1 %v23886_v30  ;;  %19567 = vmatprep.subr.bf16.mxu0 %v23886_v30 }
 0x25f   : > { %1206 = vmatmul.mubr.bf16.gmra.mrb[8].mxu1 %v20832_v62  ;;  %1442 = vmatmul.mubr.bf16.gmra.mrb[40].mxu0 %v20835_v63  ;;  %v20904_v62 = vld [vmem:[#allocation17 + $0x160] ss:$8 sps:$4 sm:$0xff]  }
 0x260   : > { %19448 = vmatpush3.bf16.msra.mxu1 %v23836_v13  ;;  %19568 = vmatpush3.bf16.msra.mxu0 %v23836_v13  ;;  %v20907_v63 = vld [vmem:[#allocation17 + $0x220] ss:$8 sps:$4 sm:$0xff]  }
 0x261   : > { %19449 = vmatprep.subr.bf16.mxu1 %v23882_v26  ;;  %19569 = vmatprep.subr.bf16.mxu0 %v23882_v26 }
 0x262   : > { %1213 = vmatprep.mubr.bf16.mxu1 %v20836_v0  ;;  %1449 = vmatprep.mubr.bf16.mxu0 %v20839_v1  ;;  %v20908_v0 = vld [vmem:[#allocation17 + $0x174] ss:$8 sps:$4 sm:$0xff]  }
 0x263   : > { %v20911_v1 = vld [vmem:[#allocation17 + $0x234] ss:$8 sps:$4 sm:$0xff]  }
 0x264   : > { %19450 = vmatpush3.bf16.msra.mxu1 %v23834_v10  ;;  %19570 = vmatpush3.bf16.msra.mxu0 %v23834_v10 }
 0x265   : > { %19451 = vmatprep.subr.bf16.mxu1 %v23903_v22  ;;  %19571 = vmatprep.subr.bf16.mxu0 %v23903_v22 }
 0x267   : > { %1214 = vmatmul.mubr.bf16.gmra.mrb[12].mxu1 %v20838_v2  ;;  %1450 = vmatmul.mubr.bf16.gmra.mrb[44].mxu0 %v20841_v3  ;;  %v20910_v2 = vld [vmem:[#allocation17 + $0x170] ss:$8 sps:$4 sm:$0xff]  }
 0x268   : > { %19452 = vmatpush3.bf16.msra.mxu1 %v23844_v32  ;;  %19572 = vmatpush3.bf16.msra.mxu0 %v23844_v32  ;;  %v20913_v3 = vld [vmem:[#allocation17 + $0x230] ss:$8 sps:$4 sm:$0xff]  }
 0x269   : > { %19453 = vmatprep.subr.bf16.mxu1 %v23899_v48  ;;  %19573 = vmatprep.subr.bf16.mxu0 %v23899_v48 }
 0x26a   : > { %1307 = vmatprep.mubr.bf16.mxu1 %v20844_v4  ;;  %1661 = vmatprep.mubr.bf16.mxu0 %v20847_v6  ;;  %v20916_v4 = vld [vmem:[#allocation17 + $0x1c4] ss:$8 sps:$4 sm:$0xff]  }
 0x26b   : > { %v20919_v6 = vld [vmem:[#allocation17 + $0x284] ss:$8 sps:$4 sm:$0xff]  }
 0x26c   : > { %19454 = vmatpush3.bf16.msra.mxu1 %v23842_v29  ;;  %19574 = vmatpush3.bf16.msra.mxu0 %v23842_v29 }
 0x26d   : > { %19519 = vmatprep.subr.bf16.mxu1 %v23852_v52  ;;  %19639 = vmatprep.subr.bf16.mxu0 %v23852_v52 }
 0x26f   : > { %1308 = vmatmul.mubr.bf16.vlgmr.msra.gmra.mrb[16].mxu1 %v20842_v7  ;;  %1662 = vmatmul.mubr.bf16.vlgmr.msra.gmra.mrb[48].mxu0 %v20845_v9  ;;  %v20914_v7 = vld [vmem:[#allocation17 + $0x1c0] ss:$8 sps:$4 sm:$0xff]  }
 0x270   : > { %19520 = vmatpush3.bf16.msra.mxu1 %v23820_v41  ;;  %19640 = vmatpush3.bf16.msra.mxu0 %v23820_v41  ;;  %v20917_v9 = vld [vmem:[#allocation17 + $0x280] ss:$8 sps:$4 sm:$0xff]  }
 0x271   : > { %19521 = vmatprep.subr.bf16.mxu1 %v23850_v49  ;;  %19641 = vmatprep.subr.bf16.mxu0 %v23850_v49 }
 0x272   : > { %1315 = vmatprep.mubr.bf16.mxu1 %v20848_v11  ;;  %1669 = vmatprep.mubr.bf16.mxu0 %v20851_v12  ;;  %v20920_v11 = vld [vmem:[#allocation17 + $0x1d4] ss:$8 sps:$4 sm:$0xff]  }
 0x273   : > { %v20923_v12 = vld [vmem:[#allocation17 + $0x294] ss:$8 sps:$4 sm:$0xff]  }
 0x274   : > { %19522 = vmatpush3.bf16.msra.mxu1 %v23818_v38  ;;  %19642 = vmatpush3.bf16.msra.mxu0 %v23818_v38 }
 0x275   : > { %19523 = vmatprep.subr.bf16.mxu1 %v23869_v8  ;;  %19643 = vmatprep.subr.bf16.mxu0 %v23869_v8 }
 0x277   : > { %1316 = vmatmul.mubr.bf16.gmra.mrb[20].mxu1 %v20850_v14  ;;  %1670 = vmatmul.mubr.bf16.gmra.mrb[52].mxu0 %v20853_v15  ;;  %v20922_v14 = vld [vmem:[#allocation17 + $0x1d0] ss:$8 sps:$4 sm:$0xff]  }
 0x278   : > { %19524 = vmatpush3.bf16.msra.mxu1 %v23828_v59  ;;  %19644 = vmatpush3.bf16.msra.mxu0 %v23828_v59  ;;  %v20925_v15 = vld [vmem:[#allocation17 + $0x290] ss:$8 sps:$4 sm:$0xff]  }
 0x279   : > { %19525 = vmatprep.subr.bf16.mxu1 %v23865_v5  ;;  %19645 = vmatprep.subr.bf16.mxu0 %v23865_v5 }
 0x27a   : > { %1323 = vmatprep.mubr.bf16.mxu1 %v20854_v16  ;;  %1677 = vmatprep.mubr.bf16.mxu0 %v20857_v17  ;;  %v20926_v16 = vld [vmem:[#allocation17 + $0x1e4] ss:$8 sps:$4 sm:$0xff]  }
 0x27b   : > { %v20929_v17 = vld [vmem:[#allocation17 + $0x2a4] ss:$8 sps:$4 sm:$0xff]  }
 0x27c   : > { %19526 = vmatpush3.bf16.msra.mxu1 %v23826_v56  ;;  %19646 = vmatpush3.bf16.msra.mxu0 %v23826_v56 }
 0x27d   : > { %19527 = vmatprep.subr.bf16.mxu1 %v23886_v30  ;;  %19647 = vmatprep.subr.bf16.mxu0 %v23886_v30 }
 0x27f   : > { %1324 = vmatmul.mubr.bf16.gmra.mrb[24].mxu1 %v20856_v18  ;;  %1678 = vmatmul.mubr.bf16.gmra.mrb[56].mxu0 %v20859_v19  ;;  %v20928_v18 = vld [vmem:[#allocation17 + $0x1e0] ss:$8 sps:$4 sm:$0xff]  }
 0x280   : > { %19528 = vmatpush3.bf16.msra.mxu1 %v23836_v13  ;;  %19648 = vmatpush3.bf16.msra.mxu0 %v23836_v13  ;;  %v20931_v19 = vld [vmem:[#allocation17 + $0x2a0] ss:$8 sps:$4 sm:$0xff]  }
 0x281   : > { %19529 = vmatprep.subr.bf16.mxu1 %v23882_v26  ;;  %19649 = vmatprep.subr.bf16.mxu0 %v23882_v26 }
 0x282   : > { %1331 = vmatprep.mubr.bf16.mxu1 %v20860_v20  ;;  %1685 = vmatprep.mubr.bf16.mxu0 %v20863_v21  ;;  %v20932_v20 = vld [vmem:[#allocation17 + $0x1f4] ss:$8 sps:$4 sm:$0xff]  }
 0x283   : > { %v20935_v21 = vld [vmem:[#allocation17 + $0x2b4] ss:$8 sps:$4 sm:$0xff]  }
 0x284   : > { %19530 = vmatpush3.bf16.msra.mxu1 %v23834_v10  ;;  %19650 = vmatpush3.bf16.msra.mxu0 %v23834_v10 }
 0x285   : > { %19531 = vmatprep.subr.bf16.mxu1 %v23903_v22  ;;  %19651 = vmatprep.subr.bf16.mxu0 %v23903_v22 }
 0x287   : > { %1332 = vmatmul.mubr.bf16.gmra.mrb[28].mxu1 %v20862_v23  ;;  %1686 = vmatmul.mubr.bf16.gmra.mrb[60].mxu0 %v20865_v24  ;;  %v20934_v23 = vld [vmem:[#allocation17 + $0x1f0] ss:$8 sps:$4 sm:$0xff]  }
 0x288   : > { %19532 = vmatpush3.bf16.msra.mxu1 %v23844_v32  ;;  %19652 = vmatpush3.bf16.msra.mxu0 %v23844_v32  ;;  %v20937_v24 = vld [vmem:[#allocation17 + $0x2b0] ss:$8 sps:$4 sm:$0xff]  }
 0x289   : > { %19533 = vmatprep.subr.bf16.mxu1 %v23899_v48  ;;  %19653 = vmatprep.subr.bf16.mxu0 %v23899_v48 }
 0x28a   : > { %1543 = vmatprep.mubr.bf16.mxu1 %v20868_v25  ;;  %1897 = vmatprep.mubr.bf16.mxu0 %v20871_v27  ;;  %v20940_v25 = vld [vmem:[#allocation17 + $0x244] ss:$8 sps:$4 sm:$0xff]  }
 0x28b   : > { %v20943_v27 = vld [vmem:[#allocation17 + $0x304] ss:$8 sps:$4 sm:$0xff]  }
 0x28c   : > { %19534 = vmatpush3.bf16.msra.mxu1 %v23842_v29  ;;  %19654 = vmatpush3.bf16.msra.mxu0 %v23842_v29 }
 0x28d   : > { %19599 = vmatprep.subr.bf16.mxu1 %v23852_v52  ;;  %19719 = vmatprep.subr.bf16.mxu0 %v23852_v52 }
 0x28f   : > { %1544 = vmatmul.mubr.bf16.vlgmr.msra.gmra.mrb[32].mxu1 %v20866_v28  ;;  %1898 = vmatmul.mubr.bf16.vlgmr.msra.gmra.mrb[64].mxu0 %v20869_v31  ;;  %v20938_v28 = vld [vmem:[#allocation17 + $0x240] ss:$8 sps:$4 sm:$0xff]  }
 0x290   : > { %19600 = vmatpush3.bf16.msra.mxu1 %v23820_v41  ;;  %19720 = vmatpush3.bf16.msra.mxu0 %v23820_v41  ;;  %v20941_v31 = vld [vmem:[#allocation17 + $0x300] ss:$8 sps:$4 sm:$0xff]  }
 0x291   : > { %19601 = vmatprep.subr.bf16.mxu1 %v23850_v49  ;;  %19721 = vmatprep.subr.bf16.mxu0 %v23850_v49 }
 0x292   : > { %1551 = vmatprep.mubr.bf16.mxu1 %v20872_v33  ;;  %1905 = vmatprep.mubr.bf16.mxu0 %v20875_v34  ;;  %v20944_v33 = vld [vmem:[#allocation17 + $0x254] ss:$8 sps:$4 sm:$0xff]   ;;  %v20946_v34 = vld [vmem:[#allocation17 + $0x250] ss:$8 sps:$4 sm:$0xff]  }
 0x294   : > { %19602 = vmatpush3.bf16.msra.mxu1 %v23818_v38  ;;  %19722 = vmatpush3.bf16.msra.mxu0 %v23818_v38 }
 0x295   : > { %19603 = vmatprep.subr.bf16.mxu1 %v23869_v8  ;;  %19723 = vmatprep.subr.bf16.mxu0 %v23869_v8 }
 0x297   : > { %1552 = vmatmul.mubr.bf16.gmra.mrb[36].mxu1 %v20874_v35  ;;  %1906 = vmatmul.mubr.bf16.gmra.mrb[68].mxu0 %v20877_v36  ;;  %v20947_v35 = vld [vmem:[#allocation17 + $0x264] ss:$8 sps:$4 sm:$0xff]   ;;  %v20949_v36 = vld [vmem:[#allocation17 + $0x260] ss:$8 sps:$4 sm:$0xff]  }
 0x298   : > { %19604 = vmatpush3.bf16.msra.mxu1 %v23828_v59  ;;  %19724 = vmatpush3.bf16.msra.mxu0 %v23828_v59 }
 0x299   : > { %19605 = vmatprep.subr.bf16.mxu1 %v23865_v5  ;;  %19725 = vmatprep.subr.bf16.mxu0 %v23865_v5 }
 0x29a   : > { %1559 = vmatprep.mubr.bf16.mxu1 %v20878_v37  ;;  %1913 = vmatprep.mubr.bf16.mxu0 %v20881_v39  ;;  %v20950_v37 = vld [vmem:[#allocation17 + $0x274] ss:$8 sps:$4 sm:$0xff]   ;;  %v20952_v39 = vld [vmem:[#allocation17 + $0x270] ss:$8 sps:$4 sm:$0xff]  }
 0x29c   : > { %19606 = vmatpush3.bf16.msra.mxu1 %v23826_v56  ;;  %19726 = vmatpush3.bf16.msra.mxu0 %v23826_v56 }
 0x29d   : > { %19607 = vmatprep.subr.bf16.mxu1 %v23886_v30  ;;  %19727 = vmatprep.subr.bf16.mxu0 %v23886_v30 }
 0x29f   : > { %1560 = vmatmul.mubr.bf16.gmra.mrb[40].mxu1 %v20880_v40  ;;  %1914 = vmatmul.mubr.bf16.gmra.mrb[72].mxu0 %v20883_v42  ;;  %v20955_v40 = vld [vmem:[#allocation17 + $0x2c4] ss:$8 sps:$4 sm:$0xff]   ;;  %v20953_v42 = vld [vmem:[#allocation17 + $0x2c0] ss:$8 sps:$4 sm:$0xff]  }
 0x2a0   : > { %19608 = vmatpush3.bf16.msra.mxu1 %v23836_v13  ;;  %19728 = vmatpush3.bf16.msra.mxu0 %v23836_v13 }
 0x2a1   : > { %19609 = vmatprep.subr.bf16.mxu1 %v23882_v26  ;;  %19729 = vmatprep.subr.bf16.mxu0 %v23882_v26 }
 0x2a2   : > { %1567 = vmatprep.mubr.bf16.mxu1 %v20884_v43  ;;  %1921 = vmatprep.mubr.bf16.mxu0 %v20887_v44  ;;  %v20956_v43 = vld [vmem:[#allocation17 + $0x2d4] ss:$8 sps:$4 sm:$0xff]   ;;  %v20958_v44 = vld [vmem:[#allocation17 + $0x2d0] ss:$8 sps:$4 sm:$0xff]  }
 0x2a4   : > { %19610 = vmatpush3.bf16.msra.mxu1 %v23834_v10  ;;  %19730 = vmatpush3.bf16.msra.mxu0 %v23834_v10 }
 0x2a5   : > { %19611 = vmatprep.subr.bf16.mxu1 %v23903_v22  ;;  %19731 = vmatprep.subr.bf16.mxu0 %v23903_v22 }
 0x2a7   : > { %1568 = vmatmul.mubr.bf16.gmra.mrb[44].mxu1 %v20886_v45  ;;  %1922 = vmatmul.mubr.bf16.gmra.mrb[76].mxu0 %v20889_v46  ;;  %v20959_v45 = vld [vmem:[#allocation17 + $0x2e4] ss:$8 sps:$4 sm:$0xff]   ;;  %v20961_v46 = vld [vmem:[#allocation17 + $0x2e0] ss:$8 sps:$4 sm:$0xff]  }
 0x2a8   : > { %19612 = vmatpush3.bf16.msra.mxu1 %v23844_v32  ;;  %19732 = vmatpush3.bf16.msra.mxu0 %v23844_v32 }
 0x2a9   : > { %19613 = vmatprep.subr.bf16.mxu1 %v23899_v48  ;;  %19733 = vmatprep.subr.bf16.mxu0 %v23899_v48 }
 0x2aa   : > { %1779 = vmatprep.mubr.bf16.mxu1 %v20892_v47  ;;  %2133 = vmatprep.mubr.bf16.mxu0 %v20895_v50  ;;  %v20962_v47 = vld [vmem:[#allocation17 + $0x2f4] ss:$8 sps:$4 sm:$0xff]   ;;  %v20964_v50 = vld [vmem:[#allocation17 + $0x2f0] ss:$8 sps:$4 sm:$0xff]  }
 0x2ac   : > { %19614 = vmatpush3.bf16.msra.mxu1 %v23842_v29  ;;  %19734 = vmatpush3.bf16.msra.mxu0 %v23842_v29 }
 0x2ad   : > { %19679 = vmatprep.subr.bf16.mxu1 %v23852_v52  ;;  %19799 = vmatprep.subr.bf16.mxu0 %v23852_v52 }
 0x2af   : > { %1780 = vmatmul.mubr.bf16.vlgmr.msra.gmra.mrb[48].mxu1 %v20890_v51  ;;  %2134 = vmatmul.mubr.bf16.vlgmr.msra.gmra.mrb[80].mxu0 %v20893_v53  ;;  %v20967_v53 = vld [vmem:[#allocation17 + $0x344] ss:$8 sps:$4 sm:$0xff]  }
 0x2b0   : > { %19680 = vmatpush3.bf16.msra.mxu1 %v23820_v41  ;;  %19800 = vmatpush3.bf16.msra.mxu0 %v23820_v41 }
 0x2b1   : > { %19681 = vmatprep.subr.bf16.mxu1 %v23850_v49  ;;  %19801 = vmatprep.subr.bf16.mxu0 %v23850_v49 }
 0x2b2   : > { %1787 = vmatprep.mubr.bf16.mxu1 %v20896_v54  ;;  %2141 = vmatprep.mubr.bf16.mxu0 %v20899_v55 }
 0x2b4   : > { %19682 = vmatpush3.bf16.msra.mxu1 %v23818_v38  ;;  %19802 = vmatpush3.bf16.msra.mxu0 %v23818_v38 }
 0x2b5   : > { %19683 = vmatprep.subr.bf16.mxu1 %v23869_v8  ;;  %19803 = vmatprep.subr.bf16.mxu0 %v23869_v8 }
 0x2b7   : > { %1788 = vmatmul.mubr.bf16.gmra.mrb[52].mxu1 %v20898_v57  ;;  %2142 = vmatmul.mubr.bf16.gmra.mrb[84].mxu0 %v20901_v58  ;;  %v20989_v58 = vld [vmem:[#allocation17 + $0x314] ss:$8 sps:$4 sm:$0xff]  }
 0x2b8   : > { %19684 = vmatpush3.bf16.msra.mxu1 %v23828_v59  ;;  %19804 = vmatpush3.bf16.msra.mxu0 %v23828_v59 }
 0x2b9   : > { %19685 = vmatprep.subr.bf16.mxu1 %v23865_v5  ;;  %19805 = vmatprep.subr.bf16.mxu0 %v23865_v5 }
 0x2ba   : > { %1795 = vmatprep.mubr.bf16.mxu1 %v20902_v60  ;;  %2149 = vmatprep.mubr.bf16.mxu0 %v20905_v61  ;;  %v20991_v61 = vld [vmem:[#allocation17 + $0x310] ss:$8 sps:$4 sm:$0xff]  }
 0x2bc   : > { %19686 = vmatpush3.bf16.msra.mxu1 %v23826_v56  ;;  %19806 = vmatpush3.bf16.msra.mxu0 %v23826_v56 }
 0x2bd   : > { %19687 = vmatprep.subr.bf16.mxu1 %v23886_v30  ;;  %19807 = vmatprep.subr.bf16.mxu0 %v23886_v30 }
 0x2bf   : > { %1796 = vmatmul.mubr.bf16.gmra.mrb[56].mxu1 %v20904_v62  ;;  %2150 = vmatmul.mubr.bf16.gmra.mrb[88].mxu0 %v20907_v63 }
 0x2c0   : > { %19688 = vmatpush3.bf16.msra.mxu1 %v23836_v13  ;;  %19808 = vmatpush3.bf16.msra.mxu0 %v23836_v13 }
 0x2c1   : > { %19689 = vmatprep.subr.bf16.mxu1 %v23882_v26  ;;  %19809 = vmatprep.subr.bf16.mxu0 %v23882_v26 }
 0x2c2   : > { %1803 = vmatprep.mubr.bf16.mxu1 %v20908_v0  ;;  %2157 = vmatprep.mubr.bf16.mxu0 %v20911_v1  ;;  %v20965_v0 = vld [vmem:[#allocation17 + $0x340] ss:$8 sps:$4 sm:$0xff]  }
 0x2c4   : > { %19690 = vmatpush3.bf16.msra.mxu1 %v23834_v10  ;;  %19810 = vmatpush3.bf16.msra.mxu0 %v23834_v10 }
 0x2c5   : > { %19691 = vmatprep.subr.bf16.mxu1 %v23903_v22  ;;  %19811 = vmatprep.subr.bf16.mxu0 %v23903_v22 }
 0x2c7   : > { %1804 = vmatmul.mubr.bf16.gmra.mrb[60].mxu1 %v20910_v2  ;;  %2158 = vmatmul.mubr.bf16.gmra.mrb[92].mxu0 %v20913_v3  ;;  %v20968_v2 = vld [vmem:[#allocation17 + $0x354] ss:$8 sps:$4 sm:$0xff]  }
 0x2c8   : > { %19692 = vmatpush3.bf16.msra.mxu1 %v23844_v32  ;;  %19812 = vmatpush3.bf16.msra.mxu0 %v23844_v32 }
 0x2c9   : > { %19693 = vmatprep.subr.bf16.mxu1 %v23899_v48  ;;  %19813 = vmatprep.subr.bf16.mxu0 %v23899_v48 }
 0x2ca   : > { %2015 = vmatprep.mubr.bf16.mxu1 %v20916_v4  ;;  %2369 = vmatprep.mubr.bf16.mxu0 %v20919_v6 }
 0x2cc   : > { %19694 = vmatpush3.bf16.msra.mxu1 %v23842_v29  ;;  %19814 = vmatpush3.bf16.msra.mxu0 %v23842_v29 }
 0x2cd   : > { %19759 = vmatprep.subr.bf16.mxu1 %v23852_v52  ;;  %19879 = vmatprep.subr.bf16.mxu0 %v23852_v52 }
 0x2cf   : > { %2016 = vmatmul.mubr.bf16.vlgmr.msra.gmra.mrb[64].mxu1 %v20914_v7  ;;  %2370 = vmatmul.mubr.bf16.vlgmr.msra.gmra.mrb[96].mxu0 %v20917_v9  ;;  %v20992_v7 = vld [vmem:[#allocation17 + $0x324] ss:$8 sps:$4 sm:$0xff]  }
 0x2d0   : > { %19760 = vmatpush3.bf16.msra.mxu1 %v23820_v41  ;;  %19880 = vmatpush3.bf16.msra.mxu0 %v23820_v41 }
 0x2d1   : > { %19761 = vmatprep.subr.bf16.mxu1 %v23850_v49  ;;  %19881 = vmatprep.subr.bf16.mxu0 %v23850_v49 }
 0x2d2   : > { %2023 = vmatprep.mubr.bf16.mxu1 %v20920_v11  ;;  %2377 = vmatprep.mubr.bf16.mxu0 %v20923_v12  ;;  %v20994_v11 = vld [vmem:[#allocation17 + $0x320] ss:$8 sps:$4 sm:$0xff]  }
 0x2d4   : > { %19762 = vmatpush3.bf16.msra.mxu1 %v23818_v38  ;;  %19882 = vmatpush3.bf16.msra.mxu0 %v23818_v38 }
 0x2d5   : > { %19763 = vmatprep.subr.bf16.mxu1 %v23869_v8  ;;  %19883 = vmatprep.subr.bf16.mxu0 %v23869_v8 }
 0x2d7   : > { %2024 = vmatmul.mubr.bf16.gmra.mrb[68].mxu1 %v20922_v14  ;;  %2378 = vmatmul.mubr.bf16.gmra.mrb[100].mxu0 %v20925_v15  ;;  %v20970_v15 = vld [vmem:[#allocation17 + $0x350] ss:$8 sps:$4 sm:$0xff]   ;;  %v21037_v14 = vld [vmem:[#allocation5 + $0xa8] sm:$0xff]  }
 0x2d8   : > { %19764 = vmatpush3.bf16.msra.mxu1 %v23828_v59  ;;  %19884 = vmatpush3.bf16.msra.mxu0 %v23828_v59 }
 0x2d9   : > { %19765 = vmatprep.subr.bf16.mxu1 %v23865_v5  ;;  %19885 = vmatprep.subr.bf16.mxu0 %v23865_v5 }
 0x2da   : > { %2031 = vmatprep.mubr.bf16.mxu1 %v20926_v16  ;;  %2385 = vmatprep.mubr.bf16.mxu0 %v20929_v17  ;;  %v20971_v17 = vld [vmem:[#allocation17 + $0x364] ss:$8 sps:$4 sm:$0xff]  }
 0x2dc   : > { %19766 = vmatpush3.bf16.msra.mxu1 %v23826_v56  ;;  %19886 = vmatpush3.bf16.msra.mxu0 %v23826_v56 }
 0x2dd   : > { %19767 = vmatprep.subr.bf16.mxu1 %v23886_v30  ;;  %19887 = vmatprep.subr.bf16.mxu0 %v23886_v30 }
 0x2df   : > { %2032 = vmatmul.mubr.bf16.gmra.mrb[72].mxu1 %v20928_v18  ;;  %2386 = vmatmul.mubr.bf16.gmra.mrb[104].mxu0 %v20931_v19 }
 0x2e0   : > { %19768 = vmatpush3.bf16.msra.mxu1 %v23836_v13  ;;  %19888 = vmatpush3.bf16.msra.mxu0 %v23836_v13 }
 0x2e1   : > { %19769 = vmatprep.subr.bf16.mxu1 %v23882_v26  ;;  %19889 = vmatprep.subr.bf16.mxu0 %v23882_v26 }
 0x2e2   : > { %2039 = vmatprep.mubr.bf16.mxu1 %v20932_v20  ;;  %2393 = vmatprep.mubr.bf16.mxu0 %v20935_v21  ;;  %v20995_v20 = vld [vmem:[#allocation17 + $0x334] ss:$8 sps:$4 sm:$0xff]  }
 0x2e4   : > { %19770 = vmatpush3.bf16.msra.mxu1 %v23834_v10  ;;  %19890 = vmatpush3.bf16.msra.mxu0 %v23834_v10 }
 0x2e5   : > { %19771 = vmatprep.subr.bf16.mxu1 %v23903_v22  ;;  %19891 = vmatprep.subr.bf16.mxu0 %v23903_v22 }
 0x2e7   : > { %2040 = vmatmul.mubr.bf16.gmra.mrb[76].mxu1 %v20934_v23  ;;  %2394 = vmatmul.mubr.bf16.gmra.mrb[108].mxu0 %v20937_v24  ;;  %v20997_v23 = vld [vmem:[#allocation17 + $0x330] ss:$8 sps:$4 sm:$0xff]  }
 0x2e8   : > { %19772 = vmatpush3.bf16.msra.mxu1 %v23844_v32  ;;  %19892 = vmatpush3.bf16.msra.mxu0 %v23844_v32 }
 0x2e9   : > { %19773 = vmatprep.subr.bf16.mxu1 %v23899_v48  ;;  %19893 = vmatprep.subr.bf16.mxu0 %v23899_v48 }
 0x2ea   : > { %2251 = vmatprep.mubr.bf16.mxu1 %v20940_v25  ;;  %2605 = vmatprep.mubr.bf16.mxu0 %v20943_v27  ;;  %v20974_v25 = vld [vmem:[#allocation17 + $0x374] ss:$8 sps:$4 sm:$0xff]  }
 0x2ec   : > { %19774 = vmatpush3.bf16.msra.mxu1 %v23842_v29  ;;  %19894 = vmatpush3.bf16.msra.mxu0 %v23842_v29 }
 0x2ed   : > { %19839 = vmatprep.subr.bf16.mxu1 %v23852_v52  ;;  %19959 = vmatprep.subr.bf16.mxu0 %v23852_v52 }
 0x2ef   : > { %2252 = vmatmul.mubr.bf16.vlgmr.msra.gmra.mrb[80].mxu1 %v20938_v28  ;;  %2606 = vmatmul.mubr.bf16.vlgmr.msra.gmra.mrb[112].mxu0 %v20941_v31  ;;  %v21000_v31 = vld [vmem:[#allocation17 + $0x384] ss:$8 sps:$4 sm:$0xff]  }
 0x2f0   : > { %19840 = vmatpush3.bf16.msra.mxu1 %v23820_v41  ;;  %19960 = vmatpush3.bf16.msra.mxu0 %v23820_v41 }
 0x2f1   : > { %19841 = vmatprep.subr.bf16.mxu1 %v23850_v49  ;;  %19961 = vmatprep.subr.bf16.mxu0 %v23850_v49 }
 0x2f2   : > { %2259 = vmatprep.mubr.bf16.mxu1 %v20944_v33  ;;  %2613 = vmatprep.mubr.bf16.mxu0 %v20989_v58 }
 0x2f4   : > { %19842 = vmatpush3.bf16.msra.mxu1 %v23818_v38  ;;  %19962 = vmatpush3.bf16.msra.mxu0 %v23818_v38 }
 0x2f5   : > { %19843 = vmatprep.subr.bf16.mxu1 %v23869_v8  ;;  %19963 = vmatprep.subr.bf16.mxu0 %v23869_v8 }
 0x2f7   : > { %2260 = vmatmul.mubr.bf16.gmra.mrb[84].mxu1 %v20946_v34  ;;  %2614 = vmatmul.mubr.bf16.gmra.mrb[116].mxu0 %v20991_v61  ;;  %v20998_v34 = vld [vmem:[#allocation17 + $0x380] ss:$8 sps:$4 sm:$0xff]   ;;  %v21012_v61 = vld [vmem:[#allocation5 + $0x58] sm:$0xff]  }
 0x2f8   : > { %19844 = vmatpush3.bf16.msra.mxu1 %v23828_v59  ;;  %19964 = vmatpush3.bf16.msra.mxu0 %v23828_v59 }
 0x2f9   : > { %19845 = vmatprep.subr.bf16.mxu1 %v23865_v5  ;;  %19965 = vmatprep.subr.bf16.mxu0 %v23865_v5 }
 0x2fa   : > { %2267 = vmatprep.mubr.bf16.mxu1 %v20947_v35  ;;  %2621 = vmatprep.mubr.bf16.mxu0 %v20992_v7  ;;  %v20982_v7 = vld [vmem:[#allocation17 + $0x3d0] ss:$8 sps:$4 sm:$0xff]  }
 0x2fc   : > { %19846 = vmatpush3.bf16.msra.mxu1 %v23826_v56  ;;  %19966 = vmatpush3.bf16.msra.mxu0 %v23826_v56 }
 0x2fd   : > { %19847 = vmatprep.subr.bf16.mxu1 %v23886_v30  ;;  %19967 = vmatprep.subr.bf16.mxu0 %v23886_v30 }
 0x2ff   : > { %2268 = vmatmul.mubr.bf16.gmra.mrb[88].mxu1 %v20949_v36  ;;  %2622 = vmatmul.mubr.bf16.gmra.mrb[120].mxu0 %v20994_v11  ;;  %v21002_v36 = vld [vmem:[#allocation5] sm:$0xff]   ;;  %v20983_v11 = vld [vmem:[#allocation17 + $0x3e4] ss:$8 sps:$4 sm:$0xff]  }
 0x300   : > { %19848 = vmatpush3.bf16.msra.mxu1 %v23836_v13  ;;  %19968 = vmatpush3.bf16.msra.mxu0 %v23836_v13 }
 0x301   : > { %19849 = vmatprep.subr.bf16.mxu1 %v23882_v26  ;;  %19969 = vmatprep.subr.bf16.mxu0 %v23882_v26 }
 0x302   : > { %2275 = vmatprep.mubr.bf16.mxu1 %v20950_v37  ;;  %2629 = vmatprep.mubr.bf16.mxu0 %v20995_v20 }
 0x304   : > { %19850 = vmatpush3.bf16.msra.mxu1 %v23834_v10  ;;  %19970 = vmatpush3.bf16.msra.mxu0 %v23834_v10 }
 0x305   : > { %19851 = vmatprep.subr.bf16.mxu1 %v23903_v22  ;;  %19971 = vmatprep.subr.bf16.mxu0 %v23903_v22 }
 0x307   : > { %2276 = vmatmul.mubr.bf16.gmra.mrb[92].mxu1 %v20952_v39  ;;  %2630 = vmatmul.mubr.bf16.gmra.mrb[124].mxu0 %v20997_v23  ;;  %v20979_v39 = vld [vmem:[#allocation17 + $0x3c4] ss:$8 sps:$4 sm:$0xff]  }
 0x308   : > { %19852 = vmatpush3.bf16.msra.mxu1 %v23844_v32  ;;  %19972 = vmatpush3.bf16.msra.mxu0 %v23844_v32  ;;  %v21019_v23 = vld [vmem:[#allocation5 + $0x68] sm:$0xff]  }
 0x309   : > { %19853 = vmatprep.subr.bf16.mxu1 %v23899_v48  ;;  %19973 = vmatprep.subr.bf16.mxu0 %v23899_v48 }
 0x30a   : > { %2487 = vmatprep.mubr.bf16.mxu1 %v20955_v40  ;;  %2841 = vmatprep.mubr.bf16.mxu0 %v21000_v31 }
 0x30c   : > { %19854 = vmatpush3.bf16.msra.mxu1 %v23842_v29  ;;  %19974 = vmatpush3.bf16.msra.mxu0 %v23842_v29 }
 0x30d   : > { %19919 = vmatprep.subr.bf16.mxu1 %v23852_v52 }
 0x30f   : > { %2488 = vmatmul.mubr.bf16.vlgmr.msra.gmra.mrb[96].mxu1 %v20953_v42  ;;  %2842 = vmatmul.mubr.bf16.vlgmr.msra.gmra.mrb[128].mxu0 %v20998_v34 }
 0x310   : > { %19920 = vmatpush3.bf16.msra.mxu1 %v23820_v41  ;;  %2495 = vmatprep.mubr.bf16.mxu1 %v20956_v43  ;;  %v21003_v43 = vld [vmem:[#allocation17 + $0x394] ss:$8 sps:$4 sm:$0xff]  }
 0x311   : > { %19921 = vmatprep.subr.bf16.mxu1 %v23850_v49  ;;  %2849 = vmatprep.mubr.bf16.mxu0 %v21003_v43 }
 0x314   : > { %19922 = vmatpush3.bf16.msra.mxu1 %v23818_v38 }
 0x315   : > { %19923 = vmatprep.subr.bf16.mxu1 %v23869_v8 }
 0x317   : > { %2496 = vmatmul.mubr.bf16.gmra.mrb[100].mxu1 %v20958_v44  ;;  %v21005_v44 = vld [vmem:[#allocation5 + $0x48] sm:$0xff]  }
 0x318   : > { %19924 = vmatpush3.bf16.msra.mxu1 %v23828_v59  ;;  %2503 = vmatprep.mubr.bf16.mxu1 %v20959_v45 }
 0x319   : > { %19925 = vmatprep.subr.bf16.mxu1 %v23865_v5 }
 0x31c   : > { %19926 = vmatpush3.bf16.msra.mxu1 %v23826_v56 }
 0x31d   : > { %19927 = vmatprep.subr.bf16.mxu1 %v23886_v30 }
 0x31f   : > { %2504 = vmatmul.mubr.bf16.gmra.mrb[104].mxu1 %v20961_v46  ;;  %v21007_v46 = vld [vmem:[#allocation5 + $0x8] sm:$0xff]  }
 0x320   : > { %19928 = vmatpush3.bf16.msra.mxu1 %v23836_v13  ;;  %2511 = vmatprep.mubr.bf16.mxu1 %v20962_v47 }
 0x321   : > { %19929 = vmatprep.subr.bf16.mxu1 %v23882_v26 }
 0x322   : > { %v19415_v51 = vpop.f32.mrb[0].mxu1 }
 0x323   : > { %v19416_v54 = vpop.f32.mrb[1].mxu1 }
 0x324   : > { %v24116_v55 = vadd.f32 %v19416_v54, %v19415_v51  ;;  %v19418_v57 = vpop.f32.mrb[2].mxu1  ;;  %19930 = vmatpush3.bf16.msra.mxu1 %v23834_v10 }
 0x325   : > { %v19419_v60 = vpop.f32.mrb[3].mxu1  ;;  %19931 = vmatprep.subr.bf16.mxu1 %v23903_v22 }
 0x326   : > { %v24120_v62 = vadd.f32 %v19419_v60, %v19418_v57  ;;  %v21010_v60 = vld [vmem:[#allocation17 + $0x3a4] ss:$8 sps:$4 sm:$0xff]  }
 0x327   : > { %2512 = vmatmul.mubr.bf16.gmra.mrb[108].mxu1 %v20964_v50  ;;  %v20977_v50 = vld [vmem:[#allocation17 + $0x3c0] ss:$8 sps:$4 sm:$0xff]  }
 0x328   : > { %19932 = vmatpush3.bf16.msra.mxu1 %v23844_v32  ;;  %2723 = vmatprep.mubr.bf16.mxu1 %v20967_v53  ;;  %v20980_v53 = vld [vmem:[#allocation17 + $0x3d4] ss:$8 sps:$4 sm:$0xff]  }
 0x329   : > { %19933 = vmatprep.subr.bf16.mxu1 %v23899_v48 }
 0x32a   : > { %v19421_v1 = vpop.f32.mrb[4].mxu1 }
 0x32b   : > { %v19422_v3 = vpop.f32.mrb[5].mxu1 }
 0x32c   : > { %v24126_v4 = vadd.f32 %v19422_v3, %v19421_v1  ;;  %v19424_v6 = vpop.f32.mrb[6].mxu1  ;;  %19934 = vmatpush3.bf16.msra.mxu1 %v23842_v29  ;;  %v21014_v1 = vld [vmem:[#allocation5 + $0x18] sm:$0xff]   ;;  %v19495_v3 = vpop.f32.mrb[32].mxu0 }
 0x32d   : > { %v19425_v9 = vpop.f32.mrb[7].mxu1  ;;  %19999 = vmatprep.subr.bf16.mxu1 %v23852_v52 }
 0x32e   : > { %v24130_v12 = vadd.f32 %v19425_v9, %v19424_v6  ;;  %v21015_v6 = vld [vmem:[#allocation5 + $0x60] sm:$0xff]  }
 0x32f   : > { %2724 = vmatmul.mubr.bf16.vlgmr.msra.gmra.mrb[112].mxu1 %v20965_v0 }
 0x330   : > { %20000 = vmatpush3.bf16.msra.mxu1 %v23820_v41  ;;  %2731 = vmatprep.mubr.bf16.mxu1 %v20968_v2 }
 0x331   : > { %20001 = vmatprep.subr.bf16.mxu1 %v23850_v49  ;;  %v20973_v49 = vld [vmem:[#allocation17 + $0x360] ss:$8 sps:$4 sm:$0xff]  }
 0x332   : > { %v19427_v16 = vpop.f32.mrb[8].mxu1 }
 0x333   : > { %v19428_v18 = vpop.f32.mrb[9].mxu1 }
 0x334   : > { %v24136_v19 = vadd.f32 %v19428_v18, %v19427_v16  ;;  %v19430_v52 = vpop.f32.mrb[10].mxu1  ;;  %20002 = vmatpush3.bf16.msra.mxu1 %v23818_v38 }
 0x335   : > { %v19431_v21 = vpop.f32.mrb[11].mxu1  ;;  %20003 = vmatprep.subr.bf16.mxu1 %v23869_v8 }
 0x336   : > { %v24140_v24 = vadd.f32 %v19431_v21, %v19430_v52  ;;  %v21017_v21 = vld [vmem:[#allocation17 + $0x3b4] ss:$8 sps:$4 sm:$0xff]  }
 0x337   : > { %2732 = vmatmul.mubr.bf16.gmra.mrb[116].mxu1 %v20970_v15  ;;  %v19496_v15 = vpop.f32.mrb[33].mxu0 }
 0x338   : > { %20004 = vmatpush3.bf16.msra.mxu1 %v23828_v59  ;;  %2739 = vmatprep.mubr.bf16.mxu1 %v20971_v17  ;;  %v24173_v17 = vadd.f32 %v19496_v15, %v19495_v3  ;;  %v19498_v20 = vpop.f32.mrb[34].mxu0  ;;  %v21033_v59 = vld [vmem:[#allocation5 + $0x98] sm:$0xff]  }
 0x339   : > { %20005 = vmatprep.subr.bf16.mxu1 %v23865_v5  ;;  %v21001_v5 = vld [vmem:[#allocation5 + $0x40] sm:$0xff]  }
 0x33a   : > { %v19433_v38 = vpop.f32.mrb[12].mxu1  ;;  %20039 = vmatprep.subr.bf16.mxu0 %v21001_v5 }
 0x33b   : > { %v19434_v27 = vpop.f32.mrb[13].mxu1  ;;  %20040 = vmatpush3.bf16.msra.mxu0 %v21002_v36  ;;  %v20985_v36 = vld [vmem:[#allocation17 + $0x3e0] ss:$8 sps:$4 sm:$0xff]  }
 0x33c   : > { %v24146_v28 = vadd.f32 %v19434_v27, %v19433_v38  ;;  %v19436_v8 = vpop.f32.mrb[14].mxu1  ;;  %20006 = vmatpush3.bf16.msra.mxu1 %v23826_v56  ;;  %v20976_v56 = vld [vmem:[#allocation17 + $0x370] ss:$8 sps:$4 sm:$0xff]   ;;  %20041 = vmatprep.subr.bf16.mxu0 %v21005_v44  ;;  %v19499_v38 = vpop.f32.mrb[35].mxu0  ;;  %v21021_v27 = vld [vmem:[#allocation5 + $0x28] sm:$0xff]  }
 0x33d   : > { %v19437_v33 = vpop.f32.mrb[15].mxu1  ;;  %20007 = vmatprep.subr.bf16.mxu1 %v23886_v30  ;;  %v24179_v31 = vadd.f32 %v19499_v38, %v19498_v20  ;;  %v19501_v5 = vpop.f32.mrb[36].mxu0 }
 0x33e   : > { %v24150_v35 = vadd.f32 %v19437_v33, %v19436_v8 }
 0x33f   : > { %2740 = vmatmul.mubr.bf16.gmra.mrb[120].mxu1 %v20973_v49  ;;  %20042 = vmatpush3.bf16.msra.mxu0 %v21007_v46 }
 0x340   : > { %20008 = vmatpush3.bf16.msra.mxu1 %v23836_v13  ;;  %2747 = vmatprep.mubr.bf16.mxu1 %v20974_v25  ;;  %v21006_v13 = vld [vmem:[#allocation17 + $0x390] ss:$8 sps:$4 sm:$0xff]  }
 0x341   : > { %20009 = vmatprep.subr.bf16.mxu1 %v23882_v26  ;;  %2850 = vmatmul.mubr.bf16.gmra.mrb[132].mxu0 %v21006_v13  ;;  %v21020_v25 = vld [vmem:[#allocation17 + $0x3b0] ss:$8 sps:$4 sm:$0xff]  }
 0x342   : > { %v19455_v37 = vpop.f32.mrb[16].mxu1  ;;  %2857 = vmatprep.mubr.bf16.mxu0 %v21010_v60 }
 0x343   : > { %v19456_v30 = vpop.f32.mrb[17].mxu1 }
 0x344   : > { %v24156_v40 = vadd.f32 %v19456_v30, %v19455_v37  ;;  %v19458_v42 = vpop.f32.mrb[18].mxu1  ;;  %20010 = vmatpush3.bf16.msra.mxu1 %v23834_v10  ;;  %v21008_v10 = vld [vmem:[#allocation5 + $0x50] sm:$0xff]   ;;  %v20986_v30 = vld [vmem:[#allocation17 + $0x3f4] ss:$8 sps:$4 sm:$0xff]  }
 0x345   : > { %v19459_v45 = vpop.f32.mrb[19].mxu1  ;;  %20011 = vmatprep.subr.bf16.mxu1 %v23903_v22  ;;  %v21009_v22 = vld [vmem:[#allocation5 + $0x10] sm:$0xff]   ;;  %20043 = vmatprep.subr.bf16.mxu0 %v21008_v10  ;;  %v21024_v10 = vld [vmem:[#allocation5 + $0x78] sm:$0xff]  }
 0x346   : > { %v24160_v26 = vadd.f32 %v19459_v45, %v19458_v42  ;;  %20044 = vmatpush3.bf16.msra.mxu0 %v21009_v22  ;;  %v21023_v37 = vld [vmem:[#allocation5 + $0x30] sm:$0xff]   ;;  %v19502_v42 = vpop.f32.mrb[37].mxu0 }
 0x347   : > { %2748 = vmatmul.mubr.bf16.gmra.mrb[124].mxu1 %v20976_v56  ;;  %20045 = vmatprep.subr.bf16.mxu0 %v21012_v61  ;;  %v21022_v56 = vld [vmem:[#allocation5 + $0x70] sm:$0xff]   ;;  %v24185_v44 = vadd.f32 %v19502_v42, %v19501_v5  ;;  %v19504_v46 = vpop.f32.mrb[38].mxu0  ;;  %v20988_v61 = vld [vmem:[#allocation17 + $0x3f0] ss:$8 sps:$4 sm:$0xff]  }
 0x348   : > { %v1340_v47 = vpack.c.bf16 %v24160_v26, %v24156_v40  ;;  %20012 = vmatpush3.bf16.msra.mxu1 %v23844_v32  ;;  %2959 = vmatprep.mubr.bf16.mxu1 %v20979_v39  ;;  %v21013_v32 = vld [vmem:[#allocation17 + $0x3a0] ss:$8 sps:$4 sm:$0xff]   ;;  %v19505_v22 = vpop.f32.mrb[39].mxu0 }
 0x349   : > { %20013 = vmatprep.subr.bf16.mxu1 %v23899_v48  ;;  %2858 = vmatmul.mubr.bf16.gmra.mrb[136].mxu0 %v21013_v32 }
 0x34a   : > { %v19461_v51 = vpop.f32.mrb[20].mxu1  ;;  %20046 = vmatpush3.bf16.msra.mxu0 %v21014_v1  ;;  %2865 = vmatprep.mubr.bf16.mxu0 %v21017_v21 }
 0x34b   : > { %v19462_v54 = vpop.f32.mrb[21].mxu1  ;;  %20047 = vmatprep.subr.bf16.mxu0 %v21015_v6 }
 0x34c   : > { %v24166_v57 = vadd.f32 %v19462_v54, %v19461_v51  ;;  %v19464_v58 = vpop.f32.mrb[22].mxu1  ;;  %20014 = vmatpush3.bf16.msra.mxu1 %v23842_v29  ;;  %v21016_v29 = vld [vmem:[#allocation5 + $0x20] sm:$0xff]   ;;  %v21025_v51 = vld [vmem:[#allocation5 + $0x38] sm:$0xff]   ;;  %v24191_v54 = vadd.f32 %v19505_v22, %v19504_v46 }
 0x34d   : > { %v19465_v0 = vpop.f32.mrb[23].mxu1 }
 0x34e   : > { %v24169_v2 = vadd.f32 %v19465_v0, %v19464_v58  ;;  %20048 = vmatpush3.bf16.msra.mxu0 %v21016_v29  ;;  %v19507_v0 = vpop.f32.mrb[40].mxu0  ;;  %v21041_v58 = vld [vmem:[#allocation5 + $0xb8] sm:$0xff]  }
 0x34f   : > { %2960 = vmatmul.mubr.bf16.vlgmr.msra.gmra.mrb[128].mxu1 %v20977_v50  ;;  %20049 = vmatprep.subr.bf16.mxu0 %v21019_v23  ;;  %v19508_v1 = vpop.f32.mrb[41].mxu0 }
 0x350   : > { %2967 = vmatprep.mubr.bf16.mxu1 %v20980_v53  ;;  %v24197_v6 = vadd.f32 %v19508_v1, %v19507_v0 }
 0x351   : > { %2866 = vmatmul.mubr.bf16.gmra.mrb[140].mxu0 %v21020_v25 }
 0x352   : > { %v19467_v9 = vpop.f32.mrb[24].mxu1  ;;  %20050 = vmatpush3.bf16.msra.mxu0 %v21021_v27 }
 0x353   : > { %v19468_v16 = vpop.f32.mrb[25].mxu1  ;;  %20051 = vmatprep.subr.bf16.mxu0 %v21022_v56 }
 0x354   : > { %v24175_v18 = vadd.f32 %v19468_v16, %v19467_v9  ;;  %v19470_v52 = vpop.f32.mrb[26].mxu1  ;;  %v19510_v9 = vpop.f32.mrb[42].mxu0 }
 0x355   : > { %v19471_v49 = vpop.f32.mrb[27].mxu1  ;;  %v19511_v15 = vpop.f32.mrb[43].mxu0 }
 0x356   : > { %v24177_v8 = vadd.f32 %v19471_v49, %v19470_v52  ;;  %20052 = vmatpush3.bf16.msra.mxu0 %v21023_v37  ;;  %v24199_v52 = vadd.f32 %v19511_v15, %v19510_v9  ;;  %v19513_v23 = vpop.f32.mrb[44].mxu0 }
 0x357   : > { %2968 = vmatmul.mubr.bf16.gmra.mrb[132].mxu1 %v20982_v7  ;;  %20053 = vmatprep.subr.bf16.mxu0 %v21024_v10  ;;  %v19514_v38 = vpop.f32.mrb[45].mxu0 }
 0x358   : > { %2975 = vmatprep.mubr.bf16.mxu1 %v20983_v11  ;;  %v24204_v27 = vadd.f32 %v19514_v38, %v19513_v23 }
 0x35a   : > { %v19473_v39 = vpop.f32.mrb[28].mxu1  ;;  %20054 = vmatpush3.bf16.msra.mxu0 %v21025_v51 }
 0x35b   : > { %v19474_v43 = vpop.f32.mrb[29].mxu1 }
 0x35c   : > { %v24187_v45 = vadd.f32 %v19474_v43, %v19473_v39  ;;  %v19476_v13 = vpop.f32.mrb[30].mxu1 }
 0x35d   : > { %v19477_v50 = vpop.f32.mrb[31].mxu1 }
 0x35e   : > { %v24189_v53 = vadd.f32 %v19477_v50, %v19476_v13 }
 0x35f   : > { %2976 = vmatmul.mubr.bf16.gmra.mrb[136].mxu1 %v20985_v36  ;;  %v19516_v36 = vpop.f32.mrb[46].mxu0 }
 0x360   : > { %2983 = vmatprep.mubr.bf16.mxu1 %v20986_v30  ;;  %v19517_v39 = vpop.f32.mrb[47].mxu0 }
 0x361   : > { %v24210_v42 = vadd.f32 %v19517_v39, %v19516_v36  ;;  %v19575_v46 = vpop.f32.mrb[48].mxu0 }
 0x362   : > { %v19535_v32 = vpop.f32.mrb[32].mxu1  ;;  %v19576_v50 = vpop.f32.mrb[49].mxu0 }
 0x363   : > { %v19536_v3 = vpop.f32.mrb[33].mxu1  ;;  %v24215_v51 = vadd.f32 %v19576_v50, %v19575_v46 }
 0x364   : > { %v19537_v7 = vadd.f32 %v19536_v3, %v19535_v32  ;;  %v19538_v29 = vpop.f32.mrb[34].mxu1  ;;  %v19578_v32 = vpop.f32.mrb[50].mxu0 }
 0x365   : > { %v19539_v11 = vpop.f32.mrb[35].mxu1  ;;  %v19579_v26 = vpop.f32.mrb[51].mxu0 }
 0x366   : > { %v19540_v16 = vadd.f32 %v19539_v11, %v19538_v29  ;;  %v24221_v1 = vadd.f32 %v19579_v26, %v19578_v32  ;;  %v19581_v29 = vpop.f32.mrb[52].mxu0  ;;  %v21028_v26 = vld [vmem:[#allocation5 + $0xc8] sm:$0xff]  }
 0x367   : > { %2984 = vmatmul.mubr.bf16.gmra.mrb[140].mxu1 %v20988_v61  ;;  %v19582_v11 = vpop.f32.mrb[53].mxu0 }
 0x368   : > { %v1576_v20 = vpack.c.bf16 %v19540_v16, %v19537_v7  ;;  %v24227_v16 = vadd.f32 %v19582_v11, %v19581_v29  ;;  %v21029_v11 = vld [vmem:[#allocation5 + $0x88] sm:$0xff]  }
 0x36a   : > { %v19541_v49 = vpop.f32.mrb[36].mxu1  ;;  %3012 = vrot.lane.b32.xlu0 %v1576_v20, %s23397_s18 }
 0x36b   : > { %v19542_v25 = vpop.f32.mrb[37].mxu1 }
 0x36c   : > { %v19543_v5 = vadd.f32 %v19542_v25, %v19541_v49  ;;  %v19544_v56 = vpop.f32.mrb[38].mxu1  ;;  %v19584_v49 = vpop.f32.mrb[54].mxu0 }
 0x36d   : > { %v19545_v37 = vpop.f32.mrb[39].mxu1  ;;  %v19585_v25 = vpop.f32.mrb[55].mxu0 }
 0x36e   : > { %v19546_v30 = vadd.f32 %v19545_v37, %v19544_v56  ;;  %3000 = vrot.lane.b32.xlu0 %v1340_v47, %s23397_s18  ;;  %v24233_v56 = vadd.f32 %v19585_v25, %v19584_v49  ;;  %v19587_v39 = vpop.f32.mrb[56].mxu0 }
 0x370   : > { %v1577_v43 = vpack.c.bf16 %v19546_v30, %v19543_v5  ;;  %v21026_v30 = vld [vmem:[#allocation5 + $0xc0] sm:$0xff]  }
 0x371   : > { %20079 = vmatprep.subr.bf16.mxu1 %v21026_v30  ;;  %v21031_v30 = vld [vmem:[#allocation5 + $0x90] sm:$0xff]  }
 0x372   : > { %v19547_v10 = vpop.f32.mrb[40].mxu1  ;;  %3014 = vrot.lane.b32.xlu0 %v1577_v43, %s23397_s18  ;;  %v21027_v43 = vld [vmem:[#allocation5 + $0x80] sm:$0xff]  }
 0x373   : > { %v19548_v22 = vpop.f32.mrb[41].mxu1  ;;  %20080 = vmatpush3.bf16.msra.mxu1 %v21027_v43 }
 0x374   : > { %v24217_v61 = vadd.f32 %v19548_v22, %v19547_v10  ;;  %v19550_v0 = vpop.f32.mrb[42].mxu1  ;;  %v19588_v10 = vpop.f32.mrb[57].mxu0  ;;  %20081 = vmatprep.subr.bf16.mxu1 %v21028_v26 }
 0x375   : > { %v19551_v40 = vpop.f32.mrb[43].mxu1  ;;  %v24239_v22 = vadd.f32 %v19588_v10, %v19587_v39  ;;  %v21030_v39 = vld [vmem:[#allocation5 + $0xd0] sm:$0xff]  }
 0x376   : > { %v24219_v47 = vadd.f32 %v19551_v40, %v19550_v0  ;;  %v19590_v40 = vpop.f32.mrb[58].mxu0 }
 0x377   : > { %20082 = vmatpush3.bf16.msra.mxu1 %v21029_v11 }
 0x378   : > { %20083 = vmatprep.subr.bf16.mxu1 %v21030_v39 }
 0x37a   : > { %v19553_v9 = vpop.f32.mrb[44].mxu1 }
 0x37b   : > { %v19554_v15 = vpop.f32.mrb[45].mxu1  ;;  %20084 = vmatpush3.bf16.msra.mxu1 %v21031_v30 }
 0x37c   : > { %v24229_v20 = vadd.f32 %v19554_v15, %v19553_v9  ;;  %v19556_v23 = vpop.f32.mrb[46].mxu1  ;;  %v19591_v9 = vpop.f32.mrb[59].mxu0 }
 0x37d   : > { %v19557_v38 = vpop.f32.mrb[47].mxu1  ;;  %v19593_v25 = vpop.f32.mrb[60].mxu0 }
 0x37e   : > { %v24231_v5 = vadd.f32 %v19557_v38, %v19556_v23  ;;  %v24245_v23 = vadd.f32 %v19591_v9, %v19590_v40 }
 0x382   : > { %v19615_v46 = vpop.f32.mrb[48].mxu1 }
 0x383   : > { %v19616_v50 = vpop.f32.mrb[49].mxu1 }
 0x384   : > { %v24241_v0 = vadd.f32 %v19616_v50, %v19615_v46  ;;  %v19618_v32 = vpop.f32.mrb[50].mxu1  ;;  %v19594_v46 = vpop.f32.mrb[61].mxu0 }
 0x385   : > { %v19619_v29 = vpop.f32.mrb[51].mxu1  ;;  %v24251_v50 = vadd.f32 %v19594_v46, %v19593_v25  ;;  %v19596_v26 = vpop.f32.mrb[62].mxu0  ;;  %v21035_v46 = vld [vmem:[#allocation5 + $0xa0] sm:$0xff]  }
 0x386   : > { %v24243_v15 = vadd.f32 %v19619_v29, %v19618_v32  ;;  %v21032_v29 = vld [vmem:[#allocation5 + $0xd8] sm:$0xff]   ;;  %v19597_v11 = vpop.f32.mrb[63].mxu0 }
 0x387   : > { %25767 = vst [vmem:[#allocation27_spill] sm:$0xff] %v24251_v50  ;;  %v24257_v38 = vadd.f32 %v19597_v11, %v19596_v26  ;;  %20085 = vmatprep.subr.bf16.mxu1 %v21032_v29  ;;  %v19655_v30 = vpop.f32.mrb[64].mxu0  ;;  %v21036_v29 = vld [vmem:[#allocation5 + $0xe8] sm:$0xff]  }
 0x388   : > { %20086 = vmatpush3.bf16.msra.mxu1 %v21033_v59  ;;  %v19656_v41 = vpop.f32.mrb[65].mxu0 }
 0x389   : > { %25768 = vst [vmem:[#allocation28_spill] sm:$0xff] %v24257_v38  ;;  %v24263_v37 = vadd.f32 %v19656_v41, %v19655_v30  ;;  %v19658_v59 = vpop.f32.mrb[66].mxu0  ;;  %v21038_v30 = vld [vmem:[#allocation5 + $0xf0] sm:$0xff]  }
 0x38a   : > { %v19621_v43 = vpop.f32.mrb[52].mxu1  ;;  %v19659_v11 = vpop.f32.mrb[67].mxu0 }
 0x38b   : > { %v19622_v10 = vpop.f32.mrb[53].mxu1  ;;  %v24269_v25 = vadd.f32 %v19659_v11, %v19658_v59 }
 0x38c   : > { %v24253_v32 = vadd.f32 %v19622_v10, %v19621_v43  ;;  %v19624_v40 = vpop.f32.mrb[54].mxu1  ;;  %v21034_v43 = vld [vmem:[#allocation5 + $0xe0] sm:$0xff]  }
 0x38d   : > { %v19625_v9 = vpop.f32.mrb[55].mxu1  ;;  %20087 = vmatprep.subr.bf16.mxu1 %v21034_v43 }
 0x38e   : > { %v24255_v13 = vadd.f32 %v19625_v9, %v19624_v40  ;;  %20088 = vmatpush3.bf16.msra.mxu1 %v21035_v46  ;;  %v21039_v46 = vld [vmem:[#allocation5 + $0xb0] sm:$0xff]  }
 0x38f   : > { %20089 = vmatprep.subr.bf16.mxu1 %v21036_v29  ;;  %v21040_v29 = vld [vmem:[#allocation5 + $0xf8] sm:$0xff]  }
 0x392   : > { %v19627_v10 = vpop.f32.mrb[56].mxu1  ;;  %20090 = vmatpush3.bf16.msra.mxu1 %v21037_v14 }
 0x393   : > { %v19628_v21 = vpop.f32.mrb[57].mxu1  ;;  %20091 = vmatprep.subr.bf16.mxu1 %v21038_v30 }
 0x394   : > { %v24265_v40 = vadd.f32 %v19628_v21, %v19627_v10  ;;  %v19630_v26 = vpop.f32.mrb[58].mxu1  ;;  %v19661_v21 = vpop.f32.mrb[68].mxu0 }
 0x395   : > { %v19631_v9 = vpop.f32.mrb[59].mxu1  ;;  %v19662_v60 = vpop.f32.mrb[69].mxu0 }
 0x396   : > { %v24267_v7 = vadd.f32 %v19631_v9, %v19630_v26  ;;  %v24275_v34 = vadd.f32 %v19662_v60, %v19661_v21  ;;  %20092 = vmatpush3.bf16.msra.mxu1 %v21039_v46  ;;  %v19664_v14 = vpop.f32.mrb[70].mxu0 }
 0x397   : > { %v19665_v11 = vpop.f32.mrb[71].mxu0  ;;  %20093 = vmatprep.subr.bf16.mxu1 %v21040_v29 }
 0x398   : > { %v24281_v41 = vadd.f32 %v19665_v11, %v19664_v14 }
 0x39a   : > { %v19633_v10 = vpop.f32.mrb[60].mxu1  ;;  %20094 = vmatpush3.bf16.msra.mxu1 %v21041_v58 }
 0x39b   : > { %v19634_v63 = vpop.f32.mrb[61].mxu1 }
 0x39c   : > { %v24277_v26 = vadd.f32 %v19634_v63, %v19633_v10  ;;  %v19636_v59 = vpop.f32.mrb[62].mxu1  ;;  %v19667_v63 = vpop.f32.mrb[72].mxu0 }
 0x39d   : > { %v19637_v9 = vpop.f32.mrb[63].mxu1  ;;  %v19668_v46 = vpop.f32.mrb[73].mxu0 }
 0x39e   : > { %v24279_v36 = vadd.f32 %v19637_v9, %v19636_v59  ;;  %v24287_v43 = vadd.f32 %v19668_v46, %v19667_v63  ;;  %v19670_v59 = vpop.f32.mrb[74].mxu0 }
 0x39f   : > { %v19671_v14 = vpop.f32.mrb[75].mxu0 }
 0x3a0   : > { %v24289_v29 = vadd.f32 %v19671_v14, %v19670_v59  ;;  %v19673_v39 = vpop.f32.mrb[76].mxu0 }
 0x3a1   : > { %v19674_v49 = vpop.f32.mrb[77].mxu0 }
 0x3a2   : > { %v19695_v21 = vpop.f32.mrb[64].mxu1 }
 0x3a3   : > { %v19696_v10 = vpop.f32.mrb[65].mxu1 }
 0x3a4   : > { %v19697_v33 = vadd.f32 %v19696_v10, %v19695_v21  ;;  %v19698_v3 = vpop.f32.mrb[66].mxu1  ;;  %v24294_v21 = vadd.f32 %v19674_v49, %v19673_v39  ;;  %v19676_v10 = vpop.f32.mrb[78].mxu0  ;;  %v25770_v49 = vpack.c.bf16 %v24169_v2, %v24166_v57  ;;  %v25772_v57 = vpack.c.bf16 %v24219_v47, %v24217_v61 }
 0x3a5   : > { %v19699_v9 = vpop.f32.mrb[67].mxu1  ;;  %v19677_v38 = vpop.f32.mrb[79].mxu0 }
 0x3a6   : > { %v19700_v11 = vadd.f32 %v19699_v9, %v19698_v3  ;;  %v24300_v59 = vadd.f32 %v19677_v38, %v19676_v10  ;;  %v25771_v10 = vpack.c.bf16 %v24255_v13, %v24253_v32 }
 0x3a8   : > { %v2048_v58 = vpack.c.bf16 %v19700_v11, %v19697_v33  ;;  %v25769_v33 = vpack.c.bf16 %v24243_v15, %v24241_v0  ;;  %v19735_v11 = vpop.f32.mrb[80].mxu0 }
 0x3a9   : > { %v19736_v39 = vpop.f32.mrb[81].mxu0 }
 0x3aa   : > { %v19701_v60 = vpop.f32.mrb[68].mxu1  ;;  %3036 = vrot.lane.b32.xlu1 %v2048_v58, %s23397_s18  ;;  %v24309_v15 = vadd.f32 %v19736_v39, %v19735_v11  ;;  %v19738_v38 = vpop.f32.mrb[82].mxu0 }
 0x3ab   : > { %v19702_v48 = vpop.f32.mrb[69].mxu1 }
 0x3ac   : > { %v19703_v63 = vadd.f32 %v19702_v48, %v19701_v60  ;;  %v19704_v46 = vpop.f32.mrb[70].mxu1 }
 0x3ad   : > { %v19705_v50 = vpop.f32.mrb[71].mxu1 }
 0x3ae   : > { %v19706_v3 = vadd.f32 %v19705_v50, %v19704_v46  ;;  %3024 = vrot.lane.b32.xlu1 %v25769_v33, %s23397_s18 }
 0x3b0   : > { %v2049_v9 = vpack.c.bf16 %v19706_v3, %v19703_v63  ;;  %v19739_v63 = vpop.f32.mrb[83].mxu0 }
 0x3b1   : > { %v24319_v2 = vadd.f32 %v19739_v63, %v19738_v38  ;;  %v25775_v38 = vpack.c.bf16 %v24267_v7, %v24265_v40  ;;  %v25778_v7 = vpack.c.bf16 %v24189_v53, %v24187_v45  ;;  %v25781_v45 = vpack.c.bf16 %v24279_v36, %v24277_v26 }
 0x3b2   : > { %v19707_v48 = vpop.f32.mrb[72].mxu1  ;;  %3002 = vrot.lane.b32.xlu1 %v25770_v49, %s23397_s18  ;;  %3038 = vrot.lane.b32.xlu0 %v2049_v9, %s23397_s18  ;;  %v19741_v9 = vpop.f32.mrb[84].mxu0 }
 0x3b3   : > { %v19708_v50 = vpop.f32.mrb[73].mxu1  ;;  %v19742_v13 = vpop.f32.mrb[85].mxu0 }
 0x3b4   : > { %v19709_v60 = vadd.f32 %v19708_v50, %v19707_v48  ;;  %v19710_v0 = vpop.f32.mrb[74].mxu1  ;;  %v25773_v48 = vpack.c.bf16 %v24177_v8, %v24175_v18  ;;  %v24328_v49 = vadd.f32 %v19742_v13, %v19741_v9  ;;  %v19744_v50 = vpop.f32.mrb[86].mxu0  ;;  %v25776_v18 = vpack.c.bf16 %v24231_v5, %v24229_v20 }
 0x3b5   : > { %v19711_v58 = vpop.f32.mrb[75].mxu1 }
 0x3b6   : > { %v19712_v46 = vadd.f32 %v19711_v58, %v19710_v0  ;;  %3026 = vrot.lane.b32.xlu1 %v25771_v10, %s23397_s18  ;;  %3016 = vrot.lane.b32.xlu0 %v25772_v57, %s23397_s18  ;;  %25774 = vst [vmem:[#allocation29_spill] sm:$0xff] %v24328_v49  ;;  %v21042_v58 = vld [vmem:[#allocation5 + $0x140] sm:$0xff]  }
 0x3b7   : > { %20119 = vmatprep.subr.bf16.mxu0 %v21042_v58 }
 0x3b8   : > { %v2050_v3 = vpack.c.bf16 %v19712_v46, %v19709_v60  ;;  %v19745_v60 = vpop.f32.mrb[87].mxu0 }
 0x3b9   : > { %v24338_v8 = vadd.f32 %v19745_v60, %v19744_v50  ;;  %v19747_v10 = vpop.f32.mrb[88].mxu0  ;;  %v25784_v50 = vpack.c.bf16 %v24179_v31, %v24173_v17  ;;  %v25785_v17 = vpack.c.bf16 %v24120_v62, %v24116_v55  ;;  %v25788_v62 = vpack.c.bf16 %v24191_v54, %v24185_v44 }
 0x3ba   : > { %v19713_v11 = vpop.f32.mrb[76].mxu1  ;;  %3004 = vrot.lane.b32.xlu1 %v25773_v48, %s23397_s18  ;;  %3040 = vrot.lane.b32.xlu0 %v2050_v3, %s23397_s18  ;;  %v19748_v40 = vpop.f32.mrb[89].mxu0 }
 0x3bb   : > { %v19714_v32 = vpop.f32.mrb[77].mxu1  ;;  %25777 = vst [vmem:[#allocation30_spill] sm:$0xff] %v24338_v8  ;;  %v24347_v5 = vadd.f32 %v19748_v40, %v19747_v10  ;;  %v19750_v3 = vpop.f32.mrb[90].mxu0 }
 0x3bc   : > { %v19715_v61 = vadd.f32 %v19714_v32, %v19713_v11  ;;  %v19716_v47 = vpop.f32.mrb[78].mxu1  ;;  %v19751_v48 = vpop.f32.mrb[91].mxu0 }
 0x3bd   : > { %v19717_v39 = vpop.f32.mrb[79].mxu1  ;;  %25779 = vst [vmem:[#allocation31_spill] sm:$0xff] %v24347_v5  ;;  %v24349_v32 = vadd.f32 %v19751_v48, %v19750_v3 }
 0x3be   : > { %v19718_v0 = vadd.f32 %v19717_v39, %v19716_v47  ;;  %3028 = vrot.lane.b32.xlu1 %v25775_v38, %s23397_s18  ;;  %3018 = vrot.lane.b32.xlu0 %v25776_v18, %s23397_s18 }
 0x3bf   : > { %25780 = vst [vmem:[#allocation32_spill] sm:$0xff] %v24349_v32 }
 0x3c0   : > { %v2051_v63 = vpack.c.bf16 %v19718_v0, %v19715_v61  ;;  %v19753_v61 = vpop.f32.mrb[92].mxu0 }
 0x3c1   : > { %v19754_v53 = vpop.f32.mrb[93].mxu0 }
 0x3c2   : > { %v19775_v57 = vpop.f32.mrb[80].mxu1  ;;  %3006 = vrot.lane.b32.xlu1 %v25778_v7, %s23397_s18  ;;  %3042 = vrot.lane.b32.xlu0 %v2051_v63, %s23397_s18  ;;  %v24357_v39 = vadd.f32 %v19754_v53, %v19753_v61  ;;  %v19756_v60 = vpop.f32.mrb[94].mxu0 }
 0x3c3   : > { %v19776_v20 = vpop.f32.mrb[81].mxu1  ;;  %v19757_v38 = vpop.f32.mrb[95].mxu0 }
 0x3c4   : > { %v19777_v9 = vadd.f32 %v19776_v20, %v19775_v57  ;;  %v19778_v11 = vpop.f32.mrb[82].mxu1  ;;  %25782 = vst [vmem:[#allocation33_spill] sm:$0xff] %v24357_v39  ;;  %v24359_v18 = vadd.f32 %v19757_v38, %v19756_v60  ;;  %v19815_v58 = vpop.f32.mrb[96].mxu0  ;;  %v21046_v39 = vld [vmem:[#allocation5 + $0x150] sm:$0xff]  }
 0x3c5   : > { %v19779_v13 = vpop.f32.mrb[83].mxu1  ;;  %v19816_v10 = vpop.f32.mrb[97].mxu0 }
 0x3c6   : > { %v19780_v47 = vadd.f32 %v19779_v13, %v19778_v11  ;;  %3030 = vrot.lane.b32.xlu1 %v25781_v45, %s23397_s18  ;;  %25783 = vst [vmem:[#allocation34_spill] sm:$0xff] %v24359_v18  ;;  %v24364_v26 = vadd.f32 %v19816_v10, %v19815_v58  ;;  %v19818_v7 = vpop.f32.mrb[98].mxu0 }
 0x3c7   : > { %v19819_v3 = vpop.f32.mrb[99].mxu0 }
 0x3c8   : > { %v2284_v0 = vpack.c.bf16 %v19780_v47, %v19777_v9  ;;  %v24368_v11 = vadd.f32 %v19819_v3, %v19818_v7  ;;  %v19821_v48 = vpop.f32.mrb[100].mxu0  ;;  %v21044_v47 = vld [vmem:[#allocation5 + $0x148] sm:$0xff]  }
 0x3c9   : > { %v19822_v61 = vpop.f32.mrb[101].mxu0 }
 0x3ca   : > { %v19781_v63 = vpop.f32.mrb[84].mxu1  ;;  %3048 = vrot.lane.b32.xlu1 %v2284_v0, %s23397_s18  ;;  %v24374_v45 = vadd.f32 %v19822_v61, %v19821_v48  ;;  %v19824_v53 = vpop.f32.mrb[102].mxu0 }
 0x3cb   : > { %v19782_v57 = vpop.f32.mrb[85].mxu1 }
 0x3cc   : > { %v24366_v40 = vadd.f32 %v19782_v57, %v19781_v63  ;;  %v19784_v20 = vpop.f32.mrb[86].mxu1 }
 0x3cd   : > { %v19785_v9 = vpop.f32.mrb[87].mxu1 }
 0x3ce   : > { %v24370_v13 = vadd.f32 %v19785_v9, %v19784_v20 }
 0x3d2   : > { %v19787_v0 = vpop.f32.mrb[88].mxu1 }
 0x3d3   : > { %v19788_v38 = vpop.f32.mrb[89].mxu1 }
 0x3d4   : > { %v24378_v58 = vadd.f32 %v19788_v38, %v19787_v0  ;;  %v19790_v63 = vpop.f32.mrb[90].mxu1  ;;  %v19825_v38 = vpop.f32.mrb[103].mxu0 }
 0x3d5   : > { %v19791_v10 = vpop.f32.mrb[91].mxu1  ;;  %v19827_v33 = vpop.f32.mrb[104].mxu0 }
 0x3d6   : > { %v24380_v57 = vadd.f32 %v19791_v10, %v19790_v63  ;;  %v24392_v63 = vadd.f32 %v19825_v38, %v19824_v53  ;;  %v21043_v10 = vld [vmem:[#allocation5 + $0x100] sm:$0xff]   ;;  %v19828_v30 = vpop.f32.mrb[105].mxu0 }
 0x3da   : > { %v19793_v20 = vpop.f32.mrb[92].mxu1 }
 0x3db   : > { %v19794_v3 = vpop.f32.mrb[93].mxu1 }
 0x3dc   : > { %v24384_v9 = vadd.f32 %v19794_v3, %v19793_v20  ;;  %v19796_v48 = vpop.f32.mrb[94].mxu1  ;;  %v3013_v61 = vpop.permute.xlu0 %3012 }
 0x3dd   : > { %v19797_v36 = vpop.f32.mrb[95].mxu1  ;;  %v3111_v0 = vsel %vm3092_vm1, %v25784_v50, %v3013_v61  ;;  %v24402_v50 = vadd.f32 %v19828_v30, %v19827_v33 }
 0x3de   : > { %v24390_v46 = vadd.f32 %v19797_v36, %v19796_v48  ;;  %3772 = vmatprep.mubr.bf16.mxu0 %v3111_v0  ;;  %v19830_v36 = vpop.f32.mrb[106].mxu0  ;;  %v21045_v0 = vld [vmem:[#allocation5 + $0x108] sm:$0xff]  }
 0x3df   : > { %25786 = vst [vmem:[#allocation35_spill] sm:$0xff] %v24402_v50  ;;  %v19831_v48 = vpop.f32.mrb[107].mxu0 }
 0x3e0   : > { %v3001_v3 = vpop.permute.xlu0 %3000  ;;  %v24404_v38 = vadd.f32 %v19831_v48, %v19830_v36  ;;  %v19833_v20 = vpop.f32.mrb[108].mxu0  ;;  %v21047_v36 = vld [vmem:[#allocation5 + $0x110] sm:$0xff]   ;;  %v21048_v48 = vld [vmem:[#allocation5 + $0x158] sm:$0xff]  }
 0x3e1   : > { %v3095_v31 = vsel %vm3092_vm1, %v25785_v17, %v3001_v3  ;;  %v19834_v3 = vpop.f32.mrb[109].mxu0 }
 0x3e2   : > { %v19855_v53 = vpop.f32.mrb[96].mxu1  ;;  %3773 = vmatmul.mubr.bf16.vlgmr.msra.gmra.mrb[144].mxu0 %v3095_v31  ;;  %25787 = vst [vmem:[#allocation36_spill] sm:$0xff] %v24404_v38  ;;  %v24412_v17 = vadd.f32 %v19834_v3, %v19833_v20  ;;  %v19836_v31 = vpop.f32.mrb[110].mxu0  ;;  %v21050_v3 = vld [vmem:[#allocation5 + $0x160] sm:$0xff]  }
 0x3e3   : > { %v19856_v61 = vpop.f32.mrb[97].mxu1  ;;  %20120 = vmatpush3.bf16.msra.mxu0 %v21043_v10 }
 0x3e4   : > { %v19857_v7 = vadd.f32 %v19856_v61, %v19855_v53  ;;  %v19858_v14 = vpop.f32.mrb[98].mxu1  ;;  %v3015_v60 = vpop.permute.xlu0 %3014  ;;  %20121 = vmatprep.subr.bf16.mxu0 %v21044_v47  ;;  %25789 = vst [vmem:[#allocation37_spill] sm:$0xff] %v24412_v17 }
 0x3e5   : > { %v19859_v55 = vpop.f32.mrb[99].mxu1  ;;  %v3115_v30 = vsel %vm3092_vm1, %v25788_v62, %v3015_v60  ;;  %v19837_v53 = vpop.f32.mrb[111].mxu0 }
 0x3e6   : > { %v19860_v10 = vadd.f32 %v19859_v55, %v19858_v14  ;;  %3780 = vmatprep.mubr.bf16.mxu0 %v3115_v30  ;;  %v24414_v61 = vadd.f32 %v19837_v53, %v19836_v31  ;;  %v19895_v44 = vpop.f32.mrb[112].mxu0 }
 0x3e7   : > { %20122 = vmatpush3.bf16.msra.mxu0 %v21045_v0  ;;  %v19896_v54 = vpop.f32.mrb[113].mxu0  ;;  %v21049_v0 = vld [vmem:[#allocation5 + $0x118] sm:$0xff]  }
 0x3e8   : > { %v2520_v47 = vpack.c.bf16 %v19860_v10, %v19857_v7  ;;  %20123 = vmatprep.subr.bf16.mxu0 %v21046_v39  ;;  %25790 = vst [vmem:[#allocation38_spill] sm:$0xff] %v24414_v61  ;;  %v24419_v55 = vadd.f32 %v19896_v54, %v19895_v44  ;;  %v19898_v20 = vpop.f32.mrb[114].mxu0  ;;  %v21051_v44 = vld [vmem:[#allocation5 + $0x120] sm:$0xff]   ;;  %v21052_v54 = vld [vmem:[#allocation5 + $0x168] sm:$0xff]  }
 0x3e9   : > { %v19899_v30 = vpop.f32.mrb[115].mxu0  ;;  %v21058_v61 = vld [vmem:[#allocation5 + $0x1c0] sm:$0xff]  }
 0x3ea   : > { %v19861_v60 = vpop.f32.mrb[100].mxu1  ;;  %3060 = vrot.lane.b32.xlu0 %v2520_v47, %s23397_s18  ;;  %v24423_v10 = vadd.f32 %v19899_v30, %v19898_v20  ;;  %v21054_v30 = vld [vmem:[#allocation5 + $0x170] sm:$0xff]   ;;  %20159 = vmatprep.subr.bf16.mxu1 %v21058_v61 }
 0x3eb   : > { %v19862_v62 = vpop.f32.mrb[101].mxu1  ;;  %20124 = vmatpush3.bf16.msra.mxu0 %v21047_v36  ;;  %v19901_v36 = vpop.f32.mrb[116].mxu0 }
 0x3ec   : > { %v24421_v7 = vadd.f32 %v19862_v62, %v19861_v60  ;;  %v19864_v39 = vpop.f32.mrb[102].mxu1  ;;  %20125 = vmatprep.subr.bf16.mxu0 %v21048_v48  ;;  %v21053_v48 = vld [vmem:[#allocation5 + $0x128] sm:$0xff]  }
 0x3ed   : > { %v19865_v31 = vpop.f32.mrb[103].mxu1 }
 0x3ee   : > { %v24425_v53 = vadd.f32 %v19865_v31, %v19864_v39 }
 0x3ef   : > { %20126 = vmatpush3.bf16.msra.mxu0 %v21049_v0  ;;  %v21055_v0 = vld [vmem:[#allocation5 + $0x130] sm:$0xff]  }
 0x3f0   : > { %20127 = vmatprep.subr.bf16.mxu0 %v21050_v3  ;;  %v21056_v3 = vld [vmem:[#allocation5 + $0x178] sm:$0xff]  }
 0x3f2   : > { %v19867_v60 = vpop.f32.mrb[104].mxu1 }
 0x3f3   : > { %v19868_v62 = vpop.f32.mrb[105].mxu1  ;;  %20128 = vmatpush3.bf16.msra.mxu0 %v21051_v44  ;;  %v21057_v44 = vld [vmem:[#allocation5 + $0x138] sm:$0xff]  }
 0x3f4   : > { %v24431_v14 = vadd.f32 %v19868_v62, %v19867_v60  ;;  %v19870_v20 = vpop.f32.mrb[106].mxu1  ;;  %20129 = vmatprep.subr.bf16.mxu0 %v21052_v54  ;;  %v19902_v60 = vpop.f32.mrb[117].mxu0 }
 0x3f5   : > { %v19871_v39 = vpop.f32.mrb[107].mxu1  ;;  %v24439_v17 = vadd.f32 %v19902_v60, %v19901_v36 }
 0x3f6   : > { %v24433_v31 = vadd.f32 %v19871_v39, %v19870_v20  ;;  %v19904_v20 = vpop.f32.mrb[118].mxu0 }
 0x3f7   : > { %20130 = vmatpush3.bf16.msra.mxu0 %v21053_v48  ;;  %25791 = vst [vmem:[#allocation39_spill] sm:$0xff] %v24439_v17  ;;  %v19905_v39 = vpop.f32.mrb[119].mxu0 }
 0x3f8   : > { %20131 = vmatprep.subr.bf16.mxu0 %v21054_v30  ;;  %v24443_v30 = vadd.f32 %v19905_v39, %v19904_v20 }
 0x3fa   : > { %v19873_v47 = vpop.f32.mrb[108].mxu1  ;;  %25792 = vst [vmem:[#allocation40_spill] sm:$0xff] %v24443_v30 }
 0x3fb   : > { %v19874_v18 = vpop.f32.mrb[109].mxu1  ;;  %20132 = vmatpush3.bf16.msra.mxu0 %v21055_v0 }
 0x3fc   : > { %v24437_v62 = vadd.f32 %v19874_v18, %v19873_v47  ;;  %v19876_v54 = vpop.f32.mrb[110].mxu1  ;;  %20133 = vmatprep.subr.bf16.mxu0 %v21056_v3  ;;  %v19907_v3 = vpop.f32.mrb[120].mxu0 }
 0x3fd   : > { %v19877_v48 = vpop.f32.mrb[111].mxu1  ;;  %v19908_v60 = vpop.f32.mrb[121].mxu0 }
 0x3fe   : > { %v24441_v5 = vadd.f32 %v19877_v48, %v19876_v54  ;;  %v24449_v50 = vadd.f32 %v19908_v60, %v19907_v3  ;;  %v19910_v54 = vpop.f32.mrb[122].mxu0 }
 0x3ff   : > { %20134 = vmatpush3.bf16.msra.mxu0 %v21057_v44  ;;  %v19911_v20 = vpop.f32.mrb[123].mxu0 }
 0x400   : > { %v24451_v44 = vadd.f32 %v19911_v20, %v19910_v54  ;;  %v19913_v18 = vpop.f32.mrb[124].mxu0 }
 0x401   : > { %v19914_v30 = vpop.f32.mrb[125].mxu0 }
 0x402   : > { %v19935_v47 = vpop.f32.mrb[112].mxu1  ;;  %v24456_v3 = vadd.f32 %v19914_v30, %v19913_v18  ;;  %v19916_v60 = vpop.f32.mrb[126].mxu0 }
 0x403   : > { %v19936_v36 = vpop.f32.mrb[113].mxu1  ;;  %v19917_v8 = vpop.f32.mrb[127].mxu0 }
 0x404   : > { %v19937_v33 = vadd.f32 %v19936_v36, %v19935_v47  ;;  %v19938_v32 = vpop.f32.mrb[114].mxu1  ;;  %v24462_v54 = vadd.f32 %v19917_v8, %v19916_v60  ;;  %v25794_v8 = vpack.c.bf16 %v24380_v57, %v24378_v58  ;;  %v25795_v58 = vpack.c.bf16 %v24269_v25, %v24263_v37 }
 0x405   : > { %v19939_v48 = vpop.f32.mrb[115].mxu1  ;;  %v25797_v37 = vpack.c.bf16 %v24221_v1, %v24215_v51 }
 0x406   : > { %v19940_v39 = vadd.f32 %v19939_v48, %v19938_v32 }
 0x408   : > { %v2756_v61 = vpack.c.bf16 %v19940_v39, %v19937_v33  ;;  %v25793_v33 = vpack.c.bf16 %v24370_v13, %v24366_v40 }
 0x40a   : > { %v19941_v38 = vpop.f32.mrb[116].mxu1  ;;  %3072 = vrot.lane.b32.xlu1 %v2756_v61, %s23397_s18 }
 0x40b   : > { %v19942_v17 = vpop.f32.mrb[117].mxu1 }
 0x40c   : > { %v19943_v47 = vadd.f32 %v19942_v17, %v19941_v38  ;;  %v19944_v36 = vpop.f32.mrb[118].mxu1  ;;  %v19975_v38 = vpop.f32.mrb[128].mxu0 }
 0x40d   : > { %v19945_v49 = vpop.f32.mrb[119].mxu1  ;;  %v19976_v30 = vpop.f32.mrb[129].mxu0 }
 0x40e   : > { %v19946_v32 = vadd.f32 %v19945_v49, %v19944_v36  ;;  %3050 = vrot.lane.b32.xlu1 %v25793_v33, %s23397_s18  ;;  %v24467_v49 = vadd.f32 %v19976_v30, %v19975_v38  ;;  %v19978_v36 = vpop.f32.mrb[130].mxu0 }
 0x40f   : > { %v19979_v40 = vpop.f32.mrb[131].mxu0 }
 0x410   : > { %v2757_v48 = vpack.c.bf16 %v19946_v32, %v19943_v47  ;;  %v24473_v47 = vadd.f32 %v19979_v40, %v19978_v36  ;;  %v25796_v40 = vpack.c.bf16 %v24390_v46, %v24384_v9 }
 0x412   : > { %v19947_v39 = vpop.f32.mrb[120].mxu1  ;;  %3074 = vrot.lane.b32.xlu1 %v2757_v48, %s23397_s18  ;;  %v2874_v32 = vpack.c.bf16 %v24473_v47, %v24467_v49 }
 0x413   : > { %v19948_v17 = vpop.f32.mrb[121].mxu1 }
 0x414   : > { %v19949_v18 = vadd.f32 %v19948_v17, %v19947_v39  ;;  %v19950_v61 = vpop.f32.mrb[122].mxu1  ;;  %v19981_v48 = vpop.f32.mrb[132].mxu0 }
 0x415   : > { %v19951_v0 = vpop.f32.mrb[123].mxu1  ;;  %v19982_v38 = vpop.f32.mrb[133].mxu0 }
 0x416   : > { %v19952_v13 = vadd.f32 %v19951_v0, %v19950_v61  ;;  %3052 = vrot.lane.b32.xlu1 %v25794_v8, %s23397_s18  ;;  %v24478_v61 = vadd.f32 %v19982_v38, %v19981_v48  ;;  %v21059_v8 = vld [vmem:[#allocation5 + $0x180] sm:$0xff]  }
 0x418   : > { %v2758_v60 = vpack.c.bf16 %v19952_v13, %v19949_v18  ;;  %v19984_v18 = vpop.f32.mrb[134].mxu0 }
 0x419   : > { %v19985_v13 = vpop.f32.mrb[135].mxu0 }
 0x41a   : > { %v19953_v33 = vpop.f32.mrb[124].mxu1  ;;  %3076 = vrot.lane.b32.xlu1 %v2758_v60, %s23397_s18  ;;  %v24488_v60 = vadd.f32 %v19985_v13, %v19984_v18  ;;  %v21062_v18 = vld [vmem:[#allocation5 + $0x1d0] sm:$0xff]  }
 0x41b   : > { %v19954_v39 = vpop.f32.mrb[125].mxu1 }
 0x41c   : > { %v19955_v17 = vadd.f32 %v19954_v39, %v19953_v33  ;;  %v19956_v30 = vpop.f32.mrb[126].mxu1  ;;  %v3037_v0 = vpop.permute.xlu1 %3036  ;;  %v21060_v39 = vld [vmem:[#allocation5 + $0x1c8] sm:$0xff]  }
 0x41d   : > { %v19957_v20 = vpop.f32.mrb[127].mxu1  ;;  %v3143_v57 = vsel %vm3092_vm1, %v25795_v58, %v3037_v0  ;;  %v19987_v46 = vpop.f32.mrb[136].mxu0 }
 0x41e   : > { %v19958_v36 = vadd.f32 %v19957_v20, %v19956_v30  ;;  %3837 = vmatprep.mubr.bf16.mxu1 %v3143_v57  ;;  %3054 = vrot.lane.b32.xlu1 %v25796_v40, %s23397_s18  ;;  %v2875_v20 = vpack.c.bf16 %v24488_v60, %v24478_v61  ;;  %v21061_v30 = vld [vmem:[#allocation5 + $0x188] sm:$0xff]   ;;  %v19988_v0 = vpop.f32.mrb[137].mxu0  ;;  %v25798_v40 = vpack.c.bf16 %v24130_v12, %v24126_v4 }
 0x41f   : > { %v24497_v51 = vadd.f32 %v19988_v0, %v19987_v46  ;;  %v25800_v12 = vpack.c.bf16 %v24233_v56, %v24227_v16 }
 0x420   : > { %v2759_v33 = vpack.c.bf16 %v19958_v36, %v19955_v17  ;;  %v3025_v48 = vpop.permute.xlu1 %3024 }
 0x421   : > { %v3127_v25 = vsel %vm3092_vm1, %v25797_v37, %v3025_v48  ;;  %v19990_v37 = vpop.f32.mrb[138].mxu0 }
 0x422   : > { %v20015_v38 = vpop.f32.mrb[128].mxu1  ;;  %3838 = vmatmul.mubr.bf16.vlgmr.msra.gmra.mrb[144].mxu1 %v3127_v25  ;;  %3078 = vrot.lane.b32.xlu1 %v2759_v33, %s23397_s18  ;;  %v19991_v25 = vpop.f32.mrb[139].mxu0 }
 0x423   : > { %v20016_v9 = vpop.f32.mrb[129].mxu1  ;;  %20160 = vmatpush3.bf16.msra.mxu1 %v21059_v8  ;;  %v25799_v8 = vpack.c.bf16 %v24281_v41, %v24275_v34  ;;  %v24507_v0 = vadd.f32 %v19991_v25, %v19990_v37  ;;  %v25801_v41 = vpack.c.bf16 %v24199_v52, %v24197_v6  ;;  %v25804_v25 = vpack.c.bf16 %v24289_v29, %v24287_v43 }
 0x424   : > { %v20017_v17 = vadd.f32 %v20016_v9, %v20015_v38  ;;  %v20018_v58 = vpop.f32.mrb[130].mxu1  ;;  %v3003_v57 = vpop.permute.xlu1 %3002  ;;  %20161 = vmatprep.subr.bf16.mxu1 %v21060_v39  ;;  %v21063_v39 = vld [vmem:[#allocation5 + $0x190] sm:$0xff]   ;;  %v21064_v9 = vld [vmem:[#allocation5 + $0x1d8] sm:$0xff]   ;;  %v25806_v29 = vpack.c.bf16 %v24210_v42, %v24204_v27  ;;  %v25807_v27 = vpack.c.bf16 %v24150_v35, %v24146_v28 }
 0x425   : > { %v3039_v1 = vpop.permute.xlu0 %3038  ;;  %v20019_v36 = vpop.f32.mrb[131].mxu1  ;;  %v3099_v13 = vsel %vm3092_vm1, %v25798_v40, %v3003_v57  ;;  %v21072_v28 = vld [vmem:[#allocation5 + $0x1f8] sm:$0xff]  }
 0x426   : > { %v20020_v33 = vadd.f32 %v20019_v36, %v20018_v58  ;;  %3781 = vmatmul.mubr.bf16.gmra.mrb[148].mxu0 %v3099_v13  ;;  %v3147_v48 = vsel %vm3092_vm1, %v25799_v8, %v3039_v1  ;;  %v19993_v57 = vpop.f32.mrb[140].mxu0  ;;  %v21065_v1 = vld [vmem:[#allocation5 + $0x198] sm:$0xff]   ;;  %v21066_v13 = vld [vmem:[#allocation5 + $0x1e0] sm:$0xff]   ;;  %v25802_v8 = vpack.c.bf16 %v24140_v24, %v24136_v19 }
 0x427   : > { %3845 = vmatprep.mubr.bf16.mxu1 %v3147_v48  ;;  %20162 = vmatpush3.bf16.msra.mxu1 %v21061_v30  ;;  %v19994_v16 = vpop.f32.mrb[141].mxu0  ;;  %v25810_v35 = vld [vmem:[#allocation28_spill] sm:$0xff] }
 0x428   : > { %v2992_v38 = vpack.c.bf16 %v20020_v33, %v20017_v17  ;;  %v3027_v46 = vpop.permute.xlu1 %3026  ;;  %20163 = vmatprep.subr.bf16.mxu1 %v21062_v18  ;;  %v2876_v17 = vpack.c.bf16 %v24507_v0, %v24497_v51  ;;  %v24520_v33 = vadd.f32 %v19994_v16, %v19993_v57  ;;  %v21070_v16 = vld [vmem:[#allocation5 + $0x1f0] sm:$0xff]  }
 0x429   : > { %v3017_v4 = vpop.permute.xlu0 %3016  ;;  %v3131_v58 = vsel %vm3092_vm1, %v25800_v12, %v3027_v46  ;;  %v19996_v46 = vpop.f32.mrb[142].mxu0  ;;  %v21068_v12 = vld [vmem:[#allocation5 + $0x1e8] sm:$0xff]  }
 0x42a   : > { %v20021_v34 = vpop.f32.mrb[132].mxu1  ;;  %3084 = vrot.lane.b32.xlu0 %v2992_v38, %s23397_s18  ;;  %v3119_v30 = vsel %vm3092_vm1, %v25801_v41, %v3017_v4  ;;  %3846 = vmatmul.mubr.bf16.gmra.mrb[148].mxu1 %v3131_v58  ;;  %v19997_v4 = vpop.f32.mrb[143].mxu0 }
 0x42b   : > { %3788 = vmatprep.mubr.bf16.mxu0 %v3119_v30  ;;  %v20022_v18 = vpop.f32.mrb[133].mxu1  ;;  %20164 = vmatpush3.bf16.msra.mxu1 %v21063_v39  ;;  %v25803_v39 = vpack.c.bf16 %v24425_v53, %v24421_v7  ;;  %v24534_v58 = vadd.f32 %v19997_v4, %v19996_v46  ;;  %v25805_v7 = vpack.c.bf16 %v24245_v23, %v24239_v22 }
 0x42c   : > { %v20023_v56 = vadd.f32 %v20022_v18, %v20021_v34  ;;  %v20024_v36 = vpop.f32.mrb[134].mxu1  ;;  %v3005_v40 = vpop.permute.xlu1 %3004  ;;  %20165 = vmatprep.subr.bf16.mxu1 %v21064_v9  ;;  %v21067_v9 = vld [vmem:[#allocation5 + $0x1a0] sm:$0xff]   ;;  %v21069_v18 = vld [vmem:[#allocation5 + $0x1a8] sm:$0xff]  }
 0x42d   : > { %v3041_v6 = vpop.permute.xlu0 %3040  ;;  %v20025_v52 = vpop.f32.mrb[135].mxu1  ;;  %v3103_v48 = vsel %vm3092_vm1, %v25802_v8, %v3005_v40  ;;  %v2877_v30 = vpack.c.bf16 %v24534_v58, %v24520_v33  ;;  %v21071_v8 = vld [vmem:[#allocation5 + $0x1b0] sm:$0xff]  }
 0x42e   : > { %v20026_v37 = vadd.f32 %v20025_v52, %v20024_v36  ;;  %3062 = vrot.lane.b32.xlu0 %v25803_v39, %s23397_s18  ;;  %3789 = vmatmul.mubr.bf16.gmra.mrb[152].mxu0 %v3103_v48  ;;  %v3151_v38 = vsel %vm3092_vm1, %v25804_v25, %v3041_v6  ;;  %v25809_v6 = vpack.c.bf16 %v24300_v59, %v24294_v21  ;;  %v25811_v39 = vld [vmem:[#allocation27_spill] sm:$0xff]  ;;  %v21073_v21 = vld [vmem:[#allocation5 + $0x1b8] sm:$0xff]  }
 0x42f   : > { %3853 = vmatprep.mubr.bf16.mxu1 %v3151_v38  ;;  %20166 = vmatpush3.bf16.msra.mxu1 %v21065_v1  ;;  %v25812_v25 = vpack.c.bf16 %v25810_v35, %v25811_v39 }
 0x430   : > { %v2993_v19 = vpack.c.bf16 %v20026_v37, %v20023_v56  ;;  %v3029_v24 = vpop.permute.xlu1 %3028  ;;  %20167 = vmatprep.subr.bf16.mxu1 %v21066_v13  ;;  %v25808_v13 = vpack.c.bf16 %v24433_v31, %v24431_v14 }
 0x431   : > { %v3019_v34 = vpop.permute.xlu0 %3018  ;;  %v3135_v53 = vsel %vm3092_vm1, %v25805_v7, %v3029_v24  ;;  %v25814_v7 = vpack.c.bf16 %v24368_v11, %v24364_v26  ;;  %v25816_v26 = vpack.c.bf16 %v24423_v10, %v24419_v55  ;;  %v25821_v10 = vld [vmem:[#allocation40_spill] sm:$0xff] }
 0x432   : > { %v20027_v43 = vpop.f32.mrb[136].mxu1  ;;  %3086 = vrot.lane.b32.xlu0 %v2993_v19, %s23397_s18  ;;  %v3123_v41 = vsel %vm3092_vm1, %v25806_v29, %v3019_v34  ;;  %3854 = vmatmul.mubr.bf16.gmra.mrb[152].mxu1 %v3135_v53  ;;  %v25813_v19 = vpack.c.bf16 %v24441_v5, %v24437_v62 }
 0x433   : > { %3796 = vmatprep.mubr.bf16.mxu0 %v3123_v41  ;;  %v20028_v57 = vpop.f32.mrb[137].mxu1  ;;  %20168 = vmatpush3.bf16.msra.mxu1 %v21067_v9 }
 0x434   : > { %v20029_v1 = vadd.f32 %v20028_v57, %v20027_v43  ;;  %v20030_v22 = vpop.f32.mrb[138].mxu1  ;;  %v3007_v23 = vpop.permute.xlu1 %3006  ;;  %20169 = vmatprep.subr.bf16.mxu1 %v21068_v12  ;;  %v25815_v43 = vpack.c.bf16 %v24319_v2, %v24309_v15 }
 0x435   : > { %v3043_v56 = vpop.permute.xlu0 %3042  ;;  %v20031_v36 = vpop.f32.mrb[139].mxu1  ;;  %v3107_v42 = vsel %vm3092_vm1, %v25807_v27, %v3007_v23  ;;  %v25818_v23 = vld [vmem:[#allocation30_spill] sm:$0xff] }
 0x436   : > { %v20032_v40 = vadd.f32 %v20031_v36, %v20030_v22  ;;  %3064 = vrot.lane.b32.xlu0 %v25808_v13, %s23397_s18  ;;  %3797 = vmatmul.mubr.bf16.gmra.mrb[156].mxu0 %v3107_v42  ;;  %v3155_v52 = vsel %vm3092_vm1, %v25809_v6, %v3043_v56  ;;  %v25822_v56 = vld [vmem:[#allocation39_spill] sm:$0xff]  ;;  %v25824_v42 = vld [vmem:[#allocation36_spill] sm:$0xff] }
 0x437   : > { %3861 = vmatprep.mubr.bf16.mxu1 %v3155_v52  ;;  %20170 = vmatpush3.bf16.msra.mxu1 %v21069_v18  ;;  %v25823_v36 = vpack.c.bf16 %v25821_v10, %v25822_v56  ;;  %v25827_v52 = vld [vmem:[#allocation32_spill] sm:$0xff] }
 0x438   : > { %v2994_v48 = vpack.c.bf16 %v20032_v40, %v20029_v1  ;;  %v3031_v37 = vpop.permute.xlu1 %3030  ;;  %20171 = vmatprep.subr.bf16.mxu1 %v21070_v16  ;;  %v25817_v1 = vpack.c.bf16 %v24392_v63, %v24374_v45  ;;  %v25819_v16 = vld [vmem:[#allocation29_spill] sm:$0xff]  ;;  %v25825_v40 = vld [vmem:[#allocation35_spill] sm:$0xff] }
 0x439   : > { %v3139_v38 = vsel %vm3092_vm1, %v25812_v25, %v3031_v37  ;;  %v25820_v49 = vpack.c.bf16 %v25818_v23, %v25819_v16  ;;  %v25826_v13 = vpack.c.bf16 %v25824_v42, %v25825_v40  ;;  %v25831_v25 = vld [vmem:[#allocation38_spill] sm:$0xff] }
 0x43a   : > { %v20033_v14 = vpop.f32.mrb[140].mxu1  ;;  %3088 = vrot.lane.b32.xlu0 %v2994_v48, %s23397_s18  ;;  %3862 = vmatmul.mubr.bf16.gmra.mrb[156].mxu1 %v3139_v38  ;;  %v25832_v38 = vld [vmem:[#allocation37_spill] sm:$0xff] }
 0x43b   : > { %v20034_v31 = vpop.f32.mrb[141].mxu1  ;;  %20172 = vmatpush3.bf16.msra.mxu1 %v21071_v8  ;;  %v25828_v8 = vld [vmem:[#allocation31_spill] sm:$0xff] }
 0x43c   : > { %v20035_v59 = vadd.f32 %v20034_v31, %v20033_v14  ;;  %v20036_v46 = vpop.f32.mrb[142].mxu1  ;;  %20173 = vmatprep.subr.bf16.mxu1 %v21072_v28  ;;  %v3049_v12 = vpop.permute.xlu1 %3048  ;;  %v25829_v61 = vpack.c.bf16 %v25827_v52, %v25828_v8  ;;  %v25830_v28 = vpack.c.bf16 %v24451_v44, %v24449_v50  ;;  %v25833_v14 = vpack.c.bf16 %v25831_v25, %v25832_v38 }
 0x43d   : > { %v20037_v9 = vpop.f32.mrb[143].mxu1  ;;  %v3159_v29 = vsel %vm3092_vm1, %v25815_v43, %v3049_v12 }
 0x43e   : > { %v20038_v4 = vadd.f32 %v20037_v9, %v20036_v46  ;;  %3066 = vrot.lane.b32.xlu0 %v25813_v19, %s23397_s18 }
 0x43f   : > { %20174 = vmatpush3.bf16.msra.mxu1 %v21073_v21  ;;  %v25834_v21 = vld [vmem:[#allocation34_spill] sm:$0xff] }
 0x440   : > { %v2995_v24 = vpack.c.bf16 %v20038_v4, %v20035_v59  ;;  %v25835_v59 = vld [vmem:[#allocation33_spill] sm:$0xff]  ;;  %v25837_v4 = vpack.c.bf16 %v24462_v54, %v24456_v3 }
 0x441   : > { %v25836_v46 = vpack.c.bf16 %v25834_v21, %v25835_v59 }
 0x442   : > { %3090 = vrot.lane.b32.xlu0 %v2995_v24, %s23397_s18  ;;  %s25839_s18 = smov %s25838_s20 }
 0x45c   : > { %v3061_v34 = vpop.permute.xlu0 %3060 }
 0x45d   : > { %v3175_v53 = vsel %vm3092_vm1, %v25814_v7, %v3061_v34 }
 0x45e   : > { %3902 = vmatprep.mubr.bf16.mxu0 %v3175_v53  ;;  %v17891_v53 = vld [vmem:[#allocation13] ss:$0 sm:$0xff] }
 0x45f   : > { %3903 = vmatmul.mubr.bf16.vlgmr.msra.gmra.mrb[160].mxu0 %v3159_v29 }
 0x47c   : > { %v3073_v5 = vpop.permute.xlu1 %3072 }
 0x47d   : > { %v3191_v11 = vsel %vm3092_vm1, %v25816_v26, %v3073_v5 }
 0x480   : > { %v3051_v62 = vpop.permute.xlu1 %3050 }
 0x481   : > { %v3163_v47 = vsel %vm3092_vm1, %v25820_v49, %v3051_v62 }
 0x484   : > { %v3075_v41 = vpop.permute.xlu1 %3074 }
 0x485   : > { %v3195_v45 = vsel %vm3092_vm1, %v25823_v36, %v3075_v41 }
 0x488   : > { %v3053_v2 = vpop.permute.xlu1 %3052 }
 0x489   : > { %v3167_v60 = vsel %vm3092_vm1, %v25829_v61, %v3053_v2 }
 0x48c   : > { %v3077_v63 = vpop.permute.xlu1 %3076 }
 0x48d   : > { %v3199_v35 = vsel %vm3092_vm1, %v25830_v28, %v3077_v63 }
 0x490   : > { %v3055_v48 = vpop.permute.xlu1 %3054 }
 0x491   : > { %v3171_v51 = vsel %vm3092_vm1, %v25836_v46, %v3055_v48 }
 0x494   : > { %v3079_v0 = vpop.permute.xlu1 %3078 }
 0x495   : > { %v3203_v19 = vsel %vm3092_vm1, %v25837_v4, %v3079_v0 }
 0x49c   : > { %v3085_v57 = vpop.permute.xlu0 %3084 }
 0x49d   : > { %v3207_v18 = vsel %vm3092_vm1, %v2874_v32, %v3085_v57 }
 0x49e   : > { %3967 = vmatprep.mubr.bf16.mxu1 %v3207_v18 }
 0x49f   : > { %3968 = vmatmul.mubr.bf16.vlgmr.msra.gmra.mrb[160].mxu1 %v3191_v11 }
 0x4a0   : > { %v3063_v15 = vpop.permute.xlu0 %3062 }
 0x4a1   : > { %v3179_v22 = vsel %vm3092_vm1, %v25817_v1, %v3063_v15 }
 0x4a2   : > { %3910 = vmatprep.mubr.bf16.mxu0 %v3179_v22 }
 0x4a3   : > { %3911 = vmatmul.mubr.bf16.gmra.mrb[164].mxu0 %v3163_v47 }
 0x4a4   : > { %v3087_v32 = vpop.permute.xlu0 %3086 }
 0x4a5   : > { %v3211_v55 = vsel %vm3092_vm1, %v2875_v20, %v3087_v32 }
 0x4a6   : > { %3975 = vmatprep.mubr.bf16.mxu1 %v3211_v55 }
 0x4a7   : > { %3976 = vmatmul.mubr.bf16.gmra.mrb[164].mxu1 %v3195_v45 }
 0x4a8   : > { %v3065_v27 = vpop.permute.xlu0 %3064 }
 0x4a9   : > { %v3183_v6 = vsel %vm3092_vm1, %v25826_v13, %v3065_v27 }
 0x4aa   : > { %3918 = vmatprep.mubr.bf16.mxu0 %v3183_v6 }
 0x4ab   : > { %3919 = vmatmul.mubr.bf16.gmra.mrb[168].mxu0 %v3167_v60 }
 0x4ac   : > { %v3089_v20 = vpop.permute.xlu0 %3088 }
 0x4ad   : > { %v3215_v37 = vsel %vm3092_vm1, %v2876_v17, %v3089_v20 }
 0x4ae   : > { %3983 = vmatprep.mubr.bf16.mxu1 %v3215_v37 }
 0x4af   : > { %3984 = vmatmul.mubr.bf16.gmra.mrb[168].mxu1 %v3199_v35 }
 0x4b0   : > { %v3067_v39 = vpop.permute.xlu0 %3066 }
 0x4b1   : > { %v3187_v31 = vsel %vm3092_vm1, %v25833_v14, %v3067_v39 }
 0x4b2   : > { %3926 = vmatprep.mubr.bf16.mxu0 %v3187_v31 }
 0x4b3   : > { %3927 = vmatmul.mubr.bf16.gmra.mrb[172].mxu0 %v3171_v51 }
 0x4b4   : > { %v3091_v17 = vpop.permute.xlu0 %3090 }
 0x4b5   : > { %v20055_v9 = vpop.f32.mrb[144].mxu0  ;;  %v3219_v50 = vsel %vm3092_vm1, %v2877_v30, %v3091_v17 }
 0x4b6   : > { %v20056_v44 = vpop.f32.mrb[145].mxu0  ;;  %3991 = vmatprep.mubr.bf16.mxu1 %v3219_v50 }
 0x4b7   : > { %v20057_v24 = vadd.f32 %v20056_v44, %v20055_v9  ;;  %v20058_v12 = vpop.f32.mrb[146].mxu0  ;;  %3992 = vmatmul.mubr.bf16.gmra.mrb[172].mxu1 %v3203_v19 }
 0x4b8   : > { %v20059_v34 = vpop.f32.mrb[147].mxu0 }
 0x4b9   : > { %v20060_v7 = vadd.f32 %v20059_v34, %v20058_v12  ;;  %v3775_v5 = vadd.f32 %v20057_v24, %v17891_v53 }
 0x4bb   : > { %v3778_v41 = vadd.f32 %v20060_v7, %v17891_v53 }
 0x4f5   : > { %v20095_v43 = vpop.f32.mrb[144].mxu1 }
 0x4f6   : > { %v20096_v29 = vpop.f32.mrb[145].mxu1 }
 0x4f7   : > { %v20097_v62 = vadd.f32 %v20096_v29, %v20095_v43  ;;  %v20098_v33 = vpop.f32.mrb[146].mxu1 }
 0x4f8   : > { %v20099_v58 = vpop.f32.mrb[147].mxu1 }
 0x4f9   : > { %v3840_v30 = vadd.f32 %v20097_v62, %v3775_v5  ;;  %v20100_v57 = vadd.f32 %v20099_v58, %v20098_v33  ;;  %v20061_v18 = vpop.f32.mrb[148].mxu0  ;;  %v23398_v62 = vmov 0.0  }
 0x4fa   : > { %v20062_v26 = vpop.f32.mrb[149].mxu0  ;;  %20317 = vmatprep.subr.bf16.mxu0 %v23398_v62  ;;  %20341 = vmatprep.subr.bf16.mxu1 %v23398_v62 }
 0x4fb   : > { %v3843_v3 = vadd.f32 %v20100_v57, %v3778_v41  ;;  %v20063_v54 = vadd.f32 %v20062_v26, %v20061_v18  ;;  %v20064_v11 = vpop.f32.mrb[150].mxu0  ;;  %20325 = vmatprep.mubr.msk.bf16.mxu0 %vm23399_vm2, %v23398_v62  ;;  %20349 = vmatprep.mubr.msk.bf16.mxu1 %vm23399_vm2, %v23398_v62 }
 0x4fc   : > { %v20065_v15 = vpop.f32.mrb[151].mxu0 }
 0x4fd   : > { %v20066_v2 = vadd.f32 %v20065_v15, %v20064_v11  ;;  %v20101_v1 = vpop.f32.mrb[148].mxu1  ;;  %v3783_v23 = vadd.f32 %v20063_v54, %v17891_v53 }
 0x4fe   : > { %v20102_v22 = vpop.f32.mrb[149].mxu1 }
 0x4ff   : > { %v20103_v16 = vadd.f32 %v20102_v22, %v20101_v1  ;;  %v20104_v49 = vpop.f32.mrb[150].mxu1  ;;  %v3786_v55 = vadd.f32 %v20066_v2, %v17891_v53 }
 0x500   : > { %v20105_v47 = vpop.f32.mrb[151].mxu1 }
 0x501   : > { %v24633_v32 = vadd.f32 %v20103_v16, %v3783_v23  ;;  %v20106_v10 = vadd.f32 %v20105_v47, %v20104_v49  ;;  %v20067_v56 = vpop.f32.mrb[152].mxu0 }
 0x502   : > { %v20068_v36 = vpop.f32.mrb[153].mxu0 }
 0x503   : > { %v24635_v45 = vadd.f32 %v20106_v10, %v3786_v55  ;;  %v20069_v63 = vadd.f32 %v20068_v36, %v20067_v56  ;;  %v20070_v27 = vpop.f32.mrb[154].mxu0 }
 0x504   : > { %v20071_v42 = vpop.f32.mrb[155].mxu0 }
 0x505   : > { %v20072_v40 = vadd.f32 %v20071_v42, %v20070_v27  ;;  %v20107_v13 = vpop.f32.mrb[152].mxu1  ;;  %v3791_v52 = vadd.f32 %v20069_v63, %v17891_v53 }
 0x506   : > { %v20108_v6 = vpop.f32.mrb[153].mxu1 }
 0x507   : > { %v20109_v8 = vadd.f32 %v20108_v6, %v20107_v13  ;;  %v20110_v61 = vpop.f32.mrb[154].mxu1  ;;  %v3794_v20 = vadd.f32 %v20072_v40, %v17891_v53 }
 0x508   : > { %v20111_v60 = vpop.f32.mrb[155].mxu1 }
 0x509   : > { %v24637_v48 = vadd.f32 %v20109_v8, %v3791_v52  ;;  %v20112_v37 = vadd.f32 %v20111_v60, %v20110_v61  ;;  %v20073_v28 = vpop.f32.mrb[156].mxu0 }
 0x50a   : > { %v20074_v35 = vpop.f32.mrb[157].mxu0 }
 0x50b   : > { %v24639_v39 = vadd.f32 %v20112_v37, %v3794_v20  ;;  %v20075_v25 = vadd.f32 %v20074_v35, %v20073_v28  ;;  %v20076_v38 = vpop.f32.mrb[158].mxu0 }
 0x50c   : > { %v20077_v14 = vpop.f32.mrb[159].mxu0 }
 0x50d   : > { %v20078_v31 = vadd.f32 %v20077_v14, %v20076_v38  ;;  %v20113_v21 = vpop.f32.mrb[156].mxu1  ;;  %v3799_v46 = vadd.f32 %v20075_v25, %v17891_v53 }
 0x50e   : > { %v20114_v59 = vpop.f32.mrb[157].mxu1 }
 0x50f   : > { %v20115_v51 = vadd.f32 %v20114_v59, %v20113_v21  ;;  %v20116_v0 = vpop.f32.mrb[158].mxu1  ;;  %v3802_v9 = vadd.f32 %v20078_v31, %v17891_v53 }
 0x510   : > { %v20117_v17 = vpop.f32.mrb[159].mxu1 }
 0x511   : > { %v24641_v50 = vadd.f32 %v20115_v51, %v3799_v46  ;;  %v20118_v44 = vadd.f32 %v20117_v17, %v20116_v0 }
 0x513   : > { %v24643_v4 = vadd.f32 %v20118_v44, %v3802_v9 }
 0x532   : > { %v20135_v19 = vpop.f32.mrb[160].mxu0 }
 0x533   : > { %v20136_v24 = vpop.f32.mrb[161].mxu0 }
 0x534   : > { %v20137_v12 = vadd.f32 %v20136_v24, %v20135_v19  ;;  %v20138_v34 = vpop.f32.mrb[162].mxu0 }
 0x535   : > { %v20139_v7 = vpop.f32.mrb[163].mxu0 }
 0x536   : > { %v3905_v43 = vadd.f32 %v20137_v12, %v3840_v30  ;;  %v20140_v29 = vadd.f32 %v20139_v7, %v20138_v34 }
 0x538   : > { %v3908_v5 = vadd.f32 %v20140_v29, %v3843_v3 }
 0x572   : > { %v20175_v53 = vpop.f32.mrb[160].mxu1 }
 0x573   : > { %v20176_v33 = vpop.f32.mrb[161].mxu1 }
 0x574   : > { %v20177_v58 = vadd.f32 %v20176_v33, %v20175_v53  ;;  %v20178_v41 = vpop.f32.mrb[162].mxu1 }
 0x575   : > { %v20179_v57 = vpop.f32.mrb[163].mxu1 }
 0x576   : > { %v24651_v30 = vadd.f32 %v20177_v58, %v3905_v43  ;;  %v20180_v18 = vadd.f32 %v20179_v57, %v20178_v41  ;;  %v20141_v26 = vpop.f32.mrb[164].mxu0 }
 0x577   : > { %v20142_v3 = vpop.f32.mrb[165].mxu0 }
 0x578   : > { %v24653_v54 = vadd.f32 %v20180_v18, %v3908_v5  ;;  %v20143_v11 = vadd.f32 %v20142_v3, %v20141_v26  ;;  %v20144_v15 = vpop.f32.mrb[166].mxu0  ;;  %v4013_v2 = vmul.f32 %v24651_v30, %v24651_v30 }
 0x579   : > { %v20145_v1 = vpop.f32.mrb[167].mxu0 }
 0x57a   : > { %v4000_v22 = vadd.f32 %v24653_v54, %v24651_v30  ;;  %v4014_v23 = vmul.f32 %v24653_v54, %v24653_v54  ;;  %v3913_v16 = vadd.f32 %v20143_v11, %v24633_v32  ;;  %v20146_v49 = vadd.f32 %v20145_v1, %v20144_v15  ;;  %v20181_v47 = vpop.f32.mrb[164].mxu1 }
 0x57b   : > { %v20182_v55 = vpop.f32.mrb[165].mxu1 }
 0x57c   : > { %v4021_v10 = vadd.f32 %v4014_v23, %v4013_v2  ;;  %v3916_v56 = vadd.f32 %v20146_v49, %v24635_v45  ;;  %v20183_v36 = vadd.f32 %v20182_v55, %v20181_v47  ;;  %v20184_v63 = vpop.f32.mrb[166].mxu1 }
 0x57d   : > { %v20185_v27 = vpop.f32.mrb[167].mxu1 }
 0x57e   : > { %v24663_v42 = vadd.f32 %v20183_v36, %v3913_v16  ;;  %v20186_v40 = vadd.f32 %v20185_v27, %v20184_v63  ;;  %v20147_v13 = vpop.f32.mrb[168].mxu0 }
 0x57f   : > { %v20148_v6 = vpop.f32.mrb[169].mxu0 }
 0x580   : > { %v4001_v52 = vadd.f32 %v4000_v22, %v24663_v42  ;;  %v4015_v8 = vmul.f32 %v24663_v42, %v24663_v42  ;;  %v24668_v32 = vadd.f32 %v20186_v40, %v3916_v56  ;;  %v20149_v61 = vadd.f32 %v20148_v6, %v20147_v13  ;;  %v20150_v60 = vpop.f32.mrb[170].mxu0 }
 0x581   : > { %v20151_v20 = vpop.f32.mrb[171].mxu0 }
 0x582   : > { %v4022_v37 = vadd.f32 %v4021_v10, %v4015_v8  ;;  %v4002_v45 = vadd.f32 %v4001_v52, %v24668_v32  ;;  %v4016_v28 = vmul.f32 %v24668_v32, %v24668_v32  ;;  %v3921_v35 = vadd.f32 %v20149_v61, %v24637_v48  ;;  %v20187_v25 = vpop.f32.mrb[168].mxu1 }
 0x583   : > { %v20152_v38 = vadd.f32 %v20151_v20, %v20150_v60  ;;  %v20188_v14 = vpop.f32.mrb[169].mxu1 }
 0x584   : > { %v4023_v31 = vadd.f32 %v4022_v37, %v4016_v28  ;;  %v20189_v21 = vadd.f32 %v20188_v14, %v20187_v25  ;;  %v20190_v59 = vpop.f32.mrb[170].mxu1 }
 0x585   : > { %v3924_v46 = vadd.f32 %v20152_v38, %v24639_v39  ;;  %v20191_v51 = vpop.f32.mrb[171].mxu1 }
 0x586   : > { %v24675_v0 = vadd.f32 %v20189_v21, %v3921_v35  ;;  %v20192_v17 = vadd.f32 %v20191_v51, %v20190_v59  ;;  %v20153_v9 = vpop.f32.mrb[172].mxu0 }
 0x587   : > { %v20154_v44 = vpop.f32.mrb[173].mxu0 }
 0x588   : > { %v4003_v19 = vadd.f32 %v4002_v45, %v24675_v0  ;;  %v4017_v24 = vmul.f32 %v24675_v0, %v24675_v0  ;;  %v3989_v48 = vadd.f32 %v20192_v17, %v3924_v46  ;;  %v20155_v12 = vadd.f32 %v20154_v44, %v20153_v9  ;;  %v20156_v34 = vpop.f32.mrb[174].mxu0 }
 0x589   : > { %v20157_v7 = vpop.f32.mrb[175].mxu0 }
 0x58a   : > { %v4024_v43 = vadd.f32 %v4023_v31, %v4017_v24  ;;  %v4004_v29 = vadd.f32 %v4003_v19, %v3989_v48  ;;  %v4018_v5 = vmul.f32 %v3989_v48, %v3989_v48  ;;  %v3929_v39 = vadd.f32 %v20155_v12, %v24641_v50  ;;  %v20193_v53 = vpop.f32.mrb[172].mxu1 }
 0x58b   : > { %v20158_v33 = vadd.f32 %v20157_v7, %v20156_v34  ;;  %v20194_v58 = vpop.f32.mrb[173].mxu1 }
 0x58c   : > { %v4025_v41 = vadd.f32 %v4024_v43, %v4018_v5  ;;  %v20195_v57 = vadd.f32 %v20194_v58, %v20193_v53  ;;  %v20196_v18 = vpop.f32.mrb[174].mxu1 }
 0x58d   : > { %v3932_v26 = vadd.f32 %v20158_v33, %v24643_v4  ;;  %v20197_v3 = vpop.f32.mrb[175].mxu1 }
 0x58e   : > { %v3994_v11 = vadd.f32 %v20195_v57, %v3929_v39  ;;  %v20198_v15 = vadd.f32 %v20197_v3, %v20196_v18 }
 0x590   : > { %v4005_v2 = vadd.f32 %v4004_v29, %v3994_v11  ;;  %v4019_v1 = vmul.f32 %v3994_v11, %v3994_v11  ;;  %v3997_v22 = vadd.f32 %v20198_v15, %v3932_v26  ;;  %v21074_v15 = vld [vmem:[#allocation19] sm:$0xff]  }
 0x592   : > { %v4026_v23 = vadd.f32 %v4025_v41, %v4019_v1  ;;  %v4006_v16 = vadd.f32 %v4005_v2, %v3997_v22  ;;  %v4020_v49 = vmul.f32 %v3997_v22, %v3997_v22  ;;  %v21075_v2 = vld [vmem:[#allocation19 + $0x10] sm:$0xff]   ;;  %v21076_v1 = vld [vmem:[#allocation19 + $0x8] sm:$0xff]  }
 0x594   : > { %v4007_v47 = vrot.slane %v4006_v16, 4  ;;  %v4027_v55 = vadd.f32 %v4026_v23, %v4020_v49  ;;  %v21078_v23 = vld [vmem:[#allocation19 + $0x18] sm:$0xff]   ;;  %v21080_v49 = vld [vmem:[#allocation19 + $0x28] sm:$0xff]  }
 0x596   : > { %v4008_v50 = vadd.f32 %v4007_v47, %v4006_v16  ;;  %v4028_v10 = vrot.slane %v4027_v55, 4  ;;  %v21079_v16 = vld [vmem:[#allocation19 + $0x30] sm:$0xff]   ;;  %v21081_v47 = vld [vmem:[#allocation19 + $0x40] sm:$0xff]  }
 0x598   : > { %v4009_v56 = vrot.slane %v4008_v50, 2  ;;  %v4029_v36 = vadd.f32 %v4028_v10, %v4027_v55  ;;  %v21082_v55 = vld [vmem:[#allocation19 + $0x38] sm:$0xff]   ;;  %v21084_v10 = vld [vmem:[#allocation19 + $0x48] sm:$0xff]  }
 0x59a   : > { %v4010_v63 = vadd.f32 %v4009_v56, %v4008_v50  ;;  %v4030_v27 = vrot.slane %v4029_v36, 2  ;;  %v21083_v50 = vld [vmem:[#allocation19 + $0x50] sm:$0xff]   ;;  %v21085_v56 = vld [vmem:[#allocation19 + $0x60] sm:$0xff]  }
 0x59c   : > { %v4011_v40 = vrot.slane %v4010_v63, 1  ;;  %v4031_v13 = vadd.f32 %v4030_v27, %v4029_v36  ;;  %v21103_v36 = vld [vmem:[#allocation7 + $0x104] ss:$8 sps:$4 sm:$0xff]   ;;  %v21104_v27 = vld [vmem:[#allocation19 + $0x70] sm:$0xff]  }
 0x59e   : > { %v4012_v4 = vadd.f32 %v4011_v40, %v4010_v63  ;;  %v4032_v6 = vrot.slane %v4031_v13, 1  ;;  %v21086_v63 = vld [vmem:[#allocation19 + $0x58] sm:$0xff]  }
 0x59f   : > { %v21101_v40 = vld [vmem:[#allocation7 + $0x100] ss:$8 sps:$4 sm:$0xff]  }
 0x5a0   : > { %v4033_v52 = vadd.f32 %v4032_v6, %v4031_v13  ;;  %v4034_v8 = vmul.f32 0.015625, %v4012_v4  ;;  %v21110_v13 = vld [vmem:[#allocation7 + $0x114] ss:$8 sps:$4 sm:$0xff]   ;;  %v21108_v4 = vld [vmem:[#allocation7 + $0x110] ss:$8 sps:$4 sm:$0xff]  }
 0x5a1   : > { %v21116_v6 = vld [vmem:[#allocation7 + $0x124] ss:$8 sps:$4 sm:$0xff]  }
 0x5a2   : > { %v4035_v61 = vmul.f32 0.015625, %v4033_v52  ;;  %v4036_v60 = vmul.f32 %v4034_v8, %v4034_v8  ;;  %v4039_v20 = vsub.f32 %v24651_v30, %v4034_v8  ;;  %v4040_v37 = vsub.f32 %v24653_v54, %v4034_v8  ;;  %v21114_v52 = vld [vmem:[#allocation7 + $0x120] ss:$8 sps:$4 sm:$0xff]  }
 0x5a3   : > { %v4041_v45 = vsub.f32 %v24663_v42, %v4034_v8  ;;  %v4042_v28 = vsub.f32 %v24668_v32, %v4034_v8  ;;  %v4043_v35 = vsub.f32 %v24675_v0, %v4034_v8  ;;  %v4044_v25 = vsub.f32 %v3989_v48, %v4034_v8 }
 0x5a4   : > { %v4037_v38 = vsub.f32 %v4035_v61, %v4036_v60  ;;  %v4045_v14 = vsub.f32 %v3994_v11, %v4034_v8  ;;  %v4046_v31 = vsub.f32 %v3997_v22, %v4034_v8  ;;  %v21077_v22 = vld [vmem:[#allocation19 + $0x20] sm:$0xff]   ;;  %v21122_v8 = vld [vmem:[#allocation7 + $0x134] ss:$8 sps:$4 sm:$0xff]  }
 0x5a5   : > { %v21120_v61 = vld [vmem:[#allocation7 + $0x130] ss:$8 sps:$4 sm:$0xff]   ;;  %v21128_v60 = vld [vmem:[#allocation7 + $0x144] ss:$8 sps:$4 sm:$0xff]  }
 0x5a6   : > { %v4038_v21 = vmax.f32 %v4037_v38, 0.0  ;;  %v21146_v38 = vld [vmem:[#allocation7 + $0x174] ss:$8 sps:$4 sm:$0xff]  }
 0x5a8   : > { %v4047_v59 = vadd.f32 1e-05, %v4038_v21  ;;  %v21152_v21 = vld [vmem:[#allocation7 + $0x184] ss:$8 sps:$4 sm:$0xff]  }
 0x5aa   : > { %23026 = vrsqrt.f32 %v4047_v59  ;;  %v21091_v59 = vld [vmem:[#allocation19 + $0x78] sm:$0xff]  }
 0x5b4   : > { %v23027_v46 = vpop.eup %23026 }
 0x5b5   : > { %v4049_v51 = vmul.f32 %v23027_v46, %v4039_v20  ;;  %v4050_v17 = vmul.f32 %v23027_v46, %v4040_v37  ;;  %v4051_v9 = vmul.f32 %v23027_v46, %v4041_v45  ;;  %v4052_v30 = vmul.f32 %v23027_v46, %v4042_v28  ;;  %v21087_v20 = vld [vmem:[#allocation19 + $0x68] sm:$0xff]   ;;  %v21126_v37 = vld [vmem:[#allocation7 + $0x140] ss:$8 sps:$4 sm:$0xff]  }
 0x5b6   : > { %v4053_v44 = vmul.f32 %v23027_v46, %v4043_v35  ;;  %v4054_v54 = vmul.f32 %v23027_v46, %v4044_v25  ;;  %v4055_v19 = vmul.f32 %v23027_v46, %v4045_v14  ;;  %v4056_v42 = vmul.f32 %v23027_v46, %v4046_v31  ;;  %v21134_v45 = vld [vmem:[#allocation7 + $0x154] ss:$8 sps:$4 sm:$0xff]   ;;  %v21132_v28 = vld [vmem:[#allocation7 + $0x150] ss:$8 sps:$4 sm:$0xff]   ;;  %v21140_v35 = vld [vmem:[#allocation7 + $0x164] ss:$8 sps:$4 sm:$0xff]  }
 0x5b7   : > { %vm4057_vm3 = vcmp.gt.f32.partialorder %v4049_v51, 0.0  ;;  %vm4058_vm4 = vcmp.gt.f32.partialorder %v4050_v17, 0.0  ;;  %vm4059_vm5 = vcmp.gt.f32.partialorder %v4051_v9, 0.0  ;;  %vm4060_vm6 = vcmp.gt.f32.partialorder %v4052_v30, 0.0  ;;  %v21138_v25 = vld [vmem:[#allocation7 + $0x160] ss:$8 sps:$4 sm:$0xff]  }
 0x5b8   : > { %vm4061_vm7 = vcmp.gt.f32.partialorder %v4053_v44, 0.0  ;;  %vm4062_vm8 = vcmp.gt.f32.partialorder %v4054_v54, 0.0  ;;  %vm4063_vm9 = vcmp.gt.f32.partialorder %v4055_v19, 0.0  ;;  %vm4064_vm10 = vcmp.gt.f32.partialorder %v4056_v42, 0.0  ;;  %v21090_v14 = vld [vmem:[#allocation7 + $0x4] ss:$8 sps:$4 sm:$0xff]  }
 0x5b9   : > { %v4065_v32 = vmul.f32 0.2, %v4049_v51  ;;  %v4066_v0 = vmul.f32 0.2, %v4050_v17  ;;  %v4067_v24 = vmul.f32 0.2, %v4051_v9 }
 0x5ba   : > { %v4068_v48 = vmul.f32 0.2, %v4052_v30  ;;  %v4069_v12 = vmul.f32 0.2, %v4053_v44  ;;  %v4070_v34 = vmul.f32 0.2, %v4054_v54 }
 0x5bb   : > { %v4071_v7 = vmul.f32 0.2, %v4055_v19  ;;  %v4072_v43 = vmul.f32 0.2, %v4056_v42  ;;  %v4073_v29 = vsel %vm4057_vm3, %v4049_v51, %v4065_v32  ;;  %v4074_v5 = vsel %vm4058_vm4, %v4050_v17, %v4066_v0  ;;  %v21144_v31 = vld [vmem:[#allocation7 + $0x170] ss:$8 sps:$4 sm:$0xff]  }
 0x5bc   : > { %v4075_v39 = vsel %vm4059_vm5, %v4051_v9, %v4067_v24  ;;  %v4076_v53 = vsel %vm4060_vm6, %v4052_v30, %v4068_v48  ;;  %v4077_v33 = vsel %vm4061_vm7, %v4053_v44, %v4069_v12  ;;  %v4078_v58 = vsel %vm4062_vm8, %v4054_v54, %v4070_v34  ;;  %v21088_v46 = vld [vmem:[#allocation7] ss:$8 sps:$4 sm:$0xff]   ;;  %v21094_v51 = vld [vmem:[#allocation7 + $0x14] ss:$8 sps:$4 sm:$0xff]   ;;  %v21092_v30 = vld [vmem:[#allocation7 + $0x10] ss:$8 sps:$4 sm:$0xff]  }
 0x5bd   : > { %v4079_v41 = vsel %vm4063_vm9, %v4055_v19, %v4071_v7  ;;  %v4080_v57 = vsel %vm4064_vm10, %v4056_v42, %v4072_v43  ;;  %v24695_v18 = vpack.c.bf16 %v4074_v5, %v4073_v29  ;;  %v24697_v26 = vpack.c.bf16 %v4076_v53, %v4075_v39  ;;  %v21150_v17 = vld [vmem:[#allocation7 + $0x180] ss:$8 sps:$4 sm:$0xff]   ;;  %v21158_v9 = vld [vmem:[#allocation7 + $0x194] ss:$8 sps:$4 sm:$0xff]   ;;  %v21156_v44 = vld [vmem:[#allocation7 + $0x190] ss:$8 sps:$4 sm:$0xff]  }
 0x5be   : > { %v24699_v3 = vpack.c.bf16 %v4078_v58, %v4077_v33  ;;  %v24701_v11 = vpack.c.bf16 %v4080_v57, %v4079_v41  ;;  %v21164_v54 = vld [vmem:[#allocation7 + $0x1a4] ss:$8 sps:$4 sm:$0xff]   ;;  %v21095_v19 = vld [vmem:[#allocation7 + $0x20] ss:$8 sps:$4 sm:$0xff]   ;;  %v21100_v42 = vld [vmem:[#allocation7 + $0x34] ss:$8 sps:$4 sm:$0xff]  }
 0x5bf   : > { %20318 = vmatpush3.bf16.msra.mxu0 %v24695_v18  ;;  %20342 = vmatpush3.bf16.msra.mxu1 %v24695_v18  ;;  %v21162_v32 = vld [vmem:[#allocation7 + $0x1a0] ss:$8 sps:$4 sm:$0xff]   ;;  %v21170_v0 = vld [vmem:[#allocation7 + $0x1b4] ss:$8 sps:$4 sm:$0xff]   ;;  %v21098_v24 = vld [vmem:[#allocation7 + $0x30] ss:$8 sps:$4 sm:$0xff]  }
 0x5c0   : > { %20319 = vmatprep.subr.bf16.mxu0 %v23398_v62  ;;  %20343 = vmatprep.subr.bf16.mxu1 %v23398_v62  ;;  %v21107_v48 = vld [vmem:[#allocation7 + $0x44] ss:$8 sps:$4 sm:$0xff]   ;;  %v21168_v12 = vld [vmem:[#allocation7 + $0x1b0] ss:$8 sps:$4 sm:$0xff]   ;;  %v21105_v7 = vld [vmem:[#allocation7 + $0x40] ss:$8 sps:$4 sm:$0xff]  }
 0x5c1   : > { %v21176_v34 = vld [vmem:[#allocation7 + $0x1c4] ss:$8 sps:$4 sm:$0xff]   ;;  %v21113_v43 = vld [vmem:[#allocation7 + $0x54] ss:$8 sps:$4 sm:$0xff]   ;;  %v21174_v29 = vld [vmem:[#allocation7 + $0x1c0] ss:$8 sps:$4 sm:$0xff]  }
 0x5c2   : > { %v21179_v5 = vld [vmem:[#allocation7 + $0x1d4] ss:$8 sps:$4 sm:$0xff]   ;;  %v21111_v39 = vld [vmem:[#allocation7 + $0x50] ss:$8 sps:$4 sm:$0xff]   ;;  %v21119_v53 = vld [vmem:[#allocation7 + $0x64] ss:$8 sps:$4 sm:$0xff]  }
 0x5c3   : > { %20320 = vmatpush3.bf16.msra.mxu0 %v24697_v26  ;;  %20344 = vmatpush3.bf16.msra.mxu1 %v24697_v26  ;;  %v21177_v33 = vld [vmem:[#allocation7 + $0x1d0] ss:$8 sps:$4 sm:$0xff]   ;;  %v21182_v58 = vld [vmem:[#allocation7 + $0x1e4] ss:$8 sps:$4 sm:$0xff]   ;;  %v21117_v41 = vld [vmem:[#allocation7 + $0x60] ss:$8 sps:$4 sm:$0xff]  }
 0x5c4   : > { %20321 = vmatprep.subr.bf16.mxu0 %v23398_v62  ;;  %20345 = vmatprep.subr.bf16.mxu1 %v23398_v62  ;;  %v21125_v57 = vld [vmem:[#allocation7 + $0x74] ss:$8 sps:$4 sm:$0xff]  }
 0x5c7   : > { %20322 = vmatpush3.bf16.msra.mxu0 %v24699_v3  ;;  %20346 = vmatpush3.bf16.msra.mxu1 %v24699_v3 }
 0x5c8   : > { %20323 = vmatprep.subr.bf16.mxu0 %v23398_v62  ;;  %20347 = vmatprep.subr.bf16.mxu1 %v23398_v62 }
 0x5cb   : > { %20324 = vmatpush3.bf16.msra.mxu0 %v24701_v11  ;;  %20348 = vmatpush3.bf16.msra.mxu1 %v24701_v11 }
 0x5cc   : > { %20329 = vmatprep.subr.bf16.mxu0 %v23398_v62  ;;  %20365 = vmatprep.subr.bf16.mxu1 %v23398_v62 }
 0x5ce   : > { %20326 = vmatmul.mubr.msk.bf16.vlgmr.msra.gmra.mrb[176].mxu0 %vm3092_vm1, %v21074_v15  ;;  %20350 = vmatmul.mubr.msk.bf16.vlgmr.msra.gmra.mrb[176].mxu1 %vm3092_vm1, %v21075_v2  ;;  %v21183_v15 = vld [vmem:[#allocation7 + $0x1f0] ss:$8 sps:$4 sm:$0xff]   ;;  %v21188_v2 = vld [vmem:[#allocation7 + $0x204] ss:$8 sps:$4 sm:$0xff]  }
 0x5cf   : > { %20330 = vmatpush3.bf16.msra.mxu0 %v24695_v18  ;;  %20366 = vmatpush3.bf16.msra.mxu1 %v24695_v18 }
 0x5d0   : > { %20331 = vmatprep.subr.bf16.mxu0 %v23398_v62  ;;  %20367 = vmatprep.subr.bf16.mxu1 %v23398_v62 }
 0x5d1   : > { %20337 = vmatprep.mubr.msk.bf16.mxu0 %vm23399_vm2, %v23398_v62  ;;  %20373 = vmatprep.mubr.msk.bf16.mxu1 %vm23399_vm2, %v23398_v62 }
 0x5d3   : > { %20332 = vmatpush3.bf16.msra.mxu0 %v24697_v26  ;;  %20368 = vmatpush3.bf16.msra.mxu1 %v24697_v26 }
 0x5d4   : > { %20333 = vmatprep.subr.bf16.mxu0 %v23398_v62  ;;  %20369 = vmatprep.subr.bf16.mxu1 %v23398_v62 }
 0x5d7   : > { %20334 = vmatpush3.bf16.msra.mxu0 %v24699_v3  ;;  %20370 = vmatpush3.bf16.msra.mxu1 %v24699_v3 }
 0x5d8   : > { %20335 = vmatprep.subr.bf16.mxu0 %v23398_v62  ;;  %20371 = vmatprep.subr.bf16.mxu1 %v23398_v62 }
 0x5db   : > { %20336 = vmatpush3.bf16.msra.mxu0 %v24701_v11  ;;  %20372 = vmatpush3.bf16.msra.mxu1 %v24701_v11 }
 0x5dc   : > { %20353 = vmatprep.subr.bf16.mxu0 %v23398_v62  ;;  %20389 = vmatprep.subr.bf16.mxu1 %v23398_v62 }
 0x5de   : > { %20338 = vmatmul.mubr.msk.bf16.vlgmr.msra.gmra.mrb[180].mxu0 %vm3092_vm1, %v21076_v1  ;;  %20374 = vmatmul.mubr.msk.bf16.vlgmr.msra.gmra.mrb[180].mxu1 %vm3092_vm1, %v21077_v22  ;;  %v21129_v1 = vld [vmem:[#allocation7 + $0x80] ss:$8 sps:$4 sm:$0xff]   ;;  %v21137_v22 = vld [vmem:[#allocation7 + $0x94] ss:$8 sps:$4 sm:$0xff]  }
 0x5df   : > { %20354 = vmatpush3.bf16.msra.mxu0 %v24695_v18  ;;  %20390 = vmatpush3.bf16.msra.mxu1 %v24695_v18 }
 0x5e0   : > { %20355 = vmatprep.subr.bf16.mxu0 %v23398_v62  ;;  %20391 = vmatprep.subr.bf16.mxu1 %v23398_v62 }
 0x5e1   : > { %20361 = vmatprep.mubr.msk.bf16.mxu0 %vm23399_vm2, %v23398_v62  ;;  %20397 = vmatprep.mubr.msk.bf16.mxu1 %vm23399_vm2, %v23398_v62 }
 0x5e3   : > { %20356 = vmatpush3.bf16.msra.mxu0 %v24697_v26  ;;  %20392 = vmatpush3.bf16.msra.mxu1 %v24697_v26 }
 0x5e4   : > { %20357 = vmatprep.subr.bf16.mxu0 %v23398_v62  ;;  %20393 = vmatprep.subr.bf16.mxu1 %v23398_v62 }
 0x5e7   : > { %20358 = vmatpush3.bf16.msra.mxu0 %v24699_v3  ;;  %20394 = vmatpush3.bf16.msra.mxu1 %v24699_v3 }
 0x5e8   : > { %20359 = vmatprep.subr.bf16.mxu0 %v23398_v62  ;;  %20395 = vmatprep.subr.bf16.mxu1 %v23398_v62 }
 0x5eb   : > { %20360 = vmatpush3.bf16.msra.mxu0 %v24701_v11  ;;  %20396 = vmatpush3.bf16.msra.mxu1 %v24701_v11 }
 0x5ec   : > { %20377 = vmatprep.subr.bf16.mxu0 %v23398_v62  ;;  %20413 = vmatprep.subr.bf16.mxu1 %v23398_v62 }
 0x5ee   : > { %20362 = vmatmul.mubr.msk.bf16.vlgmr.msra.gmra.mrb[184].mxu0 %vm3092_vm1, %v21078_v23  ;;  %20398 = vmatmul.mubr.msk.bf16.vlgmr.msra.gmra.mrb[184].mxu1 %vm3092_vm1, %v21079_v16  ;;  %v21135_v23 = vld [vmem:[#allocation7 + $0x90] ss:$8 sps:$4 sm:$0xff]   ;;  %v21143_v16 = vld [vmem:[#allocation7 + $0xa4] ss:$8 sps:$4 sm:$0xff]  }
 0x5ef   : > { %20378 = vmatpush3.bf16.msra.mxu0 %v24695_v18  ;;  %20414 = vmatpush3.bf16.msra.mxu1 %v24695_v18 }
 0x5f0   : > { %20379 = vmatprep.subr.bf16.mxu0 %v23398_v62  ;;  %20415 = vmatprep.subr.bf16.mxu1 %v23398_v62 }
 0x5f1   : > { %20385 = vmatprep.mubr.msk.bf16.mxu0 %vm23399_vm2, %v23398_v62  ;;  %20421 = vmatprep.mubr.msk.bf16.mxu1 %vm23399_vm2, %v23398_v62 }
 0x5f3   : > { %20380 = vmatpush3.bf16.msra.mxu0 %v24697_v26  ;;  %20416 = vmatpush3.bf16.msra.mxu1 %v24697_v26 }
 0x5f4   : > { %20381 = vmatprep.subr.bf16.mxu0 %v23398_v62  ;;  %20417 = vmatprep.subr.bf16.mxu1 %v23398_v62 }
 0x5f7   : > { %20382 = vmatpush3.bf16.msra.mxu0 %v24699_v3  ;;  %20418 = vmatpush3.bf16.msra.mxu1 %v24699_v3 }
 0x5f8   : > { %20383 = vmatprep.subr.bf16.mxu0 %v23398_v62  ;;  %20419 = vmatprep.subr.bf16.mxu1 %v23398_v62 }
 0x5fb   : > { %20384 = vmatpush3.bf16.msra.mxu0 %v24701_v11  ;;  %20420 = vmatpush3.bf16.msra.mxu1 %v24701_v11 }
 0x5fc   : > { %20401 = vmatprep.subr.bf16.mxu0 %v23398_v62  ;;  %20437 = vmatprep.subr.bf16.mxu1 %v23398_v62 }
 0x5fe   : > { %20386 = vmatmul.mubr.msk.bf16.vlgmr.msra.gmra.mrb[188].mxu0 %vm3092_vm1, %v21080_v49  ;;  %20422 = vmatmul.mubr.msk.bf16.vlgmr.msra.gmra.mrb[188].mxu1 %vm3092_vm1, %v21081_v47  ;;  %v21141_v49 = vld [vmem:[#allocation7 + $0xa0] ss:$8 sps:$4 sm:$0xff]   ;;  %v21149_v47 = vld [vmem:[#allocation7 + $0xb4] ss:$8 sps:$4 sm:$0xff]  }
 0x5ff   : > { %20402 = vmatpush3.bf16.msra.mxu0 %v24695_v18  ;;  %20438 = vmatpush3.bf16.msra.mxu1 %v24695_v18 }
 0x600   : > { %20403 = vmatprep.subr.bf16.mxu0 %v23398_v62  ;;  %20439 = vmatprep.subr.bf16.mxu1 %v23398_v62 }
 0x601   : > { %20409 = vmatprep.mubr.msk.bf16.mxu0 %vm23399_vm2, %v23398_v62  ;;  %20445 = vmatprep.mubr.msk.bf16.mxu1 %vm23399_vm2, %v23398_v62 }
 0x603   : > { %20404 = vmatpush3.bf16.msra.mxu0 %v24697_v26  ;;  %20440 = vmatpush3.bf16.msra.mxu1 %v24697_v26 }
 0x604   : > { %20405 = vmatprep.subr.bf16.mxu0 %v23398_v62  ;;  %20441 = vmatprep.subr.bf16.mxu1 %v23398_v62 }
 0x607   : > { %20406 = vmatpush3.bf16.msra.mxu0 %v24699_v3  ;;  %20442 = vmatpush3.bf16.msra.mxu1 %v24699_v3 }
 0x608   : > { %20407 = vmatprep.subr.bf16.mxu0 %v23398_v62  ;;  %20443 = vmatprep.subr.bf16.mxu1 %v23398_v62 }
 0x60b   : > { %20408 = vmatpush3.bf16.msra.mxu0 %v24701_v11  ;;  %20444 = vmatpush3.bf16.msra.mxu1 %v24701_v11 }
 0x60c   : > { %20425 = vmatprep.subr.bf16.mxu0 %v23398_v62  ;;  %20461 = vmatprep.subr.bf16.mxu1 %v23398_v62 }
 0x60e   : > { %20410 = vmatmul.mubr.msk.bf16.vlgmr.msra.gmra.mrb[192].mxu0 %vm3092_vm1, %v21082_v55  ;;  %20446 = vmatmul.mubr.msk.bf16.vlgmr.msra.gmra.mrb[192].mxu1 %vm3092_vm1, %v21083_v50  ;;  %v21147_v55 = vld [vmem:[#allocation7 + $0xb0] ss:$8 sps:$4 sm:$0xff]   ;;  %v21155_v50 = vld [vmem:[#allocation7 + $0xc4] ss:$8 sps:$4 sm:$0xff]  }
 0x60f   : > { %20426 = vmatpush3.bf16.msra.mxu0 %v24695_v18  ;;  %20462 = vmatpush3.bf16.msra.mxu1 %v24695_v18 }
 0x610   : > { %20427 = vmatprep.subr.bf16.mxu0 %v23398_v62  ;;  %20463 = vmatprep.subr.bf16.mxu1 %v23398_v62 }
 0x611   : > { %20433 = vmatprep.mubr.msk.bf16.mxu0 %vm23399_vm2, %v23398_v62  ;;  %20469 = vmatprep.mubr.msk.bf16.mxu1 %vm23399_vm2, %v23398_v62 }
 0x613   : > { %20428 = vmatpush3.bf16.msra.mxu0 %v24697_v26  ;;  %20464 = vmatpush3.bf16.msra.mxu1 %v24697_v26 }
 0x614   : > { %20429 = vmatprep.subr.bf16.mxu0 %v23398_v62  ;;  %20465 = vmatprep.subr.bf16.mxu1 %v23398_v62 }
 0x617   : > { %20430 = vmatpush3.bf16.msra.mxu0 %v24699_v3  ;;  %20466 = vmatpush3.bf16.msra.mxu1 %v24699_v3 }
 0x618   : > { %20431 = vmatprep.subr.bf16.mxu0 %v23398_v62  ;;  %20467 = vmatprep.subr.bf16.mxu1 %v23398_v62 }
 0x61b   : > { %20432 = vmatpush3.bf16.msra.mxu0 %v24701_v11  ;;  %20468 = vmatpush3.bf16.msra.mxu1 %v24701_v11 }
 0x61c   : > { %20449 = vmatprep.subr.bf16.mxu0 %v23398_v62  ;;  %20485 = vmatprep.subr.bf16.mxu1 %v23398_v62 }
 0x61e   : > { %20434 = vmatmul.mubr.msk.bf16.vlgmr.msra.gmra.mrb[196].mxu0 %vm3092_vm1, %v21084_v10  ;;  %20470 = vmatmul.mubr.msk.bf16.vlgmr.msra.gmra.mrb[196].mxu1 %vm3092_vm1, %v21085_v56  ;;  %v21153_v10 = vld [vmem:[#allocation7 + $0xc0] ss:$8 sps:$4 sm:$0xff]   ;;  %v21161_v56 = vld [vmem:[#allocation7 + $0xd4] ss:$8 sps:$4 sm:$0xff]  }
 0x61f   : > { %20450 = vmatpush3.bf16.msra.mxu0 %v24695_v18  ;;  %20486 = vmatpush3.bf16.msra.mxu1 %v24695_v18 }
 0x620   : > { %20451 = vmatprep.subr.bf16.mxu0 %v23398_v62  ;;  %20487 = vmatprep.subr.bf16.mxu1 %v23398_v62 }
 0x621   : > { %20457 = vmatprep.mubr.msk.bf16.mxu0 %vm23399_vm2, %v23398_v62  ;;  %20493 = vmatprep.mubr.msk.bf16.mxu1 %vm23399_vm2, %v23398_v62 }
 0x623   : > { %20452 = vmatpush3.bf16.msra.mxu0 %v24697_v26  ;;  %20488 = vmatpush3.bf16.msra.mxu1 %v24697_v26 }
 0x624   : > { %20453 = vmatprep.subr.bf16.mxu0 %v23398_v62  ;;  %20489 = vmatprep.subr.bf16.mxu1 %v23398_v62 }
 0x627   : > { %20454 = vmatpush3.bf16.msra.mxu0 %v24699_v3  ;;  %20490 = vmatpush3.bf16.msra.mxu1 %v24699_v3 }
 0x628   : > { %20455 = vmatprep.subr.bf16.mxu0 %v23398_v62  ;;  %20491 = vmatprep.subr.bf16.mxu1 %v23398_v62 }
 0x62b   : > { %20456 = vmatpush3.bf16.msra.mxu0 %v24701_v11  ;;  %20492 = vmatpush3.bf16.msra.mxu1 %v24701_v11 }
 0x62c   : > { %20473 = vmatprep.subr.bf16.mxu0 %v23398_v62  ;;  %6523 = vmatprep.subr.bf16.mxu1 %v21103_v36  ;;  %v21159_v36 = vld [vmem:[#allocation7 + $0xd0] ss:$8 sps:$4 sm:$0xff]  }
 0x62e   : > { %20458 = vmatmul.mubr.msk.bf16.vlgmr.msra.gmra.mrb[200].mxu0 %vm3092_vm1, %v21086_v63  ;;  %20494 = vmatmul.mubr.msk.bf16.vlgmr.msra.gmra.mrb[200].mxu1 %vm3092_vm1, %v21104_v27  ;;  %v21167_v63 = vld [vmem:[#allocation7 + $0xe4] ss:$8 sps:$4 sm:$0xff]   ;;  %v21165_v27 = vld [vmem:[#allocation7 + $0xe0] ss:$8 sps:$4 sm:$0xff]  }
 0x62f   : > { %20474 = vmatpush3.bf16.msra.mxu0 %v24695_v18  ;;  %20481 = vmatprep.mubr.msk.bf16.mxu0 %vm23399_vm2, %v23398_v62 }
 0x630   : > { %20475 = vmatprep.subr.bf16.mxu0 %v23398_v62  ;;  %6524 = vmatpush1.bf16.msra.mxu1 %v21101_v40  ;;  %v21173_v40 = vld [vmem:[#allocation7 + $0xf4] ss:$8 sps:$4 sm:$0xff]  }
 0x631   : > { %6525 = vmatprep.subr.bf16.mxu1 %v21110_v13  ;;  %v21171_v13 = vld [vmem:[#allocation7 + $0xf0] ss:$8 sps:$4 sm:$0xff]  }
 0x633   : > { %20476 = vmatpush3.bf16.msra.mxu0 %v24697_v26 }
 0x634   : > { %20477 = vmatprep.subr.bf16.mxu0 %v23398_v62  ;;  %6526 = vmatpush1.bf16.msra.mxu1 %v21108_v4 }
 0x635   : > { %6527 = vmatprep.subr.bf16.mxu1 %v21116_v6 }
 0x637   : > { %20478 = vmatpush3.bf16.msra.mxu0 %v24699_v3 }
 0x638   : > { %20479 = vmatprep.subr.bf16.mxu0 %v23398_v62  ;;  %6528 = vmatpush1.bf16.msra.mxu1 %v21114_v52 }
 0x639   : > { %6529 = vmatprep.subr.bf16.mxu1 %v21122_v8 }
 0x63b   : > { %20480 = vmatpush3.bf16.msra.mxu0 %v24701_v11 }
 0x63c   : > { %20497 = vmatprep.subr.bf16.mxu0 %v23398_v62  ;;  %6530 = vmatpush1.bf16.msra.mxu1 %v21120_v61 }
 0x63d   : > { %6531 = vmatprep.subr.bf16.mxu1 %v21128_v60 }
 0x63e   : > { %20482 = vmatmul.mubr.msk.bf16.vlgmr.msra.gmra.mrb[204].mxu0 %vm3092_vm1, %v21087_v20 }
 0x63f   : > { %20498 = vmatpush3.bf16.msra.mxu0 %v24695_v18  ;;  %20505 = vmatprep.mubr.msk.bf16.mxu0 %vm23399_vm2, %v23398_v62  ;;  %v21180_v18 = vld [vmem:[#allocation7 + $0x1e0] ss:$8 sps:$4 sm:$0xff]   ;;  %vm15481_vm2 = vcmask 1044480  }
 0x640   : > { %20499 = vmatprep.subr.bf16.mxu0 %v23398_v62  ;;  %6532 = vmatpush1.bf16.msra.mxu1 %v21126_v37 }
 0x641   : > { %6533 = vmatprep.subr.bf16.mxu1 %v21134_v45 }
 0x643   : > { %20500 = vmatpush3.bf16.msra.mxu0 %v24697_v26  ;;  %v21185_v26 = vld [vmem:[#allocation7 + $0x1f4] ss:$8 sps:$4 sm:$0xff]  }
 0x644   : > { %20501 = vmatprep.subr.bf16.mxu0 %v23398_v62  ;;  %6534 = vmatpush1.bf16.msra.mxu1 %v21132_v28 }
 0x645   : > { %6535 = vmatprep.subr.bf16.mxu1 %v21140_v35 }
 0x647   : > { %20502 = vmatpush3.bf16.msra.mxu0 %v24699_v3  ;;  %v21123_v3 = vld [vmem:[#allocation7 + $0x70] ss:$8 sps:$4 sm:$0xff]  }
 0x648   : > { %20503 = vmatprep.subr.bf16.mxu0 %v23398_v62  ;;  %6536 = vmatpush1.bf16.msra.mxu1 %v21138_v25  ;;  %v21097_v62 = vld [vmem:[#allocation7 + $0x24] ss:$8 sps:$4 sm:$0xff]  }
 0x649   : > { %6537 = vmatprep.subr.bf16.mxu1 %v21146_v38 }
 0x64b   : > { %20504 = vmatpush3.bf16.msra.mxu0 %v24701_v11  ;;  %v21131_v11 = vld [vmem:[#allocation7 + $0x84] ss:$8 sps:$4 sm:$0xff]  }
 0x64c   : > { %6480 = vmatprep.subr.bf16.mxu0 %v21090_v14  ;;  %6538 = vmatpush1.bf16.msra.mxu1 %v21144_v31 }
 0x64d   : > { %6539 = vmatprep.subr.bf16.mxu1 %v21152_v21 }
 0x64e   : > { %20506 = vmatmul.mubr.msk.bf16.vlgmr.msra.gmra.mrb[208].mxu0 %vm3092_vm1, %v21091_v59  ;;  %vm15480_vm1 = vcmask 1043456  }
 0x64f   : > { %6481 = vmatpush1.bf16.msra.mxu0 %v21088_v46 }
 0x650   : > { %6482 = vmatprep.subr.bf16.mxu0 %v21094_v51  ;;  %6540 = vmatpush1.bf16.msra.mxu1 %v21150_v17 }
 0x651   : > { %6541 = vmatprep.subr.bf16.mxu1 %v21158_v9 }
 0x653   : > { %6483 = vmatpush1.bf16.msra.mxu0 %v21092_v30 }
 0x654   : > { %6484 = vmatprep.subr.bf16.mxu0 %v21097_v62  ;;  %6542 = vmatpush1.bf16.msra.mxu1 %v21156_v44 }
 0x655   : > { %6543 = vmatprep.subr.bf16.mxu1 %v21164_v54 }
 0x657   : > { %6485 = vmatpush1.bf16.msra.mxu0 %v21095_v19 }
 0x658   : > { %6486 = vmatprep.subr.bf16.mxu0 %v21100_v42  ;;  %6544 = vmatpush1.bf16.msra.mxu1 %v21162_v32  ;;  %v21186_v32 = vld [vmem:[#allocation7 + $0x200] ss:$8 sps:$4 sm:$0xff]  }
 0x659   : > { %6545 = vmatprep.subr.bf16.mxu1 %v21170_v0 }
 0x65b   : > { %6487 = vmatpush1.bf16.msra.mxu0 %v21098_v24 }
 0x65c   : > { %6488 = vmatprep.subr.bf16.mxu0 %v21107_v48  ;;  %6546 = vmatpush1.bf16.msra.mxu1 %v21168_v12  ;;  %v21191_v12 = vld [vmem:[#allocation7 + $0x214] ss:$8 sps:$4 sm:$0xff]  }
 0x65d   : > { %6547 = vmatprep.subr.bf16.mxu1 %v21176_v34  ;;  %v21189_v34 = vld [vmem:[#allocation7 + $0x210] ss:$8 sps:$4 sm:$0xff]  }
 0x65f   : > { %6489 = vmatpush1.bf16.msra.mxu0 %v21105_v7  ;;  %v21194_v7 = vld [vmem:[#allocation7 + $0x224] ss:$8 sps:$4 sm:$0xff]  }
 0x660   : > { %6490 = vmatprep.subr.bf16.mxu0 %v21113_v43  ;;  %6548 = vmatpush1.bf16.msra.mxu1 %v21174_v29  ;;  %v21192_v43 = vld [vmem:[#allocation7 + $0x220] ss:$8 sps:$4 sm:$0xff]   ;;  %v21197_v29 = vld [vmem:[#allocation7 + $0x234] ss:$8 sps:$4 sm:$0xff]  }
 0x661   : > { %6549 = vmatprep.subr.bf16.mxu1 %v21179_v5  ;;  %v21195_v5 = vld [vmem:[#allocation7 + $0x230] ss:$8 sps:$4 sm:$0xff]  }
 0x663   : > { %6491 = vmatpush1.bf16.msra.mxu0 %v21111_v39  ;;  %v21200_v39 = vld [vmem:[#allocation7 + $0x244] ss:$8 sps:$4 sm:$0xff]  }
 0x664   : > { %6492 = vmatprep.subr.bf16.mxu0 %v21119_v53  ;;  %6550 = vmatpush1.bf16.msra.mxu1 %v21177_v33 }
 0x665   : > { %6551 = vmatprep.subr.bf16.mxu1 %v21182_v58 }
 0x667   : > { %6493 = vmatpush1.bf16.msra.mxu0 %v21117_v41 }
 0x668   : > { %6494 = vmatprep.subr.bf16.mxu0 %v21125_v57  ;;  %6552 = vmatpush1.bf16.msra.mxu1 %v21180_v18 }
 0x669   : > { %6553 = vmatprep.subr.bf16.mxu1 %v21185_v26  ;;  %v21198_v26 = vld [vmem:[#allocation7 + $0x240] ss:$8 sps:$4 sm:$0xff]  }
 0x66b   : > { %6495 = vmatpush1.bf16.msra.mxu0 %v21123_v3 }
 0x66c   : > { %6496 = vmatprep.subr.bf16.mxu0 %v21131_v11  ;;  %6554 = vmatpush1.bf16.msra.mxu1 %v21183_v15 }
 0x66d   : > { %6566 = vmatprep.subr.bf16.mxu1 %v21188_v2 }
 0x66f   : > { %6497 = vmatpush1.bf16.msra.mxu0 %v21129_v1  ;;  %v21203_v1 = vld [vmem:[#allocation7 + $0x254] ss:$8 sps:$4 sm:$0xff]  }
 0x670   : > { %6498 = vmatprep.subr.bf16.mxu0 %v21137_v22  ;;  %v21201_v22 = vld [vmem:[#allocation7 + $0x250] ss:$8 sps:$4 sm:$0xff]  }
 0x673   : > { %6499 = vmatpush1.bf16.msra.mxu0 %v21135_v23  ;;  %v21206_v23 = vld [vmem:[#allocation7 + $0x264] ss:$8 sps:$4 sm:$0xff]  }
 0x674   : > { %6500 = vmatprep.subr.bf16.mxu0 %v21143_v16  ;;  %v21204_v16 = vld [vmem:[#allocation7 + $0x260] ss:$8 sps:$4 sm:$0xff]  }
 0x677   : > { %6501 = vmatpush1.bf16.msra.mxu0 %v21141_v49  ;;  %v21209_v49 = vld [vmem:[#allocation7 + $0x274] ss:$8 sps:$4 sm:$0xff]  }
 0x678   : > { %6502 = vmatprep.subr.bf16.mxu0 %v21149_v47  ;;  %v21207_v47 = vld [vmem:[#allocation7 + $0x270] ss:$8 sps:$4 sm:$0xff]  }
 0x67b   : > { %6503 = vmatpush1.bf16.msra.mxu0 %v21147_v55  ;;  %v21212_v55 = vld [vmem:[#allocation7 + $0x284] ss:$8 sps:$4 sm:$0xff]  }
 0x67c   : > { %6504 = vmatprep.subr.bf16.mxu0 %v21155_v50 }
 0x67f   : > { %6505 = vmatpush1.bf16.msra.mxu0 %v21153_v10 }
 0x680   : > { %6506 = vmatprep.subr.bf16.mxu0 %v21161_v56 }
 0x683   : > { %6507 = vmatpush1.bf16.msra.mxu0 %v21159_v36 }
 0x684   : > { %6508 = vmatprep.subr.bf16.mxu0 %v21167_v63 }
 0x687   : > { %6509 = vmatpush1.bf16.msra.mxu0 %v21165_v27 }
 0x688   : > { %6510 = vmatprep.subr.bf16.mxu0 %v21173_v40  ;;  %v21210_v40 = vld [vmem:[#allocation7 + $0x280] ss:$8 sps:$4 sm:$0xff]  }
 0x68b   : > { %6511 = vmatpush1.bf16.msra.mxu0 %v21171_v13 }
 0x6a1   : > { %v4129_v4 = vpop.f32.mrb[176].mxu0  ;;  %v4235_v6 = vpop.f32.mrb[176].mxu1 }
 0x6a2   : > { %v20327_v52 = vpop.f32.mrb[177].mxu0  ;;  %v20351_v8 = vpop.f32.mrb[177].mxu1 }
 0x6a3   : > { %v4132_v61 = vpop.f32.mrb[178].mxu0  ;;  %v4238_v60 = vpop.f32.mrb[178].mxu1  ;;  %v21215_v8 = vld [vmem:[#allocation7 + $0x294] ss:$8 sps:$4 sm:$0xff]  }
 0x6a4   : > { %v4136_v20 = vpack.c.bf16 %v4132_v61, %v4129_v4  ;;  %v20328_v37 = vpop.f32.mrb[179].mxu0  ;;  %v4242_v45 = vpack.c.bf16 %v4238_v60, %v4235_v6  ;;  %v20352_v28 = vpop.f32.mrb[179].mxu1  ;;  %v21213_v61 = vld [vmem:[#allocation7 + $0x290] ss:$8 sps:$4 sm:$0xff]   ;;  %v21218_v60 = vld [vmem:[#allocation7 + $0x2a4] ss:$8 sps:$4 sm:$0xff]  }
 0x6a5   : > { %v21221_v37 = vld [vmem:[#allocation7 + $0x2b4] ss:$8 sps:$4 sm:$0xff]   ;;  %v21224_v28 = vld [vmem:[#allocation7 + $0x2c4] ss:$8 sps:$4 sm:$0xff]  }
 0x6b1   : > { %v4182_v35 = vpop.f32.mrb[180].mxu0  ;;  %v24873_v25 = vpop.f32.mrb[180].mxu1 }
 0x6b2   : > { %v20339_v38 = vpop.f32.mrb[181].mxu0  ;;  %v20375_v14 = vpop.f32.mrb[181].mxu1 }
 0x6b3   : > { %v4185_v31 = vpop.f32.mrb[182].mxu0  ;;  %v24875_v21 = vpop.f32.mrb[182].mxu1 }
 0x6b4   : > { %v4189_v59 = vpack.c.bf16 %v4185_v31, %v4182_v35  ;;  %v20340_v46 = vpop.f32.mrb[183].mxu0  ;;  %v4348_v51 = vpack.c.bf16 %v24875_v21, %v24873_v25  ;;  %v20376_v17 = vpop.f32.mrb[183].mxu1  ;;  %v21222_v31 = vld [vmem:[#allocation7 + $0x2c0] ss:$8 sps:$4 sm:$0xff]  }
 0x6b5   : > { %v21227_v17 = vld [vmem:[#allocation7 + $0x2d4] ss:$8 sps:$4 sm:$0xff]   ;;  %v21246_v25 = vld [vmem:[#allocation7 + $0x340] ss:$8 sps:$4 sm:$0xff]  }
 0x6b6   : > { %6512 = vmatprep.mubr.bf16.mxu0 %v4189_v59 }
 0x6b7   : > { %6513 = vmatmul.mubr.bf16.vlgmr.msra.gmra.mrb[212].mxu0 %v4136_v20  ;;  %v21216_v20 = vld [vmem:[#allocation7 + $0x2a0] ss:$8 sps:$4 sm:$0xff]  }
 0x6c1   : > { %v4288_v9 = vpop.f32.mrb[184].mxu0  ;;  %v24879_v30 = vpop.f32.mrb[184].mxu1 }
 0x6c2   : > { %v20363_v62 = vpop.f32.mrb[185].mxu0  ;;  %v20399_v44 = vpop.f32.mrb[185].mxu1 }
 0x6c3   : > { %v4291_v54 = vpop.f32.mrb[186].mxu0  ;;  %v24881_v19 = vpop.f32.mrb[186].mxu1  ;;  %v21230_v44 = vld [vmem:[#allocation7 + $0x2e4] ss:$8 sps:$4 sm:$0xff]  }
 0x6c4   : > { %v4295_v42 = vpack.c.bf16 %v4291_v54, %v4288_v9  ;;  %v20364_v0 = vpop.f32.mrb[187].mxu0  ;;  %v4454_v24 = vpack.c.bf16 %v24881_v19, %v24879_v30  ;;  %v20400_v48 = vpop.f32.mrb[187].mxu1  ;;  %v21225_v9 = vld [vmem:[#allocation7 + $0x2d0] ss:$8 sps:$4 sm:$0xff]   ;;  %v21299_v30 = vld [vmem:[#allocation7 + $0x454] ss:$8 sps:$4 sm:$0xff]  }
 0x6c5   : > { %v21233_v0 = vld [vmem:[#allocation7 + $0x2f4] ss:$8 sps:$4 sm:$0xff]   ;;  %v21297_v19 = vld [vmem:[#allocation7 + $0x450] ss:$8 sps:$4 sm:$0xff]  }
 0x6c6   : > { %6555 = vmatprep.mubr.bf16.mxu1 %v4295_v42  ;;  %v21228_v42 = vld [vmem:[#allocation7 + $0x2e0] ss:$8 sps:$4 sm:$0xff]  }
 0x6c7   : > { %6556 = vmatmul.mubr.bf16.vlgmr.msra.gmra.mrb[204].mxu1 %v4242_v45  ;;  %v21219_v45 = vld [vmem:[#allocation7 + $0x2b0] ss:$8 sps:$4 sm:$0xff]  }
 0x6c8   : > { %6567 = vmatpush1.bf16.msra.mxu1 %v21186_v32 }
 0x6c9   : > { %6568 = vmatprep.subr.bf16.mxu1 %v21191_v12 }
 0x6cc   : > { %6569 = vmatpush1.bf16.msra.mxu1 %v21189_v34  ;;  %v21231_v34 = vld [vmem:[#allocation7 + $0x2f0] ss:$8 sps:$4 sm:$0xff]  }
 0x6cd   : > { %6570 = vmatprep.subr.bf16.mxu1 %v21194_v7  ;;  %v21236_v7 = vld [vmem:[#allocation7 + $0x304] ss:$8 sps:$4 sm:$0xff]  }
 0x6d0   : > { %6571 = vmatpush1.bf16.msra.mxu1 %v21192_v43 }
 0x6d1   : > { %6572 = vmatprep.subr.bf16.mxu1 %v21197_v29  ;;  %v4394_v53 = vpop.f32.mrb[188].mxu0  ;;  %v24885_v33 = vpop.f32.mrb[188].mxu1 }
 0x6d2   : > { %v20387_v58 = vpop.f32.mrb[189].mxu0  ;;  %v20423_v41 = vpop.f32.mrb[189].mxu1 }
 0x6d3   : > { %v4397_v57 = vpop.f32.mrb[190].mxu0  ;;  %v24887_v18 = vpop.f32.mrb[190].mxu1  ;;  %v21234_v41 = vld [vmem:[#allocation7 + $0x300] ss:$8 sps:$4 sm:$0xff]  }
 0x6d4   : > { %6573 = vmatpush1.bf16.msra.mxu1 %v21195_v5  ;;  %v4401_v3 = vpack.c.bf16 %v4397_v57, %v4394_v53  ;;  %v20388_v11 = vpop.f32.mrb[191].mxu0  ;;  %v4560_v15 = vpack.c.bf16 %v24887_v18, %v24885_v33  ;;  %v20424_v2 = vpop.f32.mrb[191].mxu1  ;;  %v21341_v33 = vld [vmem:[#allocation7 + $0x534] ss:$8 sps:$4 sm:$0xff]   ;;  %v21339_v18 = vld [vmem:[#allocation7 + $0x530] ss:$8 sps:$4 sm:$0xff]  }
 0x6d5   : > { %6574 = vmatprep.subr.bf16.mxu1 %v21200_v39  ;;  %v21239_v2 = vld [vmem:[#allocation7 + $0x314] ss:$8 sps:$4 sm:$0xff]  }
 0x6d6   : > { %6598 = vmatprep.mubr.bf16.mxu1 %v4401_v3 }
 0x6d8   : > { %6575 = vmatpush1.bf16.msra.mxu1 %v21198_v26 }
 0x6d9   : > { %6576 = vmatprep.subr.bf16.mxu1 %v21203_v1  ;;  %v21237_v1 = vld [vmem:[#allocation7 + $0x310] ss:$8 sps:$4 sm:$0xff]  }
 0x6dc   : > { %6577 = vmatpush1.bf16.msra.mxu1 %v21201_v22  ;;  %v21242_v22 = vld [vmem:[#allocation7 + $0x324] ss:$8 sps:$4 sm:$0xff]  }
 0x6dd   : > { %6578 = vmatprep.subr.bf16.mxu1 %v21206_v23  ;;  %v21240_v23 = vld [vmem:[#allocation7 + $0x320] ss:$8 sps:$4 sm:$0xff]  }
 0x6e0   : > { %6579 = vmatpush1.bf16.msra.mxu1 %v21204_v16  ;;  %v21245_v16 = vld [vmem:[#allocation7 + $0x334] ss:$8 sps:$4 sm:$0xff]  }
 0x6e1   : > { %6580 = vmatprep.subr.bf16.mxu1 %v21209_v49  ;;  %v24891_v50 = vpop.f32.mrb[192].mxu0  ;;  %v24893_v10 = vpop.f32.mrb[192].mxu1  ;;  %v21243_v49 = vld [vmem:[#allocation7 + $0x330] ss:$8 sps:$4 sm:$0xff]  }
 0x6e2   : > { %v20411_v56 = vpop.f32.mrb[193].mxu0  ;;  %v20447_v36 = vpop.f32.mrb[193].mxu1 }
 0x6e3   : > { %v24895_v63 = vpop.f32.mrb[194].mxu0  ;;  %v24897_v27 = vpop.f32.mrb[194].mxu1  ;;  %v21251_v36 = vld [vmem:[#allocation7 + $0x354] ss:$8 sps:$4 sm:$0xff]  }
 0x6e4   : > { %6581 = vmatpush1.bf16.msra.mxu1 %v21207_v47  ;;  %v4507_v13 = vpack.c.bf16 %v24895_v63, %v24891_v50  ;;  %v4666_v4 = vpack.c.bf16 %v24897_v27, %v24893_v10  ;;  %v20448_v6 = vpop.f32.mrb[195].mxu1  ;;  %v20412_v52 = vpop.f32.mrb[195].mxu0  ;;  %v21248_v47 = vld [vmem:[#allocation7 + $0x344] ss:$8 sps:$4 sm:$0xff]   ;;  %v21249_v63 = vld [vmem:[#allocation7 + $0x350] ss:$8 sps:$4 sm:$0xff]  }
 0x6e5   : > { %6582 = vmatprep.subr.bf16.mxu1 %v21212_v55  ;;  %v21257_v6 = vld [vmem:[#allocation7 + $0x374] ss:$8 sps:$4 sm:$0xff]   ;;  %v21255_v52 = vld [vmem:[#allocation7 + $0x370] ss:$8 sps:$4 sm:$0xff]  }
 0x6e6   : > { %v21395_v10 = vld [vmem:[#allocation7 + $0x654] ss:$8 sps:$4 sm:$0xff]   ;;  %v21393_v27 = vld [vmem:[#allocation7 + $0x650] ss:$8 sps:$4 sm:$0xff]  }
 0x6e8   : > { %6583 = vmatpush1.bf16.msra.mxu1 %v21210_v40  ;;  %v21254_v40 = vld [vmem:[#allocation7 + $0x364] ss:$8 sps:$4 sm:$0xff]  }
 0x6e9   : > { %6584 = vmatprep.subr.bf16.mxu1 %v21215_v8  ;;  %v21260_v8 = vld [vmem:[#allocation7 + $0x384] ss:$8 sps:$4 sm:$0xff]  }
 0x6ec   : > { %6585 = vmatpush1.bf16.msra.mxu1 %v21213_v61 }
 0x6ed   : > { %6586 = vmatprep.subr.bf16.mxu1 %v21218_v60 }
 0x6f0   : > { %6587 = vmatpush1.bf16.msra.mxu1 %v21216_v20 }
 0x6f1   : > { %6588 = vmatprep.subr.bf16.mxu1 %v21221_v37  ;;  %v24903_v35 = vpop.f32.mrb[196].mxu1  ;;  %v24909_v62 = vpop.f32.mrb[196].mxu0  ;;  %v21258_v37 = vld [vmem:[#allocation7 + $0x380] ss:$8 sps:$4 sm:$0xff]  }
 0x6f2   : > { %v20471_v38 = vpop.f32.mrb[197].mxu1  ;;  %v20435_v54 = vpop.f32.mrb[197].mxu0 }
 0x6f3   : > { %v24905_v14 = vpop.f32.mrb[198].mxu1  ;;  %v24911_v32 = vpop.f32.mrb[198].mxu0  ;;  %v21263_v38 = vld [vmem:[#allocation7 + $0x394] ss:$8 sps:$4 sm:$0xff]   ;;  %v21272_v54 = vld [vmem:[#allocation7 + $0x3c4] ss:$8 sps:$4 sm:$0xff]  }
 0x6f4   : > { %6589 = vmatpush1.bf16.msra.mxu1 %v21219_v45  ;;  %v4772_v59 = vpack.c.bf16 %v24905_v14, %v24903_v35  ;;  %v20472_v46 = vpop.f32.mrb[199].mxu1  ;;  %v4613_v48 = vpack.c.bf16 %v24911_v32, %v24909_v62  ;;  %v20436_v12 = vpop.f32.mrb[199].mxu0  ;;  %v21300_v62 = vld [vmem:[#allocation7 + $0x460] ss:$8 sps:$4 sm:$0xff]   ;;  %v21305_v32 = vld [vmem:[#allocation7 + $0x474] ss:$8 sps:$4 sm:$0xff]  }
 0x6f5   : > { %6590 = vmatprep.subr.bf16.mxu1 %v21224_v28  ;;  %v21266_v46 = vld [vmem:[#allocation7 + $0x3a4] ss:$8 sps:$4 sm:$0xff]   ;;  %v21273_v12 = vld [vmem:[#allocation7 + $0x3d0] ss:$8 sps:$4 sm:$0xff]   ;;  %v21443_v35 = vld [vmem:[#allocation7 + $0x754] ss:$8 sps:$4 sm:$0xff]  }
 0x6f6   : > { %v21441_v14 = vld [vmem:[#allocation7 + $0x750] ss:$8 sps:$4 sm:$0xff]  }
 0x6f8   : > { %6591 = vmatpush1.bf16.msra.mxu1 %v21222_v31  ;;  %v21261_v31 = vld [vmem:[#allocation7 + $0x390] ss:$8 sps:$4 sm:$0xff]  }
 0x6f9   : > { %6592 = vmatprep.subr.bf16.mxu1 %v21227_v17  ;;  %v21264_v17 = vld [vmem:[#allocation7 + $0x3a0] ss:$8 sps:$4 sm:$0xff]  }
 0x6fc   : > { %6593 = vmatpush1.bf16.msra.mxu1 %v21225_v9  ;;  %v21269_v9 = vld [vmem:[#allocation7 + $0x3b4] ss:$8 sps:$4 sm:$0xff]  }
 0x6fd   : > { %6594 = vmatprep.subr.bf16.mxu1 %v21230_v44  ;;  %v21267_v44 = vld [vmem:[#allocation7 + $0x3b0] ss:$8 sps:$4 sm:$0xff]  }
 0x700   : > { %6595 = vmatpush1.bf16.msra.mxu1 %v21228_v42  ;;  %v21270_v42 = vld [vmem:[#allocation7 + $0x3c0] ss:$8 sps:$4 sm:$0xff]  }
 0x701   : > { %6596 = vmatprep.subr.bf16.mxu1 %v21233_v0  ;;  %v24915_v43 = vpop.f32.mrb[200].mxu1  ;;  %v24917_v29 = vpop.f32.mrb[200].mxu0  ;;  %v21275_v0 = vld [vmem:[#allocation7 + $0x3d4] ss:$8 sps:$4 sm:$0xff]  }
 0x702   : > { %v20495_v5 = vpop.f32.mrb[201].mxu1  ;;  %v20459_v39 = vpop.f32.mrb[201].mxu0 }
 0x703   : > { %v24919_v53 = vpop.f32.mrb[202].mxu1  ;;  %v24921_v58 = vpop.f32.mrb[202].mxu0  ;;  %v21281_v5 = vld [vmem:[#allocation7 + $0x3f4] ss:$8 sps:$4 sm:$0xff]   ;;  %v21279_v39 = vld [vmem:[#allocation7 + $0x3f0] ss:$8 sps:$4 sm:$0xff]  }
 0x704   : > { %6597 = vmatpush1.bf16.msra.mxu1 %v21231_v34  ;;  %v4878_v57 = vpack.c.bf16 %v24919_v53, %v24915_v43  ;;  %v20496_v26 = vpop.f32.mrb[203].mxu1  ;;  %v4719_v3 = vpack.c.bf16 %v24921_v58, %v24917_v29  ;;  %v20460_v11 = vpop.f32.mrb[203].mxu0  ;;  %v21278_v34 = vld [vmem:[#allocation7 + $0x3e4] ss:$8 sps:$4 sm:$0xff]   ;;  %v21342_v29 = vld [vmem:[#allocation7 + $0x540] ss:$8 sps:$4 sm:$0xff]  }
 0x705   : > { %6609 = vmatprep.subr.bf16.mxu1 %v21236_v7  ;;  %v21276_v7 = vld [vmem:[#allocation7 + $0x3e0] ss:$8 sps:$4 sm:$0xff]   ;;  %v21287_v11 = vld [vmem:[#allocation7 + $0x414] ss:$8 sps:$4 sm:$0xff]  }
 0x706   : > { %v21282_v26 = vld [vmem:[#allocation7 + $0x400] ss:$8 sps:$4 sm:$0xff]   ;;  %v21347_v58 = vld [vmem:[#allocation7 + $0x554] ss:$8 sps:$4 sm:$0xff]  }
 0x707   : > { %6599 = vmatmul.mubr.bf16.vlgmr.msra.gmra.mrb[204].mxu1 %v4348_v51 }
 0x708   : > { %6610 = vmatpush1.bf16.msra.mxu1 %v21234_v41  ;;  %6641 = vmatprep.mubr.bf16.mxu1 %v4507_v13  ;;  %v21252_v13 = vld [vmem:[#allocation7 + $0x360] ss:$8 sps:$4 sm:$0xff]   ;;  %v21284_v41 = vld [vmem:[#allocation7 + $0x404] ss:$8 sps:$4 sm:$0xff]  }
 0x709   : > { %6611 = vmatprep.subr.bf16.mxu1 %v21239_v2  ;;  %v21285_v2 = vld [vmem:[#allocation7 + $0x410] ss:$8 sps:$4 sm:$0xff]  }
 0x70c   : > { %6612 = vmatpush1.bf16.msra.mxu1 %v21237_v1  ;;  %v21290_v1 = vld [vmem:[#allocation7 + $0x424] ss:$8 sps:$4 sm:$0xff]  }
 0x70d   : > { %6613 = vmatprep.subr.bf16.mxu1 %v21242_v22  ;;  %v21288_v22 = vld [vmem:[#allocation7 + $0x420] ss:$8 sps:$4 sm:$0xff]  }
 0x710   : > { %6614 = vmatpush1.bf16.msra.mxu1 %v21240_v23  ;;  %v21293_v23 = vld [vmem:[#allocation7 + $0x434] ss:$8 sps:$4 sm:$0xff]  }
 0x711   : > { %6615 = vmatprep.subr.bf16.mxu1 %v21245_v16  ;;  %v24930_v55 = vpop.f32.mrb[204].mxu0  ;;  %v21291_v16 = vld [vmem:[#allocation7 + $0x430] ss:$8 sps:$4 sm:$0xff]  }
 0x712   : > { %v20483_v50 = vpop.f32.mrb[205].mxu0 }
 0x713   : > { %v24932_v56 = vpop.f32.mrb[206].mxu0  ;;  %v21308_v50 = vld [vmem:[#allocation7 + $0x484] ss:$8 sps:$4 sm:$0xff]  }
 0x714   : > { %6616 = vmatpush1.bf16.msra.mxu1 %v21243_v49  ;;  %v4825_v21 = vpack.c.bf16 %v24932_v56, %v24930_v55  ;;  %v20484_v51 = vpop.f32.mrb[207].mxu0  ;;  %v21296_v49 = vld [vmem:[#allocation7 + $0x444] ss:$8 sps:$4 sm:$0xff]   ;;  %v21396_v55 = vld [vmem:[#allocation7 + $0x660] ss:$8 sps:$4 sm:$0xff]  }
 0x715   : > { %6617 = vmatprep.subr.bf16.mxu1 %v21248_v47  ;;  %v21294_v47 = vld [vmem:[#allocation7 + $0x440] ss:$8 sps:$4 sm:$0xff]   ;;  %v21311_v51 = vld [vmem:[#allocation7 + $0x494] ss:$8 sps:$4 sm:$0xff]  }
 0x716   : > { %v21401_v56 = vld [vmem:[#allocation7 + $0x674] ss:$8 sps:$4 sm:$0xff]  }
 0x718   : > { %6618 = vmatpush1.bf16.msra.mxu1 %v21246_v25  ;;  %v21306_v25 = vld [vmem:[#allocation7 + $0x480] ss:$8 sps:$4 sm:$0xff]  }
 0x719   : > { %6619 = vmatprep.subr.bf16.mxu1 %v21251_v36  ;;  %v21309_v36 = vld [vmem:[#allocation7 + $0x490] ss:$8 sps:$4 sm:$0xff]  }
 0x71c   : > { %6620 = vmatpush1.bf16.msra.mxu1 %v21249_v63  ;;  %v21314_v63 = vld [vmem:[#allocation7 + $0x4a4] ss:$8 sps:$4 sm:$0xff]  }
 0x71d   : > { %6621 = vmatprep.subr.bf16.mxu1 %v21254_v40  ;;  %v21312_v40 = vld [vmem:[#allocation7 + $0x4a0] ss:$8 sps:$4 sm:$0xff]  }
 0x720   : > { %6622 = vmatpush1.bf16.msra.mxu1 %v21252_v13  ;;  %v21317_v13 = vld [vmem:[#allocation7 + $0x4b4] ss:$8 sps:$4 sm:$0xff]  }
 0x721   : > { %6623 = vmatprep.subr.bf16.mxu1 %v21257_v6  ;;  %v24936_v61 = vpop.f32.mrb[208].mxu0  ;;  %v21315_v6 = vld [vmem:[#allocation7 + $0x4b0] ss:$8 sps:$4 sm:$0xff]  }
 0x722   : > { %v20507_v60 = vpop.f32.mrb[209].mxu0 }
 0x723   : > { %v24938_v20 = vpop.f32.mrb[210].mxu0  ;;  %v21323_v60 = vld [vmem:[#allocation7 + $0x4d4] ss:$8 sps:$4 sm:$0xff]  }
 0x724   : > { %6624 = vmatpush1.bf16.msra.mxu1 %v21255_v52  ;;  %v4931_v45 = vpack.c.bf16 %v24938_v20, %v24936_v61  ;;  %v20508_v28 = vpop.f32.mrb[211].mxu0  ;;  %v21320_v52 = vld [vmem:[#allocation7 + $0x4c4] ss:$8 sps:$4 sm:$0xff]   ;;  %v21444_v61 = vld [vmem:[#allocation7 + $0x760] ss:$8 sps:$4 sm:$0xff]  }
 0x725   : > { %6625 = vmatprep.subr.bf16.mxu1 %v21260_v8  ;;  %v21318_v8 = vld [vmem:[#allocation7 + $0x4c0] ss:$8 sps:$4 sm:$0xff]   ;;  %v21326_v28 = vld [vmem:[#allocation7 + $0x4e4] ss:$8 sps:$4 sm:$0xff]   ;;  %v21449_v20 = vld [vmem:[#allocation7 + $0x774] ss:$8 sps:$4 sm:$0xff]  }
 0x728   : > { %6626 = vmatpush1.bf16.msra.mxu1 %v21258_v37  ;;  %v21321_v37 = vld [vmem:[#allocation7 + $0x4d0] ss:$8 sps:$4 sm:$0xff]  }
 0x729   : > { %6627 = vmatprep.subr.bf16.mxu1 %v21263_v38  ;;  %v21324_v38 = vld [vmem:[#allocation7 + $0x4e0] ss:$8 sps:$4 sm:$0xff]  }
 0x72c   : > { %6628 = vmatpush1.bf16.msra.mxu1 %v21261_v31  ;;  %v21329_v31 = vld [vmem:[#allocation7 + $0x4f4] ss:$8 sps:$4 sm:$0xff]  }
 0x72d   : > { %6629 = vmatprep.subr.bf16.mxu1 %v21266_v46  ;;  %v21327_v46 = vld [vmem:[#allocation7 + $0x4f0] ss:$8 sps:$4 sm:$0xff]  }
 0x730   : > { %6630 = vmatpush1.bf16.msra.mxu1 %v21264_v17  ;;  %v21332_v17 = vld [vmem:[#allocation7 + $0x504] ss:$8 sps:$4 sm:$0xff]  }
 0x731   : > { %6631 = vmatprep.subr.bf16.mxu1 %v21269_v9  ;;  %v21330_v9 = vld [vmem:[#allocation7 + $0x500] ss:$8 sps:$4 sm:$0xff]  }
 0x734   : > { %6632 = vmatpush1.bf16.msra.mxu1 %v21267_v44  ;;  %v21335_v44 = vld [vmem:[#allocation7 + $0x514] ss:$8 sps:$4 sm:$0xff]  }
 0x735   : > { %6633 = vmatprep.subr.bf16.mxu1 %v21272_v54  ;;  %v21333_v54 = vld [vmem:[#allocation7 + $0x510] ss:$8 sps:$4 sm:$0xff]  }
 0x738   : > { %6634 = vmatpush1.bf16.msra.mxu1 %v21270_v42  ;;  %v21338_v42 = vld [vmem:[#allocation7 + $0x524] ss:$8 sps:$4 sm:$0xff]  }
 0x739   : > { %6635 = vmatprep.subr.bf16.mxu1 %v21275_v0 }
 0x73c   : > { %6636 = vmatpush1.bf16.msra.mxu1 %v21273_v12 }
 0x73d   : > { %6637 = vmatprep.subr.bf16.mxu1 %v21278_v34 }
 0x740   : > { %6638 = vmatpush1.bf16.msra.mxu1 %v21276_v7  ;;  %v21336_v7 = vld [vmem:[#allocation7 + $0x520] ss:$8 sps:$4 sm:$0xff]  }
 0x741   : > { %6639 = vmatprep.subr.bf16.mxu1 %v21281_v5 }
 0x744   : > { %6640 = vmatpush1.bf16.msra.mxu1 %v21279_v39  ;;  %v21350_v39 = vld [vmem:[#allocation7 + $0x564] ss:$8 sps:$4 sm:$0xff]  }
 0x745   : > { %6652 = vmatprep.subr.bf16.mxu1 %v21284_v41  ;;  %v21348_v41 = vld [vmem:[#allocation7 + $0x560] ss:$8 sps:$4 sm:$0xff]  }
 0x747   : > { %6642 = vmatmul.mubr.bf16.vlgmr.msra.gmra.mrb[204].mxu1 %v4454_v24  ;;  %v21302_v24 = vld [vmem:[#allocation7 + $0x464] ss:$8 sps:$4 sm:$0xff]  }
 0x748   : > { %6653 = vmatpush1.bf16.msra.mxu1 %v21282_v26  ;;  %6684 = vmatprep.mubr.bf16.mxu1 %v4613_v48  ;;  %v21303_v48 = vld [vmem:[#allocation7 + $0x470] ss:$8 sps:$4 sm:$0xff]   ;;  %v21353_v26 = vld [vmem:[#allocation7 + $0x574] ss:$8 sps:$4 sm:$0xff]  }
 0x749   : > { %6654 = vmatprep.subr.bf16.mxu1 %v21287_v11  ;;  %v21351_v11 = vld [vmem:[#allocation7 + $0x570] ss:$8 sps:$4 sm:$0xff]  }
 0x74c   : > { %6655 = vmatpush1.bf16.msra.mxu1 %v21285_v2  ;;  %v21356_v2 = vld [vmem:[#allocation7 + $0x584] ss:$8 sps:$4 sm:$0xff]  }
 0x74d   : > { %6656 = vmatprep.subr.bf16.mxu1 %v21290_v1  ;;  %v21354_v1 = vld [vmem:[#allocation7 + $0x580] ss:$8 sps:$4 sm:$0xff]  }
 0x750   : > { %6657 = vmatpush1.bf16.msra.mxu1 %v21288_v22  ;;  %v21359_v22 = vld [vmem:[#allocation7 + $0x594] ss:$8 sps:$4 sm:$0xff]  }
 0x751   : > { %6658 = vmatprep.subr.bf16.mxu1 %v21293_v23  ;;  %v21357_v23 = vld [vmem:[#allocation7 + $0x590] ss:$8 sps:$4 sm:$0xff]  }
 0x754   : > { %6659 = vmatpush1.bf16.msra.mxu1 %v21291_v16  ;;  %v21362_v16 = vld [vmem:[#allocation7 + $0x5a4] ss:$8 sps:$4 sm:$0xff]  }
 0x755   : > { %6660 = vmatprep.subr.bf16.mxu1 %v21296_v49  ;;  %v21360_v49 = vld [vmem:[#allocation7 + $0x5a0] ss:$8 sps:$4 sm:$0xff]  }
 0x758   : > { %6661 = vmatpush1.bf16.msra.mxu1 %v21294_v47  ;;  %v21365_v47 = vld [vmem:[#allocation7 + $0x5b4] ss:$8 sps:$4 sm:$0xff]  }
 0x759   : > { %6662 = vmatprep.subr.bf16.mxu1 %v21299_v30  ;;  %v21363_v30 = vld [vmem:[#allocation7 + $0x5b0] ss:$8 sps:$4 sm:$0xff]  }
 0x75c   : > { %6663 = vmatpush1.bf16.msra.mxu1 %v21297_v19  ;;  %v21368_v19 = vld [vmem:[#allocation7 + $0x5c4] ss:$8 sps:$4 sm:$0xff]  }
 0x75d   : > { %6664 = vmatprep.subr.bf16.mxu1 %v21302_v24  ;;  %v21366_v24 = vld [vmem:[#allocation7 + $0x5c0] ss:$8 sps:$4 sm:$0xff]  }
 0x760   : > { %6665 = vmatpush1.bf16.msra.mxu1 %v21300_v62  ;;  %v21371_v62 = vld [vmem:[#allocation7 + $0x5d4] ss:$8 sps:$4 sm:$0xff]  }
 0x761   : > { %6666 = vmatprep.subr.bf16.mxu1 %v21305_v32  ;;  %v21369_v32 = vld [vmem:[#allocation7 + $0x5d0] ss:$8 sps:$4 sm:$0xff]  }
 0x764   : > { %6667 = vmatpush1.bf16.msra.mxu1 %v21303_v48  ;;  %v21374_v48 = vld [vmem:[#allocation7 + $0x5e4] ss:$8 sps:$4 sm:$0xff]  }
 0x765   : > { %6668 = vmatprep.subr.bf16.mxu1 %v21308_v50  ;;  %v21372_v50 = vld [vmem:[#allocation7 + $0x5e0] ss:$8 sps:$4 sm:$0xff]  }
 0x768   : > { %6669 = vmatpush1.bf16.msra.mxu1 %v21306_v25  ;;  %v21377_v25 = vld [vmem:[#allocation7 + $0x5f4] ss:$8 sps:$4 sm:$0xff]  }
 0x769   : > { %6670 = vmatprep.subr.bf16.mxu1 %v21311_v51  ;;  %v21375_v51 = vld [vmem:[#allocation7 + $0x5f0] ss:$8 sps:$4 sm:$0xff]  }
 0x76c   : > { %6671 = vmatpush1.bf16.msra.mxu1 %v21309_v36  ;;  %v21380_v36 = vld [vmem:[#allocation7 + $0x604] ss:$8 sps:$4 sm:$0xff]  }
 0x76d   : > { %6672 = vmatprep.subr.bf16.mxu1 %v21314_v63  ;;  %v21378_v63 = vld [vmem:[#allocation7 + $0x600] ss:$8 sps:$4 sm:$0xff]  }
 0x770   : > { %6673 = vmatpush1.bf16.msra.mxu1 %v21312_v40  ;;  %v21383_v40 = vld [vmem:[#allocation7 + $0x614] ss:$8 sps:$4 sm:$0xff]  }
 0x771   : > { %6674 = vmatprep.subr.bf16.mxu1 %v21317_v13  ;;  %v21381_v13 = vld [vmem:[#allocation7 + $0x610] ss:$8 sps:$4 sm:$0xff]  }
 0x774   : > { %6675 = vmatpush1.bf16.msra.mxu1 %v21315_v6  ;;  %v21386_v6 = vld [vmem:[#allocation7 + $0x624] ss:$8 sps:$4 sm:$0xff]  }
 0x775   : > { %6676 = vmatprep.subr.bf16.mxu1 %v21320_v52  ;;  %v21384_v52 = vld [vmem:[#allocation7 + $0x620] ss:$8 sps:$4 sm:$0xff]  }
 0x778   : > { %6677 = vmatpush1.bf16.msra.mxu1 %v21318_v8  ;;  %v21389_v8 = vld [vmem:[#allocation7 + $0x634] ss:$8 sps:$4 sm:$0xff]  }
 0x779   : > { %6678 = vmatprep.subr.bf16.mxu1 %v21323_v60  ;;  %v21387_v60 = vld [vmem:[#allocation7 + $0x630] ss:$8 sps:$4 sm:$0xff]  }
 0x77c   : > { %6679 = vmatpush1.bf16.msra.mxu1 %v21321_v37  ;;  %v21392_v37 = vld [vmem:[#allocation7 + $0x644] ss:$8 sps:$4 sm:$0xff]  }
 0x77d   : > { %6680 = vmatprep.subr.bf16.mxu1 %v21326_v28  ;;  %v21390_v28 = vld [vmem:[#allocation7 + $0x640] ss:$8 sps:$4 sm:$0xff]  }
 0x780   : > { %6681 = vmatpush1.bf16.msra.mxu1 %v21324_v38  ;;  %v21404_v38 = vld [vmem:[#allocation7 + $0x684] ss:$8 sps:$4 sm:$0xff]  }
 0x781   : > { %6682 = vmatprep.subr.bf16.mxu1 %v21329_v31  ;;  %v21402_v31 = vld [vmem:[#allocation7 + $0x680] ss:$8 sps:$4 sm:$0xff]  }
 0x784   : > { %6683 = vmatpush1.bf16.msra.mxu1 %v21327_v46  ;;  %v21407_v46 = vld [vmem:[#allocation7 + $0x694] ss:$8 sps:$4 sm:$0xff]  }
 0x785   : > { %6695 = vmatprep.subr.bf16.mxu1 %v21332_v17  ;;  %v21405_v17 = vld [vmem:[#allocation7 + $0x690] ss:$8 sps:$4 sm:$0xff]  }
 0x787   : > { %6685 = vmatmul.mubr.bf16.vlgmr.msra.gmra.mrb[204].mxu1 %v4560_v15  ;;  %v21344_v15 = vld [vmem:[#allocation7 + $0x544] ss:$8 sps:$4 sm:$0xff]  }
 0x788   : > { %6696 = vmatpush1.bf16.msra.mxu1 %v21330_v9  ;;  %6727 = vmatprep.mubr.bf16.mxu1 %v4719_v3  ;;  %v21345_v3 = vld [vmem:[#allocation7 + $0x550] ss:$8 sps:$4 sm:$0xff]   ;;  %v21410_v9 = vld [vmem:[#allocation7 + $0x6a4] ss:$8 sps:$4 sm:$0xff]  }
 0x789   : > { %6697 = vmatprep.subr.bf16.mxu1 %v21335_v44  ;;  %v21408_v44 = vld [vmem:[#allocation7 + $0x6a0] ss:$8 sps:$4 sm:$0xff]  }
 0x78a   : > { %v24954_v0 = vpop.f32.mrb[212].mxu0 }
 0x78b   : > { %v24956_v12 = vpop.f32.mrb[213].mxu0 }
 0x78c   : > { %6698 = vmatpush1.bf16.msra.mxu1 %v21333_v54  ;;  %v24958_v34 = vpop.f32.mrb[214].mxu0  ;;  %v21413_v54 = vld [vmem:[#allocation7 + $0x6b4] ss:$8 sps:$4 sm:$0xff]  }
 0x78d   : > { %v24960_v5 = vpop.f32.mrb[215].mxu0  ;;  %6699 = vmatprep.subr.bf16.mxu1 %v21338_v42  ;;  %v21411_v42 = vld [vmem:[#allocation7 + $0x6b0] ss:$8 sps:$4 sm:$0xff]  }
 0x790   : > { %6700 = vmatpush1.bf16.msra.mxu1 %v21336_v7  ;;  %v21416_v7 = vld [vmem:[#allocation7 + $0x6c4] ss:$8 sps:$4 sm:$0xff]  }
 0x791   : > { %6701 = vmatprep.subr.bf16.mxu1 %v21341_v33  ;;  %v21414_v33 = vld [vmem:[#allocation7 + $0x6c0] ss:$8 sps:$4 sm:$0xff]  }
 0x794   : > { %6702 = vmatpush1.bf16.msra.mxu1 %v21339_v18  ;;  %v21419_v18 = vld [vmem:[#allocation7 + $0x6d4] ss:$8 sps:$4 sm:$0xff]  }
 0x795   : > { %6703 = vmatprep.subr.bf16.mxu1 %v21344_v15  ;;  %v21417_v15 = vld [vmem:[#allocation7 + $0x6d0] ss:$8 sps:$4 sm:$0xff]  }
 0x798   : > { %6704 = vmatpush1.bf16.msra.mxu1 %v21342_v29  ;;  %v21422_v29 = vld [vmem:[#allocation7 + $0x6e4] ss:$8 sps:$4 sm:$0xff]  }
 0x799   : > { %6705 = vmatprep.subr.bf16.mxu1 %v21347_v58  ;;  %v21420_v58 = vld [vmem:[#allocation7 + $0x6e0] ss:$8 sps:$4 sm:$0xff]  }
 0x79c   : > { %6706 = vmatpush1.bf16.msra.mxu1 %v21345_v3  ;;  %v21425_v3 = vld [vmem:[#allocation7 + $0x6f4] ss:$8 sps:$4 sm:$0xff]  }
 0x79d   : > { %6707 = vmatprep.subr.bf16.mxu1 %v21350_v39  ;;  %v21423_v39 = vld [vmem:[#allocation7 + $0x6f0] ss:$8 sps:$4 sm:$0xff]  }
 0x7a0   : > { %6708 = vmatpush1.bf16.msra.mxu1 %v21348_v41  ;;  %v21428_v41 = vld [vmem:[#allocation7 + $0x704] ss:$8 sps:$4 sm:$0xff]  }
 0x7a1   : > { %6709 = vmatprep.subr.bf16.mxu1 %v21353_v26  ;;  %v21426_v26 = vld [vmem:[#allocation7 + $0x700] ss:$8 sps:$4 sm:$0xff]  }
 0x7a4   : > { %6710 = vmatpush1.bf16.msra.mxu1 %v21351_v11  ;;  %v21431_v11 = vld [vmem:[#allocation7 + $0x714] ss:$8 sps:$4 sm:$0xff]  }
 0x7a5   : > { %6711 = vmatprep.subr.bf16.mxu1 %v21356_v2  ;;  %v21429_v2 = vld [vmem:[#allocation7 + $0x710] ss:$8 sps:$4 sm:$0xff]  }
 0x7a8   : > { %6712 = vmatpush1.bf16.msra.mxu1 %v21354_v1  ;;  %v21434_v1 = vld [vmem:[#allocation7 + $0x724] ss:$8 sps:$4 sm:$0xff]  }
 0x7a9   : > { %6713 = vmatprep.subr.bf16.mxu1 %v21359_v22  ;;  %v21432_v22 = vld [vmem:[#allocation7 + $0x720] ss:$8 sps:$4 sm:$0xff]  }
 0x7ac   : > { %6714 = vmatpush1.bf16.msra.mxu1 %v21357_v23  ;;  %v21437_v23 = vld [vmem:[#allocation7 + $0x734] ss:$8 sps:$4 sm:$0xff]  }
 0x7ad   : > { %6715 = vmatprep.subr.bf16.mxu1 %v21362_v16  ;;  %v21435_v16 = vld [vmem:[#allocation7 + $0x730] ss:$8 sps:$4 sm:$0xff]  }
 0x7b0   : > { %6716 = vmatpush1.bf16.msra.mxu1 %v21360_v49  ;;  %v21440_v49 = vld [vmem:[#allocation7 + $0x744] ss:$8 sps:$4 sm:$0xff]  }
 0x7b1   : > { %6717 = vmatprep.subr.bf16.mxu1 %v21365_v47  ;;  %v21438_v47 = vld [vmem:[#allocation7 + $0x740] ss:$8 sps:$4 sm:$0xff]  }
 0x7b4   : > { %6718 = vmatpush1.bf16.msra.mxu1 %v21363_v30  ;;  %v21452_v30 = vld [vmem:[#allocation7 + $0x784] ss:$8 sps:$4 sm:$0xff]  }
 0x7b5   : > { %6719 = vmatprep.subr.bf16.mxu1 %v21368_v19  ;;  %v21450_v19 = vld [vmem:[#allocation7 + $0x780] ss:$8 sps:$4 sm:$0xff]  }
 0x7b8   : > { %6720 = vmatpush1.bf16.msra.mxu1 %v21366_v24  ;;  %v21455_v24 = vld [vmem:[#allocation7 + $0x794] ss:$8 sps:$4 sm:$0xff]  }
 0x7b9   : > { %6721 = vmatprep.subr.bf16.mxu1 %v21371_v62  ;;  %v21453_v62 = vld [vmem:[#allocation7 + $0x790] ss:$8 sps:$4 sm:$0xff]  }
 0x7bc   : > { %6722 = vmatpush1.bf16.msra.mxu1 %v21369_v32  ;;  %v21458_v32 = vld [vmem:[#allocation7 + $0x7a4] ss:$8 sps:$4 sm:$0xff]  }
 0x7bd   : > { %6723 = vmatprep.subr.bf16.mxu1 %v21374_v48  ;;  %v21456_v48 = vld [vmem:[#allocation7 + $0x7a0] ss:$8 sps:$4 sm:$0xff]  }
 0x7c0   : > { %6724 = vmatpush1.bf16.msra.mxu1 %v21372_v50  ;;  %v21461_v50 = vld [vmem:[#allocation7 + $0x7b4] ss:$8 sps:$4 sm:$0xff]  }
 0x7c1   : > { %6725 = vmatprep.subr.bf16.mxu1 %v21377_v25  ;;  %v21459_v25 = vld [vmem:[#allocation7 + $0x7b0] ss:$8 sps:$4 sm:$0xff]  }
 0x7c4   : > { %6726 = vmatpush1.bf16.msra.mxu1 %v21375_v51  ;;  %v21464_v51 = vld [vmem:[#allocation7 + $0x7c4] ss:$8 sps:$4 sm:$0xff]  }
 0x7c5   : > { %6738 = vmatprep.subr.bf16.mxu1 %v21380_v36  ;;  %v21462_v36 = vld [vmem:[#allocation7 + $0x7c0] ss:$8 sps:$4 sm:$0xff]  }
 0x7c7   : > { %6728 = vmatmul.mubr.bf16.vlgmr.msra.gmra.mrb[204].mxu1 %v4666_v4  ;;  %v21398_v4 = vld [vmem:[#allocation7 + $0x664] ss:$8 sps:$4 sm:$0xff]  }
 0x7c8   : > { %6739 = vmatpush1.bf16.msra.mxu1 %v21378_v63  ;;  %6770 = vmatprep.mubr.bf16.mxu1 %v4825_v21  ;;  %v21399_v21 = vld [vmem:[#allocation7 + $0x670] ss:$8 sps:$4 sm:$0xff]   ;;  %v21467_v63 = vld [vmem:[#allocation7 + $0x7d4] ss:$8 sps:$4 sm:$0xff]  }
 0x7c9   : > { %6740 = vmatprep.subr.bf16.mxu1 %v21383_v40  ;;  %v21465_v40 = vld [vmem:[#allocation7 + $0x7d0] ss:$8 sps:$4 sm:$0xff]  }
 0x7cc   : > { %6741 = vmatpush1.bf16.msra.mxu1 %v21381_v13  ;;  %v21470_v13 = vld [vmem:[#allocation7 + $0x7e4] ss:$8 sps:$4 sm:$0xff]  }
 0x7cd   : > { %6742 = vmatprep.subr.bf16.mxu1 %v21386_v6  ;;  %v21468_v6 = vld [vmem:[#allocation7 + $0x7e0] ss:$8 sps:$4 sm:$0xff]  }
 0x7d0   : > { %6743 = vmatpush1.bf16.msra.mxu1 %v21384_v52  ;;  %v21473_v52 = vld [vmem:[#allocation7 + $0x7f4] ss:$8 sps:$4 sm:$0xff]  }
 0x7d1   : > { %6744 = vmatprep.subr.bf16.mxu1 %v21389_v8  ;;  %v21471_v8 = vld [vmem:[#allocation7 + $0x7f0] ss:$8 sps:$4 sm:$0xff]  }
 0x7d4   : > { %6745 = vmatpush1.bf16.msra.mxu1 %v21387_v60  ;;  %v23400_v60 = vmov 0  }
 0x7d5   : > { %6746 = vmatprep.subr.bf16.mxu1 %v21392_v37  ;;  %6991 = vmatprep.mubr.bf16.mxu0 %v23400_v60  ;;  %v5190_v37 = vlaneseq }
 0x7d8   : > { %6747 = vmatpush1.bf16.msra.mxu1 %v21390_v28  ;;  %v24979_v28 = vshrl.u32 %v5190_v37, 7 }
 0x7d9   : > { %6748 = vmatprep.subr.bf16.mxu1 %v21395_v10 }
 0x7da   : > { %v24982_v10 = vsub.s32 0, %v24979_v28 }
 0x7dc   : > { %6749 = vmatpush1.bf16.msra.mxu1 %v21393_v27  ;;  %v5188_v27 = vld [vmem:[#allocation14] sm:$0x3] }
 0x7dd   : > { %6750 = vmatprep.subr.bf16.mxu1 %v21398_v4  ;;  %v24985_v4 = vsub.s32 1, %v24979_v28 }
 0x7df   : > { %v5197_v43 = vrot.slane %v5188_v27, %v24985_v4 }
 0x7e0   : > { %6751 = vmatpush1.bf16.msra.mxu1 %v21396_v55  ;;  %v5193_v55 = vrot.slane %v5188_v27, %v24982_v10 }
 0x7e1   : > { %6752 = vmatprep.subr.bf16.mxu1 %v21401_v56 }
 0x7e2   : > { %v6515_v53 = vadd.f32 %v24954_v0, %v5193_v55 }
 0x7e4   : > { %6753 = vmatpush1.bf16.msra.mxu1 %v21399_v21  ;;  %v6519_v21 = vadd.f32 %v24958_v34, %v5193_v55 }
 0x7e5   : > { %6754 = vmatprep.subr.bf16.mxu1 %v21404_v38 }
 0x7e8   : > { %6755 = vmatpush1.bf16.msra.mxu1 %v21402_v31 }
 0x7e9   : > { %6756 = vmatprep.subr.bf16.mxu1 %v21407_v46  ;;  %v6521_v46 = vadd.f32 %v24960_v5, %v5197_v43 }
 0x7ec   : > { %6757 = vmatpush1.bf16.msra.mxu1 %v21405_v17 }
 0x7ed   : > { %6758 = vmatprep.subr.bf16.mxu1 %v21410_v9 }
 0x7f0   : > { %6759 = vmatpush1.bf16.msra.mxu1 %v21408_v44 }
 0x7f1   : > { %6760 = vmatprep.subr.bf16.mxu1 %v21413_v54 }
 0x7f4   : > { %6761 = vmatpush1.bf16.msra.mxu1 %v21411_v42 }
 0x7f5   : > { %6762 = vmatprep.subr.bf16.mxu1 %v21416_v7 }
 0x7f8   : > { %6763 = vmatpush1.bf16.msra.mxu1 %v21414_v33 }
 0x7f9   : > { %6764 = vmatprep.subr.bf16.mxu1 %v21419_v18 }
 0x7fc   : > { %6765 = vmatpush1.bf16.msra.mxu1 %v21417_v15 }
 0x7fd   : > { %6766 = vmatprep.subr.bf16.mxu1 %v21422_v29 }
 0x800   : > { %6767 = vmatpush1.bf16.msra.mxu1 %v21420_v58 }
 0x801   : > { %6768 = vmatprep.subr.bf16.mxu1 %v21425_v3 }
 0x804   : > { %6769 = vmatpush1.bf16.msra.mxu1 %v21423_v39 }
 0x805   : > { %6781 = vmatprep.subr.bf16.mxu1 %v21428_v41 }
 0x807   : > { %6771 = vmatmul.mubr.bf16.vlgmr.msra.gmra.mrb[204].mxu1 %v4772_v59  ;;  %v21446_v59 = vld [vmem:[#allocation7 + $0x764] ss:$8 sps:$4 sm:$0xff]  }
 0x808   : > { %6782 = vmatpush1.bf16.msra.mxu1 %v21426_v26  ;;  %6813 = vmatprep.mubr.bf16.mxu1 %v4931_v45  ;;  %v21447_v45 = vld [vmem:[#allocation7 + $0x770] ss:$8 sps:$4 sm:$0xff]  }
 0x809   : > { %6783 = vmatprep.subr.bf16.mxu1 %v21431_v11 }
 0x80c   : > { %6784 = vmatpush1.bf16.msra.mxu1 %v21429_v2 }
 0x80d   : > { %6785 = vmatprep.subr.bf16.mxu1 %v21434_v1 }
 0x810   : > { %6786 = vmatpush1.bf16.msra.mxu1 %v21432_v22 }
 0x811   : > { %6787 = vmatprep.subr.bf16.mxu1 %v21437_v23 }
 0x814   : > { %6788 = vmatpush1.bf16.msra.mxu1 %v21435_v16 }
 0x815   : > { %6789 = vmatprep.subr.bf16.mxu1 %v21440_v49 }
 0x818   : > { %6790 = vmatpush1.bf16.msra.mxu1 %v21438_v47 }
 0x819   : > { %6791 = vmatprep.subr.bf16.mxu1 %v21443_v35 }
 0x81c   : > { %6792 = vmatpush1.bf16.msra.mxu1 %v21441_v14 }
 0x81d   : > { %6793 = vmatprep.subr.bf16.mxu1 %v21446_v59 }
 0x820   : > { %6794 = vmatpush1.bf16.msra.mxu1 %v21444_v61 }
 0x821   : > { %6795 = vmatprep.subr.bf16.mxu1 %v21449_v20 }
 0x824   : > { %6796 = vmatpush1.bf16.msra.mxu1 %v21447_v45 }
 0x825   : > { %6797 = vmatprep.subr.bf16.mxu1 %v21452_v30 }
 0x828   : > { %6798 = vmatpush1.bf16.msra.mxu1 %v21450_v19 }
 0x829   : > { %6799 = vmatprep.subr.bf16.mxu1 %v21455_v24 }
 0x82c   : > { %6800 = vmatpush1.bf16.msra.mxu1 %v21453_v62 }
 0x82d   : > { %6801 = vmatprep.subr.bf16.mxu1 %v21458_v32 }
 0x830   : > { %6802 = vmatpush1.bf16.msra.mxu1 %v21456_v48 }
 0x831   : > { %6803 = vmatprep.subr.bf16.mxu1 %v21461_v50 }
 0x834   : > { %6804 = vmatpush1.bf16.msra.mxu1 %v21459_v25 }
 0x835   : > { %6805 = vmatprep.subr.bf16.mxu1 %v21464_v51 }
 0x838   : > { %6806 = vmatpush1.bf16.msra.mxu1 %v21462_v36 }
 0x839   : > { %6807 = vmatprep.subr.bf16.mxu1 %v21467_v63 }
 0x83c   : > { %6808 = vmatpush1.bf16.msra.mxu1 %v21465_v40 }
 0x83d   : > { %6809 = vmatprep.subr.bf16.mxu1 %v21470_v13 }
 0x840   : > { %6810 = vmatpush1.bf16.msra.mxu1 %v21468_v6 }
 0x841   : > { %6811 = vmatprep.subr.bf16.mxu1 %v21473_v52 }
 0x844   : > { %6812 = vmatpush1.bf16.msra.mxu1 %v21471_v8 }
 0x847   : > { %6814 = vmatmul.mubr.bf16.vlgmr.msra.gmra.mrb[204].mxu1 %v4878_v57  ;;  %v6517_v57 = vadd.f32 %v24956_v12, %v5197_v43 }
 0x848   : > { %6935 = vmatprep.mubr.bf16.mxu1 %v23400_v60 }
 0x91a   : > { %v6815_v56 = vpop.f32.mrb[204].mxu1 }
 0x91b   : > { %v20510_v38 = vadd.f32 %v6815_v56, %v6515_v53  ;;  %v6817_v31 = vpop.f32.mrb[205].mxu1 }
 0x91c   : > { %v20512_v17 = vadd.f32 %v6817_v31, %v6517_v57  ;;  %v6819_v9 = vpop.f32.mrb[206].mxu1 }
 0x91d   : > { %v20514_v44 = vadd.f32 %v6819_v9, %v6519_v21  ;;  %v6821_v54 = vpop.f32.mrb[207].mxu1  ;;  %v6838_v7 = vmul.f32 %v20510_v38, %v20510_v38 }
 0x91e   : > { %v20516_v42 = vadd.f32 %v6821_v54, %v6521_v46  ;;  %v6839_v15 = vmul.f32 %v20512_v17, %v20512_v17 }
 0x91f   : > { %v6824_v33 = vadd.f32 %v20514_v44, %v20510_v38  ;;  %v6840_v18 = vmul.f32 %v20514_v44, %v20514_v44 }
 0x920   : > { %v6831_v29 = vadd.f32 %v20516_v42, %v20512_v17  ;;  %v6841_v0 = vmul.f32 %v20516_v42, %v20516_v42 }
 0x921   : > { %v6825_v58 = vrot.slane %v6824_v33, 4  ;;  %v6842_v12 = vadd.f32 %v6840_v18, %v6838_v7 }
 0x922   : > { %v6832_v3 = vrot.slane %v6831_v29, 4  ;;  %v6849_v39 = vadd.f32 %v6841_v0, %v6839_v15  ;;  %v21474_v0 = vld [vmem:[%s25715_s13] sm:$0x1f]  }
 0x923   : > { %v6826_v34 = vadd.f32 %v6825_v58, %v6824_v33  ;;  %v6843_v41 = vrot.slane %v6842_v12, 4  ;;  %v21475_v58 = vld [vmem:[%s25715_s13 + $0x8] sm:$0x1f]  }
 0x924   : > { %v6833_v26 = vadd.f32 %v6832_v3, %v6831_v29  ;;  %v6850_v11 = vrot.slane %v6849_v39, 4  ;;  %v21494_v29 = vld [vmem:[#allocation8 + $0xc] ss:$16 sps:$4 sm:$0xff]  }
 0x925   : > { %v6827_v5 = vrot.slane %v6826_v34, 2  ;;  %v6844_v2 = vadd.f32 %v6843_v41, %v6842_v12  ;;  %v21492_v12 = vld [vmem:[#allocation8 + $0x8] ss:$16 sps:$4 sm:$0xff]   ;;  %v21501_v3 = vld [vmem:[#allocation8 + $0x2c] ss:$16 sps:$4 sm:$0xff]  }
 0x926   : > { %v6834_v1 = vrot.slane %v6833_v26, 2  ;;  %v6851_v22 = vadd.f32 %v6850_v11, %v6849_v39  ;;  %v21499_v39 = vld [vmem:[#allocation8 + $0x28] ss:$16 sps:$4 sm:$0xff]   ;;  %v21513_v11 = vld [vmem:[#allocation8 + $0x6c] ss:$16 sps:$4 sm:$0xff]  }
 0x927   : > { %v6828_v23 = vadd.f32 %v6827_v5, %v6826_v34  ;;  %v6845_v16 = vrot.slane %v6844_v2, 2  ;;  %v21507_v34 = vld [vmem:[#allocation8 + $0x4c] ss:$16 sps:$4 sm:$0xff]   ;;  %v21476_v41 = vld [vmem:[%s25715_s13 + $0x10] sm:$0x1f]  }
 0x928   : > { %v6835_v49 = vadd.f32 %v6834_v1, %v6833_v26  ;;  %v6852_v47 = vrot.slane %v6851_v22, 2  ;;  %v21505_v26 = vld [vmem:[#allocation8 + $0x48] ss:$16 sps:$4 sm:$0xff]   ;;  %v21477_v1 = vld [vmem:[%s25715_s13 + $0x18] sm:$0x1f]  }
 0x929   : > { %v6829_v35 = vrot.slane %v6828_v23, 1  ;;  %v6846_v14 = vadd.f32 %v6845_v16, %v6844_v2  ;;  %v21511_v5 = vld [vmem:[#allocation8 + $0x68] ss:$16 sps:$4 sm:$0xff]   ;;  %v21519_v2 = vld [vmem:[#allocation8 + $0x8c] ss:$16 sps:$4 sm:$0xff]  }
 0x92a   : > { %v6836_v59 = vrot.slane %v6835_v49, 1  ;;  %v6853_v61 = vadd.f32 %v6852_v47, %v6851_v22  ;;  %v21517_v22 = vld [vmem:[#allocation8 + $0x88] ss:$16 sps:$4 sm:$0xff]  }
 0x92b   : > { %v6830_v20 = vadd.f32 %v6829_v35, %v6828_v23  ;;  %v6847_v45 = vrot.slane %v6846_v14, 1  ;;  %v21525_v23 = vld [vmem:[#allocation8 + $0xac] ss:$16 sps:$4 sm:$0xff]   ;;  %v21523_v16 = vld [vmem:[#allocation8 + $0xa8] ss:$16 sps:$4 sm:$0xff]  }
 0x92c   : > { %v6837_v30 = vadd.f32 %v6836_v59, %v6835_v49  ;;  %v6854_v19 = vrot.slane %v6853_v61, 1  ;;  %v21531_v49 = vld [vmem:[#allocation8 + $0xcc] ss:$16 sps:$4 sm:$0xff]   ;;  %v21478_v47 = vld [vmem:[%s25715_s13 + $0x20] sm:$0x1f]  }
 0x92d   : > { %v6848_v24 = vadd.f32 %v6847_v45, %v6846_v14  ;;  %v6856_v62 = vmul.f32 0.0625, %v6830_v20  ;;  %v21529_v35 = vld [vmem:[#allocation8 + $0xc8] ss:$16 sps:$4 sm:$0xff]   ;;  %v21537_v14 = vld [vmem:[#allocation8 + $0xec] ss:$16 sps:$4 sm:$0xff]  }
 0x92e   : > { %v6855_v32 = vadd.f32 %v6854_v19, %v6853_v61  ;;  %v6857_v48 = vmul.f32 0.0625, %v6837_v30  ;;  %v21535_v59 = vld [vmem:[#allocation8 + $0xe8] ss:$16 sps:$4 sm:$0xff]   ;;  %v21543_v61 = vld [vmem:[#allocation8 + $0x10c] ss:$16 sps:$4 sm:$0xff]  }
 0x92f   : > { %v6858_v50 = vmul.f32 0.0625, %v6848_v24  ;;  %v6860_v25 = vmul.f32 %v6856_v62, %v6856_v62  ;;  %v6866_v51 = vsub.f32 %v20510_v38, %v6856_v62  ;;  %v6868_v36 = vsub.f32 %v20514_v44, %v6856_v62  ;;  %v21479_v20 = vld [vmem:[%s25715_s13 + $0x28] sm:$0x1f]   ;;  %v21541_v45 = vld [vmem:[#allocation8 + $0x108] ss:$16 sps:$4 sm:$0xff]  }
 0x930   : > { %v6859_v63 = vmul.f32 0.0625, %v6855_v32  ;;  %v6861_v40 = vmul.f32 %v6857_v48, %v6857_v48  ;;  %v6867_v13 = vsub.f32 %v20512_v17, %v6857_v48  ;;  %v6869_v6 = vsub.f32 %v20516_v42, %v6857_v48  ;;  %v21549_v30 = vld [vmem:[#allocation8 + $0x12c] ss:$16 sps:$4 sm:$0xff]   ;;  %v21547_v19 = vld [vmem:[#allocation8 + $0x128] ss:$16 sps:$4 sm:$0xff]  }
 0x931   : > { %v6862_v52 = vsub.f32 %v6858_v50, %v6860_v25  ;;  %v21555_v24 = vld [vmem:[#allocation8 + $0x14c] ss:$16 sps:$4 sm:$0xff]   ;;  %v21480_v62 = vld [vmem:[%s25715_s13 + $0x30] sm:$0x1f]  }
 0x932   : > { %v6863_v8 = vsub.f32 %v6859_v63, %v6861_v40  ;;  %v21553_v32 = vld [vmem:[#allocation8 + $0x148] ss:$16 sps:$4 sm:$0xff]   ;;  %v21561_v48 = vld [vmem:[#allocation8 + $0x16c] ss:$16 sps:$4 sm:$0xff]  }
 0x933   : > { %v6864_v37 = vmax.f32 %v6862_v52, 0.0  ;;  %v21559_v50 = vld [vmem:[#allocation8 + $0x168] ss:$16 sps:$4 sm:$0xff]   ;;  %v21567_v25 = vld [vmem:[#allocation8 + $0x18c] ss:$16 sps:$4 sm:$0xff]  }
 0x934   : > { %v6865_v27 = vmax.f32 %v6863_v8, 0.0  ;;  %v21573_v63 = vld [vmem:[#allocation8 + $0x1ac] ss:$16 sps:$4 sm:$0xff]   ;;  %v21571_v40 = vld [vmem:[#allocation8 + $0x1a8] ss:$16 sps:$4 sm:$0xff]  }
 0x935   : > { %v6870_v55 = vadd.f32 1e-05, %v6864_v37  ;;  %v21577_v52 = vld [vmem:[#allocation8 + $0x1c8] ss:$16 sps:$4 sm:$0xff]   ;;  %v21483_v8 = vld [vmem:[%s25715_s13 + $0x48] sm:$0x1f]  }
 0x936   : > { %v6871_v43 = vadd.f32 1e-05, %v6865_v27  ;;  %v21484_v37 = vld [vmem:[%s25715_s13 + $0x50] sm:$0x1f]   ;;  %v21485_v27 = vld [vmem:[%s25715_s13 + $0x58] sm:$0x1f]  }
 0x937   : > { %23028 = vrsqrt.f32 %v6870_v55  ;;  %v21486_v55 = vld [vmem:[%s25715_s13 + $0x60] sm:$0x1f]  }
 0x938   : > { %23030 = vrsqrt.f32 %v6871_v43  ;;  %v21585_v43 = vld [vmem:[#allocation8 + $0x1ec] ss:$16 sps:$4 sm:$0xff]  }
 0x941   : > { %v23029_v53 = vpop.eup %23028 }
 0x942   : > { %v23031_v57 = vpop.eup %23030  ;;  %v6874_v56 = vmul.f32 %v23029_v53, %v6866_v51  ;;  %v6876_v21 = vmul.f32 %v23029_v53, %v6868_v36  ;;  %v21481_v51 = vld [vmem:[%s25715_s13 + $0x38] sm:$0x1f]   ;;  %v21565_v36 = vld [vmem:[#allocation8 + $0x188] ss:$16 sps:$4 sm:$0xff]  }
 0x943   : > { %v6875_v31 = vmul.f32 %v23031_v57, %v6867_v13  ;;  %v6877_v46 = vmul.f32 %v23031_v57, %v6869_v6  ;;  %v21579_v13 = vld [vmem:[#allocation8 + $0x1cc] ss:$16 sps:$4 sm:$0xff]   ;;  %v21482_v6 = vld [vmem:[%s25715_s13 + $0x40] sm:$0x1f]  }
 0x944   : > { %vm6878_vm11 = vcmp.gt.f32.partialorder %v6874_v56, 0.0  ;;  %vm6880_vm12 = vcmp.gt.f32.partialorder %v6876_v21, 0.0  ;;  %v6882_v38 = vmul.f32 0.2, %v6874_v56  ;;  %v6884_v9 = vmul.f32 0.2, %v6876_v21 }
 0x945   : > { %vm6879_vm13 = vcmp.gt.f32.partialorder %v6875_v31, 0.0  ;;  %vm6881_vm14 = vcmp.gt.f32.partialorder %v6877_v46, 0.0  ;;  %v6883_v17 = vmul.f32 0.2, %v6875_v31  ;;  %v6885_v44 = vmul.f32 0.2, %v6877_v46 }
 0x946   : > { %v6886_v54 = vsel %vm6878_vm11, %v6874_v56, %v6882_v38  ;;  %v6888_v42 = vsel %vm6880_vm12, %v6876_v21, %v6884_v9  ;;  %v21583_v53 = vld [vmem:[#allocation8 + $0x1e8] ss:$16 sps:$4 sm:$0xff]   ;;  %v21591_v57 = vld [vmem:[#allocation8 + $0x20c] ss:$16 sps:$4 sm:$0xff]   ;;  %v21489_v38 = vld [vmem:[#allocation8] ss:$16 sps:$4 sm:$0xff]  }
 0x947   : > { %v24993_v7 = vpack.c.bf16 %v6888_v42, %v6886_v54  ;;  %v6887_v33 = vsel %vm6879_vm13, %v6875_v31, %v6883_v17  ;;  %v6889_v18 = vsel %vm6881_vm14, %v6877_v46, %v6885_v44  ;;  %v21487_v56 = vld [vmem:[%s25715_s13 + $0x68] sm:$0x1f]   ;;  %v21488_v21 = vld [vmem:[%s25715_s13 + $0x70] sm:$0x1f]   ;;  %v21495_v46 = vld [vmem:[%s25715_s13 + $0x78] sm:$0x1f]  }
 0x948   : > { %v24995_v15 = vpack.c.bf16 %v6889_v18, %v6887_v33  ;;  %v21491_v31 = vld [vmem:[#allocation8 + $0x4] ss:$16 sps:$4 sm:$0xff]   ;;  %v21496_v17 = vld [vmem:[#allocation8 + $0x20] ss:$16 sps:$4 sm:$0xff]   ;;  %vm15476_vm11 = vcmask 72704   ;;  %vm17542_vm12 = vcmask 0  }
 0x949   : > { %v21498_v9 = vld [vmem:[#allocation8 + $0x24] ss:$16 sps:$4 sm:$0xff]   ;;  %v21502_v54 = vld [vmem:[#allocation8 + $0x40] ss:$16 sps:$4 sm:$0xff]  }
 0x94a   : > { %6903 = vmatprep.subr.bf16.mxu1 %v24995_v15  ;;  %6959 = vmatprep.subr.bf16.mxu0 %v24995_v15  ;;  %v21504_v44 = vld [vmem:[#allocation8 + $0x44] ss:$16 sps:$4 sm:$0xff]   ;;  %v21514_v18 = vld [vmem:[#allocation8 + $0x80] ss:$16 sps:$4 sm:$0xff]  }
 0x94b   : > { %6904 = vmatpush1.bf16.msra.mxu1 %v24993_v7  ;;  %6960 = vmatpush1.bf16.msra.mxu0 %v24993_v7  ;;  %v21510_v42 = vld [vmem:[#allocation8 + $0x64] ss:$16 sps:$4 sm:$0xff]  }
 0x94c   : > { %7015 = vmatprep.subr.bf16.mxu0 %v24995_v15  ;;  %14642 = vmatprep.subr.bf16.mxu1 %v21494_v29  ;;  %v21516_v33 = vld [vmem:[#allocation8 + $0x84] ss:$16 sps:$4 sm:$0xff]   ;;  %v21520_v29 = vld [vmem:[#allocation8 + $0xa0] ss:$16 sps:$4 sm:$0xff]  }
 0x94e   : > { %18245 = vmatmul.mubr.msk.bf16.vlgmr.msra.gmra.mrb[208].mxu1 %vm6899_vm15, %v21474_v0  ;;  %18249 = vmatmul.mubr.msk.bf16.vlgmr.msra.gmra.mrb[216].mxu0 %vm6899_vm15, %v21475_v58  ;;  %v21528_v0 = vld [vmem:[#allocation8 + $0xc4] ss:$16 sps:$4 sm:$0xff]   ;;  %v21526_v58 = vld [vmem:[#allocation8 + $0xc0] ss:$16 sps:$4 sm:$0xff]  }
 0x94f   : > { %7016 = vmatpush1.bf16.msra.mxu0 %v24993_v7  ;;  %7047 = vmatprep.mubr.bf16.mxu0 %v23400_v60 }
 0x950   : > { %7071 = vmatprep.subr.bf16.mxu0 %v24995_v15  ;;  %14643 = vmatpush1.bf16.msra.mxu1 %v21492_v12  ;;  %v21534_v12 = vld [vmem:[#allocation8 + $0xe4] ss:$16 sps:$4 sm:$0xff]  }
 0x951   : > { %14644 = vmatprep.subr.bf16.mxu1 %v21501_v3  ;;  %v21532_v3 = vld [vmem:[#allocation8 + $0xe0] ss:$16 sps:$4 sm:$0xff]  }
 0x954   : > { %14645 = vmatpush1.bf16.msra.mxu1 %v21499_v39  ;;  %v21540_v39 = vld [vmem:[#allocation8 + $0x104] ss:$16 sps:$4 sm:$0xff]  }
 0x955   : > { %14646 = vmatprep.subr.bf16.mxu1 %v21507_v34  ;;  %v21538_v34 = vld [vmem:[#allocation8 + $0x100] ss:$16 sps:$4 sm:$0xff]  }
 0x956   : > { %18253 = vmatmul.mubr.msk.bf16.vlgmr.msra.gmra.mrb[220].mxu0 %vm6899_vm15, %v21476_v41  ;;  %v21546_v41 = vld [vmem:[#allocation8 + $0x124] ss:$16 sps:$4 sm:$0xff]  }
 0x957   : > { %7072 = vmatpush1.bf16.msra.mxu0 %v24993_v7  ;;  %7103 = vmatprep.mubr.bf16.mxu0 %v23400_v60 }
 0x958   : > { %7127 = vmatprep.subr.bf16.mxu0 %v24995_v15  ;;  %14647 = vmatpush1.bf16.msra.mxu1 %v21505_v26  ;;  %v21544_v26 = vld [vmem:[#allocation8 + $0x120] ss:$16 sps:$4 sm:$0xff]  }
 0x959   : > { %14648 = vmatprep.subr.bf16.mxu1 %v21513_v11  ;;  %v21552_v11 = vld [vmem:[#allocation8 + $0x144] ss:$16 sps:$4 sm:$0xff]  }
 0x95c   : > { %14649 = vmatpush1.bf16.msra.mxu1 %v21511_v5  ;;  %v21550_v5 = vld [vmem:[#allocation8 + $0x140] ss:$16 sps:$4 sm:$0xff]  }
 0x95d   : > { %14650 = vmatprep.subr.bf16.mxu1 %v21519_v2  ;;  %v21558_v2 = vld [vmem:[#allocation8 + $0x164] ss:$16 sps:$4 sm:$0xff]  }
 0x95e   : > { %18257 = vmatmul.mubr.msk.bf16.vlgmr.msra.gmra.mrb[224].mxu0 %vm6899_vm15, %v21477_v1  ;;  %v21556_v1 = vld [vmem:[#allocation8 + $0x160] ss:$16 sps:$4 sm:$0xff]  }
 0x95f   : > { %7128 = vmatpush1.bf16.msra.mxu0 %v24993_v7  ;;  %7159 = vmatprep.mubr.bf16.mxu0 %v23400_v60 }
 0x960   : > { %7183 = vmatprep.subr.bf16.mxu0 %v24995_v15  ;;  %14651 = vmatpush1.bf16.msra.mxu1 %v21517_v22  ;;  %v21564_v22 = vld [vmem:[#allocation8 + $0x184] ss:$16 sps:$4 sm:$0xff]  }
 0x961   : > { %14652 = vmatprep.subr.bf16.mxu1 %v21525_v23  ;;  %v21562_v23 = vld [vmem:[#allocation8 + $0x180] ss:$16 sps:$4 sm:$0xff]  }
 0x964   : > { %14653 = vmatpush1.bf16.msra.mxu1 %v21523_v16  ;;  %v21570_v16 = vld [vmem:[#allocation8 + $0x1a4] ss:$16 sps:$4 sm:$0xff]  }
 0x965   : > { %14654 = vmatprep.subr.bf16.mxu1 %v21531_v49  ;;  %v21568_v49 = vld [vmem:[#allocation8 + $0x1a0] ss:$16 sps:$4 sm:$0xff]  }
 0x966   : > { %18261 = vmatmul.mubr.msk.bf16.vlgmr.msra.gmra.mrb[228].mxu0 %vm6899_vm15, %v21478_v47  ;;  %v21576_v47 = vld [vmem:[#allocation8 + $0x1c4] ss:$16 sps:$4 sm:$0xff]  }
 0x967   : > { %7184 = vmatpush1.bf16.msra.mxu0 %v24993_v7  ;;  %7215 = vmatprep.mubr.bf16.mxu0 %v23400_v60 }
 0x968   : > { %7239 = vmatprep.subr.bf16.mxu0 %v24995_v15  ;;  %14655 = vmatpush1.bf16.msra.mxu1 %v21529_v35  ;;  %v21574_v35 = vld [vmem:[#allocation8 + $0x1c0] ss:$16 sps:$4 sm:$0xff]  }
 0x969   : > { %14656 = vmatprep.subr.bf16.mxu1 %v21537_v14  ;;  %v21582_v14 = vld [vmem:[#allocation8 + $0x1e4] ss:$16 sps:$4 sm:$0xff]  }
 0x96c   : > { %14657 = vmatpush1.bf16.msra.mxu1 %v21535_v59  ;;  %v21580_v59 = vld [vmem:[#allocation8 + $0x1e0] ss:$16 sps:$4 sm:$0xff]  }
 0x96d   : > { %14658 = vmatprep.subr.bf16.mxu1 %v21543_v61  ;;  %v21588_v61 = vld [vmem:[#allocation8 + $0x204] ss:$16 sps:$4 sm:$0xff]  }
 0x96e   : > { %18265 = vmatmul.mubr.msk.bf16.vlgmr.msra.gmra.mrb[232].mxu0 %vm6899_vm15, %v21479_v20 }
 0x96f   : > { %7240 = vmatpush1.bf16.msra.mxu0 %v24993_v7  ;;  %7271 = vmatprep.mubr.bf16.mxu0 %v23400_v60 }
 0x970   : > { %7295 = vmatprep.subr.bf16.mxu0 %v24995_v15  ;;  %14659 = vmatpush1.bf16.msra.mxu1 %v21541_v45 }
 0x971   : > { %14660 = vmatprep.subr.bf16.mxu1 %v21549_v30 }
 0x974   : > { %14661 = vmatpush1.bf16.msra.mxu1 %v21547_v19 }
 0x975   : > { %14662 = vmatprep.subr.bf16.mxu1 %v21555_v24 }
 0x976   : > { %18269 = vmatmul.mubr.msk.bf16.vlgmr.msra.gmra.mrb[236].mxu0 %vm6899_vm15, %v21480_v62 }
 0x977   : > { %7296 = vmatpush1.bf16.msra.mxu0 %v24993_v7  ;;  %7327 = vmatprep.mubr.bf16.mxu0 %v23400_v60 }
 0x978   : > { %7351 = vmatprep.subr.bf16.mxu0 %v24995_v15  ;;  %14663 = vmatpush1.bf16.msra.mxu1 %v21553_v32 }
 0x979   : > { %14664 = vmatprep.subr.bf16.mxu1 %v21561_v48 }
 0x97c   : > { %14665 = vmatpush1.bf16.msra.mxu1 %v21559_v50 }
 0x97d   : > { %14666 = vmatprep.subr.bf16.mxu1 %v21567_v25 }
 0x97e   : > { %18273 = vmatmul.mubr.msk.bf16.vlgmr.msra.gmra.mrb[240].mxu0 %vm6899_vm15, %v21481_v51 }
 0x97f   : > { %7352 = vmatpush1.bf16.msra.mxu0 %v24993_v7  ;;  %7383 = vmatprep.mubr.bf16.mxu0 %v23400_v60 }
 0x980   : > { %7407 = vmatprep.subr.bf16.mxu0 %v24995_v15  ;;  %14667 = vmatpush1.bf16.msra.mxu1 %v21565_v36  ;;  %v21586_v36 = vld [vmem:[#allocation8 + $0x200] ss:$16 sps:$4 sm:$0xff]  }
 0x981   : > { %14668 = vmatprep.subr.bf16.mxu1 %v21573_v63  ;;  %v21589_v63 = vld [vmem:[#allocation8 + $0x208] ss:$16 sps:$4 sm:$0xff]  }
 0x984   : > { %14669 = vmatpush1.bf16.msra.mxu1 %v21571_v40 }
 0x985   : > { %14670 = vmatprep.subr.bf16.mxu1 %v21579_v13  ;;  %v21594_v13 = vld [vmem:[#allocation8 + $0x224] ss:$16 sps:$4 sm:$0xff]  }
 0x986   : > { %18277 = vmatmul.mubr.msk.bf16.vlgmr.msra.gmra.mrb[244].mxu0 %vm6899_vm15, %v21482_v6  ;;  %v21597_v6 = vld [vmem:[#allocation8 + $0x22c] ss:$16 sps:$4 sm:$0xff]  }
 0x987   : > { %7408 = vmatpush1.bf16.msra.mxu0 %v24993_v7  ;;  %7439 = vmatprep.mubr.bf16.mxu0 %v23400_v60 }
 0x988   : > { %7463 = vmatprep.subr.bf16.mxu0 %v24995_v15  ;;  %14671 = vmatpush1.bf16.msra.mxu1 %v21577_v52  ;;  %v21592_v52 = vld [vmem:[#allocation8 + $0x220] ss:$16 sps:$4 sm:$0xff]  }
 0x989   : > { %14672 = vmatprep.subr.bf16.mxu1 %v21585_v43 }
 0x98c   : > { %14673 = vmatpush1.bf16.msra.mxu1 %v21583_v53 }
 0x98d   : > { %14685 = vmatprep.subr.bf16.mxu1 %v21591_v57 }
 0x98e   : > { %18281 = vmatmul.mubr.msk.bf16.vlgmr.msra.gmra.mrb[248].mxu0 %vm6899_vm15, %v21483_v8  ;;  %v21595_v8 = vld [vmem:[#allocation8 + $0x228] ss:$16 sps:$4 sm:$0xff]  }
 0x98f   : > { %7464 = vmatpush1.bf16.msra.mxu0 %v24993_v7  ;;  %7495 = vmatprep.mubr.bf16.mxu0 %v23400_v60 }
 0x990   : > { %7519 = vmatprep.subr.bf16.mxu0 %v24995_v15 }
 0x996   : > { %18285 = vmatmul.mubr.msk.bf16.vlgmr.msra.gmra.mrb[252].mxu0 %vm6899_vm15, %v21484_v37 }
 0x997   : > { %7520 = vmatpush1.bf16.msra.mxu0 %v24993_v7  ;;  %7551 = vmatprep.mubr.bf16.mxu0 %v23400_v60 }
 0x998   : > { %7575 = vmatprep.subr.bf16.mxu0 %v24995_v15 }
 0x99e   : > { %18289 = vmatmul.mubr.msk.bf16.vlgmr.msra.gmra.mrb[0].mxu0 %vm6899_vm15, %v21485_v27  ;;  %v21600_v27 = vld [vmem:[#allocation8 + $0x244] ss:$16 sps:$4 sm:$0xff]  }
 0x99f   : > { %7576 = vmatpush1.bf16.msra.mxu0 %v24993_v7  ;;  %7607 = vmatprep.mubr.bf16.mxu0 %v23400_v60 }
 0x9a0   : > { %7631 = vmatprep.subr.bf16.mxu0 %v24995_v15 }
 0x9a6   : > { %18293 = vmatmul.mubr.msk.bf16.vlgmr.msra.gmra.mrb[4].mxu0 %vm6899_vm15, %v21486_v55  ;;  %v21603_v55 = vld [vmem:[#allocation8 + $0x24c] ss:$16 sps:$4 sm:$0xff]  }
 0x9a7   : > { %7632 = vmatpush1.bf16.msra.mxu0 %v24993_v7  ;;  %7663 = vmatprep.mubr.bf16.mxu0 %v23400_v60 }
 0x9a8   : > { %7687 = vmatprep.subr.bf16.mxu0 %v24995_v15 }
 0x9ae   : > { %18297 = vmatmul.mubr.msk.bf16.vlgmr.msra.gmra.mrb[8].mxu0 %vm6899_vm15, %v21487_v56 }
 0x9af   : > { %7688 = vmatpush1.bf16.msra.mxu0 %v24993_v7  ;;  %7719 = vmatprep.mubr.bf16.mxu0 %v23400_v60 }
 0x9b0   : > { %7743 = vmatprep.subr.bf16.mxu0 %v24995_v15  ;;  %v21522_v15 = vld [vmem:[#allocation8 + $0xa4] ss:$16 sps:$4 sm:$0xff]  }
 0x9b6   : > { %18301 = vmatmul.mubr.msk.bf16.vlgmr.msra.gmra.mrb[12].mxu0 %vm6899_vm15, %v21488_v21  ;;  %v21598_v21 = vld [vmem:[#allocation8 + $0x240] ss:$16 sps:$4 sm:$0xff]  }
 0x9b7   : > { %7744 = vmatpush1.bf16.msra.mxu0 %v24993_v7  ;;  %7775 = vmatprep.mubr.bf16.mxu0 %v23400_v60  ;;  %v21508_v7 = vld [vmem:[#allocation8 + $0x60] ss:$16 sps:$4 sm:$0xff]  }
 0x9b8   : > { %13954 = vmatprep.subr.bf16.mxu0 %v21491_v31  ;;  %v21601_v31 = vld [vmem:[#allocation8 + $0x248] ss:$16 sps:$4 sm:$0xff]  }
 0x9be   : > { %18305 = vmatmul.mubr.msk.bf16.vlgmr.msra.gmra.mrb[16].mxu0 %vm6899_vm15, %v21495_v46 }
 0x9bf   : > { %13955 = vmatpush1.bf16.msra.mxu0 %v21489_v38  ;;  %v21606_v38 = vld [vmem:[#allocation8 + $0x264] ss:$16 sps:$4 sm:$0xff]  }
 0x9c0   : > { %13956 = vmatprep.subr.bf16.mxu0 %v21498_v9  ;;  %v21609_v9 = vld [vmem:[#allocation8 + $0x26c] ss:$16 sps:$4 sm:$0xff]  }
 0x9c3   : > { %13957 = vmatpush1.bf16.msra.mxu0 %v21496_v17  ;;  %v21604_v17 = vld [vmem:[#allocation8 + $0x260] ss:$16 sps:$4 sm:$0xff]  }
 0x9c4   : > { %13958 = vmatprep.subr.bf16.mxu0 %v21504_v44  ;;  %v21607_v44 = vld [vmem:[#allocation8 + $0x268] ss:$16 sps:$4 sm:$0xff]  }
 0x9c7   : > { %13959 = vmatpush1.bf16.msra.mxu0 %v21502_v54 }
 0x9c8   : > { %13960 = vmatprep.subr.bf16.mxu0 %v21510_v42  ;;  %v21612_v42 = vld [vmem:[#allocation8 + $0x284] ss:$16 sps:$4 sm:$0xff]  }
 0x9cb   : > { %13961 = vmatpush1.bf16.msra.mxu0 %v21508_v7  ;;  %v21615_v7 = vld [vmem:[#allocation8 + $0x28c] ss:$16 sps:$4 sm:$0xff]  }
 0x9cc   : > { %13962 = vmatprep.subr.bf16.mxu0 %v21516_v33 }
 0x9cf   : > { %13963 = vmatpush1.bf16.msra.mxu0 %v21514_v18 }
 0x9d0   : > { %13964 = vmatprep.subr.bf16.mxu0 %v21522_v15 }
 0x9d3   : > { %13965 = vmatpush1.bf16.msra.mxu0 %v21520_v29 }
 0x9d4   : > { %13966 = vmatprep.subr.bf16.mxu0 %v21528_v0  ;;  %v21610_v0 = vld [vmem:[#allocation8 + $0x280] ss:$16 sps:$4 sm:$0xff]  }
 0x9d7   : > { %13967 = vmatpush1.bf16.msra.mxu0 %v21526_v58  ;;  %v21613_v58 = vld [vmem:[#allocation8 + $0x288] ss:$16 sps:$4 sm:$0xff]  }
 0x9d8   : > { %13968 = vmatprep.subr.bf16.mxu0 %v21534_v12 }
 0x9db   : > { %13969 = vmatpush1.bf16.msra.mxu0 %v21532_v3  ;;  %v21618_v3 = vld [vmem:[#allocation8 + $0x2a4] ss:$16 sps:$4 sm:$0xff]  }
 0x9dc   : > { %13970 = vmatprep.subr.bf16.mxu0 %v21540_v39  ;;  %v21621_v39 = vld [vmem:[#allocation8 + $0x2ac] ss:$16 sps:$4 sm:$0xff]  }
 0x9df   : > { %13971 = vmatpush1.bf16.msra.mxu0 %v21538_v34  ;;  %v21616_v34 = vld [vmem:[#allocation8 + $0x2a0] ss:$16 sps:$4 sm:$0xff]  }
 0x9e0   : > { %13972 = vmatprep.subr.bf16.mxu0 %v21546_v41  ;;  %v21619_v41 = vld [vmem:[#allocation8 + $0x2a8] ss:$16 sps:$4 sm:$0xff]  }
 0x9e3   : > { %13973 = vmatpush1.bf16.msra.mxu0 %v21544_v26 }
 0x9e4   : > { %13974 = vmatprep.subr.bf16.mxu0 %v21552_v11  ;;  %v21624_v11 = vld [vmem:[#allocation8 + $0x2c4] ss:$16 sps:$4 sm:$0xff]  }
 0x9e7   : > { %13975 = vmatpush1.bf16.msra.mxu0 %v21550_v5  ;;  %v21627_v5 = vld [vmem:[#allocation8 + $0x2cc] ss:$16 sps:$4 sm:$0xff]  }
 0x9e8   : > { %13976 = vmatprep.subr.bf16.mxu0 %v21558_v2 }
 0x9eb   : > { %13977 = vmatpush1.bf16.msra.mxu0 %v21556_v1 }
 0x9ec   : > { %13978 = vmatprep.subr.bf16.mxu0 %v21564_v22 }
 0x9ef   : > { %13979 = vmatpush1.bf16.msra.mxu0 %v21562_v23 }
 0x9f0   : > { %13980 = vmatprep.subr.bf16.mxu0 %v21570_v16  ;;  %v21622_v16 = vld [vmem:[#allocation8 + $0x2c0] ss:$16 sps:$4 sm:$0xff]  }
 0x9f3   : > { %13981 = vmatpush1.bf16.msra.mxu0 %v21568_v49  ;;  %v21625_v49 = vld [vmem:[#allocation8 + $0x2c8] ss:$16 sps:$4 sm:$0xff]  }
 0x9f4   : > { %13982 = vmatprep.subr.bf16.mxu0 %v21576_v47 }
 0x9f7   : > { %13983 = vmatpush1.bf16.msra.mxu0 %v21574_v35  ;;  %v21630_v35 = vld [vmem:[#allocation8 + $0x2e4] ss:$16 sps:$4 sm:$0xff]  }
 0x9f8   : > { %13984 = vmatprep.subr.bf16.mxu0 %v21582_v14  ;;  %v21633_v14 = vld [vmem:[#allocation8 + $0x2ec] ss:$16 sps:$4 sm:$0xff]  }
 0x9fb   : > { %13985 = vmatpush1.bf16.msra.mxu0 %v21580_v59  ;;  %v21628_v59 = vld [vmem:[#allocation8 + $0x2e0] ss:$16 sps:$4 sm:$0xff]  }
 0x9fc   : > { %13997 = vmatprep.subr.bf16.mxu0 %v21588_v61  ;;  %v21631_v61 = vld [vmem:[#allocation8 + $0x2e8] ss:$16 sps:$4 sm:$0xff]  }
 0xa21   : > { %v6937_v20 = vpop.f32.mrb[208].mxu1  ;;  %v6993_v45 = vpop.f32.mrb[216].mxu0 }
 0xa22   : > { %v6939_v30 = vpop.f32.mrb[209].mxu1  ;;  %v6995_v19 = vpop.f32.mrb[217].mxu0 }
 0xa23   : > { %v6941_v24 = vpop.f32.mrb[210].mxu1  ;;  %v6997_v62 = vpop.f32.mrb[218].mxu0 }
 0xa24   : > { %v6946_v32 = vpack.c.bf16 %v6941_v24, %v6937_v20  ;;  %v6943_v48 = vpop.f32.mrb[211].mxu1  ;;  %v25107_v50 = vpack.c.bf16 %v6997_v62, %v6993_v45  ;;  %v6999_v25 = vpop.f32.mrb[219].mxu0  ;;  %v21636_v45 = vld [vmem:[#allocation8 + $0x304] ss:$16 sps:$4 sm:$0xff]  }
 0xa25   : > { %v6947_v51 = vpack.c.bf16 %v6943_v48, %v6939_v30  ;;  %v7003_v40 = vpack.c.bf16 %v6999_v25, %v6995_v19  ;;  %v21639_v30 = vld [vmem:[#allocation8 + $0x30c] ss:$16 sps:$4 sm:$0xff]   ;;  %v21634_v48 = vld [vmem:[#allocation8 + $0x300] ss:$16 sps:$4 sm:$0xff]   ;;  %v21637_v25 = vld [vmem:[#allocation8 + $0x308] ss:$16 sps:$4 sm:$0xff]  }
 0xa27   : > { %13986 = vmatprep.mubr.bf16.mxu0 %v6947_v51  ;;  %14674 = vmatprep.mubr.bf16.mxu1 %v6947_v51 }
 0xa28   : > { %13987 = vmatmul.mubr.bf16.vlgmr.msra.gmra.mrb[20].mxu0 %v6946_v32  ;;  %14675 = vmatmul.mubr.bf16.vlgmr.msra.gmra.mrb[212].mxu1 %v6946_v32 }
 0xa29   : > { %13998 = vmatpush1.bf16.msra.mxu0 %v21586_v36  ;;  %14686 = vmatpush1.bf16.msra.mxu1 %v21589_v63  ;;  %v7049_v37 = vpop.f32.mrb[220].mxu0  ;;  %v21642_v36 = vld [vmem:[#allocation8 + $0x324] ss:$16 sps:$4 sm:$0xff]   ;;  %v21645_v63 = vld [vmem:[#allocation8 + $0x32c] ss:$16 sps:$4 sm:$0xff]  }
 0xa2a   : > { %13999 = vmatprep.subr.bf16.mxu0 %v21594_v13  ;;  %14687 = vmatprep.subr.bf16.mxu1 %v21597_v6  ;;  %v7051_v43 = vpop.f32.mrb[221].mxu0  ;;  %v21643_v13 = vld [vmem:[#allocation8 + $0x328] ss:$16 sps:$4 sm:$0xff]  }
 0xa2b   : > { %14029 = vmatprep.mubr.bf16.mxu0 %v7003_v40  ;;  %14717 = vmatprep.mubr.bf16.mxu1 %v7003_v40  ;;  %v7053_v53 = vpop.f32.mrb[222].mxu0  ;;  %v21640_v40 = vld [vmem:[#allocation8 + $0x320] ss:$16 sps:$4 sm:$0xff]  }
 0xa2c   : > { %v25109_v57 = vpack.c.bf16 %v7053_v53, %v7049_v37  ;;  %v7055_v56 = vpop.f32.mrb[223].mxu0  ;;  %v21646_v53 = vld [vmem:[#allocation8 + $0x340] ss:$16 sps:$4 sm:$0xff]  }
 0xa2d   : > { %14000 = vmatpush1.bf16.msra.mxu0 %v21592_v52  ;;  %14688 = vmatpush1.bf16.msra.mxu1 %v21595_v8  ;;  %v25111_v46 = vpack.c.bf16 %v7055_v56, %v7051_v43  ;;  %v21648_v52 = vld [vmem:[#allocation8 + $0x344] ss:$16 sps:$4 sm:$0xff]   ;;  %v21651_v8 = vld [vmem:[#allocation8 + $0x34c] ss:$16 sps:$4 sm:$0xff]   ;;  %v21649_v56 = vld [vmem:[#allocation8 + $0x348] ss:$16 sps:$4 sm:$0xff]  }
 0xa2e   : > { %14001 = vmatprep.subr.bf16.mxu0 %v21600_v27  ;;  %14689 = vmatprep.subr.bf16.mxu1 %v21603_v55 }
 0xa31   : > { %14002 = vmatpush1.bf16.msra.mxu0 %v21598_v21  ;;  %14690 = vmatpush1.bf16.msra.mxu1 %v21601_v31  ;;  %v7105_v54 = vpop.f32.mrb[224].mxu0  ;;  %v21654_v31 = vld [vmem:[#allocation8 + $0x364] ss:$16 sps:$4 sm:$0xff]  }
 0xa32   : > { %14003 = vmatprep.subr.bf16.mxu0 %v21606_v38  ;;  %14691 = vmatprep.subr.bf16.mxu1 %v21609_v9  ;;  %v7107_v33 = vpop.f32.mrb[225].mxu0  ;;  %v21657_v38 = vld [vmem:[#allocation8 + $0x36c] ss:$16 sps:$4 sm:$0xff]   ;;  %v21652_v9 = vld [vmem:[#allocation8 + $0x360] ss:$16 sps:$4 sm:$0xff]  }
 0xa33   : > { %v7109_v18 = vpop.f32.mrb[226].mxu0 }
 0xa34   : > { %v25113_v15 = vpack.c.bf16 %v7109_v18, %v7105_v54  ;;  %v7111_v29 = vpop.f32.mrb[227].mxu0  ;;  %v21660_v54 = vld [vmem:[#allocation8 + $0x384] ss:$16 sps:$4 sm:$0xff]  }
 0xa35   : > { %14004 = vmatpush1.bf16.msra.mxu0 %v21604_v17  ;;  %14692 = vmatpush1.bf16.msra.mxu1 %v21607_v44  ;;  %v25115_v12 = vpack.c.bf16 %v7111_v29, %v7107_v33  ;;  %v21655_v17 = vld [vmem:[#allocation8 + $0x368] ss:$16 sps:$4 sm:$0xff]  }
 0xa36   : > { %14005 = vmatprep.subr.bf16.mxu0 %v21612_v42  ;;  %14693 = vmatprep.subr.bf16.mxu1 %v21615_v7  ;;  %v21663_v42 = vld [vmem:[#allocation8 + $0x38c] ss:$16 sps:$4 sm:$0xff]  }
 0xa39   : > { %14006 = vmatpush1.bf16.msra.mxu0 %v21610_v0  ;;  %14694 = vmatpush1.bf16.msra.mxu1 %v21613_v58  ;;  %v7161_v26 = vpop.f32.mrb[228].mxu0  ;;  %v21658_v0 = vld [vmem:[#allocation8 + $0x380] ss:$16 sps:$4 sm:$0xff]   ;;  %v21661_v58 = vld [vmem:[#allocation8 + $0x388] ss:$16 sps:$4 sm:$0xff]  }
 0xa3a   : > { %14007 = vmatprep.subr.bf16.mxu0 %v21618_v3  ;;  %14695 = vmatprep.subr.bf16.mxu1 %v21621_v39  ;;  %v7163_v2 = vpop.f32.mrb[229].mxu0  ;;  %v21666_v39 = vld [vmem:[#allocation8 + $0x3a4] ss:$16 sps:$4 sm:$0xff]  }
 0xa3b   : > { %v7165_v1 = vpop.f32.mrb[230].mxu0 }
 0xa3c   : > { %v25117_v22 = vpack.c.bf16 %v7165_v1, %v7161_v26  ;;  %v7167_v23 = vpop.f32.mrb[231].mxu0  ;;  %v21667_v26 = vld [vmem:[#allocation8 + $0x3a8] ss:$16 sps:$4 sm:$0xff]  }
 0xa3d   : > { %14008 = vmatpush1.bf16.msra.mxu0 %v21616_v34  ;;  %14696 = vmatpush1.bf16.msra.mxu1 %v21619_v41  ;;  %v25119_v47 = vpack.c.bf16 %v7167_v23, %v7163_v2  ;;  %v21669_v34 = vld [vmem:[#allocation8 + $0x3ac] ss:$16 sps:$4 sm:$0xff]   ;;  %v21664_v41 = vld [vmem:[#allocation8 + $0x3a0] ss:$16 sps:$4 sm:$0xff]  }
 0xa3e   : > { %14009 = vmatprep.subr.bf16.mxu0 %v21624_v11  ;;  %14697 = vmatprep.subr.bf16.mxu1 %v21627_v5  ;;  %v21672_v5 = vld [vmem:[#allocation8 + $0x3c4] ss:$16 sps:$4 sm:$0xff]   ;;  %v21675_v2 = vld [vmem:[#allocation8 + $0x3cc] ss:$16 sps:$4 sm:$0xff]  }
 0xa41   : > { %14010 = vmatpush1.bf16.msra.mxu0 %v21622_v16  ;;  %14698 = vmatpush1.bf16.msra.mxu1 %v21625_v49  ;;  %v7217_v20 = vpop.f32.mrb[232].mxu0 }
 0xa42   : > { %14011 = vmatprep.subr.bf16.mxu0 %v21630_v35  ;;  %14699 = vmatprep.subr.bf16.mxu1 %v21633_v14  ;;  %v7219_v19 = vpop.f32.mrb[233].mxu0  ;;  %v21670_v35 = vld [vmem:[#allocation8 + $0x3c0] ss:$16 sps:$4 sm:$0xff]   ;;  %v21673_v14 = vld [vmem:[#allocation8 + $0x3c8] ss:$16 sps:$4 sm:$0xff]  }
 0xa43   : > { %v7221_v24 = vpop.f32.mrb[234].mxu0 }
 0xa44   : > { %v25121_v62 = vpack.c.bf16 %v7221_v24, %v7217_v20  ;;  %v7223_v32 = vpop.f32.mrb[235].mxu0  ;;  %v21681_v20 = vld [vmem:[#allocation8 + $0x3ec] ss:$16 sps:$4 sm:$0xff]   ;;  %v21684_v24 = vld [vmem:[#allocation8 + $0x404] ss:$16 sps:$4 sm:$0xff]  }
 0xa45   : > { %14012 = vmatpush1.bf16.msra.mxu0 %v21628_v59  ;;  %14700 = vmatpush1.bf16.msra.mxu1 %v21631_v61  ;;  %v25123_v51 = vpack.c.bf16 %v7223_v32, %v7219_v19  ;;  %v21678_v61 = vld [vmem:[#allocation8 + $0x3e4] ss:$16 sps:$4 sm:$0xff]   ;;  %v21687_v32 = vld [vmem:[#allocation8 + $0x40c] ss:$16 sps:$4 sm:$0xff]  }
 0xa46   : > { %14013 = vmatprep.subr.bf16.mxu0 %v21636_v45  ;;  %14701 = vmatprep.subr.bf16.mxu1 %v21639_v30  ;;  %v21676_v45 = vld [vmem:[#allocation8 + $0x3e0] ss:$16 sps:$4 sm:$0xff]   ;;  %v21679_v30 = vld [vmem:[#allocation8 + $0x3e8] ss:$16 sps:$4 sm:$0xff]  }
 0xa49   : > { %14014 = vmatpush1.bf16.msra.mxu0 %v21634_v48  ;;  %14702 = vmatpush1.bf16.msra.mxu1 %v21637_v25  ;;  %v7273_v6 = vpop.f32.mrb[236].mxu0 }
 0xa4a   : > { %14015 = vmatprep.subr.bf16.mxu0 %v21642_v36  ;;  %14703 = vmatprep.subr.bf16.mxu1 %v21645_v63  ;;  %v7275_v37 = vpop.f32.mrb[237].mxu0 }
 0xa4b   : > { %v7277_v27 = vpop.f32.mrb[238].mxu0 }
 0xa4c   : > { %v25125_v55 = vpack.c.bf16 %v7277_v27, %v7273_v6  ;;  %v7279_v43 = vpop.f32.mrb[239].mxu0  ;;  %v21685_v6 = vld [vmem:[#allocation8 + $0x408] ss:$16 sps:$4 sm:$0xff]  }
 0xa4d   : > { %14016 = vmatpush1.bf16.msra.mxu0 %v21640_v40  ;;  %14704 = vmatpush1.bf16.msra.mxu1 %v21643_v13  ;;  %v25127_v21 = vpack.c.bf16 %v7279_v43, %v7275_v37  ;;  %v21682_v40 = vld [vmem:[#allocation8 + $0x400] ss:$16 sps:$4 sm:$0xff]   ;;  %v21691_v43 = vld [vmem:[#allocation8 + $0x428] ss:$16 sps:$4 sm:$0xff]  }
 0xa4e   : > { %14017 = vmatprep.subr.bf16.mxu0 %v21648_v52  ;;  %14705 = vmatprep.subr.bf16.mxu1 %v21651_v8  ;;  %v21690_v52 = vld [vmem:[#allocation8 + $0x424] ss:$16 sps:$4 sm:$0xff]   ;;  %v21693_v8 = vld [vmem:[#allocation8 + $0x42c] ss:$16 sps:$4 sm:$0xff]   ;;  %v21688_v37 = vld [vmem:[#allocation8 + $0x420] ss:$16 sps:$4 sm:$0xff]  }
 0xa51   : > { %14018 = vmatpush1.bf16.msra.mxu0 %v21646_v53  ;;  %14706 = vmatpush1.bf16.msra.mxu1 %v21649_v56  ;;  %v7329_v44 = vpop.f32.mrb[240].mxu0  ;;  %v21696_v53 = vld [vmem:[#allocation8 + $0x444] ss:$16 sps:$4 sm:$0xff]  }
 0xa52   : > { %14019 = vmatprep.subr.bf16.mxu0 %v21654_v31  ;;  %14707 = vmatprep.subr.bf16.mxu1 %v21657_v38  ;;  %v7331_v7 = vpop.f32.mrb[241].mxu0  ;;  %v21699_v31 = vld [vmem:[#allocation8 + $0x44c] ss:$16 sps:$4 sm:$0xff]  }
 0xa53   : > { %v7333_v33 = vpop.f32.mrb[242].mxu0 }
 0xa54   : > { %v25129_v18 = vpack.c.bf16 %v7333_v33, %v7329_v44  ;;  %v7335_v29 = vpop.f32.mrb[243].mxu0 }
 0xa55   : > { %14020 = vmatpush1.bf16.msra.mxu0 %v21652_v9  ;;  %14708 = vmatpush1.bf16.msra.mxu1 %v21655_v17  ;;  %v25131_v3 = vpack.c.bf16 %v7335_v29, %v7331_v7  ;;  %v21700_v7 = vld [vmem:[#allocation8 + $0x460] ss:$16 sps:$4 sm:$0xff]   ;;  %v21703_v29 = vld [vmem:[#allocation8 + $0x468] ss:$16 sps:$4 sm:$0xff]  }
 0xa56   : > { %14021 = vmatprep.subr.bf16.mxu0 %v21660_v54  ;;  %14709 = vmatprep.subr.bf16.mxu1 %v21663_v42  ;;  %v21697_v54 = vld [vmem:[#allocation8 + $0x448] ss:$16 sps:$4 sm:$0xff]   ;;  %v21702_v42 = vld [vmem:[#allocation8 + $0x464] ss:$16 sps:$4 sm:$0xff]  }
 0xa59   : > { %14022 = vmatpush1.bf16.msra.mxu0 %v21658_v0  ;;  %14710 = vmatpush1.bf16.msra.mxu1 %v21661_v58  ;;  %v7385_v11 = vpop.f32.mrb[244].mxu0  ;;  %v21708_v0 = vld [vmem:[#allocation8 + $0x484] ss:$16 sps:$4 sm:$0xff]  }
 0xa5a   : > { %14023 = vmatprep.subr.bf16.mxu0 %v21666_v39  ;;  %14711 = vmatprep.subr.bf16.mxu1 %v21669_v34  ;;  %v7387_v1 = vpop.f32.mrb[245].mxu0  ;;  %v21711_v39 = vld [vmem:[#allocation8 + $0x48c] ss:$16 sps:$4 sm:$0xff]  }
 0xa5b   : > { %v7389_v23 = vpop.f32.mrb[246].mxu0 }
 0xa5c   : > { %v25133_v16 = vpack.c.bf16 %v7389_v23, %v7385_v11  ;;  %v7391_v49 = vpop.f32.mrb[247].mxu0  ;;  %v21706_v11 = vld [vmem:[#allocation8 + $0x480] ss:$16 sps:$4 sm:$0xff]   ;;  %v21717_v23 = vld [vmem:[#allocation8 + $0x4ac] ss:$16 sps:$4 sm:$0xff]  }
 0xa5d   : > { %14024 = vmatpush1.bf16.msra.mxu0 %v21664_v41  ;;  %14712 = vmatpush1.bf16.msra.mxu1 %v21667_v26  ;;  %v25135_v59 = vpack.c.bf16 %v7391_v49, %v7387_v1  ;;  %v21714_v1 = vld [vmem:[#allocation8 + $0x4a4] ss:$16 sps:$4 sm:$0xff]   ;;  %v21712_v49 = vld [vmem:[#allocation8 + $0x4a0] ss:$16 sps:$4 sm:$0xff]  }
 0xa5e   : > { %14025 = vmatprep.subr.bf16.mxu0 %v21672_v5  ;;  %14713 = vmatprep.subr.bf16.mxu1 %v21675_v2  ;;  %v21709_v2 = vld [vmem:[#allocation8 + $0x488] ss:$16 sps:$4 sm:$0xff]  }
 0xa61   : > { %14026 = vmatpush1.bf16.msra.mxu0 %v21670_v35  ;;  %14714 = vmatpush1.bf16.msra.mxu1 %v21673_v14  ;;  %v7441_v19 = vpop.f32.mrb[248].mxu0  ;;  %v21715_v14 = vld [vmem:[#allocation8 + $0x4a8] ss:$16 sps:$4 sm:$0xff]  }
 0xa62   : > { %14027 = vmatprep.subr.bf16.mxu0 %v21678_v61  ;;  %14715 = vmatprep.subr.bf16.mxu1 %v21681_v20  ;;  %v7443_v48 = vpop.f32.mrb[249].mxu0  ;;  %v21720_v61 = vld [vmem:[#allocation8 + $0x4c4] ss:$16 sps:$4 sm:$0xff]  }
 0xa63   : > { %v7445_v25 = vpop.f32.mrb[250].mxu0 }
 0xa64   : > { %v25137_v36 = vpack.c.bf16 %v7445_v25, %v7441_v19  ;;  %v7447_v63 = vpop.f32.mrb[251].mxu0  ;;  %v21721_v25 = vld [vmem:[#allocation8 + $0x4c8] ss:$16 sps:$4 sm:$0xff]  }
 0xa65   : > { %14028 = vmatpush1.bf16.msra.mxu0 %v21676_v45  ;;  %14716 = vmatpush1.bf16.msra.mxu1 %v21679_v30  ;;  %v25139_v13 = vpack.c.bf16 %v7447_v63, %v7443_v48  ;;  %v21723_v45 = vld [vmem:[#allocation8 + $0x4cc] ss:$16 sps:$4 sm:$0xff]   ;;  %v21726_v63 = vld [vmem:[#allocation8 + $0x4e4] ss:$16 sps:$4 sm:$0xff]  }
 0xa66   : > { %14040 = vmatprep.subr.bf16.mxu0 %v21684_v24  ;;  %14728 = vmatprep.subr.bf16.mxu1 %v21687_v32  ;;  %v21718_v32 = vld [vmem:[#allocation8 + $0x4c0] ss:$16 sps:$4 sm:$0xff]  }
 0xa68   : > { %14030 = vmatmul.mubr.bf16.vlgmr.msra.gmra.mrb[20].mxu0 %v25107_v50  ;;  %14718 = vmatmul.mubr.bf16.vlgmr.msra.gmra.mrb[212].mxu1 %v25107_v50  ;;  %v21694_v50 = vld [vmem:[#allocation8 + $0x440] ss:$16 sps:$4 sm:$0xff]  }
 0xa69   : > { %14041 = vmatpush1.bf16.msra.mxu0 %v21682_v40  ;;  %14072 = vmatprep.mubr.bf16.mxu0 %v25111_v46  ;;  %v7497_v27 = vpop.f32.mrb[252].mxu0  ;;  %v21729_v40 = vld [vmem:[#allocation8 + $0x4ec] ss:$16 sps:$4 sm:$0xff]  }
 0xa6a   : > { %14729 = vmatpush1.bf16.msra.mxu1 %v21685_v6  ;;  %14760 = vmatprep.mubr.bf16.mxu1 %v25111_v46  ;;  %v7499_v56 = vpop.f32.mrb[253].mxu0  ;;  %v21705_v46 = vld [vmem:[#allocation8 + $0x46c] ss:$16 sps:$4 sm:$0xff]   ;;  %v21724_v6 = vld [vmem:[#allocation8 + $0x4e0] ss:$16 sps:$4 sm:$0xff]  }
 0xa6b   : > { %14042 = vmatprep.subr.bf16.mxu0 %v21690_v52  ;;  %14730 = vmatprep.subr.bf16.mxu1 %v21693_v8  ;;  %v7501_v38 = vpop.f32.mrb[254].mxu0  ;;  %v21727_v8 = vld [vmem:[#allocation8 + $0x4e8] ss:$16 sps:$4 sm:$0xff]  }
 0xa6c   : > { %v25145_v9 = vpack.c.bf16 %v7501_v38, %v7497_v27  ;;  %v7503_v17 = vpop.f32.mrb[255].mxu0  ;;  %v21730_v38 = vld [vmem:[#allocation8 + $0x500] ss:$16 sps:$4 sm:$0xff]  }
 0xa6d   : > { %14043 = vmatpush1.bf16.msra.mxu0 %v21688_v37  ;;  %v25147_v44 = vpack.c.bf16 %v7503_v17, %v7499_v56  ;;  %v21732_v37 = vld [vmem:[#allocation8 + $0x504] ss:$16 sps:$4 sm:$0xff]  }
 0xa6e   : > { %14731 = vmatpush1.bf16.msra.mxu1 %v21691_v43  ;;  %14044 = vmatprep.subr.bf16.mxu0 %v21696_v53  ;;  %v21735_v43 = vld [vmem:[#allocation8 + $0x50c] ss:$16 sps:$4 sm:$0xff]  }
 0xa6f   : > { %14732 = vmatprep.subr.bf16.mxu1 %v21699_v31 }
 0xa71   : > { %14045 = vmatpush1.bf16.msra.mxu0 %v21694_v50  ;;  %v7553_v33 = vpop.f32.mrb[0].mxu0  ;;  %v21733_v50 = vld [vmem:[#allocation8 + $0x508] ss:$16 sps:$4 sm:$0xff]  }
 0xa72   : > { %14733 = vmatpush1.bf16.msra.mxu1 %v21697_v54  ;;  %14046 = vmatprep.subr.bf16.mxu0 %v21702_v42  ;;  %v7555_v58 = vpop.f32.mrb[1].mxu0  ;;  %v21738_v54 = vld [vmem:[#allocation8 + $0x524] ss:$16 sps:$4 sm:$0xff]   ;;  %v21741_v42 = vld [vmem:[#allocation8 + $0x52c] ss:$16 sps:$4 sm:$0xff]  }
 0xa73   : > { %14734 = vmatprep.subr.bf16.mxu1 %v21705_v46  ;;  %v7557_v34 = vpop.f32.mrb[2].mxu0  ;;  %v21736_v46 = vld [vmem:[#allocation8 + $0x520] ss:$16 sps:$4 sm:$0xff]  }
 0xa74   : > { %v25149_v41 = vpack.c.bf16 %v7557_v34, %v7553_v33  ;;  %v7559_v26 = vpop.f32.mrb[3].mxu0  ;;  %v21739_v33 = vld [vmem:[#allocation8 + $0x528] ss:$16 sps:$4 sm:$0xff]  }
 0xa75   : > { %14047 = vmatpush1.bf16.msra.mxu0 %v21700_v7  ;;  %v25151_v5 = vpack.c.bf16 %v7559_v26, %v7555_v58  ;;  %v21747_v58 = vld [vmem:[#allocation8 + $0x54c] ss:$16 sps:$4 sm:$0xff]  }
 0xa76   : > { %14735 = vmatpush1.bf16.msra.mxu1 %v21703_v29  ;;  %14048 = vmatprep.subr.bf16.mxu0 %v21708_v0  ;;  %v21744_v29 = vld [vmem:[#allocation8 + $0x544] ss:$16 sps:$4 sm:$0xff]  }
 0xa77   : > { %14736 = vmatprep.subr.bf16.mxu1 %v21711_v39 }
 0xa79   : > { %14049 = vmatpush1.bf16.msra.mxu0 %v21706_v11  ;;  %v7609_v35 = vpop.f32.mrb[4].mxu0  ;;  %v21742_v11 = vld [vmem:[#allocation8 + $0x540] ss:$16 sps:$4 sm:$0xff]  }
 0xa7a   : > { %14737 = vmatpush1.bf16.msra.mxu1 %v21709_v2  ;;  %14050 = vmatprep.subr.bf16.mxu0 %v21714_v1  ;;  %v7611_v20 = vpop.f32.mrb[5].mxu0  ;;  %v21745_v1 = vld [vmem:[#allocation8 + $0x548] ss:$16 sps:$4 sm:$0xff]  }
 0xa7b   : > { %14738 = vmatprep.subr.bf16.mxu1 %v21717_v23  ;;  %v7613_v30 = vpop.f32.mrb[6].mxu0  ;;  %v21750_v23 = vld [vmem:[#allocation8 + $0x564] ss:$16 sps:$4 sm:$0xff]  }
 0xa7c   : > { %v25153_v19 = vpack.c.bf16 %v7613_v30, %v7609_v35  ;;  %v7615_v24 = vpop.f32.mrb[7].mxu0  ;;  %v21748_v35 = vld [vmem:[#allocation8 + $0x560] ss:$16 sps:$4 sm:$0xff]   ;;  %v21759_v30 = vld [vmem:[#allocation8 + $0x58c] ss:$16 sps:$4 sm:$0xff]  }
 0xa7d   : > { %14051 = vmatpush1.bf16.msra.mxu0 %v21712_v49  ;;  %v25155_v48 = vpack.c.bf16 %v7615_v24, %v7611_v20  ;;  %v21753_v49 = vld [vmem:[#allocation8 + $0x56c] ss:$16 sps:$4 sm:$0xff]   ;;  %v21756_v20 = vld [vmem:[#allocation8 + $0x584] ss:$16 sps:$4 sm:$0xff]  }
 0xa7e   : > { %14739 = vmatpush1.bf16.msra.mxu1 %v21715_v14  ;;  %14052 = vmatprep.subr.bf16.mxu0 %v21720_v61  ;;  %v21751_v61 = vld [vmem:[#allocation8 + $0x568] ss:$16 sps:$4 sm:$0xff]  }
 0xa7f   : > { %14740 = vmatprep.subr.bf16.mxu1 %v21723_v45 }
 0xa81   : > { %14053 = vmatpush1.bf16.msra.mxu0 %v21718_v32  ;;  %v7665_v52 = vpop.f32.mrb[8].mxu0 }
 0xa82   : > { %14741 = vmatpush1.bf16.msra.mxu1 %v21721_v25  ;;  %14054 = vmatprep.subr.bf16.mxu0 %v21726_v63  ;;  %v7667_v27 = vpop.f32.mrb[9].mxu0  ;;  %v21754_v63 = vld [vmem:[#allocation8 + $0x580] ss:$16 sps:$4 sm:$0xff]  }
 0xa83   : > { %14742 = vmatprep.subr.bf16.mxu1 %v21729_v40  ;;  %v7669_v53 = vpop.f32.mrb[10].mxu0 }
 0xa84   : > { %v25157_v56 = vpack.c.bf16 %v7669_v53, %v7665_v52  ;;  %v7671_v31 = vpop.f32.mrb[11].mxu0  ;;  %v21762_v52 = vld [vmem:[#allocation8 + $0x5a4] ss:$16 sps:$4 sm:$0xff]   ;;  %v21771_v53 = vld [vmem:[#allocation8 + $0x5cc] ss:$16 sps:$4 sm:$0xff]  }
 0xa85   : > { %14055 = vmatpush1.bf16.msra.mxu0 %v21724_v6  ;;  %v25159_v17 = vpack.c.bf16 %v7671_v31, %v7667_v27  ;;  %v21757_v6 = vld [vmem:[#allocation8 + $0x588] ss:$16 sps:$4 sm:$0xff]   ;;  %v21766_v31 = vld [vmem:[#allocation8 + $0x5c0] ss:$16 sps:$4 sm:$0xff]  }
 0xa86   : > { %14743 = vmatpush1.bf16.msra.mxu1 %v21727_v8  ;;  %14056 = vmatprep.subr.bf16.mxu0 %v21732_v37  ;;  %v21765_v8 = vld [vmem:[#allocation8 + $0x5ac] ss:$16 sps:$4 sm:$0xff]   ;;  %v21760_v37 = vld [vmem:[#allocation8 + $0x5a0] ss:$16 sps:$4 sm:$0xff]   ;;  %v21763_v27 = vld [vmem:[#allocation8 + $0x5a8] ss:$16 sps:$4 sm:$0xff]  }
 0xa87   : > { %14744 = vmatprep.subr.bf16.mxu1 %v21735_v43  ;;  %v21768_v43 = vld [vmem:[#allocation8 + $0x5c4] ss:$16 sps:$4 sm:$0xff]  }
 0xa89   : > { %14057 = vmatpush1.bf16.msra.mxu0 %v21730_v38  ;;  %v7721_v7 = vpop.f32.mrb[12].mxu0  ;;  %v21769_v38 = vld [vmem:[#allocation8 + $0x5c8] ss:$16 sps:$4 sm:$0xff]  }
 0xa8a   : > { %14745 = vmatpush1.bf16.msra.mxu1 %v21733_v50  ;;  %14058 = vmatprep.subr.bf16.mxu0 %v21738_v54  ;;  %v7723_v0 = vpop.f32.mrb[13].mxu0  ;;  %v21774_v50 = vld [vmem:[#allocation8 + $0x5e4] ss:$16 sps:$4 sm:$0xff]   ;;  %v21777_v54 = vld [vmem:[#allocation8 + $0x5ec] ss:$16 sps:$4 sm:$0xff]  }
 0xa8b   : > { %14746 = vmatprep.subr.bf16.mxu1 %v21741_v42  ;;  %v7725_v39 = vpop.f32.mrb[14].mxu0  ;;  %v21772_v42 = vld [vmem:[#allocation8 + $0x5e0] ss:$16 sps:$4 sm:$0xff]  }
 0xa8c   : > { %v25161_v34 = vpack.c.bf16 %v7725_v39, %v7721_v7  ;;  %v7727_v26 = vpop.f32.mrb[15].mxu0  ;;  %v21780_v7 = vld [vmem:[#allocation8 + $0x604] ss:$16 sps:$4 sm:$0xff]   ;;  %v21789_v39 = vld [vmem:[#allocation8 + $0x62c] ss:$16 sps:$4 sm:$0xff]  }
 0xa8d   : > { %14059 = vmatpush1.bf16.msra.mxu0 %v21736_v46  ;;  %v25163_v2 = vpack.c.bf16 %v7727_v26, %v7723_v0  ;;  %v21775_v46 = vld [vmem:[#allocation8 + $0x5e8] ss:$16 sps:$4 sm:$0xff]   ;;  %v21784_v26 = vld [vmem:[#allocation8 + $0x620] ss:$16 sps:$4 sm:$0xff]  }
 0xa8e   : > { %14747 = vmatpush1.bf16.msra.mxu1 %v21739_v33  ;;  %14060 = vmatprep.subr.bf16.mxu0 %v21744_v29  ;;  %v21783_v33 = vld [vmem:[#allocation8 + $0x60c] ss:$16 sps:$4 sm:$0xff]   ;;  %v21778_v29 = vld [vmem:[#allocation8 + $0x600] ss:$16 sps:$4 sm:$0xff]   ;;  %v21781_v0 = vld [vmem:[#allocation8 + $0x608] ss:$16 sps:$4 sm:$0xff]  }
 0xa8f   : > { %14748 = vmatprep.subr.bf16.mxu1 %v21747_v58  ;;  %v21786_v58 = vld [vmem:[#allocation8 + $0x624] ss:$16 sps:$4 sm:$0xff]  }
 0xa91   : > { %14061 = vmatpush1.bf16.msra.mxu0 %v21742_v11  ;;  %v7777_v14 = vpop.f32.mrb[16].mxu0  ;;  %v21787_v11 = vld [vmem:[#allocation8 + $0x628] ss:$16 sps:$4 sm:$0xff]  }
 0xa92   : > { %14749 = vmatpush1.bf16.msra.mxu1 %v21745_v1  ;;  %14062 = vmatprep.subr.bf16.mxu0 %v21750_v23  ;;  %v7779_v45 = vpop.f32.mrb[17].mxu0  ;;  %v21792_v1 = vld [vmem:[#allocation8 + $0x644] ss:$16 sps:$4 sm:$0xff]   ;;  %v21795_v23 = vld [vmem:[#allocation8 + $0x64c] ss:$16 sps:$4 sm:$0xff]  }
 0xa93   : > { %14750 = vmatprep.subr.bf16.mxu1 %v21753_v49  ;;  %v7781_v24 = vpop.f32.mrb[18].mxu0  ;;  %v21790_v49 = vld [vmem:[#allocation8 + $0x640] ss:$16 sps:$4 sm:$0xff]  }
 0xa94   : > { %v25165_v32 = vpack.c.bf16 %v7781_v24, %v7777_v14  ;;  %v7783_v25 = vpop.f32.mrb[19].mxu0  ;;  %v21798_v14 = vld [vmem:[#allocation8 + $0x664] ss:$16 sps:$4 sm:$0xff]   ;;  %v21805_v24 = vld [vmem:[#allocation8 + $0x688] ss:$16 sps:$4 sm:$0xff]  }
 0xa95   : > { %14063 = vmatpush1.bf16.msra.mxu0 %v21748_v35  ;;  %v25167_v40 = vpack.c.bf16 %v7783_v25, %v7779_v45  ;;  %v21793_v35 = vld [vmem:[#allocation8 + $0x648] ss:$16 sps:$4 sm:$0xff]   ;;  %v21804_v45 = vld [vmem:[#allocation8 + $0x684] ss:$16 sps:$4 sm:$0xff]  }
 0xa96   : > { %14751 = vmatpush1.bf16.msra.mxu1 %v21751_v61  ;;  %14064 = vmatprep.subr.bf16.mxu0 %v21756_v20  ;;  %v21796_v61 = vld [vmem:[#allocation8 + $0x660] ss:$16 sps:$4 sm:$0xff]   ;;  %v21799_v20 = vld [vmem:[#allocation8 + $0x668] ss:$16 sps:$4 sm:$0xff]   ;;  %v21810_v25 = vld [vmem:[#allocation8 + $0x6a4] ss:$16 sps:$4 sm:$0xff]  }
 0xa97   : > { %14752 = vmatprep.subr.bf16.mxu1 %v21759_v30  ;;  %v21807_v30 = vld [vmem:[#allocation8 + $0x68c] ss:$16 sps:$4 sm:$0xff]  }
 0xa99   : > { %14065 = vmatpush1.bf16.msra.mxu0 %v21754_v63  ;;  %v21813_v63 = vld [vmem:[#allocation8 + $0x6ac] ss:$16 sps:$4 sm:$0xff]  }
 0xa9a   : > { %14753 = vmatpush1.bf16.msra.mxu1 %v21757_v6  ;;  %14066 = vmatprep.subr.bf16.mxu0 %v21762_v52  ;;  %v21808_v6 = vld [vmem:[#allocation8 + $0x6a0] ss:$16 sps:$4 sm:$0xff]   ;;  %v21811_v52 = vld [vmem:[#allocation8 + $0x6a8] ss:$16 sps:$4 sm:$0xff]  }
 0xa9b   : > { %14754 = vmatprep.subr.bf16.mxu1 %v21765_v8  ;;  %v21816_v8 = vld [vmem:[#allocation8 + $0x6c4] ss:$16 sps:$4 sm:$0xff]  }
 0xa9d   : > { %14067 = vmatpush1.bf16.msra.mxu0 %v21760_v37  ;;  %v21819_v37 = vld [vmem:[#allocation8 + $0x6cc] ss:$16 sps:$4 sm:$0xff]  }
 0xa9e   : > { %14755 = vmatpush1.bf16.msra.mxu1 %v21763_v27  ;;  %14068 = vmatprep.subr.bf16.mxu0 %v21768_v43  ;;  %v21814_v27 = vld [vmem:[#allocation8 + $0x6c0] ss:$16 sps:$4 sm:$0xff]   ;;  %v21817_v43 = vld [vmem:[#allocation8 + $0x6c8] ss:$16 sps:$4 sm:$0xff]  }
 0xa9f   : > { %14756 = vmatprep.subr.bf16.mxu1 %v21771_v53  ;;  %v21822_v53 = vld [vmem:[#allocation8 + $0x6e4] ss:$16 sps:$4 sm:$0xff]  }
 0xaa1   : > { %14069 = vmatpush1.bf16.msra.mxu0 %v21766_v31  ;;  %v21825_v31 = vld [vmem:[#allocation8 + $0x6ec] ss:$16 sps:$4 sm:$0xff]  }
 0xaa2   : > { %14757 = vmatpush1.bf16.msra.mxu1 %v21769_v38  ;;  %14070 = vmatprep.subr.bf16.mxu0 %v21774_v50  ;;  %v21820_v38 = vld [vmem:[#allocation8 + $0x6e0] ss:$16 sps:$4 sm:$0xff]   ;;  %v21823_v50 = vld [vmem:[#allocation8 + $0x6e8] ss:$16 sps:$4 sm:$0xff]  }
 0xaa3   : > { %14758 = vmatprep.subr.bf16.mxu1 %v21777_v54  ;;  %v21828_v54 = vld [vmem:[#allocation8 + $0x704] ss:$16 sps:$4 sm:$0xff]  }
 0xaa5   : > { %14071 = vmatpush1.bf16.msra.mxu0 %v21772_v42  ;;  %v21831_v42 = vld [vmem:[#allocation8 + $0x70c] ss:$16 sps:$4 sm:$0xff]  }
 0xaa6   : > { %14759 = vmatpush1.bf16.msra.mxu1 %v21775_v46  ;;  %14083 = vmatprep.subr.bf16.mxu0 %v21780_v7  ;;  %v21826_v46 = vld [vmem:[#allocation8 + $0x700] ss:$16 sps:$4 sm:$0xff]   ;;  %v21829_v7 = vld [vmem:[#allocation8 + $0x708] ss:$16 sps:$4 sm:$0xff]  }
 0xaa7   : > { %14771 = vmatprep.subr.bf16.mxu1 %v21783_v33  ;;  %v21834_v33 = vld [vmem:[#allocation8 + $0x724] ss:$16 sps:$4 sm:$0xff]  }
 0xaa8   : > { %14073 = vmatmul.mubr.bf16.vlgmr.msra.gmra.mrb[20].mxu0 %v25109_v57 }
 0xaa9   : > { %14761 = vmatmul.mubr.bf16.vlgmr.msra.gmra.mrb[212].mxu1 %v25109_v57  ;;  %14084 = vmatpush1.bf16.msra.mxu0 %v21778_v29  ;;  %v21801_v57 = vld [vmem:[#allocation8 + $0x66c] ss:$16 sps:$4 sm:$0xff]  }
 0xaaa   : > { %14115 = vmatprep.mubr.bf16.mxu0 %v25115_v12  ;;  %14772 = vmatpush1.bf16.msra.mxu1 %v21781_v0  ;;  %v21837_v29 = vld [vmem:[#allocation8 + $0x72c] ss:$16 sps:$4 sm:$0xff]   ;;  %v21832_v0 = vld [vmem:[#allocation8 + $0x720] ss:$16 sps:$4 sm:$0xff]  }
 0xaab   : > { %14803 = vmatprep.mubr.bf16.mxu1 %v25115_v12  ;;  %14085 = vmatprep.subr.bf16.mxu0 %v21786_v58  ;;  %v21802_v12 = vld [vmem:[#allocation8 + $0x680] ss:$16 sps:$4 sm:$0xff]   ;;  %v21835_v58 = vld [vmem:[#allocation8 + $0x728] ss:$16 sps:$4 sm:$0xff]  }
 0xaac   : > { %14773 = vmatprep.subr.bf16.mxu1 %v21789_v39  ;;  %v21840_v39 = vld [vmem:[#allocation8 + $0x744] ss:$16 sps:$4 sm:$0xff]  }
 0xaad   : > { %14086 = vmatpush1.bf16.msra.mxu0 %v21784_v26  ;;  %v21843_v26 = vld [vmem:[#allocation8 + $0x74c] ss:$16 sps:$4 sm:$0xff]  }
 0xaae   : > { %14774 = vmatpush1.bf16.msra.mxu1 %v21787_v11  ;;  %14087 = vmatprep.subr.bf16.mxu0 %v21792_v1  ;;  %v21838_v11 = vld [vmem:[#allocation8 + $0x740] ss:$16 sps:$4 sm:$0xff]   ;;  %v21841_v1 = vld [vmem:[#allocation8 + $0x748] ss:$16 sps:$4 sm:$0xff]  }
 0xaaf   : > { %14775 = vmatprep.subr.bf16.mxu1 %v21795_v23  ;;  %v21846_v23 = vld [vmem:[#allocation8 + $0x764] ss:$16 sps:$4 sm:$0xff]  }
 0xab1   : > { %14088 = vmatpush1.bf16.msra.mxu0 %v21790_v49  ;;  %v21849_v49 = vld [vmem:[#allocation8 + $0x76c] ss:$16 sps:$4 sm:$0xff]  }
 0xab2   : > { %14776 = vmatpush1.bf16.msra.mxu1 %v21793_v35  ;;  %14089 = vmatprep.subr.bf16.mxu0 %v21798_v14  ;;  %v21844_v35 = vld [vmem:[#allocation8 + $0x760] ss:$16 sps:$4 sm:$0xff]   ;;  %v21847_v14 = vld [vmem:[#allocation8 + $0x768] ss:$16 sps:$4 sm:$0xff]  }
 0xab3   : > { %14777 = vmatprep.subr.bf16.mxu1 %v21801_v57  ;;  %v21852_v57 = vld [vmem:[#allocation8 + $0x784] ss:$16 sps:$4 sm:$0xff]  }
 0xab5   : > { %14090 = vmatpush1.bf16.msra.mxu0 %v21796_v61  ;;  %v21855_v61 = vld [vmem:[#allocation8 + $0x78c] ss:$16 sps:$4 sm:$0xff]  }
 0xab6   : > { %14778 = vmatpush1.bf16.msra.mxu1 %v21799_v20  ;;  %14091 = vmatprep.subr.bf16.mxu0 %v21804_v45  ;;  %v21850_v20 = vld [vmem:[#allocation8 + $0x780] ss:$16 sps:$4 sm:$0xff]   ;;  %v21853_v45 = vld [vmem:[#allocation8 + $0x788] ss:$16 sps:$4 sm:$0xff]  }
 0xab7   : > { %14779 = vmatprep.subr.bf16.mxu1 %v21807_v30  ;;  %v21858_v30 = vld [vmem:[#allocation8 + $0x7a4] ss:$16 sps:$4 sm:$0xff]  }
 0xab9   : > { %14092 = vmatpush1.bf16.msra.mxu0 %v21802_v12  ;;  %v21861_v12 = vld [vmem:[#allocation8 + $0x7ac] ss:$16 sps:$4 sm:$0xff]  }
 0xaba   : > { %14780 = vmatpush1.bf16.msra.mxu1 %v21805_v24  ;;  %14093 = vmatprep.subr.bf16.mxu0 %v21810_v25  ;;  %v21856_v24 = vld [vmem:[#allocation8 + $0x7a0] ss:$16 sps:$4 sm:$0xff]   ;;  %v21859_v25 = vld [vmem:[#allocation8 + $0x7a8] ss:$16 sps:$4 sm:$0xff]  }
 0xabb   : > { %14781 = vmatprep.subr.bf16.mxu1 %v21813_v63  ;;  %v21864_v63 = vld [vmem:[#allocation8 + $0x7c4] ss:$16 sps:$4 sm:$0xff]  }
 0xabd   : > { %14094 = vmatpush1.bf16.msra.mxu0 %v21808_v6  ;;  %v21867_v6 = vld [vmem:[#allocation8 + $0x7cc] ss:$16 sps:$4 sm:$0xff]  }
 0xabe   : > { %14782 = vmatpush1.bf16.msra.mxu1 %v21811_v52  ;;  %14095 = vmatprep.subr.bf16.mxu0 %v21816_v8  ;;  %v21862_v52 = vld [vmem:[#allocation8 + $0x7c0] ss:$16 sps:$4 sm:$0xff]   ;;  %v21865_v8 = vld [vmem:[#allocation8 + $0x7c8] ss:$16 sps:$4 sm:$0xff]  }
 0xabf   : > { %14783 = vmatprep.subr.bf16.mxu1 %v21819_v37  ;;  %v21870_v37 = vld [vmem:[#allocation8 + $0x7e4] ss:$16 sps:$4 sm:$0xff]  }
 0xac1   : > { %14096 = vmatpush1.bf16.msra.mxu0 %v21814_v27  ;;  %v21873_v27 = vld [vmem:[#allocation8 + $0x7ec] ss:$16 sps:$4 sm:$0xff]  }
 0xac2   : > { %14784 = vmatpush1.bf16.msra.mxu1 %v21817_v43  ;;  %14097 = vmatprep.subr.bf16.mxu0 %v21822_v53  ;;  %v21868_v43 = vld [vmem:[#allocation8 + $0x7e0] ss:$16 sps:$4 sm:$0xff]   ;;  %v21871_v53 = vld [vmem:[#allocation8 + $0x7e8] ss:$16 sps:$4 sm:$0xff]  }
 0xac3   : > { %14785 = vmatprep.subr.bf16.mxu1 %v21825_v31  ;;  %v21876_v31 = vld [vmem:[#allocation8 + $0x804] ss:$16 sps:$4 sm:$0xff]  }
 0xac5   : > { %14098 = vmatpush1.bf16.msra.mxu0 %v21820_v38  ;;  %v21879_v38 = vld [vmem:[#allocation8 + $0x80c] ss:$16 sps:$4 sm:$0xff]  }
 0xac6   : > { %14786 = vmatpush1.bf16.msra.mxu1 %v21823_v50  ;;  %14099 = vmatprep.subr.bf16.mxu0 %v21828_v54  ;;  %v21874_v50 = vld [vmem:[#allocation8 + $0x800] ss:$16 sps:$4 sm:$0xff]   ;;  %v21877_v54 = vld [vmem:[#allocation8 + $0x808] ss:$16 sps:$4 sm:$0xff]  }
 0xac7   : > { %14787 = vmatprep.subr.bf16.mxu1 %v21831_v42  ;;  %v21882_v42 = vld [vmem:[#allocation8 + $0x824] ss:$16 sps:$4 sm:$0xff]  }
 0xac9   : > { %14100 = vmatpush1.bf16.msra.mxu0 %v21826_v46  ;;  %v21885_v46 = vld [vmem:[#allocation8 + $0x82c] ss:$16 sps:$4 sm:$0xff]  }
 0xaca   : > { %14788 = vmatpush1.bf16.msra.mxu1 %v21829_v7  ;;  %14101 = vmatprep.subr.bf16.mxu0 %v21834_v33  ;;  %v21880_v7 = vld [vmem:[#allocation8 + $0x820] ss:$16 sps:$4 sm:$0xff]   ;;  %v21883_v33 = vld [vmem:[#allocation8 + $0x828] ss:$16 sps:$4 sm:$0xff]  }
 0xacb   : > { %14789 = vmatprep.subr.bf16.mxu1 %v21837_v29  ;;  %v21888_v29 = vld [vmem:[#allocation8 + $0x844] ss:$16 sps:$4 sm:$0xff]  }
 0xacd   : > { %14102 = vmatpush1.bf16.msra.mxu0 %v21832_v0  ;;  %v21891_v0 = vld [vmem:[#allocation8 + $0x84c] ss:$16 sps:$4 sm:$0xff]  }
 0xace   : > { %14790 = vmatpush1.bf16.msra.mxu1 %v21835_v58  ;;  %14103 = vmatprep.subr.bf16.mxu0 %v21840_v39  ;;  %v21886_v58 = vld [vmem:[#allocation8 + $0x840] ss:$16 sps:$4 sm:$0xff]   ;;  %v21889_v39 = vld [vmem:[#allocation8 + $0x848] ss:$16 sps:$4 sm:$0xff]  }
 0xacf   : > { %14791 = vmatprep.subr.bf16.mxu1 %v21843_v26  ;;  %v21894_v26 = vld [vmem:[#allocation8 + $0x864] ss:$16 sps:$4 sm:$0xff]  }
 0xad1   : > { %14104 = vmatpush1.bf16.msra.mxu0 %v21838_v11  ;;  %v21892_v11 = vld [vmem:[#allocation8 + $0x860] ss:$16 sps:$4 sm:$0xff]  }
 0xad2   : > { %14792 = vmatpush1.bf16.msra.mxu1 %v21841_v1  ;;  %14105 = vmatprep.subr.bf16.mxu0 %v21846_v23  ;;  %v21895_v1 = vld [vmem:[#allocation8 + $0x868] ss:$16 sps:$4 sm:$0xff]   ;;  %v21900_v23 = vld [vmem:[#allocation8 + $0x884] ss:$16 sps:$4 sm:$0xff]  }
 0xad3   : > { %14793 = vmatprep.subr.bf16.mxu1 %v21849_v49  ;;  %v21903_v49 = vld [vmem:[#allocation8 + $0x88c] ss:$16 sps:$4 sm:$0xff]  }
 0xad5   : > { %14106 = vmatpush1.bf16.msra.mxu0 %v21844_v35  ;;  %v21901_v35 = vld [vmem:[#allocation8 + $0x888] ss:$16 sps:$4 sm:$0xff]  }
 0xad6   : > { %14794 = vmatpush1.bf16.msra.mxu1 %v21847_v14  ;;  %14107 = vmatprep.subr.bf16.mxu0 %v21852_v57  ;;  %v21906_v14 = vld [vmem:[#allocation8 + $0x8a4] ss:$16 sps:$4 sm:$0xff]   ;;  %v21909_v57 = vld [vmem:[#allocation8 + $0x8ac] ss:$16 sps:$4 sm:$0xff]  }
 0xad7   : > { %14795 = vmatprep.subr.bf16.mxu1 %v21855_v61  ;;  %v21904_v61 = vld [vmem:[#allocation8 + $0x8a0] ss:$16 sps:$4 sm:$0xff]  }
 0xad9   : > { %14108 = vmatpush1.bf16.msra.mxu0 %v21850_v20  ;;  %v21907_v20 = vld [vmem:[#allocation8 + $0x8a8] ss:$16 sps:$4 sm:$0xff]  }
 0xada   : > { %14796 = vmatpush1.bf16.msra.mxu1 %v21853_v45  ;;  %14109 = vmatprep.subr.bf16.mxu0 %v21858_v30  ;;  %v21912_v45 = vld [vmem:[#allocation8 + $0x8c4] ss:$16 sps:$4 sm:$0xff]   ;;  %v21915_v30 = vld [vmem:[#allocation8 + $0x8cc] ss:$16 sps:$4 sm:$0xff]  }
 0xadb   : > { %14797 = vmatprep.subr.bf16.mxu1 %v21861_v12  ;;  %v21910_v12 = vld [vmem:[#allocation8 + $0x8c0] ss:$16 sps:$4 sm:$0xff]  }
 0xadd   : > { %14110 = vmatpush1.bf16.msra.mxu0 %v21856_v24  ;;  %v21913_v24 = vld [vmem:[#allocation8 + $0x8c8] ss:$16 sps:$4 sm:$0xff]  }
 0xade   : > { %14798 = vmatpush1.bf16.msra.mxu1 %v21859_v25  ;;  %14111 = vmatprep.subr.bf16.mxu0 %v21864_v63  ;;  %v21918_v25 = vld [vmem:[#allocation8 + $0x8e4] ss:$16 sps:$4 sm:$0xff]   ;;  %v21921_v63 = vld [vmem:[#allocation8 + $0x8ec] ss:$16 sps:$4 sm:$0xff]  }
 0xadf   : > { %14799 = vmatprep.subr.bf16.mxu1 %v21867_v6  ;;  %v21916_v6 = vld [vmem:[#allocation8 + $0x8e0] ss:$16 sps:$4 sm:$0xff]  }
 0xae1   : > { %14112 = vmatpush1.bf16.msra.mxu0 %v21862_v52  ;;  %v21919_v52 = vld [vmem:[#allocation8 + $0x8e8] ss:$16 sps:$4 sm:$0xff]  }
 0xae2   : > { %14800 = vmatpush1.bf16.msra.mxu1 %v21865_v8  ;;  %14113 = vmatprep.subr.bf16.mxu0 %v21870_v37  ;;  %v21924_v8 = vld [vmem:[#allocation8 + $0x904] ss:$16 sps:$4 sm:$0xff]   ;;  %v21927_v37 = vld [vmem:[#allocation8 + $0x90c] ss:$16 sps:$4 sm:$0xff]  }
 0xae3   : > { %14801 = vmatprep.subr.bf16.mxu1 %v21873_v27  ;;  %v21922_v27 = vld [vmem:[#allocation8 + $0x900] ss:$16 sps:$4 sm:$0xff]  }
 0xae5   : > { %14114 = vmatpush1.bf16.msra.mxu0 %v21868_v43  ;;  %v21925_v43 = vld [vmem:[#allocation8 + $0x908] ss:$16 sps:$4 sm:$0xff]  }
 0xae6   : > { %14802 = vmatpush1.bf16.msra.mxu1 %v21871_v53  ;;  %14126 = vmatprep.subr.bf16.mxu0 %v21876_v31  ;;  %v21930_v53 = vld [vmem:[#allocation8 + $0x924] ss:$16 sps:$4 sm:$0xff]   ;;  %v21933_v31 = vld [vmem:[#allocation8 + $0x92c] ss:$16 sps:$4 sm:$0xff]  }
 0xae7   : > { %14814 = vmatprep.subr.bf16.mxu1 %v21879_v38  ;;  %v21928_v38 = vld [vmem:[#allocation8 + $0x920] ss:$16 sps:$4 sm:$0xff]  }
 0xae8   : > { %14116 = vmatmul.mubr.bf16.vlgmr.msra.gmra.mrb[20].mxu0 %v25113_v15 }
 0xae9   : > { %14804 = vmatmul.mubr.bf16.vlgmr.msra.gmra.mrb[212].mxu1 %v25113_v15  ;;  %14127 = vmatpush1.bf16.msra.mxu0 %v21874_v50  ;;  %v21897_v15 = vld [vmem:[#allocation8 + $0x86c] ss:$16 sps:$4 sm:$0xff]   ;;  %v21931_v50 = vld [vmem:[#allocation8 + $0x928] ss:$16 sps:$4 sm:$0xff]  }
 0xaea   : > { %14158 = vmatprep.mubr.bf16.mxu0 %v25119_v47  ;;  %14815 = vmatpush1.bf16.msra.mxu1 %v21877_v54  ;;  %v21936_v54 = vld [vmem:[#allocation8 + $0x944] ss:$16 sps:$4 sm:$0xff]  }
 0xaeb   : > { %14846 = vmatprep.mubr.bf16.mxu1 %v25119_v47  ;;  %14128 = vmatprep.subr.bf16.mxu0 %v21882_v42  ;;  %v21898_v47 = vld [vmem:[#allocation8 + $0x880] ss:$16 sps:$4 sm:$0xff]   ;;  %v21939_v42 = vld [vmem:[#allocation8 + $0x94c] ss:$16 sps:$4 sm:$0xff]  }
 0xaec   : > { %14816 = vmatprep.subr.bf16.mxu1 %v21885_v46  ;;  %v21934_v46 = vld [vmem:[#allocation8 + $0x940] ss:$16 sps:$4 sm:$0xff]  }
 0xaed   : > { %14129 = vmatpush1.bf16.msra.mxu0 %v21880_v7  ;;  %v21937_v7 = vld [vmem:[#allocation8 + $0x948] ss:$16 sps:$4 sm:$0xff]  }
 0xaee   : > { %14817 = vmatpush1.bf16.msra.mxu1 %v21883_v33  ;;  %14130 = vmatprep.subr.bf16.mxu0 %v21888_v29  ;;  %v21942_v33 = vld [vmem:[#allocation8 + $0x964] ss:$16 sps:$4 sm:$0xff]   ;;  %v21945_v29 = vld [vmem:[#allocation8 + $0x96c] ss:$16 sps:$4 sm:$0xff]  }
 0xaef   : > { %14818 = vmatprep.subr.bf16.mxu1 %v21891_v0  ;;  %v21940_v0 = vld [vmem:[#allocation8 + $0x960] ss:$16 sps:$4 sm:$0xff]  }
 0xaf1   : > { %14131 = vmatpush1.bf16.msra.mxu0 %v21886_v58  ;;  %v21943_v58 = vld [vmem:[#allocation8 + $0x968] ss:$16 sps:$4 sm:$0xff]  }
 0xaf2   : > { %14819 = vmatpush1.bf16.msra.mxu1 %v21889_v39  ;;  %14132 = vmatprep.subr.bf16.mxu0 %v21894_v26  ;;  %v21948_v39 = vld [vmem:[#allocation8 + $0x984] ss:$16 sps:$4 sm:$0xff]   ;;  %v21951_v26 = vld [vmem:[#allocation8 + $0x98c] ss:$16 sps:$4 sm:$0xff]  }
 0xaf3   : > { %14820 = vmatprep.subr.bf16.mxu1 %v21897_v15  ;;  %v21946_v15 = vld [vmem:[#allocation8 + $0x980] ss:$16 sps:$4 sm:$0xff]  }
 0xaf5   : > { %14133 = vmatpush1.bf16.msra.mxu0 %v21892_v11  ;;  %v21949_v11 = vld [vmem:[#allocation8 + $0x988] ss:$16 sps:$4 sm:$0xff]  }
 0xaf6   : > { %14821 = vmatpush1.bf16.msra.mxu1 %v21895_v1  ;;  %14134 = vmatprep.subr.bf16.mxu0 %v21900_v23  ;;  %v21954_v1 = vld [vmem:[#allocation8 + $0x9a4] ss:$16 sps:$4 sm:$0xff]   ;;  %v21957_v23 = vld [vmem:[#allocation8 + $0x9ac] ss:$16 sps:$4 sm:$0xff]  }
 0xaf7   : > { %14822 = vmatprep.subr.bf16.mxu1 %v21903_v49  ;;  %v21952_v49 = vld [vmem:[#allocation8 + $0x9a0] ss:$16 sps:$4 sm:$0xff]  }
 0xaf9   : > { %14135 = vmatpush1.bf16.msra.mxu0 %v21898_v47  ;;  %v21955_v47 = vld [vmem:[#allocation8 + $0x9a8] ss:$16 sps:$4 sm:$0xff]  }
 0xafa   : > { %14823 = vmatpush1.bf16.msra.mxu1 %v21901_v35  ;;  %14136 = vmatprep.subr.bf16.mxu0 %v21906_v14  ;;  %v21960_v35 = vld [vmem:[#allocation8 + $0x9c4] ss:$16 sps:$4 sm:$0xff]   ;;  %v21963_v14 = vld [vmem:[#allocation8 + $0x9cc] ss:$16 sps:$4 sm:$0xff]  }
 0xafb   : > { %14824 = vmatprep.subr.bf16.mxu1 %v21909_v57  ;;  %v21958_v57 = vld [vmem:[#allocation8 + $0x9c0] ss:$16 sps:$4 sm:$0xff]  }
 0xafd   : > { %14137 = vmatpush1.bf16.msra.mxu0 %v21904_v61  ;;  %v21961_v61 = vld [vmem:[#allocation8 + $0x9c8] ss:$16 sps:$4 sm:$0xff]  }
 0xafe   : > { %14825 = vmatpush1.bf16.msra.mxu1 %v21907_v20  ;;  %14138 = vmatprep.subr.bf16.mxu0 %v21912_v45  ;;  %v21966_v20 = vld [vmem:[#allocation8 + $0x9e4] ss:$16 sps:$4 sm:$0xff]   ;;  %v21969_v45 = vld [vmem:[#allocation8 + $0x9ec] ss:$16 sps:$4 sm:$0xff]  }
 0xaff   : > { %14826 = vmatprep.subr.bf16.mxu1 %v21915_v30  ;;  %v21964_v30 = vld [vmem:[#allocation8 + $0x9e0] ss:$16 sps:$4 sm:$0xff]  }
 0xb01   : > { %14139 = vmatpush1.bf16.msra.mxu0 %v21910_v12  ;;  %v21967_v12 = vld [vmem:[#allocation8 + $0x9e8] ss:$16 sps:$4 sm:$0xff]  }
 0xb02   : > { %14827 = vmatpush1.bf16.msra.mxu1 %v21913_v24  ;;  %14140 = vmatprep.subr.bf16.mxu0 %v21918_v25  ;;  %v21972_v24 = vld [vmem:[#allocation8 + $0xa04] ss:$16 sps:$4 sm:$0xff]   ;;  %v21975_v25 = vld [vmem:[#allocation8 + $0xa0c] ss:$16 sps:$4 sm:$0xff]  }
 0xb03   : > { %14828 = vmatprep.subr.bf16.mxu1 %v21921_v63  ;;  %v21970_v63 = vld [vmem:[#allocation8 + $0xa00] ss:$16 sps:$4 sm:$0xff]  }
 0xb05   : > { %14141 = vmatpush1.bf16.msra.mxu0 %v21916_v6  ;;  %v21973_v6 = vld [vmem:[#allocation8 + $0xa08] ss:$16 sps:$4 sm:$0xff]  }
 0xb06   : > { %14829 = vmatpush1.bf16.msra.mxu1 %v21919_v52  ;;  %14142 = vmatprep.subr.bf16.mxu0 %v21924_v8  ;;  %v21978_v52 = vld [vmem:[#allocation8 + $0xa24] ss:$16 sps:$4 sm:$0xff]   ;;  %v21981_v8 = vld [vmem:[#allocation8 + $0xa2c] ss:$16 sps:$4 sm:$0xff]  }
 0xb07   : > { %14830 = vmatprep.subr.bf16.mxu1 %v21927_v37  ;;  %v21976_v37 = vld [vmem:[#allocation8 + $0xa20] ss:$16 sps:$4 sm:$0xff]  }
 0xb09   : > { %14143 = vmatpush1.bf16.msra.mxu0 %v21922_v27  ;;  %v21979_v27 = vld [vmem:[#allocation8 + $0xa28] ss:$16 sps:$4 sm:$0xff]  }
 0xb0a   : > { %14831 = vmatpush1.bf16.msra.mxu1 %v21925_v43  ;;  %14144 = vmatprep.subr.bf16.mxu0 %v21930_v53  ;;  %v21984_v43 = vld [vmem:[#allocation8 + $0xa44] ss:$16 sps:$4 sm:$0xff]   ;;  %v21987_v53 = vld [vmem:[#allocation8 + $0xa4c] ss:$16 sps:$4 sm:$0xff]  }
 0xb0b   : > { %14832 = vmatprep.subr.bf16.mxu1 %v21933_v31  ;;  %v21982_v31 = vld [vmem:[#allocation8 + $0xa40] ss:$16 sps:$4 sm:$0xff]  }
 0xb0d   : > { %14145 = vmatpush1.bf16.msra.mxu0 %v21928_v38  ;;  %v21985_v38 = vld [vmem:[#allocation8 + $0xa48] ss:$16 sps:$4 sm:$0xff]  }
 0xb0e   : > { %14833 = vmatpush1.bf16.msra.mxu1 %v21931_v50  ;;  %14146 = vmatprep.subr.bf16.mxu0 %v21936_v54  ;;  %v21990_v50 = vld [vmem:[#allocation8 + $0xa64] ss:$16 sps:$4 sm:$0xff]   ;;  %v21988_v54 = vld [vmem:[#allocation8 + $0xa60] ss:$16 sps:$4 sm:$0xff]  }
 0xb0f   : > { %14834 = vmatprep.subr.bf16.mxu1 %v21939_v42  ;;  %v21991_v42 = vld [vmem:[#allocation8 + $0xa68] ss:$16 sps:$4 sm:$0xff]  }
 0xb11   : > { %14147 = vmatpush1.bf16.msra.mxu0 %v21934_v46  ;;  %v21996_v46 = vld [vmem:[#allocation8 + $0xa84] ss:$16 sps:$4 sm:$0xff]  }
 0xb12   : > { %14835 = vmatpush1.bf16.msra.mxu1 %v21937_v7  ;;  %14148 = vmatprep.subr.bf16.mxu0 %v21942_v33  ;;  %v21999_v7 = vld [vmem:[#allocation8 + $0xa8c] ss:$16 sps:$4 sm:$0xff]   ;;  %v21997_v33 = vld [vmem:[#allocation8 + $0xa88] ss:$16 sps:$4 sm:$0xff]  }
 0xb13   : > { %14836 = vmatprep.subr.bf16.mxu1 %v21945_v29  ;;  %v22002_v29 = vld [vmem:[#allocation8 + $0xaa4] ss:$16 sps:$4 sm:$0xff]  }
 0xb15   : > { %14149 = vmatpush1.bf16.msra.mxu0 %v21940_v0  ;;  %v22005_v0 = vld [vmem:[#allocation8 + $0xaac] ss:$16 sps:$4 sm:$0xff]  }
 0xb16   : > { %14837 = vmatpush1.bf16.msra.mxu1 %v21943_v58  ;;  %14150 = vmatprep.subr.bf16.mxu0 %v21948_v39  ;;  %v22000_v58 = vld [vmem:[#allocation8 + $0xaa0] ss:$16 sps:$4 sm:$0xff]   ;;  %v22003_v39 = vld [vmem:[#allocation8 + $0xaa8] ss:$16 sps:$4 sm:$0xff]  }
 0xb17   : > { %14838 = vmatprep.subr.bf16.mxu1 %v21951_v26  ;;  %v22008_v26 = vld [vmem:[#allocation8 + $0xac4] ss:$16 sps:$4 sm:$0xff]  }
 0xb19   : > { %14151 = vmatpush1.bf16.msra.mxu0 %v21946_v15  ;;  %v22011_v15 = vld [vmem:[#allocation8 + $0xacc] ss:$16 sps:$4 sm:$0xff]  }
 0xb1a   : > { %14839 = vmatpush1.bf16.msra.mxu1 %v21949_v11  ;;  %14152 = vmatprep.subr.bf16.mxu0 %v21954_v1  ;;  %v22006_v11 = vld [vmem:[#allocation8 + $0xac0] ss:$16 sps:$4 sm:$0xff]   ;;  %v22009_v1 = vld [vmem:[#allocation8 + $0xac8] ss:$16 sps:$4 sm:$0xff]  }
 0xb1b   : > { %14840 = vmatprep.subr.bf16.mxu1 %v21957_v23  ;;  %v22014_v23 = vld [vmem:[#allocation8 + $0xae4] ss:$16 sps:$4 sm:$0xff]  }
 0xb1d   : > { %14153 = vmatpush1.bf16.msra.mxu0 %v21952_v49  ;;  %v22017_v49 = vld [vmem:[#allocation8 + $0xaec] ss:$16 sps:$4 sm:$0xff]  }
 0xb1e   : > { %14841 = vmatpush1.bf16.msra.mxu1 %v21955_v47  ;;  %14154 = vmatprep.subr.bf16.mxu0 %v21960_v35  ;;  %v22012_v47 = vld [vmem:[#allocation8 + $0xae0] ss:$16 sps:$4 sm:$0xff]   ;;  %v22015_v35 = vld [vmem:[#allocation8 + $0xae8] ss:$16 sps:$4 sm:$0xff]  }
 0xb1f   : > { %14842 = vmatprep.subr.bf16.mxu1 %v21963_v14  ;;  %v22020_v14 = vld [vmem:[#allocation8 + $0xb04] ss:$16 sps:$4 sm:$0xff]  }
 0xb21   : > { %14155 = vmatpush1.bf16.msra.mxu0 %v21958_v57  ;;  %v22023_v57 = vld [vmem:[#allocation8 + $0xb0c] ss:$16 sps:$4 sm:$0xff]  }
 0xb22   : > { %14843 = vmatpush1.bf16.msra.mxu1 %v21961_v61  ;;  %14156 = vmatprep.subr.bf16.mxu0 %v21966_v20  ;;  %v22018_v61 = vld [vmem:[#allocation8 + $0xb00] ss:$16 sps:$4 sm:$0xff]   ;;  %v22021_v20 = vld [vmem:[#allocation8 + $0xb08] ss:$16 sps:$4 sm:$0xff]  }
 0xb23   : > { %14844 = vmatprep.subr.bf16.mxu1 %v21969_v45  ;;  %v22026_v45 = vld [vmem:[#allocation8 + $0xb24] ss:$16 sps:$4 sm:$0xff]  }
 0xb25   : > { %14157 = vmatpush1.bf16.msra.mxu0 %v21964_v30  ;;  %v22029_v30 = vld [vmem:[#allocation8 + $0xb2c] ss:$16 sps:$4 sm:$0xff]  }
 0xb26   : > { %14845 = vmatpush1.bf16.msra.mxu1 %v21967_v12  ;;  %14169 = vmatprep.subr.bf16.mxu0 %v21972_v24  ;;  %v22024_v12 = vld [vmem:[#allocation8 + $0xb20] ss:$16 sps:$4 sm:$0xff]   ;;  %v22027_v24 = vld [vmem:[#allocation8 + $0xb28] ss:$16 sps:$4 sm:$0xff]  }
 0xb27   : > { %14857 = vmatprep.subr.bf16.mxu1 %v21975_v25  ;;  %v22032_v25 = vld [vmem:[#allocation8 + $0xb44] ss:$16 sps:$4 sm:$0xff]  }
 0xb28   : > { %14159 = vmatmul.mubr.bf16.vlgmr.msra.gmra.mrb[20].mxu0 %v25117_v22 }
 0xb29   : > { %14847 = vmatmul.mubr.bf16.vlgmr.msra.gmra.mrb[212].mxu1 %v25117_v22  ;;  %14170 = vmatpush1.bf16.msra.mxu0 %v21970_v63  ;;  %v21993_v22 = vld [vmem:[#allocation8 + $0xa6c] ss:$16 sps:$4 sm:$0xff]  }
 0xb2a   : > { %14201 = vmatprep.mubr.bf16.mxu0 %v25123_v51  ;;  %14858 = vmatpush1.bf16.msra.mxu1 %v21973_v6  ;;  %v22035_v63 = vld [vmem:[#allocation8 + $0xb4c] ss:$16 sps:$4 sm:$0xff]   ;;  %v22030_v6 = vld [vmem:[#allocation8 + $0xb40] ss:$16 sps:$4 sm:$0xff]  }
 0xb2b   : > { %14889 = vmatprep.mubr.bf16.mxu1 %v25123_v51  ;;  %14171 = vmatprep.subr.bf16.mxu0 %v21978_v52  ;;  %v21994_v51 = vld [vmem:[#allocation8 + $0xa80] ss:$16 sps:$4 sm:$0xff]   ;;  %v22033_v52 = vld [vmem:[#allocation8 + $0xb48] ss:$16 sps:$4 sm:$0xff]  }
 0xb2c   : > { %14859 = vmatprep.subr.bf16.mxu1 %v21981_v8  ;;  %v22038_v8 = vld [vmem:[#allocation8 + $0xb64] ss:$16 sps:$4 sm:$0xff]  }
 0xb2d   : > { %14172 = vmatpush1.bf16.msra.mxu0 %v21976_v37  ;;  %v22041_v37 = vld [vmem:[#allocation8 + $0xb6c] ss:$16 sps:$4 sm:$0xff]  }
 0xb2e   : > { %14860 = vmatpush1.bf16.msra.mxu1 %v21979_v27  ;;  %14173 = vmatprep.subr.bf16.mxu0 %v21984_v43  ;;  %v22036_v27 = vld [vmem:[#allocation8 + $0xb60] ss:$16 sps:$4 sm:$0xff]   ;;  %v22039_v43 = vld [vmem:[#allocation8 + $0xb68] ss:$16 sps:$4 sm:$0xff]  }
 0xb2f   : > { %14861 = vmatprep.subr.bf16.mxu1 %v21987_v53  ;;  %v22044_v53 = vld [vmem:[#allocation8 + $0xb84] ss:$16 sps:$4 sm:$0xff]  }
 0xb31   : > { %14174 = vmatpush1.bf16.msra.mxu0 %v21982_v31  ;;  %v22047_v31 = vld [vmem:[#allocation8 + $0xb8c] ss:$16 sps:$4 sm:$0xff]  }
 0xb32   : > { %14862 = vmatpush1.bf16.msra.mxu1 %v21985_v38  ;;  %14175 = vmatprep.subr.bf16.mxu0 %v21990_v50  ;;  %v22042_v38 = vld [vmem:[#allocation8 + $0xb80] ss:$16 sps:$4 sm:$0xff]   ;;  %v22045_v50 = vld [vmem:[#allocation8 + $0xb88] ss:$16 sps:$4 sm:$0xff]  }
 0xb33   : > { %14863 = vmatprep.subr.bf16.mxu1 %v21993_v22  ;;  %v22050_v22 = vld [vmem:[#allocation8 + $0xba4] ss:$16 sps:$4 sm:$0xff]  }
 0xb35   : > { %14176 = vmatpush1.bf16.msra.mxu0 %v21988_v54  ;;  %v22053_v54 = vld [vmem:[#allocation8 + $0xbac] ss:$16 sps:$4 sm:$0xff]  }
 0xb36   : > { %14864 = vmatpush1.bf16.msra.mxu1 %v21991_v42  ;;  %14177 = vmatprep.subr.bf16.mxu0 %v21996_v46  ;;  %v22048_v42 = vld [vmem:[#allocation8 + $0xba0] ss:$16 sps:$4 sm:$0xff]   ;;  %v22051_v46 = vld [vmem:[#allocation8 + $0xba8] ss:$16 sps:$4 sm:$0xff]  }
 0xb37   : > { %14865 = vmatprep.subr.bf16.mxu1 %v21999_v7  ;;  %v22056_v7 = vld [vmem:[#allocation8 + $0xbc4] ss:$16 sps:$4 sm:$0xff]  }
 0xb39   : > { %14178 = vmatpush1.bf16.msra.mxu0 %v21994_v51  ;;  %v22059_v51 = vld [vmem:[#allocation8 + $0xbcc] ss:$16 sps:$4 sm:$0xff]  }
 0xb3a   : > { %14866 = vmatpush1.bf16.msra.mxu1 %v21997_v33  ;;  %14179 = vmatprep.subr.bf16.mxu0 %v22002_v29  ;;  %v22054_v33 = vld [vmem:[#allocation8 + $0xbc0] ss:$16 sps:$4 sm:$0xff]   ;;  %v22057_v29 = vld [vmem:[#allocation8 + $0xbc8] ss:$16 sps:$4 sm:$0xff]  }
 0xb3b   : > { %14867 = vmatprep.subr.bf16.mxu1 %v22005_v0  ;;  %v22062_v0 = vld [vmem:[#allocation8 + $0xbe4] ss:$16 sps:$4 sm:$0xff]  }
 0xb3d   : > { %14180 = vmatpush1.bf16.msra.mxu0 %v22000_v58  ;;  %v22065_v58 = vld [vmem:[#allocation8 + $0xbec] ss:$16 sps:$4 sm:$0xff]  }
 0xb3e   : > { %14868 = vmatpush1.bf16.msra.mxu1 %v22003_v39  ;;  %14181 = vmatprep.subr.bf16.mxu0 %v22008_v26  ;;  %v22060_v39 = vld [vmem:[#allocation8 + $0xbe0] ss:$16 sps:$4 sm:$0xff]   ;;  %v22063_v26 = vld [vmem:[#allocation8 + $0xbe8] ss:$16 sps:$4 sm:$0xff]  }
 0xb3f   : > { %14869 = vmatprep.subr.bf16.mxu1 %v22011_v15  ;;  %v22068_v15 = vld [vmem:[#allocation8 + $0xc04] ss:$16 sps:$4 sm:$0xff]  }
 0xb41   : > { %14182 = vmatpush1.bf16.msra.mxu0 %v22006_v11  ;;  %v22071_v11 = vld [vmem:[#allocation8 + $0xc0c] ss:$16 sps:$4 sm:$0xff]  }
 0xb42   : > { %14870 = vmatpush1.bf16.msra.mxu1 %v22009_v1  ;;  %14183 = vmatprep.subr.bf16.mxu0 %v22014_v23  ;;  %v22066_v1 = vld [vmem:[#allocation8 + $0xc00] ss:$16 sps:$4 sm:$0xff]   ;;  %v22069_v23 = vld [vmem:[#allocation8 + $0xc08] ss:$16 sps:$4 sm:$0xff]  }
 0xb43   : > { %14871 = vmatprep.subr.bf16.mxu1 %v22017_v49  ;;  %v22074_v49 = vld [vmem:[#allocation8 + $0xc24] ss:$16 sps:$4 sm:$0xff]  }
 0xb45   : > { %14184 = vmatpush1.bf16.msra.mxu0 %v22012_v47  ;;  %v22077_v47 = vld [vmem:[#allocation8 + $0xc2c] ss:$16 sps:$4 sm:$0xff]  }
 0xb46   : > { %14872 = vmatpush1.bf16.msra.mxu1 %v22015_v35  ;;  %14185 = vmatprep.subr.bf16.mxu0 %v22020_v14  ;;  %v22072_v35 = vld [vmem:[#allocation8 + $0xc20] ss:$16 sps:$4 sm:$0xff]   ;;  %v22075_v14 = vld [vmem:[#allocation8 + $0xc28] ss:$16 sps:$4 sm:$0xff]  }
 0xb47   : > { %14873 = vmatprep.subr.bf16.mxu1 %v22023_v57  ;;  %v22080_v57 = vld [vmem:[#allocation8 + $0xc44] ss:$16 sps:$4 sm:$0xff]  }
 0xb49   : > { %14186 = vmatpush1.bf16.msra.mxu0 %v22018_v61  ;;  %v22083_v61 = vld [vmem:[#allocation8 + $0xc4c] ss:$16 sps:$4 sm:$0xff]  }
 0xb4a   : > { %14874 = vmatpush1.bf16.msra.mxu1 %v22021_v20  ;;  %14187 = vmatprep.subr.bf16.mxu0 %v22026_v45  ;;  %v22078_v20 = vld [vmem:[#allocation8 + $0xc40] ss:$16 sps:$4 sm:$0xff]   ;;  %v22081_v45 = vld [vmem:[#allocation8 + $0xc48] ss:$16 sps:$4 sm:$0xff]  }
 0xb4b   : > { %14875 = vmatprep.subr.bf16.mxu1 %v22029_v30  ;;  %v22086_v30 = vld [vmem:[#allocation8 + $0xc64] ss:$16 sps:$4 sm:$0xff]  }
 0xb4d   : > { %14188 = vmatpush1.bf16.msra.mxu0 %v22024_v12  ;;  %v22084_v12 = vld [vmem:[#allocation8 + $0xc60] ss:$16 sps:$4 sm:$0xff]  }
 0xb4e   : > { %14876 = vmatpush1.bf16.msra.mxu1 %v22027_v24  ;;  %14189 = vmatprep.subr.bf16.mxu0 %v22032_v25  ;;  %v22087_v24 = vld [vmem:[#allocation8 + $0xc68] ss:$16 sps:$4 sm:$0xff]   ;;  %v22092_v25 = vld [vmem:[#allocation8 + $0xc84] ss:$16 sps:$4 sm:$0xff]  }
 0xb4f   : > { %14877 = vmatprep.subr.bf16.mxu1 %v22035_v63  ;;  %v22095_v63 = vld [vmem:[#allocation8 + $0xc8c] ss:$16 sps:$4 sm:$0xff]  }
 0xb51   : > { %14190 = vmatpush1.bf16.msra.mxu0 %v22030_v6  ;;  %v22093_v6 = vld [vmem:[#allocation8 + $0xc88] ss:$16 sps:$4 sm:$0xff]  }
 0xb52   : > { %14878 = vmatpush1.bf16.msra.mxu1 %v22033_v52  ;;  %14191 = vmatprep.subr.bf16.mxu0 %v22038_v8  ;;  %v22098_v52 = vld [vmem:[#allocation8 + $0xca4] ss:$16 sps:$4 sm:$0xff]   ;;  %v22101_v8 = vld [vmem:[#allocation8 + $0xcac] ss:$16 sps:$4 sm:$0xff]  }
 0xb53   : > { %14879 = vmatprep.subr.bf16.mxu1 %v22041_v37  ;;  %v22096_v37 = vld [vmem:[#allocation8 + $0xca0] ss:$16 sps:$4 sm:$0xff]  }
 0xb55   : > { %14192 = vmatpush1.bf16.msra.mxu0 %v22036_v27  ;;  %v22099_v27 = vld [vmem:[#allocation8 + $0xca8] ss:$16 sps:$4 sm:$0xff]  }
 0xb56   : > { %14880 = vmatpush1.bf16.msra.mxu1 %v22039_v43  ;;  %14193 = vmatprep.subr.bf16.mxu0 %v22044_v53  ;;  %v22104_v43 = vld [vmem:[#allocation8 + $0xcc4] ss:$16 sps:$4 sm:$0xff]   ;;  %v22107_v53 = vld [vmem:[#allocation8 + $0xccc] ss:$16 sps:$4 sm:$0xff]  }
 0xb57   : > { %14881 = vmatprep.subr.bf16.mxu1 %v22047_v31  ;;  %v22102_v31 = vld [vmem:[#allocation8 + $0xcc0] ss:$16 sps:$4 sm:$0xff]  }
 0xb59   : > { %14194 = vmatpush1.bf16.msra.mxu0 %v22042_v38  ;;  %v22105_v38 = vld [vmem:[#allocation8 + $0xcc8] ss:$16 sps:$4 sm:$0xff]  }
 0xb5a   : > { %14882 = vmatpush1.bf16.msra.mxu1 %v22045_v50  ;;  %14195 = vmatprep.subr.bf16.mxu0 %v22050_v22  ;;  %v22110_v50 = vld [vmem:[#allocation8 + $0xce4] ss:$16 sps:$4 sm:$0xff]   ;;  %v22113_v22 = vld [vmem:[#allocation8 + $0xcec] ss:$16 sps:$4 sm:$0xff]  }
 0xb5b   : > { %14883 = vmatprep.subr.bf16.mxu1 %v22053_v54  ;;  %v22108_v54 = vld [vmem:[#allocation8 + $0xce0] ss:$16 sps:$4 sm:$0xff]  }
 0xb5d   : > { %14196 = vmatpush1.bf16.msra.mxu0 %v22048_v42  ;;  %v22111_v42 = vld [vmem:[#allocation8 + $0xce8] ss:$16 sps:$4 sm:$0xff]  }
 0xb5e   : > { %14884 = vmatpush1.bf16.msra.mxu1 %v22051_v46  ;;  %14197 = vmatprep.subr.bf16.mxu0 %v22056_v7  ;;  %v22116_v46 = vld [vmem:[#allocation8 + $0xd04] ss:$16 sps:$4 sm:$0xff]   ;;  %v22119_v7 = vld [vmem:[#allocation8 + $0xd0c] ss:$16 sps:$4 sm:$0xff]  }
 0xb5f   : > { %14885 = vmatprep.subr.bf16.mxu1 %v22059_v51  ;;  %v22114_v51 = vld [vmem:[#allocation8 + $0xd00] ss:$16 sps:$4 sm:$0xff]  }
 0xb61   : > { %14198 = vmatpush1.bf16.msra.mxu0 %v22054_v33  ;;  %v22117_v33 = vld [vmem:[#allocation8 + $0xd08] ss:$16 sps:$4 sm:$0xff]  }
 0xb62   : > { %14886 = vmatpush1.bf16.msra.mxu1 %v22057_v29  ;;  %14199 = vmatprep.subr.bf16.mxu0 %v22062_v0  ;;  %v22122_v29 = vld [vmem:[#allocation8 + $0xd24] ss:$16 sps:$4 sm:$0xff]   ;;  %v22125_v0 = vld [vmem:[#allocation8 + $0xd2c] ss:$16 sps:$4 sm:$0xff]  }
 0xb63   : > { %14887 = vmatprep.subr.bf16.mxu1 %v22065_v58  ;;  %v22120_v58 = vld [vmem:[#allocation8 + $0xd20] ss:$16 sps:$4 sm:$0xff]  }
 0xb65   : > { %14200 = vmatpush1.bf16.msra.mxu0 %v22060_v39  ;;  %v22123_v39 = vld [vmem:[#allocation8 + $0xd28] ss:$16 sps:$4 sm:$0xff]  }
 0xb66   : > { %14888 = vmatpush1.bf16.msra.mxu1 %v22063_v26  ;;  %14212 = vmatprep.subr.bf16.mxu0 %v22068_v15  ;;  %v22128_v26 = vld [vmem:[#allocation8 + $0xd44] ss:$16 sps:$4 sm:$0xff]   ;;  %v22131_v15 = vld [vmem:[#allocation8 + $0xd4c] ss:$16 sps:$4 sm:$0xff]  }
 0xb67   : > { %14900 = vmatprep.subr.bf16.mxu1 %v22071_v11  ;;  %v22126_v11 = vld [vmem:[#allocation8 + $0xd40] ss:$16 sps:$4 sm:$0xff]  }
 0xb68   : > { %14202 = vmatmul.mubr.bf16.vlgmr.msra.gmra.mrb[20].mxu0 %v25121_v62 }
 0xb69   : > { %14890 = vmatmul.mubr.bf16.vlgmr.msra.gmra.mrb[212].mxu1 %v25121_v62  ;;  %14213 = vmatpush1.bf16.msra.mxu0 %v22066_v1  ;;  %v22089_v62 = vld [vmem:[#allocation8 + $0xc6c] ss:$16 sps:$4 sm:$0xff]   ;;  %v22129_v1 = vld [vmem:[#allocation8 + $0xd48] ss:$16 sps:$4 sm:$0xff]  }
 0xb6a   : > { %14244 = vmatprep.mubr.bf16.mxu0 %v25127_v21  ;;  %14901 = vmatpush1.bf16.msra.mxu1 %v22069_v23  ;;  %v22134_v23 = vld [vmem:[#allocation8 + $0xd64] ss:$16 sps:$4 sm:$0xff]  }
 0xb6b   : > { %14932 = vmatprep.mubr.bf16.mxu1 %v25127_v21  ;;  %14214 = vmatprep.subr.bf16.mxu0 %v22074_v49  ;;  %v22090_v21 = vld [vmem:[#allocation8 + $0xc80] ss:$16 sps:$4 sm:$0xff]   ;;  %v22137_v49 = vld [vmem:[#allocation8 + $0xd6c] ss:$16 sps:$4 sm:$0xff]  }
 0xb6c   : > { %14902 = vmatprep.subr.bf16.mxu1 %v22077_v47  ;;  %v22132_v47 = vld [vmem:[#allocation8 + $0xd60] ss:$16 sps:$4 sm:$0xff]  }
 0xb6d   : > { %14215 = vmatpush1.bf16.msra.mxu0 %v22072_v35  ;;  %v22135_v35 = vld [vmem:[#allocation8 + $0xd68] ss:$16 sps:$4 sm:$0xff]  }
 0xb6e   : > { %14903 = vmatpush1.bf16.msra.mxu1 %v22075_v14  ;;  %14216 = vmatprep.subr.bf16.mxu0 %v22080_v57  ;;  %v22140_v14 = vld [vmem:[#allocation8 + $0xd84] ss:$16 sps:$4 sm:$0xff]   ;;  %v22143_v57 = vld [vmem:[#allocation8 + $0xd8c] ss:$16 sps:$4 sm:$0xff]  }
 0xb6f   : > { %14904 = vmatprep.subr.bf16.mxu1 %v22083_v61  ;;  %v22138_v61 = vld [vmem:[#allocation8 + $0xd80] ss:$16 sps:$4 sm:$0xff]  }
 0xb71   : > { %14217 = vmatpush1.bf16.msra.mxu0 %v22078_v20  ;;  %v22141_v20 = vld [vmem:[#allocation8 + $0xd88] ss:$16 sps:$4 sm:$0xff]  }
 0xb72   : > { %14905 = vmatpush1.bf16.msra.mxu1 %v22081_v45  ;;  %14218 = vmatprep.subr.bf16.mxu0 %v22086_v30  ;;  %v22146_v45 = vld [vmem:[#allocation8 + $0xda4] ss:$16 sps:$4 sm:$0xff]   ;;  %v22149_v30 = vld [vmem:[#allocation8 + $0xdac] ss:$16 sps:$4 sm:$0xff]  }
 0xb73   : > { %14906 = vmatprep.subr.bf16.mxu1 %v22089_v62  ;;  %v22144_v62 = vld [vmem:[#allocation8 + $0xda0] ss:$16 sps:$4 sm:$0xff]  }
 0xb75   : > { %14219 = vmatpush1.bf16.msra.mxu0 %v22084_v12  ;;  %v22147_v12 = vld [vmem:[#allocation8 + $0xda8] ss:$16 sps:$4 sm:$0xff]  }
 0xb76   : > { %14907 = vmatpush1.bf16.msra.mxu1 %v22087_v24  ;;  %14220 = vmatprep.subr.bf16.mxu0 %v22092_v25  ;;  %v22152_v24 = vld [vmem:[#allocation8 + $0xdc4] ss:$16 sps:$4 sm:$0xff]   ;;  %v22155_v25 = vld [vmem:[#allocation8 + $0xdcc] ss:$16 sps:$4 sm:$0xff]  }
 0xb77   : > { %14908 = vmatprep.subr.bf16.mxu1 %v22095_v63  ;;  %v22150_v63 = vld [vmem:[#allocation8 + $0xdc0] ss:$16 sps:$4 sm:$0xff]  }
 0xb79   : > { %14221 = vmatpush1.bf16.msra.mxu0 %v22090_v21  ;;  %v22153_v21 = vld [vmem:[#allocation8 + $0xdc8] ss:$16 sps:$4 sm:$0xff]  }
 0xb7a   : > { %14909 = vmatpush1.bf16.msra.mxu1 %v22093_v6  ;;  %14222 = vmatprep.subr.bf16.mxu0 %v22098_v52  ;;  %v22158_v6 = vld [vmem:[#allocation8 + $0xde4] ss:$16 sps:$4 sm:$0xff]   ;;  %v22161_v52 = vld [vmem:[#allocation8 + $0xdec] ss:$16 sps:$4 sm:$0xff]  }
 0xb7b   : > { %14910 = vmatprep.subr.bf16.mxu1 %v22101_v8  ;;  %v22156_v8 = vld [vmem:[#allocation8 + $0xde0] ss:$16 sps:$4 sm:$0xff]  }
 0xb7d   : > { %14223 = vmatpush1.bf16.msra.mxu0 %v22096_v37  ;;  %v22159_v37 = vld [vmem:[#allocation8 + $0xde8] ss:$16 sps:$4 sm:$0xff]  }
 0xb7e   : > { %14911 = vmatpush1.bf16.msra.mxu1 %v22099_v27  ;;  %14224 = vmatprep.subr.bf16.mxu0 %v22104_v43  ;;  %v22164_v27 = vld [vmem:[#allocation8 + $0xe04] ss:$16 sps:$4 sm:$0xff]   ;;  %v22167_v43 = vld [vmem:[#allocation8 + $0xe0c] ss:$16 sps:$4 sm:$0xff]  }
 0xb7f   : > { %14912 = vmatprep.subr.bf16.mxu1 %v22107_v53  ;;  %v22162_v53 = vld [vmem:[#allocation8 + $0xe00] ss:$16 sps:$4 sm:$0xff]  }
 0xb81   : > { %14225 = vmatpush1.bf16.msra.mxu0 %v22102_v31  ;;  %v22165_v31 = vld [vmem:[#allocation8 + $0xe08] ss:$16 sps:$4 sm:$0xff]  }
 0xb82   : > { %14913 = vmatpush1.bf16.msra.mxu1 %v22105_v38  ;;  %14226 = vmatprep.subr.bf16.mxu0 %v22110_v50  ;;  %v22170_v38 = vld [vmem:[#allocation8 + $0xe24] ss:$16 sps:$4 sm:$0xff]   ;;  %v22173_v50 = vld [vmem:[#allocation8 + $0xe2c] ss:$16 sps:$4 sm:$0xff]  }
 0xb83   : > { %14914 = vmatprep.subr.bf16.mxu1 %v22113_v22  ;;  %v22168_v22 = vld [vmem:[#allocation8 + $0xe20] ss:$16 sps:$4 sm:$0xff]  }
 0xb85   : > { %14227 = vmatpush1.bf16.msra.mxu0 %v22108_v54  ;;  %v22171_v54 = vld [vmem:[#allocation8 + $0xe28] ss:$16 sps:$4 sm:$0xff]  }
 0xb86   : > { %14915 = vmatpush1.bf16.msra.mxu1 %v22111_v42  ;;  %14228 = vmatprep.subr.bf16.mxu0 %v22116_v46  ;;  %v22176_v42 = vld [vmem:[#allocation8 + $0xe44] ss:$16 sps:$4 sm:$0xff]   ;;  %v22179_v46 = vld [vmem:[#allocation8 + $0xe4c] ss:$16 sps:$4 sm:$0xff]  }
 0xb87   : > { %14916 = vmatprep.subr.bf16.mxu1 %v22119_v7  ;;  %v22174_v7 = vld [vmem:[#allocation8 + $0xe40] ss:$16 sps:$4 sm:$0xff]  }
 0xb89   : > { %14229 = vmatpush1.bf16.msra.mxu0 %v22114_v51  ;;  %v22177_v51 = vld [vmem:[#allocation8 + $0xe48] ss:$16 sps:$4 sm:$0xff]  }
 0xb8a   : > { %14917 = vmatpush1.bf16.msra.mxu1 %v22117_v33  ;;  %14230 = vmatprep.subr.bf16.mxu0 %v22122_v29  ;;  %v22182_v33 = vld [vmem:[#allocation8 + $0xe64] ss:$16 sps:$4 sm:$0xff]   ;;  %v22180_v29 = vld [vmem:[#allocation8 + $0xe60] ss:$16 sps:$4 sm:$0xff]  }
 0xb8b   : > { %14918 = vmatprep.subr.bf16.mxu1 %v22125_v0  ;;  %v22183_v0 = vld [vmem:[#allocation8 + $0xe68] ss:$16 sps:$4 sm:$0xff]  }
 0xb8d   : > { %14231 = vmatpush1.bf16.msra.mxu0 %v22120_v58  ;;  %v22188_v58 = vld [vmem:[#allocation8 + $0xe84] ss:$16 sps:$4 sm:$0xff]  }
 0xb8e   : > { %14919 = vmatpush1.bf16.msra.mxu1 %v22123_v39  ;;  %14232 = vmatprep.subr.bf16.mxu0 %v22128_v26  ;;  %v22191_v39 = vld [vmem:[#allocation8 + $0xe8c] ss:$16 sps:$4 sm:$0xff]   ;;  %v22189_v26 = vld [vmem:[#allocation8 + $0xe88] ss:$16 sps:$4 sm:$0xff]  }
 0xb8f   : > { %14920 = vmatprep.subr.bf16.mxu1 %v22131_v15  ;;  %v22194_v15 = vld [vmem:[#allocation8 + $0xea4] ss:$16 sps:$4 sm:$0xff]  }
 0xb91   : > { %14233 = vmatpush1.bf16.msra.mxu0 %v22126_v11  ;;  %v22197_v11 = vld [vmem:[#allocation8 + $0xeac] ss:$16 sps:$4 sm:$0xff]  }
 0xb92   : > { %14921 = vmatpush1.bf16.msra.mxu1 %v22129_v1  ;;  %14234 = vmatprep.subr.bf16.mxu0 %v22134_v23  ;;  %v22192_v1 = vld [vmem:[#allocation8 + $0xea0] ss:$16 sps:$4 sm:$0xff]   ;;  %v22195_v23 = vld [vmem:[#allocation8 + $0xea8] ss:$16 sps:$4 sm:$0xff]  }
 0xb93   : > { %14922 = vmatprep.subr.bf16.mxu1 %v22137_v49  ;;  %v22200_v49 = vld [vmem:[#allocation8 + $0xec4] ss:$16 sps:$4 sm:$0xff]  }
 0xb95   : > { %14235 = vmatpush1.bf16.msra.mxu0 %v22132_v47  ;;  %v22203_v47 = vld [vmem:[#allocation8 + $0xecc] ss:$16 sps:$4 sm:$0xff]  }
 0xb96   : > { %14923 = vmatpush1.bf16.msra.mxu1 %v22135_v35  ;;  %14236 = vmatprep.subr.bf16.mxu0 %v22140_v14  ;;  %v22198_v35 = vld [vmem:[#allocation8 + $0xec0] ss:$16 sps:$4 sm:$0xff]   ;;  %v22201_v14 = vld [vmem:[#allocation8 + $0xec8] ss:$16 sps:$4 sm:$0xff]  }
 0xb97   : > { %14924 = vmatprep.subr.bf16.mxu1 %v22143_v57  ;;  %v22206_v57 = vld [vmem:[#allocation8 + $0xee4] ss:$16 sps:$4 sm:$0xff]  }
 0xb99   : > { %14237 = vmatpush1.bf16.msra.mxu0 %v22138_v61  ;;  %v22209_v61 = vld [vmem:[#allocation8 + $0xeec] ss:$16 sps:$4 sm:$0xff]  }
 0xb9a   : > { %14925 = vmatpush1.bf16.msra.mxu1 %v22141_v20  ;;  %14238 = vmatprep.subr.bf16.mxu0 %v22146_v45  ;;  %v22204_v20 = vld [vmem:[#allocation8 + $0xee0] ss:$16 sps:$4 sm:$0xff]   ;;  %v22207_v45 = vld [vmem:[#allocation8 + $0xee8] ss:$16 sps:$4 sm:$0xff]  }
 0xb9b   : > { %14926 = vmatprep.subr.bf16.mxu1 %v22149_v30  ;;  %v22212_v30 = vld [vmem:[#allocation8 + $0xf04] ss:$16 sps:$4 sm:$0xff]  }
 0xb9d   : > { %14239 = vmatpush1.bf16.msra.mxu0 %v22144_v62  ;;  %v22215_v62 = vld [vmem:[#allocation8 + $0xf0c] ss:$16 sps:$4 sm:$0xff]  }
 0xb9e   : > { %14927 = vmatpush1.bf16.msra.mxu1 %v22147_v12  ;;  %14240 = vmatprep.subr.bf16.mxu0 %v22152_v24  ;;  %v22210_v12 = vld [vmem:[#allocation8 + $0xf00] ss:$16 sps:$4 sm:$0xff]   ;;  %v22213_v24 = vld [vmem:[#allocation8 + $0xf08] ss:$16 sps:$4 sm:$0xff]  }
 0xb9f   : > { %14928 = vmatprep.subr.bf16.mxu1 %v22155_v25  ;;  %v22218_v25 = vld [vmem:[#allocation8 + $0xf24] ss:$16 sps:$4 sm:$0xff]  }
 0xba1   : > { %14241 = vmatpush1.bf16.msra.mxu0 %v22150_v63  ;;  %v22221_v63 = vld [vmem:[#allocation8 + $0xf2c] ss:$16 sps:$4 sm:$0xff]  }
 0xba2   : > { %14929 = vmatpush1.bf16.msra.mxu1 %v22153_v21  ;;  %14242 = vmatprep.subr.bf16.mxu0 %v22158_v6  ;;  %v22216_v21 = vld [vmem:[#allocation8 + $0xf20] ss:$16 sps:$4 sm:$0xff]   ;;  %v22219_v6 = vld [vmem:[#allocation8 + $0xf28] ss:$16 sps:$4 sm:$0xff]  }
 0xba3   : > { %14930 = vmatprep.subr.bf16.mxu1 %v22161_v52  ;;  %v22224_v52 = vld [vmem:[#allocation8 + $0xf44] ss:$16 sps:$4 sm:$0xff]  }
 0xba5   : > { %14243 = vmatpush1.bf16.msra.mxu0 %v22156_v8  ;;  %v22227_v8 = vld [vmem:[#allocation8 + $0xf4c] ss:$16 sps:$4 sm:$0xff]  }
 0xba6   : > { %14931 = vmatpush1.bf16.msra.mxu1 %v22159_v37  ;;  %14255 = vmatprep.subr.bf16.mxu0 %v22164_v27  ;;  %v22222_v37 = vld [vmem:[#allocation8 + $0xf40] ss:$16 sps:$4 sm:$0xff]   ;;  %v22225_v27 = vld [vmem:[#allocation8 + $0xf48] ss:$16 sps:$4 sm:$0xff]  }
 0xba7   : > { %14943 = vmatprep.subr.bf16.mxu1 %v22167_v43  ;;  %v22230_v43 = vld [vmem:[#allocation8 + $0xf64] ss:$16 sps:$4 sm:$0xff]  }
 0xba8   : > { %14245 = vmatmul.mubr.bf16.vlgmr.msra.gmra.mrb[20].mxu0 %v25125_v55 }
 0xba9   : > { %14933 = vmatmul.mubr.bf16.vlgmr.msra.gmra.mrb[212].mxu1 %v25125_v55  ;;  %14256 = vmatpush1.bf16.msra.mxu0 %v22162_v53  ;;  %v22185_v55 = vld [vmem:[#allocation8 + $0xe6c] ss:$16 sps:$4 sm:$0xff]  }
 0xbaa   : > { %14287 = vmatprep.mubr.bf16.mxu0 %v25131_v3  ;;  %14944 = vmatpush1.bf16.msra.mxu1 %v22165_v31  ;;  %v22233_v53 = vld [vmem:[#allocation8 + $0xf6c] ss:$16 sps:$4 sm:$0xff]   ;;  %v22228_v31 = vld [vmem:[#allocation8 + $0xf60] ss:$16 sps:$4 sm:$0xff]  }
 0xbab   : > { %14975 = vmatprep.mubr.bf16.mxu1 %v25131_v3  ;;  %14257 = vmatprep.subr.bf16.mxu0 %v22170_v38  ;;  %v22186_v3 = vld [vmem:[#allocation8 + $0xe80] ss:$16 sps:$4 sm:$0xff]   ;;  %v22231_v38 = vld [vmem:[#allocation8 + $0xf68] ss:$16 sps:$4 sm:$0xff]  }
 0xbac   : > { %14945 = vmatprep.subr.bf16.mxu1 %v22173_v50  ;;  %v22236_v50 = vld [vmem:[#allocation8 + $0xf84] ss:$16 sps:$4 sm:$0xff]  }
 0xbad   : > { %14258 = vmatpush1.bf16.msra.mxu0 %v22168_v22  ;;  %v22239_v22 = vld [vmem:[#allocation8 + $0xf8c] ss:$16 sps:$4 sm:$0xff]  }
 0xbae   : > { %14946 = vmatpush1.bf16.msra.mxu1 %v22171_v54  ;;  %14259 = vmatprep.subr.bf16.mxu0 %v22176_v42  ;;  %v22234_v54 = vld [vmem:[#allocation8 + $0xf80] ss:$16 sps:$4 sm:$0xff]   ;;  %v22237_v42 = vld [vmem:[#allocation8 + $0xf88] ss:$16 sps:$4 sm:$0xff]  }
 0xbaf   : > { %14947 = vmatprep.subr.bf16.mxu1 %v22179_v46  ;;  %v22242_v46 = vld [vmem:[#allocation8 + $0xfa4] ss:$16 sps:$4 sm:$0xff]  }
 0xbb1   : > { %14260 = vmatpush1.bf16.msra.mxu0 %v22174_v7  ;;  %v22245_v7 = vld [vmem:[#allocation8 + $0xfac] ss:$16 sps:$4 sm:$0xff]  }
 0xbb2   : > { %14948 = vmatpush1.bf16.msra.mxu1 %v22177_v51  ;;  %14261 = vmatprep.subr.bf16.mxu0 %v22182_v33  ;;  %v22240_v51 = vld [vmem:[#allocation8 + $0xfa0] ss:$16 sps:$4 sm:$0xff]   ;;  %v22243_v33 = vld [vmem:[#allocation8 + $0xfa8] ss:$16 sps:$4 sm:$0xff]  }
 0xbb3   : > { %14949 = vmatprep.subr.bf16.mxu1 %v22185_v55  ;;  %v22248_v55 = vld [vmem:[#allocation8 + $0xfc4] ss:$16 sps:$4 sm:$0xff]  }
 0xbb5   : > { %14262 = vmatpush1.bf16.msra.mxu0 %v22180_v29  ;;  %v22251_v29 = vld [vmem:[#allocation8 + $0xfcc] ss:$16 sps:$4 sm:$0xff]  }
 0xbb6   : > { %14950 = vmatpush1.bf16.msra.mxu1 %v22183_v0  ;;  %14263 = vmatprep.subr.bf16.mxu0 %v22188_v58  ;;  %v22246_v0 = vld [vmem:[#allocation8 + $0xfc0] ss:$16 sps:$4 sm:$0xff]   ;;  %v22249_v58 = vld [vmem:[#allocation8 + $0xfc8] ss:$16 sps:$4 sm:$0xff]  }
 0xbb7   : > { %14951 = vmatprep.subr.bf16.mxu1 %v22191_v39  ;;  %v22254_v39 = vld [vmem:[#allocation8 + $0xfe4] ss:$16 sps:$4 sm:$0xff]  }
 0xbb9   : > { %14264 = vmatpush1.bf16.msra.mxu0 %v22186_v3  ;;  %v22257_v3 = vld [vmem:[#allocation8 + $0xfec] ss:$16 sps:$4 sm:$0xff]  }
 0xbba   : > { %14952 = vmatpush1.bf16.msra.mxu1 %v22189_v26  ;;  %14265 = vmatprep.subr.bf16.mxu0 %v22194_v15  ;;  %v22252_v26 = vld [vmem:[#allocation8 + $0xfe0] ss:$16 sps:$4 sm:$0xff]   ;;  %v22255_v15 = vld [vmem:[#allocation8 + $0xfe8] ss:$16 sps:$4 sm:$0xff]  }
 0xbbb   : > { %14953 = vmatprep.subr.bf16.mxu1 %v22197_v11  ;;  %v22260_v11 = vld [vmem:[#allocation8 + $0x1004] ss:$16 sps:$4 sm:$0xff]  }
 0xbbd   : > { %14266 = vmatpush1.bf16.msra.mxu0 %v22192_v1  ;;  %v22263_v1 = vld [vmem:[#allocation8 + $0x100c] ss:$16 sps:$4 sm:$0xff]  }
 0xbbe   : > { %14954 = vmatpush1.bf16.msra.mxu1 %v22195_v23  ;;  %14267 = vmatprep.subr.bf16.mxu0 %v22200_v49  ;;  %v22258_v23 = vld [vmem:[#allocation8 + $0x1000] ss:$16 sps:$4 sm:$0xff]   ;;  %v22261_v49 = vld [vmem:[#allocation8 + $0x1008] ss:$16 sps:$4 sm:$0xff]  }
 0xbbf   : > { %14955 = vmatprep.subr.bf16.mxu1 %v22203_v47  ;;  %v22266_v47 = vld [vmem:[#allocation8 + $0x1024] ss:$16 sps:$4 sm:$0xff]  }
 0xbc1   : > { %14268 = vmatpush1.bf16.msra.mxu0 %v22198_v35  ;;  %v22269_v35 = vld [vmem:[#allocation8 + $0x102c] ss:$16 sps:$4 sm:$0xff]  }
 0xbc2   : > { %14956 = vmatpush1.bf16.msra.mxu1 %v22201_v14  ;;  %14269 = vmatprep.subr.bf16.mxu0 %v22206_v57  ;;  %v22264_v14 = vld [vmem:[#allocation8 + $0x1020] ss:$16 sps:$4 sm:$0xff]   ;;  %v22267_v57 = vld [vmem:[#allocation8 + $0x1028] ss:$16 sps:$4 sm:$0xff]  }
 0xbc3   : > { %14957 = vmatprep.subr.bf16.mxu1 %v22209_v61  ;;  %v22272_v61 = vld [vmem:[#allocation8 + $0x1044] ss:$16 sps:$4 sm:$0xff]  }
 0xbc5   : > { %14270 = vmatpush1.bf16.msra.mxu0 %v22204_v20  ;;  %v22275_v20 = vld [vmem:[#allocation8 + $0x104c] ss:$16 sps:$4 sm:$0xff]  }
 0xbc6   : > { %14958 = vmatpush1.bf16.msra.mxu1 %v22207_v45  ;;  %14271 = vmatprep.subr.bf16.mxu0 %v22212_v30  ;;  %v22270_v45 = vld [vmem:[#allocation8 + $0x1040] ss:$16 sps:$4 sm:$0xff]   ;;  %v22273_v30 = vld [vmem:[#allocation8 + $0x1048] ss:$16 sps:$4 sm:$0xff]  }
 0xbc7   : > { %14959 = vmatprep.subr.bf16.mxu1 %v22215_v62  ;;  %v22278_v62 = vld [vmem:[#allocation8 + $0x1064] ss:$16 sps:$4 sm:$0xff]  }
 0xbc9   : > { %14272 = vmatpush1.bf16.msra.mxu0 %v22210_v12  ;;  %v22276_v12 = vld [vmem:[#allocation8 + $0x1060] ss:$16 sps:$4 sm:$0xff]  }
 0xbca   : > { %14960 = vmatpush1.bf16.msra.mxu1 %v22213_v24  ;;  %14273 = vmatprep.subr.bf16.mxu0 %v22218_v25  ;;  %v22279_v24 = vld [vmem:[#allocation8 + $0x1068] ss:$16 sps:$4 sm:$0xff]   ;;  %v22284_v25 = vld [vmem:[#allocation8 + $0x1084] ss:$16 sps:$4 sm:$0xff]  }
 0xbcb   : > { %14961 = vmatprep.subr.bf16.mxu1 %v22221_v63  ;;  %v22287_v63 = vld [vmem:[#allocation8 + $0x108c] ss:$16 sps:$4 sm:$0xff]  }
 0xbcd   : > { %14274 = vmatpush1.bf16.msra.mxu0 %v22216_v21  ;;  %v22285_v21 = vld [vmem:[#allocation8 + $0x1088] ss:$16 sps:$4 sm:$0xff]  }
 0xbce   : > { %14962 = vmatpush1.bf16.msra.mxu1 %v22219_v6  ;;  %14275 = vmatprep.subr.bf16.mxu0 %v22224_v52  ;;  %v22290_v6 = vld [vmem:[#allocation8 + $0x10a4] ss:$16 sps:$4 sm:$0xff]   ;;  %v22293_v52 = vld [vmem:[#allocation8 + $0x10ac] ss:$16 sps:$4 sm:$0xff]  }
 0xbcf   : > { %14963 = vmatprep.subr.bf16.mxu1 %v22227_v8  ;;  %v22288_v8 = vld [vmem:[#allocation8 + $0x10a0] ss:$16 sps:$4 sm:$0xff]  }
 0xbd1   : > { %14276 = vmatpush1.bf16.msra.mxu0 %v22222_v37  ;;  %v22291_v37 = vld [vmem:[#allocation8 + $0x10a8] ss:$16 sps:$4 sm:$0xff]  }
 0xbd2   : > { %14964 = vmatpush1.bf16.msra.mxu1 %v22225_v27  ;;  %14277 = vmatprep.subr.bf16.mxu0 %v22230_v43  ;;  %v22296_v27 = vld [vmem:[#allocation8 + $0x10c4] ss:$16 sps:$4 sm:$0xff]   ;;  %v22299_v43 = vld [vmem:[#allocation8 + $0x10cc] ss:$16 sps:$4 sm:$0xff]  }
 0xbd3   : > { %14965 = vmatprep.subr.bf16.mxu1 %v22233_v53  ;;  %v22294_v53 = vld [vmem:[#allocation8 + $0x10c0] ss:$16 sps:$4 sm:$0xff]  }
 0xbd5   : > { %14278 = vmatpush1.bf16.msra.mxu0 %v22228_v31  ;;  %v22297_v31 = vld [vmem:[#allocation8 + $0x10c8] ss:$16 sps:$4 sm:$0xff]  }
 0xbd6   : > { %14966 = vmatpush1.bf16.msra.mxu1 %v22231_v38  ;;  %14279 = vmatprep.subr.bf16.mxu0 %v22236_v50  ;;  %v22302_v38 = vld [vmem:[#allocation8 + $0x10e4] ss:$16 sps:$4 sm:$0xff]   ;;  %v22305_v50 = vld [vmem:[#allocation8 + $0x10ec] ss:$16 sps:$4 sm:$0xff]  }
 0xbd7   : > { %14967 = vmatprep.subr.bf16.mxu1 %v22239_v22  ;;  %v22300_v22 = vld [vmem:[#allocation8 + $0x10e0] ss:$16 sps:$4 sm:$0xff]  }
 0xbd9   : > { %14280 = vmatpush1.bf16.msra.mxu0 %v22234_v54  ;;  %v22303_v54 = vld [vmem:[#allocation8 + $0x10e8] ss:$16 sps:$4 sm:$0xff]  }
 0xbda   : > { %14968 = vmatpush1.bf16.msra.mxu1 %v22237_v42  ;;  %14281 = vmatprep.subr.bf16.mxu0 %v22242_v46  ;;  %v22308_v42 = vld [vmem:[#allocation8 + $0x1104] ss:$16 sps:$4 sm:$0xff]   ;;  %v22311_v46 = vld [vmem:[#allocation8 + $0x110c] ss:$16 sps:$4 sm:$0xff]  }
 0xbdb   : > { %14969 = vmatprep.subr.bf16.mxu1 %v22245_v7  ;;  %v22306_v7 = vld [vmem:[#allocation8 + $0x1100] ss:$16 sps:$4 sm:$0xff]  }
 0xbdd   : > { %14282 = vmatpush1.bf16.msra.mxu0 %v22240_v51  ;;  %v22309_v51 = vld [vmem:[#allocation8 + $0x1108] ss:$16 sps:$4 sm:$0xff]  }
 0xbde   : > { %14970 = vmatpush1.bf16.msra.mxu1 %v22243_v33  ;;  %14283 = vmatprep.subr.bf16.mxu0 %v22248_v55  ;;  %v22314_v33 = vld [vmem:[#allocation8 + $0x1124] ss:$16 sps:$4 sm:$0xff]   ;;  %v22317_v55 = vld [vmem:[#allocation8 + $0x112c] ss:$16 sps:$4 sm:$0xff]  }
 0xbdf   : > { %14971 = vmatprep.subr.bf16.mxu1 %v22251_v29  ;;  %v22312_v29 = vld [vmem:[#allocation8 + $0x1120] ss:$16 sps:$4 sm:$0xff]  }
 0xbe1   : > { %14284 = vmatpush1.bf16.msra.mxu0 %v22246_v0  ;;  %v22315_v0 = vld [vmem:[#allocation8 + $0x1128] ss:$16 sps:$4 sm:$0xff]  }
 0xbe2   : > { %14972 = vmatpush1.bf16.msra.mxu1 %v22249_v58  ;;  %14285 = vmatprep.subr.bf16.mxu0 %v22254_v39  ;;  %v22320_v58 = vld [vmem:[#allocation8 + $0x1144] ss:$16 sps:$4 sm:$0xff]   ;;  %v22323_v39 = vld [vmem:[#allocation8 + $0x114c] ss:$16 sps:$4 sm:$0xff]  }
 0xbe3   : > { %14973 = vmatprep.subr.bf16.mxu1 %v22257_v3  ;;  %v22318_v3 = vld [vmem:[#allocation8 + $0x1140] ss:$16 sps:$4 sm:$0xff]  }
 0xbe5   : > { %14286 = vmatpush1.bf16.msra.mxu0 %v22252_v26  ;;  %v22321_v26 = vld [vmem:[#allocation8 + $0x1148] ss:$16 sps:$4 sm:$0xff]  }
 0xbe6   : > { %14974 = vmatpush1.bf16.msra.mxu1 %v22255_v15  ;;  %14298 = vmatprep.subr.bf16.mxu0 %v22260_v11  ;;  %v22326_v15 = vld [vmem:[#allocation8 + $0x1164] ss:$16 sps:$4 sm:$0xff]   ;;  %v22329_v11 = vld [vmem:[#allocation8 + $0x116c] ss:$16 sps:$4 sm:$0xff]  }
 0xbe7   : > { %14986 = vmatprep.subr.bf16.mxu1 %v22263_v1  ;;  %v22324_v1 = vld [vmem:[#allocation8 + $0x1160] ss:$16 sps:$4 sm:$0xff]  }
 0xbe8   : > { %14288 = vmatmul.mubr.bf16.vlgmr.msra.gmra.mrb[20].mxu0 %v25129_v18 }
 0xbe9   : > { %14976 = vmatmul.mubr.bf16.vlgmr.msra.gmra.mrb[212].mxu1 %v25129_v18  ;;  %14299 = vmatpush1.bf16.msra.mxu0 %v22258_v23  ;;  %v22281_v18 = vld [vmem:[#allocation8 + $0x106c] ss:$16 sps:$4 sm:$0xff]   ;;  %v22327_v23 = vld [vmem:[#allocation8 + $0x1168] ss:$16 sps:$4 sm:$0xff]  }
 0xbea   : > { %14330 = vmatprep.mubr.bf16.mxu0 %v25135_v59  ;;  %14987 = vmatpush1.bf16.msra.mxu1 %v22261_v49  ;;  %v22332_v49 = vld [vmem:[#allocation8 + $0x1184] ss:$16 sps:$4 sm:$0xff]  }
 0xbeb   : > { %15018 = vmatprep.mubr.bf16.mxu1 %v25135_v59  ;;  %14300 = vmatprep.subr.bf16.mxu0 %v22266_v47  ;;  %v22282_v59 = vld [vmem:[#allocation8 + $0x1080] ss:$16 sps:$4 sm:$0xff]   ;;  %v22335_v47 = vld [vmem:[#allocation8 + $0x118c] ss:$16 sps:$4 sm:$0xff]  }
 0xbec   : > { %14988 = vmatprep.subr.bf16.mxu1 %v22269_v35  ;;  %v22330_v35 = vld [vmem:[#allocation8 + $0x1180] ss:$16 sps:$4 sm:$0xff]  }
 0xbed   : > { %14301 = vmatpush1.bf16.msra.mxu0 %v22264_v14  ;;  %v22333_v14 = vld [vmem:[#allocation8 + $0x1188] ss:$16 sps:$4 sm:$0xff]  }
 0xbee   : > { %14989 = vmatpush1.bf16.msra.mxu1 %v22267_v57  ;;  %14302 = vmatprep.subr.bf16.mxu0 %v22272_v61  ;;  %v22338_v57 = vld [vmem:[#allocation8 + $0x11a4] ss:$16 sps:$4 sm:$0xff]   ;;  %v22341_v61 = vld [vmem:[#allocation8 + $0x11ac] ss:$16 sps:$4 sm:$0xff]  }
 0xbef   : > { %14990 = vmatprep.subr.bf16.mxu1 %v22275_v20  ;;  %v22336_v20 = vld [vmem:[#allocation8 + $0x11a0] ss:$16 sps:$4 sm:$0xff]  }
 0xbf1   : > { %14303 = vmatpush1.bf16.msra.mxu0 %v22270_v45  ;;  %v22339_v45 = vld [vmem:[#allocation8 + $0x11a8] ss:$16 sps:$4 sm:$0xff]  }
 0xbf2   : > { %14991 = vmatpush1.bf16.msra.mxu1 %v22273_v30  ;;  %14304 = vmatprep.subr.bf16.mxu0 %v22278_v62  ;;  %v22344_v30 = vld [vmem:[#allocation8 + $0x11c4] ss:$16 sps:$4 sm:$0xff]   ;;  %v22347_v62 = vld [vmem:[#allocation8 + $0x11cc] ss:$16 sps:$4 sm:$0xff]  }
 0xbf3   : > { %14992 = vmatprep.subr.bf16.mxu1 %v22281_v18  ;;  %v22342_v18 = vld [vmem:[#allocation8 + $0x11c0] ss:$16 sps:$4 sm:$0xff]  }
 0xbf5   : > { %14305 = vmatpush1.bf16.msra.mxu0 %v22276_v12  ;;  %v22345_v12 = vld [vmem:[#allocation8 + $0x11c8] ss:$16 sps:$4 sm:$0xff]  }
 0xbf6   : > { %14993 = vmatpush1.bf16.msra.mxu1 %v22279_v24  ;;  %14306 = vmatprep.subr.bf16.mxu0 %v22284_v25  ;;  %v22350_v24 = vld [vmem:[#allocation8 + $0x11e4] ss:$16 sps:$4 sm:$0xff]   ;;  %v22353_v25 = vld [vmem:[#allocation8 + $0x11ec] ss:$16 sps:$4 sm:$0xff]  }
 0xbf7   : > { %14994 = vmatprep.subr.bf16.mxu1 %v22287_v63  ;;  %v22348_v63 = vld [vmem:[#allocation8 + $0x11e0] ss:$16 sps:$4 sm:$0xff]  }
 0xbf9   : > { %14307 = vmatpush1.bf16.msra.mxu0 %v22282_v59  ;;  %v22351_v59 = vld [vmem:[#allocation8 + $0x11e8] ss:$16 sps:$4 sm:$0xff]  }
 0xbfa   : > { %14995 = vmatpush1.bf16.msra.mxu1 %v22285_v21  ;;  %14308 = vmatprep.subr.bf16.mxu0 %v22290_v6  ;;  %v22356_v21 = vld [vmem:[#allocation8 + $0x1204] ss:$16 sps:$4 sm:$0xff]   ;;  %v22359_v6 = vld [vmem:[#allocation8 + $0x120c] ss:$16 sps:$4 sm:$0xff]  }
 0xbfb   : > { %14996 = vmatprep.subr.bf16.mxu1 %v22293_v52  ;;  %v22354_v52 = vld [vmem:[#allocation8 + $0x1200] ss:$16 sps:$4 sm:$0xff]  }
 0xbfd   : > { %14309 = vmatpush1.bf16.msra.mxu0 %v22288_v8  ;;  %v22357_v8 = vld [vmem:[#allocation8 + $0x1208] ss:$16 sps:$4 sm:$0xff]  }
 0xbfe   : > { %14997 = vmatpush1.bf16.msra.mxu1 %v22291_v37  ;;  %14310 = vmatprep.subr.bf16.mxu0 %v22296_v27  ;;  %v22362_v37 = vld [vmem:[#allocation8 + $0x1224] ss:$16 sps:$4 sm:$0xff]   ;;  %v22365_v27 = vld [vmem:[#allocation8 + $0x122c] ss:$16 sps:$4 sm:$0xff]  }
 0xbff   : > { %14998 = vmatprep.subr.bf16.mxu1 %v22299_v43  ;;  %v22360_v43 = vld [vmem:[#allocation8 + $0x1220] ss:$16 sps:$4 sm:$0xff]  }
 0xc01   : > { %14311 = vmatpush1.bf16.msra.mxu0 %v22294_v53  ;;  %v22363_v53 = vld [vmem:[#allocation8 + $0x1228] ss:$16 sps:$4 sm:$0xff]  }
 0xc02   : > { %14999 = vmatpush1.bf16.msra.mxu1 %v22297_v31  ;;  %14312 = vmatprep.subr.bf16.mxu0 %v22302_v38  ;;  %v22368_v31 = vld [vmem:[#allocation8 + $0x1244] ss:$16 sps:$4 sm:$0xff]   ;;  %v22371_v38 = vld [vmem:[#allocation8 + $0x124c] ss:$16 sps:$4 sm:$0xff]  }
 0xc03   : > { %15000 = vmatprep.subr.bf16.mxu1 %v22305_v50  ;;  %v22366_v50 = vld [vmem:[#allocation8 + $0x1240] ss:$16 sps:$4 sm:$0xff]  }
 0xc05   : > { %14313 = vmatpush1.bf16.msra.mxu0 %v22300_v22  ;;  %v22369_v22 = vld [vmem:[#allocation8 + $0x1248] ss:$16 sps:$4 sm:$0xff]  }
 0xc06   : > { %15001 = vmatpush1.bf16.msra.mxu1 %v22303_v54  ;;  %14314 = vmatprep.subr.bf16.mxu0 %v22308_v42  ;;  %v22374_v54 = vld [vmem:[#allocation8 + $0x1264] ss:$16 sps:$4 sm:$0xff]   ;;  %v22372_v42 = vld [vmem:[#allocation8 + $0x1260] ss:$16 sps:$4 sm:$0xff]  }
 0xc07   : > { %15002 = vmatprep.subr.bf16.mxu1 %v22311_v46  ;;  %v22375_v46 = vld [vmem:[#allocation8 + $0x1268] ss:$16 sps:$4 sm:$0xff]  }
 0xc09   : > { %14315 = vmatpush1.bf16.msra.mxu0 %v22306_v7  ;;  %v22380_v7 = vld [vmem:[#allocation8 + $0x1284] ss:$16 sps:$4 sm:$0xff]  }
 0xc0a   : > { %15003 = vmatpush1.bf16.msra.mxu1 %v22309_v51  ;;  %14316 = vmatprep.subr.bf16.mxu0 %v22314_v33  ;;  %v22383_v51 = vld [vmem:[#allocation8 + $0x128c] ss:$16 sps:$4 sm:$0xff]   ;;  %v22381_v33 = vld [vmem:[#allocation8 + $0x1288] ss:$16 sps:$4 sm:$0xff]  }
 0xc0b   : > { %15004 = vmatprep.subr.bf16.mxu1 %v22317_v55  ;;  %v22386_v55 = vld [vmem:[#allocation8 + $0x12a4] ss:$16 sps:$4 sm:$0xff]  }
 0xc0d   : > { %14317 = vmatpush1.bf16.msra.mxu0 %v22312_v29  ;;  %v22389_v29 = vld [vmem:[#allocation8 + $0x12ac] ss:$16 sps:$4 sm:$0xff]  }
 0xc0e   : > { %15005 = vmatpush1.bf16.msra.mxu1 %v22315_v0  ;;  %14318 = vmatprep.subr.bf16.mxu0 %v22320_v58  ;;  %v22384_v0 = vld [vmem:[#allocation8 + $0x12a0] ss:$16 sps:$4 sm:$0xff]   ;;  %v22387_v58 = vld [vmem:[#allocation8 + $0x12a8] ss:$16 sps:$4 sm:$0xff]  }
 0xc0f   : > { %15006 = vmatprep.subr.bf16.mxu1 %v22323_v39  ;;  %v22392_v39 = vld [vmem:[#allocation8 + $0x12c4] ss:$16 sps:$4 sm:$0xff]  }
 0xc11   : > { %14319 = vmatpush1.bf16.msra.mxu0 %v22318_v3  ;;  %v22395_v3 = vld [vmem:[#allocation8 + $0x12cc] ss:$16 sps:$4 sm:$0xff]  }
 0xc12   : > { %15007 = vmatpush1.bf16.msra.mxu1 %v22321_v26  ;;  %14320 = vmatprep.subr.bf16.mxu0 %v22326_v15  ;;  %v22390_v26 = vld [vmem:[#allocation8 + $0x12c0] ss:$16 sps:$4 sm:$0xff]   ;;  %v22393_v15 = vld [vmem:[#allocation8 + $0x12c8] ss:$16 sps:$4 sm:$0xff]  }
 0xc13   : > { %15008 = vmatprep.subr.bf16.mxu1 %v22329_v11  ;;  %v22398_v11 = vld [vmem:[#allocation8 + $0x12e4] ss:$16 sps:$4 sm:$0xff]  }
 0xc15   : > { %14321 = vmatpush1.bf16.msra.mxu0 %v22324_v1  ;;  %v22401_v1 = vld [vmem:[#allocation8 + $0x12ec] ss:$16 sps:$4 sm:$0xff]  }
 0xc16   : > { %15009 = vmatpush1.bf16.msra.mxu1 %v22327_v23  ;;  %14322 = vmatprep.subr.bf16.mxu0 %v22332_v49  ;;  %v22396_v23 = vld [vmem:[#allocation8 + $0x12e0] ss:$16 sps:$4 sm:$0xff]   ;;  %v22399_v49 = vld [vmem:[#allocation8 + $0x12e8] ss:$16 sps:$4 sm:$0xff]  }
 0xc17   : > { %15010 = vmatprep.subr.bf16.mxu1 %v22335_v47  ;;  %v22404_v47 = vld [vmem:[#allocation8 + $0x1304] ss:$16 sps:$4 sm:$0xff]  }
 0xc19   : > { %14323 = vmatpush1.bf16.msra.mxu0 %v22330_v35  ;;  %v22407_v35 = vld [vmem:[#allocation8 + $0x130c] ss:$16 sps:$4 sm:$0xff]  }
 0xc1a   : > { %15011 = vmatpush1.bf16.msra.mxu1 %v22333_v14  ;;  %14324 = vmatprep.subr.bf16.mxu0 %v22338_v57  ;;  %v22402_v14 = vld [vmem:[#allocation8 + $0x1300] ss:$16 sps:$4 sm:$0xff]   ;;  %v22405_v57 = vld [vmem:[#allocation8 + $0x1308] ss:$16 sps:$4 sm:$0xff]  }
 0xc1b   : > { %15012 = vmatprep.subr.bf16.mxu1 %v22341_v61  ;;  %v22410_v61 = vld [vmem:[#allocation8 + $0x1324] ss:$16 sps:$4 sm:$0xff]  }
 0xc1d   : > { %14325 = vmatpush1.bf16.msra.mxu0 %v22336_v20  ;;  %v22413_v20 = vld [vmem:[#allocation8 + $0x132c] ss:$16 sps:$4 sm:$0xff]  }
 0xc1e   : > { %15013 = vmatpush1.bf16.msra.mxu1 %v22339_v45  ;;  %14326 = vmatprep.subr.bf16.mxu0 %v22344_v30  ;;  %v22408_v45 = vld [vmem:[#allocation8 + $0x1320] ss:$16 sps:$4 sm:$0xff]   ;;  %v22411_v30 = vld [vmem:[#allocation8 + $0x1328] ss:$16 sps:$4 sm:$0xff]  }
 0xc1f   : > { %15014 = vmatprep.subr.bf16.mxu1 %v22347_v62  ;;  %v22416_v62 = vld [vmem:[#allocation8 + $0x1344] ss:$16 sps:$4 sm:$0xff]  }
 0xc21   : > { %14327 = vmatpush1.bf16.msra.mxu0 %v22342_v18  ;;  %v22419_v18 = vld [vmem:[#allocation8 + $0x134c] ss:$16 sps:$4 sm:$0xff]  }
 0xc22   : > { %15015 = vmatpush1.bf16.msra.mxu1 %v22345_v12  ;;  %14328 = vmatprep.subr.bf16.mxu0 %v22350_v24  ;;  %v22414_v12 = vld [vmem:[#allocation8 + $0x1340] ss:$16 sps:$4 sm:$0xff]   ;;  %v22417_v24 = vld [vmem:[#allocation8 + $0x1348] ss:$16 sps:$4 sm:$0xff]  }
 0xc23   : > { %15016 = vmatprep.subr.bf16.mxu1 %v22353_v25  ;;  %v22422_v25 = vld [vmem:[#allocation8 + $0x1364] ss:$16 sps:$4 sm:$0xff]  }
 0xc25   : > { %14329 = vmatpush1.bf16.msra.mxu0 %v22348_v63  ;;  %v22425_v63 = vld [vmem:[#allocation8 + $0x136c] ss:$16 sps:$4 sm:$0xff]  }
 0xc26   : > { %15017 = vmatpush1.bf16.msra.mxu1 %v22351_v59  ;;  %14341 = vmatprep.subr.bf16.mxu0 %v22356_v21  ;;  %v22420_v59 = vld [vmem:[#allocation8 + $0x1360] ss:$16 sps:$4 sm:$0xff]   ;;  %v22423_v21 = vld [vmem:[#allocation8 + $0x1368] ss:$16 sps:$4 sm:$0xff]  }
 0xc27   : > { %15029 = vmatprep.subr.bf16.mxu1 %v22359_v6  ;;  %v22428_v6 = vld [vmem:[#allocation8 + $0x1384] ss:$16 sps:$4 sm:$0xff]  }
 0xc28   : > { %14331 = vmatmul.mubr.bf16.vlgmr.msra.gmra.mrb[20].mxu0 %v25133_v16 }
 0xc29   : > { %15019 = vmatmul.mubr.bf16.vlgmr.msra.gmra.mrb[212].mxu1 %v25133_v16  ;;  %14342 = vmatpush1.bf16.msra.mxu0 %v22354_v52  ;;  %v22377_v16 = vld [vmem:[#allocation8 + $0x126c] ss:$16 sps:$4 sm:$0xff]  }
 0xc2a   : > { %14373 = vmatprep.mubr.bf16.mxu0 %v25139_v13  ;;  %15030 = vmatpush1.bf16.msra.mxu1 %v22357_v8  ;;  %v22431_v52 = vld [vmem:[#allocation8 + $0x138c] ss:$16 sps:$4 sm:$0xff]   ;;  %v22426_v8 = vld [vmem:[#allocation8 + $0x1380] ss:$16 sps:$4 sm:$0xff]  }
 0xc2b   : > { %15061 = vmatprep.mubr.bf16.mxu1 %v25139_v13  ;;  %14343 = vmatprep.subr.bf16.mxu0 %v22362_v37  ;;  %v22378_v13 = vld [vmem:[#allocation8 + $0x1280] ss:$16 sps:$4 sm:$0xff]   ;;  %v22429_v37 = vld [vmem:[#allocation8 + $0x1388] ss:$16 sps:$4 sm:$0xff]  }
 0xc2c   : > { %15031 = vmatprep.subr.bf16.mxu1 %v22365_v27  ;;  %v22434_v27 = vld [vmem:[#allocation8 + $0x13a4] ss:$16 sps:$4 sm:$0xff]  }
 0xc2d   : > { %14344 = vmatpush1.bf16.msra.mxu0 %v22360_v43  ;;  %v22437_v43 = vld [vmem:[#allocation8 + $0x13ac] ss:$16 sps:$4 sm:$0xff]  }
 0xc2e   : > { %15032 = vmatpush1.bf16.msra.mxu1 %v22363_v53  ;;  %14345 = vmatprep.subr.bf16.mxu0 %v22368_v31  ;;  %v22432_v53 = vld [vmem:[#allocation8 + $0x13a0] ss:$16 sps:$4 sm:$0xff]   ;;  %v22435_v31 = vld [vmem:[#allocation8 + $0x13a8] ss:$16 sps:$4 sm:$0xff]  }
 0xc2f   : > { %15033 = vmatprep.subr.bf16.mxu1 %v22371_v38  ;;  %v22440_v38 = vld [vmem:[#allocation8 + $0x13c4] ss:$16 sps:$4 sm:$0xff]  }
 0xc31   : > { %14346 = vmatpush1.bf16.msra.mxu0 %v22366_v50  ;;  %v22443_v50 = vld [vmem:[#allocation8 + $0x13cc] ss:$16 sps:$4 sm:$0xff]  }
 0xc32   : > { %15034 = vmatpush1.bf16.msra.mxu1 %v22369_v22  ;;  %14347 = vmatprep.subr.bf16.mxu0 %v22374_v54  ;;  %v22438_v22 = vld [vmem:[#allocation8 + $0x13c0] ss:$16 sps:$4 sm:$0xff]   ;;  %v22441_v54 = vld [vmem:[#allocation8 + $0x13c8] ss:$16 sps:$4 sm:$0xff]  }
 0xc33   : > { %15035 = vmatprep.subr.bf16.mxu1 %v22377_v16  ;;  %v22446_v16 = vld [vmem:[#allocation8 + $0x13e4] ss:$16 sps:$4 sm:$0xff]  }
 0xc35   : > { %14348 = vmatpush1.bf16.msra.mxu0 %v22372_v42  ;;  %v22449_v42 = vld [vmem:[#allocation8 + $0x13ec] ss:$16 sps:$4 sm:$0xff]  }
 0xc36   : > { %15036 = vmatpush1.bf16.msra.mxu1 %v22375_v46  ;;  %14349 = vmatprep.subr.bf16.mxu0 %v22380_v7  ;;  %v22444_v46 = vld [vmem:[#allocation8 + $0x13e0] ss:$16 sps:$4 sm:$0xff]   ;;  %v22447_v7 = vld [vmem:[#allocation8 + $0x13e8] ss:$16 sps:$4 sm:$0xff]  }
 0xc37   : > { %15037 = vmatprep.subr.bf16.mxu1 %v22383_v51  ;;  %v22452_v51 = vld [vmem:[#allocation8 + $0x1404] ss:$16 sps:$4 sm:$0xff]  }
 0xc39   : > { %14350 = vmatpush1.bf16.msra.mxu0 %v22378_v13  ;;  %v22455_v13 = vld [vmem:[#allocation8 + $0x140c] ss:$16 sps:$4 sm:$0xff]  }
 0xc3a   : > { %15038 = vmatpush1.bf16.msra.mxu1 %v22381_v33  ;;  %14351 = vmatprep.subr.bf16.mxu0 %v22386_v55  ;;  %v22450_v33 = vld [vmem:[#allocation8 + $0x1400] ss:$16 sps:$4 sm:$0xff]   ;;  %v22453_v55 = vld [vmem:[#allocation8 + $0x1408] ss:$16 sps:$4 sm:$0xff]  }
 0xc3b   : > { %15039 = vmatprep.subr.bf16.mxu1 %v22389_v29  ;;  %v22458_v29 = vld [vmem:[#allocation8 + $0x1424] ss:$16 sps:$4 sm:$0xff]  }
 0xc3d   : > { %14352 = vmatpush1.bf16.msra.mxu0 %v22384_v0  ;;  %v22461_v0 = vld [vmem:[#allocation8 + $0x142c] ss:$16 sps:$4 sm:$0xff]  }
 0xc3e   : > { %15040 = vmatpush1.bf16.msra.mxu1 %v22387_v58  ;;  %14353 = vmatprep.subr.bf16.mxu0 %v22392_v39  ;;  %v22456_v58 = vld [vmem:[#allocation8 + $0x1420] ss:$16 sps:$4 sm:$0xff]   ;;  %v22459_v39 = vld [vmem:[#allocation8 + $0x1428] ss:$16 sps:$4 sm:$0xff]  }
 0xc3f   : > { %15041 = vmatprep.subr.bf16.mxu1 %v22395_v3  ;;  %v22464_v3 = vld [vmem:[#allocation8 + $0x1444] ss:$16 sps:$4 sm:$0xff]  }
 0xc41   : > { %14354 = vmatpush1.bf16.msra.mxu0 %v22390_v26  ;;  %v22467_v26 = vld [vmem:[#allocation8 + $0x144c] ss:$16 sps:$4 sm:$0xff]  }
 0xc42   : > { %15042 = vmatpush1.bf16.msra.mxu1 %v22393_v15  ;;  %14355 = vmatprep.subr.bf16.mxu0 %v22398_v11  ;;  %v22462_v15 = vld [vmem:[#allocation8 + $0x1440] ss:$16 sps:$4 sm:$0xff]   ;;  %v22465_v11 = vld [vmem:[#allocation8 + $0x1448] ss:$16 sps:$4 sm:$0xff]  }
 0xc43   : > { %15043 = vmatprep.subr.bf16.mxu1 %v22401_v1  ;;  %v22470_v1 = vld [vmem:[#allocation8 + $0x1464] ss:$16 sps:$4 sm:$0xff]  }
 0xc45   : > { %14356 = vmatpush1.bf16.msra.mxu0 %v22396_v23  ;;  %v22468_v23 = vld [vmem:[#allocation8 + $0x1460] ss:$16 sps:$4 sm:$0xff]  }
 0xc46   : > { %15044 = vmatpush1.bf16.msra.mxu1 %v22399_v49  ;;  %14357 = vmatprep.subr.bf16.mxu0 %v22404_v47  ;;  %v22471_v49 = vld [vmem:[#allocation8 + $0x1468] ss:$16 sps:$4 sm:$0xff]   ;;  %v22476_v47 = vld [vmem:[#allocation8 + $0x1484] ss:$16 sps:$4 sm:$0xff]  }
 0xc47   : > { %15045 = vmatprep.subr.bf16.mxu1 %v22407_v35  ;;  %v22479_v35 = vld [vmem:[#allocation8 + $0x148c] ss:$16 sps:$4 sm:$0xff]  }
 0xc49   : > { %14358 = vmatpush1.bf16.msra.mxu0 %v22402_v14  ;;  %v22477_v14 = vld [vmem:[#allocation8 + $0x1488] ss:$16 sps:$4 sm:$0xff]  }
 0xc4a   : > { %15046 = vmatpush1.bf16.msra.mxu1 %v22405_v57  ;;  %14359 = vmatprep.subr.bf16.mxu0 %v22410_v61  ;;  %v22482_v57 = vld [vmem:[#allocation8 + $0x14a4] ss:$16 sps:$4 sm:$0xff]   ;;  %v22485_v61 = vld [vmem:[#allocation8 + $0x14ac] ss:$16 sps:$4 sm:$0xff]  }
 0xc4b   : > { %15047 = vmatprep.subr.bf16.mxu1 %v22413_v20  ;;  %v22480_v20 = vld [vmem:[#allocation8 + $0x14a0] ss:$16 sps:$4 sm:$0xff]  }
 0xc4d   : > { %14360 = vmatpush1.bf16.msra.mxu0 %v22408_v45  ;;  %v22483_v45 = vld [vmem:[#allocation8 + $0x14a8] ss:$16 sps:$4 sm:$0xff]  }
 0xc4e   : > { %15048 = vmatpush1.bf16.msra.mxu1 %v22411_v30  ;;  %14361 = vmatprep.subr.bf16.mxu0 %v22416_v62  ;;  %v22488_v30 = vld [vmem:[#allocation8 + $0x14c4] ss:$16 sps:$4 sm:$0xff]   ;;  %v22491_v62 = vld [vmem:[#allocation8 + $0x14cc] ss:$16 sps:$4 sm:$0xff]  }
 0xc4f   : > { %15049 = vmatprep.subr.bf16.mxu1 %v22419_v18  ;;  %v22486_v18 = vld [vmem:[#allocation8 + $0x14c0] ss:$16 sps:$4 sm:$0xff]  }
 0xc51   : > { %14362 = vmatpush1.bf16.msra.mxu0 %v22414_v12  ;;  %v22489_v12 = vld [vmem:[#allocation8 + $0x14c8] ss:$16 sps:$4 sm:$0xff]  }
 0xc52   : > { %15050 = vmatpush1.bf16.msra.mxu1 %v22417_v24  ;;  %14363 = vmatprep.subr.bf16.mxu0 %v22422_v25  ;;  %v22494_v24 = vld [vmem:[#allocation8 + $0x14e4] ss:$16 sps:$4 sm:$0xff]   ;;  %v22497_v25 = vld [vmem:[#allocation8 + $0x14ec] ss:$16 sps:$4 sm:$0xff]  }
 0xc53   : > { %15051 = vmatprep.subr.bf16.mxu1 %v22425_v63  ;;  %v22492_v63 = vld [vmem:[#allocation8 + $0x14e0] ss:$16 sps:$4 sm:$0xff]  }
 0xc55   : > { %14364 = vmatpush1.bf16.msra.mxu0 %v22420_v59  ;;  %v22495_v59 = vld [vmem:[#allocation8 + $0x14e8] ss:$16 sps:$4 sm:$0xff]  }
 0xc56   : > { %15052 = vmatpush1.bf16.msra.mxu1 %v22423_v21  ;;  %14365 = vmatprep.subr.bf16.mxu0 %v22428_v6  ;;  %v22500_v21 = vld [vmem:[#allocation8 + $0x1504] ss:$16 sps:$4 sm:$0xff]   ;;  %v22503_v6 = vld [vmem:[#allocation8 + $0x150c] ss:$16 sps:$4 sm:$0xff]  }
 0xc57   : > { %15053 = vmatprep.subr.bf16.mxu1 %v22431_v52  ;;  %v22498_v52 = vld [vmem:[#allocation8 + $0x1500] ss:$16 sps:$4 sm:$0xff]  }
 0xc59   : > { %14366 = vmatpush1.bf16.msra.mxu0 %v22426_v8  ;;  %v22501_v8 = vld [vmem:[#allocation8 + $0x1508] ss:$16 sps:$4 sm:$0xff]  }
 0xc5a   : > { %15054 = vmatpush1.bf16.msra.mxu1 %v22429_v37  ;;  %14367 = vmatprep.subr.bf16.mxu0 %v22434_v27  ;;  %v22506_v37 = vld [vmem:[#allocation8 + $0x1524] ss:$16 sps:$4 sm:$0xff]   ;;  %v22509_v27 = vld [vmem:[#allocation8 + $0x152c] ss:$16 sps:$4 sm:$0xff]  }
 0xc5b   : > { %15055 = vmatprep.subr.bf16.mxu1 %v22437_v43  ;;  %v22504_v43 = vld [vmem:[#allocation8 + $0x1520] ss:$16 sps:$4 sm:$0xff]  }
 0xc5d   : > { %14368 = vmatpush1.bf16.msra.mxu0 %v22432_v53  ;;  %v22507_v53 = vld [vmem:[#allocation8 + $0x1528] ss:$16 sps:$4 sm:$0xff]  }
 0xc5e   : > { %15056 = vmatpush1.bf16.msra.mxu1 %v22435_v31  ;;  %14369 = vmatprep.subr.bf16.mxu0 %v22440_v38  ;;  %v22512_v31 = vld [vmem:[#allocation8 + $0x1544] ss:$16 sps:$4 sm:$0xff]   ;;  %v22515_v38 = vld [vmem:[#allocation8 + $0x154c] ss:$16 sps:$4 sm:$0xff]  }
 0xc5f   : > { %15057 = vmatprep.subr.bf16.mxu1 %v22443_v50  ;;  %v22510_v50 = vld [vmem:[#allocation8 + $0x1540] ss:$16 sps:$4 sm:$0xff]  }
 0xc61   : > { %14370 = vmatpush1.bf16.msra.mxu0 %v22438_v22  ;;  %v22513_v22 = vld [vmem:[#allocation8 + $0x1548] ss:$16 sps:$4 sm:$0xff]  }
 0xc62   : > { %15058 = vmatpush1.bf16.msra.mxu1 %v22441_v54  ;;  %14371 = vmatprep.subr.bf16.mxu0 %v22446_v16  ;;  %v22518_v54 = vld [vmem:[#allocation8 + $0x1564] ss:$16 sps:$4 sm:$0xff]   ;;  %v22521_v16 = vld [vmem:[#allocation8 + $0x156c] ss:$16 sps:$4 sm:$0xff]  }
 0xc63   : > { %15059 = vmatprep.subr.bf16.mxu1 %v22449_v42  ;;  %v22516_v42 = vld [vmem:[#allocation8 + $0x1560] ss:$16 sps:$4 sm:$0xff]  }
 0xc65   : > { %14372 = vmatpush1.bf16.msra.mxu0 %v22444_v46  ;;  %v22519_v46 = vld [vmem:[#allocation8 + $0x1568] ss:$16 sps:$4 sm:$0xff]  }
 0xc66   : > { %15060 = vmatpush1.bf16.msra.mxu1 %v22447_v7  ;;  %14384 = vmatprep.subr.bf16.mxu0 %v22452_v51  ;;  %v22524_v7 = vld [vmem:[#allocation8 + $0x1584] ss:$16 sps:$4 sm:$0xff]   ;;  %v22527_v51 = vld [vmem:[#allocation8 + $0x158c] ss:$16 sps:$4 sm:$0xff]  }
 0xc67   : > { %15072 = vmatprep.subr.bf16.mxu1 %v22455_v13  ;;  %v22522_v13 = vld [vmem:[#allocation8 + $0x1580] ss:$16 sps:$4 sm:$0xff]  }
 0xc68   : > { %14374 = vmatmul.mubr.bf16.vlgmr.msra.gmra.mrb[20].mxu0 %v25137_v36 }
 0xc69   : > { %15062 = vmatmul.mubr.bf16.vlgmr.msra.gmra.mrb[212].mxu1 %v25137_v36  ;;  %14385 = vmatpush1.bf16.msra.mxu0 %v22450_v33  ;;  %v22473_v36 = vld [vmem:[#allocation8 + $0x146c] ss:$16 sps:$4 sm:$0xff]   ;;  %v22525_v33 = vld [vmem:[#allocation8 + $0x1588] ss:$16 sps:$4 sm:$0xff]  }
 0xc6a   : > { %14416 = vmatprep.mubr.bf16.mxu0 %v25147_v44  ;;  %15073 = vmatpush1.bf16.msra.mxu1 %v22453_v55  ;;  %v22530_v55 = vld [vmem:[#allocation8 + $0x15a4] ss:$16 sps:$4 sm:$0xff]  }
 0xc6b   : > { %15104 = vmatprep.mubr.bf16.mxu1 %v25147_v44  ;;  %14386 = vmatprep.subr.bf16.mxu0 %v22458_v29  ;;  %v22474_v44 = vld [vmem:[#allocation8 + $0x1480] ss:$16 sps:$4 sm:$0xff]   ;;  %v22533_v29 = vld [vmem:[#allocation8 + $0x15ac] ss:$16 sps:$4 sm:$0xff]  }
 0xc6c   : > { %15074 = vmatprep.subr.bf16.mxu1 %v22461_v0  ;;  %v22528_v0 = vld [vmem:[#allocation8 + $0x15a0] ss:$16 sps:$4 sm:$0xff]  }
 0xc6d   : > { %14387 = vmatpush1.bf16.msra.mxu0 %v22456_v58  ;;  %v22531_v58 = vld [vmem:[#allocation8 + $0x15a8] ss:$16 sps:$4 sm:$0xff]  }
 0xc6e   : > { %15075 = vmatpush1.bf16.msra.mxu1 %v22459_v39  ;;  %14388 = vmatprep.subr.bf16.mxu0 %v22464_v3  ;;  %v22536_v39 = vld [vmem:[#allocation8 + $0x15c4] ss:$16 sps:$4 sm:$0xff]   ;;  %v22539_v3 = vld [vmem:[#allocation8 + $0x15cc] ss:$16 sps:$4 sm:$0xff]  }
 0xc6f   : > { %15076 = vmatprep.subr.bf16.mxu1 %v22467_v26  ;;  %v22534_v26 = vld [vmem:[#allocation8 + $0x15c0] ss:$16 sps:$4 sm:$0xff]  }
 0xc71   : > { %14389 = vmatpush1.bf16.msra.mxu0 %v22462_v15  ;;  %v22537_v15 = vld [vmem:[#allocation8 + $0x15c8] ss:$16 sps:$4 sm:$0xff]  }
 0xc72   : > { %15077 = vmatpush1.bf16.msra.mxu1 %v22465_v11  ;;  %14390 = vmatprep.subr.bf16.mxu0 %v22470_v1  ;;  %v22542_v11 = vld [vmem:[#allocation8 + $0x15e4] ss:$16 sps:$4 sm:$0xff]   ;;  %v22545_v1 = vld [vmem:[#allocation8 + $0x15ec] ss:$16 sps:$4 sm:$0xff]  }
 0xc73   : > { %15078 = vmatprep.subr.bf16.mxu1 %v22473_v36  ;;  %v22540_v36 = vld [vmem:[#allocation8 + $0x15e0] ss:$16 sps:$4 sm:$0xff]  }
 0xc75   : > { %14391 = vmatpush1.bf16.msra.mxu0 %v22468_v23  ;;  %v22543_v23 = vld [vmem:[#allocation8 + $0x15e8] ss:$16 sps:$4 sm:$0xff]  }
 0xc76   : > { %15079 = vmatpush1.bf16.msra.mxu1 %v22471_v49  ;;  %14392 = vmatprep.subr.bf16.mxu0 %v22476_v47  ;;  %v22548_v49 = vld [vmem:[#allocation8 + $0x1604] ss:$16 sps:$4 sm:$0xff]   ;;  %v22551_v47 = vld [vmem:[#allocation8 + $0x160c] ss:$16 sps:$4 sm:$0xff]  }
 0xc77   : > { %15080 = vmatprep.subr.bf16.mxu1 %v22479_v35  ;;  %v22546_v35 = vld [vmem:[#allocation8 + $0x1600] ss:$16 sps:$4 sm:$0xff]  }
 0xc79   : > { %14393 = vmatpush1.bf16.msra.mxu0 %v22474_v44  ;;  %v22549_v44 = vld [vmem:[#allocation8 + $0x1608] ss:$16 sps:$4 sm:$0xff]  }
 0xc7a   : > { %15081 = vmatpush1.bf16.msra.mxu1 %v22477_v14  ;;  %14394 = vmatprep.subr.bf16.mxu0 %v22482_v57  ;;  %v22554_v14 = vld [vmem:[#allocation8 + $0x1624] ss:$16 sps:$4 sm:$0xff]   ;;  %v22557_v57 = vld [vmem:[#allocation8 + $0x162c] ss:$16 sps:$4 sm:$0xff]  }
 0xc7b   : > { %15082 = vmatprep.subr.bf16.mxu1 %v22485_v61  ;;  %v22552_v61 = vld [vmem:[#allocation8 + $0x1620] ss:$16 sps:$4 sm:$0xff]  }
 0xc7d   : > { %14395 = vmatpush1.bf16.msra.mxu0 %v22480_v20  ;;  %v22555_v20 = vld [vmem:[#allocation8 + $0x1628] ss:$16 sps:$4 sm:$0xff]  }
 0xc7e   : > { %15083 = vmatpush1.bf16.msra.mxu1 %v22483_v45  ;;  %14396 = vmatprep.subr.bf16.mxu0 %v22488_v30  ;;  %v22560_v45 = vld [vmem:[#allocation8 + $0x1644] ss:$16 sps:$4 sm:$0xff]   ;;  %v22563_v30 = vld [vmem:[#allocation8 + $0x164c] ss:$16 sps:$4 sm:$0xff]  }
 0xc7f   : > { %15084 = vmatprep.subr.bf16.mxu1 %v22491_v62  ;;  %v22558_v62 = vld [vmem:[#allocation8 + $0x1640] ss:$16 sps:$4 sm:$0xff]  }
 0xc81   : > { %14397 = vmatpush1.bf16.msra.mxu0 %v22486_v18  ;;  %v22561_v18 = vld [vmem:[#allocation8 + $0x1648] ss:$16 sps:$4 sm:$0xff]  }
 0xc82   : > { %15085 = vmatpush1.bf16.msra.mxu1 %v22489_v12  ;;  %14398 = vmatprep.subr.bf16.mxu0 %v22494_v24  ;;  %v22566_v12 = vld [vmem:[#allocation8 + $0x1664] ss:$16 sps:$4 sm:$0xff]   ;;  %v22564_v24 = vld [vmem:[#allocation8 + $0x1660] ss:$16 sps:$4 sm:$0xff]  }
 0xc83   : > { %15086 = vmatprep.subr.bf16.mxu1 %v22497_v25  ;;  %v22567_v25 = vld [vmem:[#allocation8 + $0x1668] ss:$16 sps:$4 sm:$0xff]  }
 0xc85   : > { %14399 = vmatpush1.bf16.msra.mxu0 %v22492_v63  ;;  %v22572_v63 = vld [vmem:[#allocation8 + $0x1684] ss:$16 sps:$4 sm:$0xff]  }
 0xc86   : > { %15087 = vmatpush1.bf16.msra.mxu1 %v22495_v59  ;;  %14400 = vmatprep.subr.bf16.mxu0 %v22500_v21  ;;  %v22575_v59 = vld [vmem:[#allocation8 + $0x168c] ss:$16 sps:$4 sm:$0xff]   ;;  %v22573_v21 = vld [vmem:[#allocation8 + $0x1688] ss:$16 sps:$4 sm:$0xff]  }
 0xc87   : > { %15088 = vmatprep.subr.bf16.mxu1 %v22503_v6  ;;  %v22578_v6 = vld [vmem:[#allocation8 + $0x16a4] ss:$16 sps:$4 sm:$0xff]  }
 0xc89   : > { %14401 = vmatpush1.bf16.msra.mxu0 %v22498_v52  ;;  %v22581_v52 = vld [vmem:[#allocation8 + $0x16ac] ss:$16 sps:$4 sm:$0xff]  }
 0xc8a   : > { %15089 = vmatpush1.bf16.msra.mxu1 %v22501_v8  ;;  %14402 = vmatprep.subr.bf16.mxu0 %v22506_v37  ;;  %v22576_v8 = vld [vmem:[#allocation8 + $0x16a0] ss:$16 sps:$4 sm:$0xff]   ;;  %v22579_v37 = vld [vmem:[#allocation8 + $0x16a8] ss:$16 sps:$4 sm:$0xff]  }
 0xc8b   : > { %15090 = vmatprep.subr.bf16.mxu1 %v22509_v27  ;;  %v22584_v27 = vld [vmem:[#allocation8 + $0x16c4] ss:$16 sps:$4 sm:$0xff]  }
 0xc8d   : > { %14403 = vmatpush1.bf16.msra.mxu0 %v22504_v43  ;;  %v22587_v43 = vld [vmem:[#allocation8 + $0x16cc] ss:$16 sps:$4 sm:$0xff]  }
 0xc8e   : > { %15091 = vmatpush1.bf16.msra.mxu1 %v22507_v53  ;;  %14404 = vmatprep.subr.bf16.mxu0 %v22512_v31  ;;  %v22582_v53 = vld [vmem:[#allocation8 + $0x16c0] ss:$16 sps:$4 sm:$0xff]   ;;  %v22585_v31 = vld [vmem:[#allocation8 + $0x16c8] ss:$16 sps:$4 sm:$0xff]  }
 0xc8f   : > { %15092 = vmatprep.subr.bf16.mxu1 %v22515_v38  ;;  %v22590_v38 = vld [vmem:[#allocation8 + $0x16e4] ss:$16 sps:$4 sm:$0xff]  }
 0xc91   : > { %14405 = vmatpush1.bf16.msra.mxu0 %v22510_v50  ;;  %v22593_v50 = vld [vmem:[#allocation8 + $0x16ec] ss:$16 sps:$4 sm:$0xff]  }
 0xc92   : > { %15093 = vmatpush1.bf16.msra.mxu1 %v22513_v22  ;;  %14406 = vmatprep.subr.bf16.mxu0 %v22518_v54  ;;  %v22588_v22 = vld [vmem:[#allocation8 + $0x16e0] ss:$16 sps:$4 sm:$0xff]   ;;  %v22591_v54 = vld [vmem:[#allocation8 + $0x16e8] ss:$16 sps:$4 sm:$0xff]  }
 0xc93   : > { %15094 = vmatprep.subr.bf16.mxu1 %v22521_v16  ;;  %v22596_v16 = vld [vmem:[#allocation8 + $0x1704] ss:$16 sps:$4 sm:$0xff]  }
 0xc95   : > { %14407 = vmatpush1.bf16.msra.mxu0 %v22516_v42  ;;  %v22599_v42 = vld [vmem:[#allocation8 + $0x170c] ss:$16 sps:$4 sm:$0xff]  }
 0xc96   : > { %15095 = vmatpush1.bf16.msra.mxu1 %v22519_v46  ;;  %14408 = vmatprep.subr.bf16.mxu0 %v22524_v7  ;;  %v22594_v46 = vld [vmem:[#allocation8 + $0x1700] ss:$16 sps:$4 sm:$0xff]   ;;  %v22597_v7 = vld [vmem:[#allocation8 + $0x1708] ss:$16 sps:$4 sm:$0xff]  }
 0xc97   : > { %15096 = vmatprep.subr.bf16.mxu1 %v22527_v51  ;;  %v22602_v51 = vld [vmem:[#allocation8 + $0x1724] ss:$16 sps:$4 sm:$0xff]  }
 0xc99   : > { %14409 = vmatpush1.bf16.msra.mxu0 %v22522_v13  ;;  %v22605_v13 = vld [vmem:[#allocation8 + $0x172c] ss:$16 sps:$4 sm:$0xff]  }
 0xc9a   : > { %15097 = vmatpush1.bf16.msra.mxu1 %v22525_v33  ;;  %14410 = vmatprep.subr.bf16.mxu0 %v22530_v55  ;;  %v22600_v33 = vld [vmem:[#allocation8 + $0x1720] ss:$16 sps:$4 sm:$0xff]   ;;  %v22603_v55 = vld [vmem:[#allocation8 + $0x1728] ss:$16 sps:$4 sm:$0xff]  }
 0xc9b   : > { %15098 = vmatprep.subr.bf16.mxu1 %v22533_v29  ;;  %v22608_v29 = vld [vmem:[#allocation8 + $0x1744] ss:$16 sps:$4 sm:$0xff]  }
 0xc9d   : > { %14411 = vmatpush1.bf16.msra.mxu0 %v22528_v0  ;;  %v22611_v0 = vld [vmem:[#allocation8 + $0x174c] ss:$16 sps:$4 sm:$0xff]  }
 0xc9e   : > { %15099 = vmatpush1.bf16.msra.mxu1 %v22531_v58  ;;  %14412 = vmatprep.subr.bf16.mxu0 %v22536_v39  ;;  %v22606_v58 = vld [vmem:[#allocation8 + $0x1740] ss:$16 sps:$4 sm:$0xff]   ;;  %v22609_v39 = vld [vmem:[#allocation8 + $0x1748] ss:$16 sps:$4 sm:$0xff]  }
 0xc9f   : > { %15100 = vmatprep.subr.bf16.mxu1 %v22539_v3  ;;  %v22614_v3 = vld [vmem:[#allocation8 + $0x1764] ss:$16 sps:$4 sm:$0xff]  }
 0xca1   : > { %14413 = vmatpush1.bf16.msra.mxu0 %v22534_v26  ;;  %v22617_v26 = vld [vmem:[#allocation8 + $0x176c] ss:$16 sps:$4 sm:$0xff]  }
 0xca2   : > { %15101 = vmatpush1.bf16.msra.mxu1 %v22537_v15  ;;  %14414 = vmatprep.subr.bf16.mxu0 %v22542_v11  ;;  %v22612_v15 = vld [vmem:[#allocation8 + $0x1760] ss:$16 sps:$4 sm:$0xff]   ;;  %v22615_v11 = vld [vmem:[#allocation8 + $0x1768] ss:$16 sps:$4 sm:$0xff]  }
 0xca3   : > { %15102 = vmatprep.subr.bf16.mxu1 %v22545_v1  ;;  %v22620_v1 = vld [vmem:[#allocation8 + $0x1784] ss:$16 sps:$4 sm:$0xff]  }
 0xca5   : > { %14415 = vmatpush1.bf16.msra.mxu0 %v22540_v36  ;;  %v22623_v36 = vld [vmem:[#allocation8 + $0x178c] ss:$16 sps:$4 sm:$0xff]  }
 0xca6   : > { %15103 = vmatpush1.bf16.msra.mxu1 %v22543_v23  ;;  %14427 = vmatprep.subr.bf16.mxu0 %v22548_v49  ;;  %v22618_v23 = vld [vmem:[#allocation8 + $0x1780] ss:$16 sps:$4 sm:$0xff]   ;;  %v22621_v49 = vld [vmem:[#allocation8 + $0x1788] ss:$16 sps:$4 sm:$0xff]  }
 0xca7   : > { %15115 = vmatprep.subr.bf16.mxu1 %v22551_v47  ;;  %v22626_v47 = vld [vmem:[#allocation8 + $0x17a4] ss:$16 sps:$4 sm:$0xff]  }
 0xca8   : > { %14417 = vmatmul.mubr.bf16.vlgmr.msra.gmra.mrb[20].mxu0 %v25145_v9 }
 0xca9   : > { %15105 = vmatmul.mubr.bf16.vlgmr.msra.gmra.mrb[212].mxu1 %v25145_v9  ;;  %14428 = vmatpush1.bf16.msra.mxu0 %v22546_v35  ;;  %v22569_v9 = vld [vmem:[#allocation8 + $0x166c] ss:$16 sps:$4 sm:$0xff]  }
 0xcaa   : > { %14459 = vmatprep.mubr.bf16.mxu0 %v25151_v5  ;;  %15116 = vmatpush1.bf16.msra.mxu1 %v22549_v44  ;;  %v22629_v35 = vld [vmem:[#allocation8 + $0x17ac] ss:$16 sps:$4 sm:$0xff]   ;;  %v22624_v44 = vld [vmem:[#allocation8 + $0x17a0] ss:$16 sps:$4 sm:$0xff]  }
 0xcab   : > { %15147 = vmatprep.mubr.bf16.mxu1 %v25151_v5  ;;  %14429 = vmatprep.subr.bf16.mxu0 %v22554_v14  ;;  %v22570_v5 = vld [vmem:[#allocation8 + $0x1680] ss:$16 sps:$4 sm:$0xff]   ;;  %v22627_v14 = vld [vmem:[#allocation8 + $0x17a8] ss:$16 sps:$4 sm:$0xff]  }
 0xcac   : > { %15117 = vmatprep.subr.bf16.mxu1 %v22557_v57  ;;  %v22632_v57 = vld [vmem:[#allocation8 + $0x17c4] ss:$16 sps:$4 sm:$0xff]  }
 0xcad   : > { %14430 = vmatpush1.bf16.msra.mxu0 %v22552_v61  ;;  %v22635_v61 = vld [vmem:[#allocation8 + $0x17cc] ss:$16 sps:$4 sm:$0xff]  }
 0xcae   : > { %15118 = vmatpush1.bf16.msra.mxu1 %v22555_v20  ;;  %14431 = vmatprep.subr.bf16.mxu0 %v22560_v45  ;;  %v22630_v20 = vld [vmem:[#allocation8 + $0x17c0] ss:$16 sps:$4 sm:$0xff]   ;;  %v22633_v45 = vld [vmem:[#allocation8 + $0x17c8] ss:$16 sps:$4 sm:$0xff]  }
 0xcaf   : > { %15119 = vmatprep.subr.bf16.mxu1 %v22563_v30  ;;  %v22638_v30 = vld [vmem:[#allocation8 + $0x17e4] ss:$16 sps:$4 sm:$0xff]  }
 0xcb1   : > { %14432 = vmatpush1.bf16.msra.mxu0 %v22558_v62  ;;  %v22641_v62 = vld [vmem:[#allocation8 + $0x17ec] ss:$16 sps:$4 sm:$0xff]  }
 0xcb2   : > { %15120 = vmatpush1.bf16.msra.mxu1 %v22561_v18  ;;  %14433 = vmatprep.subr.bf16.mxu0 %v22566_v12  ;;  %v22636_v18 = vld [vmem:[#allocation8 + $0x17e0] ss:$16 sps:$4 sm:$0xff]   ;;  %v22639_v12 = vld [vmem:[#allocation8 + $0x17e8] ss:$16 sps:$4 sm:$0xff]  }
 0xcb3   : > { %15121 = vmatprep.subr.bf16.mxu1 %v22569_v9  ;;  %v22644_v9 = vld [vmem:[#allocation8 + $0x1804] ss:$16 sps:$4 sm:$0xff]  }
 0xcb5   : > { %14434 = vmatpush1.bf16.msra.mxu0 %v22564_v24  ;;  %v22647_v24 = vld [vmem:[#allocation8 + $0x180c] ss:$16 sps:$4 sm:$0xff]  }
 0xcb6   : > { %15122 = vmatpush1.bf16.msra.mxu1 %v22567_v25  ;;  %14435 = vmatprep.subr.bf16.mxu0 %v22572_v63  ;;  %v22642_v25 = vld [vmem:[#allocation8 + $0x1800] ss:$16 sps:$4 sm:$0xff]   ;;  %v22645_v63 = vld [vmem:[#allocation8 + $0x1808] ss:$16 sps:$4 sm:$0xff]  }
 0xcb7   : > { %15123 = vmatprep.subr.bf16.mxu1 %v22575_v59  ;;  %v22650_v59 = vld [vmem:[#allocation8 + $0x1824] ss:$16 sps:$4 sm:$0xff]  }
 0xcb9   : > { %14436 = vmatpush1.bf16.msra.mxu0 %v22570_v5  ;;  %v22653_v5 = vld [vmem:[#allocation8 + $0x182c] ss:$16 sps:$4 sm:$0xff]  }
 0xcba   : > { %15124 = vmatpush1.bf16.msra.mxu1 %v22573_v21  ;;  %14437 = vmatprep.subr.bf16.mxu0 %v22578_v6  ;;  %v22648_v21 = vld [vmem:[#allocation8 + $0x1820] ss:$16 sps:$4 sm:$0xff]   ;;  %v22651_v6 = vld [vmem:[#allocation8 + $0x1828] ss:$16 sps:$4 sm:$0xff]  }
 0xcbb   : > { %15125 = vmatprep.subr.bf16.mxu1 %v22581_v52  ;;  %v22656_v52 = vld [vmem:[#allocation8 + $0x1844] ss:$16 sps:$4 sm:$0xff]  }
 0xcbd   : > { %14438 = vmatpush1.bf16.msra.mxu0 %v22576_v8  ;;  %v22659_v8 = vld [vmem:[#allocation8 + $0x184c] ss:$16 sps:$4 sm:$0xff]  }
 0xcbe   : > { %15126 = vmatpush1.bf16.msra.mxu1 %v22579_v37  ;;  %14439 = vmatprep.subr.bf16.mxu0 %v22584_v27  ;;  %v22654_v37 = vld [vmem:[#allocation8 + $0x1840] ss:$16 sps:$4 sm:$0xff]   ;;  %v22657_v27 = vld [vmem:[#allocation8 + $0x1848] ss:$16 sps:$4 sm:$0xff]  }
 0xcbf   : > { %15127 = vmatprep.subr.bf16.mxu1 %v22587_v43  ;;  %v22662_v43 = vld [vmem:[#allocation8 + $0x1864] ss:$16 sps:$4 sm:$0xff]  }
 0xcc1   : > { %14440 = vmatpush1.bf16.msra.mxu0 %v22582_v53  ;;  %v22660_v53 = vld [vmem:[#allocation8 + $0x1860] ss:$16 sps:$4 sm:$0xff]  }
 0xcc2   : > { %15128 = vmatpush1.bf16.msra.mxu1 %v22585_v31  ;;  %14441 = vmatprep.subr.bf16.mxu0 %v22590_v38  ;;  %v22663_v31 = vld [vmem:[#allocation8 + $0x1868] ss:$16 sps:$4 sm:$0xff]   ;;  %v22668_v38 = vld [vmem:[#allocation8 + $0x1884] ss:$16 sps:$4 sm:$0xff]  }
 0xcc3   : > { %15129 = vmatprep.subr.bf16.mxu1 %v22593_v50  ;;  %v22671_v50 = vld [vmem:[#allocation8 + $0x188c] ss:$16 sps:$4 sm:$0xff]  }
 0xcc5   : > { %14442 = vmatpush1.bf16.msra.mxu0 %v22588_v22  ;;  %v22669_v22 = vld [vmem:[#allocation8 + $0x1888] ss:$16 sps:$4 sm:$0xff]  }
 0xcc6   : > { %15130 = vmatpush1.bf16.msra.mxu1 %v22591_v54  ;;  %14443 = vmatprep.subr.bf16.mxu0 %v22596_v16  ;;  %v22674_v54 = vld [vmem:[#allocation8 + $0x18a4] ss:$16 sps:$4 sm:$0xff]   ;;  %v22677_v16 = vld [vmem:[#allocation8 + $0x18ac] ss:$16 sps:$4 sm:$0xff]  }
 0xcc7   : > { %15131 = vmatprep.subr.bf16.mxu1 %v22599_v42  ;;  %v22672_v42 = vld [vmem:[#allocation8 + $0x18a0] ss:$16 sps:$4 sm:$0xff]  }
 0xcc9   : > { %14444 = vmatpush1.bf16.msra.mxu0 %v22594_v46  ;;  %v22675_v46 = vld [vmem:[#allocation8 + $0x18a8] ss:$16 sps:$4 sm:$0xff]  }
 0xcca   : > { %15132 = vmatpush1.bf16.msra.mxu1 %v22597_v7  ;;  %14445 = vmatprep.subr.bf16.mxu0 %v22602_v51  ;;  %v22680_v7 = vld [vmem:[#allocation8 + $0x18c4] ss:$16 sps:$4 sm:$0xff]   ;;  %v22683_v51 = vld [vmem:[#allocation8 + $0x18cc] ss:$16 sps:$4 sm:$0xff]  }
 0xccb   : > { %15133 = vmatprep.subr.bf16.mxu1 %v22605_v13  ;;  %v22678_v13 = vld [vmem:[#allocation8 + $0x18c0] ss:$16 sps:$4 sm:$0xff]  }
 0xccd   : > { %14446 = vmatpush1.bf16.msra.mxu0 %v22600_v33  ;;  %v22681_v33 = vld [vmem:[#allocation8 + $0x18c8] ss:$16 sps:$4 sm:$0xff]  }
 0xcce   : > { %15134 = vmatpush1.bf16.msra.mxu1 %v22603_v55  ;;  %14447 = vmatprep.subr.bf16.mxu0 %v22608_v29  ;;  %v22686_v55 = vld [vmem:[#allocation8 + $0x18e4] ss:$16 sps:$4 sm:$0xff]   ;;  %v22689_v29 = vld [vmem:[#allocation8 + $0x18ec] ss:$16 sps:$4 sm:$0xff]  }
 0xccf   : > { %15135 = vmatprep.subr.bf16.mxu1 %v22611_v0  ;;  %v22684_v0 = vld [vmem:[#allocation8 + $0x18e0] ss:$16 sps:$4 sm:$0xff]  }
 0xcd1   : > { %14448 = vmatpush1.bf16.msra.mxu0 %v22606_v58  ;;  %v22687_v58 = vld [vmem:[#allocation8 + $0x18e8] ss:$16 sps:$4 sm:$0xff]  }
 0xcd2   : > { %15136 = vmatpush1.bf16.msra.mxu1 %v22609_v39  ;;  %14449 = vmatprep.subr.bf16.mxu0 %v22614_v3  ;;  %v22692_v39 = vld [vmem:[#allocation8 + $0x1904] ss:$16 sps:$4 sm:$0xff]   ;;  %v22695_v3 = vld [vmem:[#allocation8 + $0x190c] ss:$16 sps:$4 sm:$0xff]  }
 0xcd3   : > { %15137 = vmatprep.subr.bf16.mxu1 %v22617_v26  ;;  %v22690_v26 = vld [vmem:[#allocation8 + $0x1900] ss:$16 sps:$4 sm:$0xff]  }
 0xcd5   : > { %14450 = vmatpush1.bf16.msra.mxu0 %v22612_v15  ;;  %v22693_v15 = vld [vmem:[#allocation8 + $0x1908] ss:$16 sps:$4 sm:$0xff]  }
 0xcd6   : > { %15138 = vmatpush1.bf16.msra.mxu1 %v22615_v11  ;;  %14451 = vmatprep.subr.bf16.mxu0 %v22620_v1  ;;  %v22698_v11 = vld [vmem:[#allocation8 + $0x1924] ss:$16 sps:$4 sm:$0xff]   ;;  %v22701_v1 = vld [vmem:[#allocation8 + $0x192c] ss:$16 sps:$4 sm:$0xff]  }
 0xcd7   : > { %15139 = vmatprep.subr.bf16.mxu1 %v22623_v36  ;;  %v22696_v36 = vld [vmem:[#allocation8 + $0x1920] ss:$16 sps:$4 sm:$0xff]  }
 0xcd9   : > { %14452 = vmatpush1.bf16.msra.mxu0 %v22618_v23  ;;  %v22699_v23 = vld [vmem:[#allocation8 + $0x1928] ss:$16 sps:$4 sm:$0xff]  }
 0xcda   : > { %15140 = vmatpush1.bf16.msra.mxu1 %v22621_v49  ;;  %14453 = vmatprep.subr.bf16.mxu0 %v22626_v47  ;;  %v22704_v49 = vld [vmem:[#allocation8 + $0x1944] ss:$16 sps:$4 sm:$0xff]   ;;  %v22707_v47 = vld [vmem:[#allocation8 + $0x194c] ss:$16 sps:$4 sm:$0xff]  }
 0xcdb   : > { %15141 = vmatprep.subr.bf16.mxu1 %v22629_v35  ;;  %v22702_v35 = vld [vmem:[#allocation8 + $0x1940] ss:$16 sps:$4 sm:$0xff]  }
 0xcdd   : > { %14454 = vmatpush1.bf16.msra.mxu0 %v22624_v44  ;;  %v22705_v44 = vld [vmem:[#allocation8 + $0x1948] ss:$16 sps:$4 sm:$0xff]  }
 0xcde   : > { %15142 = vmatpush1.bf16.msra.mxu1 %v22627_v14  ;;  %14455 = vmatprep.subr.bf16.mxu0 %v22632_v57  ;;  %v22710_v14 = vld [vmem:[#allocation8 + $0x1964] ss:$16 sps:$4 sm:$0xff]   ;;  %v22713_v57 = vld [vmem:[#allocation8 + $0x196c] ss:$16 sps:$4 sm:$0xff]  }
 0xcdf   : > { %15143 = vmatprep.subr.bf16.mxu1 %v22635_v61  ;;  %v22708_v61 = vld [vmem:[#allocation8 + $0x1960] ss:$16 sps:$4 sm:$0xff]  }
 0xce1   : > { %14456 = vmatpush1.bf16.msra.mxu0 %v22630_v20  ;;  %v22711_v20 = vld [vmem:[#allocation8 + $0x1968] ss:$16 sps:$4 sm:$0xff]  }
 0xce2   : > { %15144 = vmatpush1.bf16.msra.mxu1 %v22633_v45  ;;  %14457 = vmatprep.subr.bf16.mxu0 %v22638_v30  ;;  %v22716_v45 = vld [vmem:[#allocation8 + $0x1984] ss:$16 sps:$4 sm:$0xff]   ;;  %v22719_v30 = vld [vmem:[#allocation8 + $0x198c] ss:$16 sps:$4 sm:$0xff]  }
 0xce3   : > { %15145 = vmatprep.subr.bf16.mxu1 %v22641_v62  ;;  %v22714_v62 = vld [vmem:[#allocation8 + $0x1980] ss:$16 sps:$4 sm:$0xff]  }
 0xce5   : > { %14458 = vmatpush1.bf16.msra.mxu0 %v22636_v18  ;;  %v22717_v18 = vld [vmem:[#allocation8 + $0x1988] ss:$16 sps:$4 sm:$0xff]  }
 0xce6   : > { %15146 = vmatpush1.bf16.msra.mxu1 %v22639_v12  ;;  %14470 = vmatprep.subr.bf16.mxu0 %v22644_v9  ;;  %v22722_v12 = vld [vmem:[#allocation8 + $0x19a4] ss:$16 sps:$4 sm:$0xff]   ;;  %v22725_v9 = vld [vmem:[#allocation8 + $0x19ac] ss:$16 sps:$4 sm:$0xff]  }
 0xce7   : > { %15158 = vmatprep.subr.bf16.mxu1 %v22647_v24  ;;  %v22720_v24 = vld [vmem:[#allocation8 + $0x19a0] ss:$16 sps:$4 sm:$0xff]  }
 0xce8   : > { %14460 = vmatmul.mubr.bf16.vlgmr.msra.gmra.mrb[20].mxu0 %v25149_v41 }
 0xce9   : > { %15148 = vmatmul.mubr.bf16.vlgmr.msra.gmra.mrb[212].mxu1 %v25149_v41  ;;  %14471 = vmatpush1.bf16.msra.mxu0 %v22642_v25  ;;  %v22665_v41 = vld [vmem:[#allocation8 + $0x186c] ss:$16 sps:$4 sm:$0xff]   ;;  %v22723_v25 = vld [vmem:[#allocation8 + $0x19a8] ss:$16 sps:$4 sm:$0xff]  }
 0xcea   : > { %14502 = vmatprep.mubr.bf16.mxu0 %v25155_v48  ;;  %15159 = vmatpush1.bf16.msra.mxu1 %v22645_v63  ;;  %v22728_v63 = vld [vmem:[#allocation8 + $0x19c4] ss:$16 sps:$4 sm:$0xff]  }
 0xceb   : > { %15190 = vmatprep.mubr.bf16.mxu1 %v25155_v48  ;;  %14472 = vmatprep.subr.bf16.mxu0 %v22650_v59  ;;  %v22666_v48 = vld [vmem:[#allocation8 + $0x1880] ss:$16 sps:$4 sm:$0xff]   ;;  %v22731_v59 = vld [vmem:[#allocation8 + $0x19cc] ss:$16 sps:$4 sm:$0xff]  }
 0xcec   : > { %15160 = vmatprep.subr.bf16.mxu1 %v22653_v5  ;;  %v22726_v5 = vld [vmem:[#allocation8 + $0x19c0] ss:$16 sps:$4 sm:$0xff]  }
 0xced   : > { %14473 = vmatpush1.bf16.msra.mxu0 %v22648_v21  ;;  %v22729_v21 = vld [vmem:[#allocation8 + $0x19c8] ss:$16 sps:$4 sm:$0xff]  }
 0xcee   : > { %15161 = vmatpush1.bf16.msra.mxu1 %v22651_v6  ;;  %14474 = vmatprep.subr.bf16.mxu0 %v22656_v52  ;;  %v22734_v6 = vld [vmem:[#allocation8 + $0x19e4] ss:$16 sps:$4 sm:$0xff]   ;;  %v22737_v52 = vld [vmem:[#allocation8 + $0x19ec] ss:$16 sps:$4 sm:$0xff]  }
 0xcef   : > { %15162 = vmatprep.subr.bf16.mxu1 %v22659_v8  ;;  %v22732_v8 = vld [vmem:[#allocation8 + $0x19e0] ss:$16 sps:$4 sm:$0xff]  }
 0xcf1   : > { %14475 = vmatpush1.bf16.msra.mxu0 %v22654_v37  ;;  %v22735_v37 = vld [vmem:[#allocation8 + $0x19e8] ss:$16 sps:$4 sm:$0xff]  }
 0xcf2   : > { %15163 = vmatpush1.bf16.msra.mxu1 %v22657_v27  ;;  %14476 = vmatprep.subr.bf16.mxu0 %v22662_v43  ;;  %v22740_v27 = vld [vmem:[#allocation8 + $0x1a04] ss:$16 sps:$4 sm:$0xff]   ;;  %v22743_v43 = vld [vmem:[#allocation8 + $0x1a0c] ss:$16 sps:$4 sm:$0xff]  }
 0xcf3   : > { %15164 = vmatprep.subr.bf16.mxu1 %v22665_v41  ;;  %v22738_v41 = vld [vmem:[#allocation8 + $0x1a00] ss:$16 sps:$4 sm:$0xff]  }
 0xcf5   : > { %14477 = vmatpush1.bf16.msra.mxu0 %v22660_v53  ;;  %v22741_v53 = vld [vmem:[#allocation8 + $0x1a08] ss:$16 sps:$4 sm:$0xff]  }
 0xcf6   : > { %15165 = vmatpush1.bf16.msra.mxu1 %v22663_v31  ;;  %14478 = vmatprep.subr.bf16.mxu0 %v22668_v38  ;;  %v22746_v31 = vld [vmem:[#allocation8 + $0x1a24] ss:$16 sps:$4 sm:$0xff]   ;;  %v22749_v38 = vld [vmem:[#allocation8 + $0x1a2c] ss:$16 sps:$4 sm:$0xff]  }
 0xcf7   : > { %15166 = vmatprep.subr.bf16.mxu1 %v22671_v50  ;;  %v22744_v50 = vld [vmem:[#allocation8 + $0x1a20] ss:$16 sps:$4 sm:$0xff]  }
 0xcf9   : > { %14479 = vmatpush1.bf16.msra.mxu0 %v22666_v48  ;;  %v22747_v48 = vld [vmem:[#allocation8 + $0x1a28] ss:$16 sps:$4 sm:$0xff]  }
 0xcfa   : > { %15167 = vmatpush1.bf16.msra.mxu1 %v22669_v22  ;;  %14480 = vmatprep.subr.bf16.mxu0 %v22674_v54  ;;  %v22752_v22 = vld [vmem:[#allocation8 + $0x1a44] ss:$16 sps:$4 sm:$0xff]   ;;  %v22755_v54 = vld [vmem:[#allocation8 + $0x1a4c] ss:$16 sps:$4 sm:$0xff]  }
 0xcfb   : > { %15168 = vmatprep.subr.bf16.mxu1 %v22677_v16  ;;  %v22750_v16 = vld [vmem:[#allocation8 + $0x1a40] ss:$16 sps:$4 sm:$0xff]  }
 0xcfd   : > { %14481 = vmatpush1.bf16.msra.mxu0 %v22672_v42  ;;  %v22753_v42 = vld [vmem:[#allocation8 + $0x1a48] ss:$16 sps:$4 sm:$0xff]  }
 0xcfe   : > { %15169 = vmatpush1.bf16.msra.mxu1 %v22675_v46  ;;  %14482 = vmatprep.subr.bf16.mxu0 %v22680_v7  ;;  %v22758_v46 = vld [vmem:[#allocation8 + $0x1a64] ss:$16 sps:$4 sm:$0xff]   ;;  %v22756_v7 = vld [vmem:[#allocation8 + $0x1a60] ss:$16 sps:$4 sm:$0xff]  }
 0xcff   : > { %15170 = vmatprep.subr.bf16.mxu1 %v22683_v51  ;;  %v22759_v51 = vld [vmem:[#allocation8 + $0x1a68] ss:$16 sps:$4 sm:$0xff]  }
 0xd01   : > { %14483 = vmatpush1.bf16.msra.mxu0 %v22678_v13  ;;  %v22764_v13 = vld [vmem:[#allocation8 + $0x1a84] ss:$16 sps:$4 sm:$0xff]  }
 0xd02   : > { %15171 = vmatpush1.bf16.msra.mxu1 %v22681_v33  ;;  %14484 = vmatprep.subr.bf16.mxu0 %v22686_v55  ;;  %v22767_v33 = vld [vmem:[#allocation8 + $0x1a8c] ss:$16 sps:$4 sm:$0xff]   ;;  %v22765_v55 = vld [vmem:[#allocation8 + $0x1a88] ss:$16 sps:$4 sm:$0xff]  }
 0xd03   : > { %15172 = vmatprep.subr.bf16.mxu1 %v22689_v29  ;;  %v22770_v29 = vld [vmem:[#allocation8 + $0x1aa4] ss:$16 sps:$4 sm:$0xff]  }
 0xd05   : > { %14485 = vmatpush1.bf16.msra.mxu0 %v22684_v0  ;;  %v22773_v0 = vld [vmem:[#allocation8 + $0x1aac] ss:$16 sps:$4 sm:$0xff]  }
 0xd06   : > { %15173 = vmatpush1.bf16.msra.mxu1 %v22687_v58  ;;  %14486 = vmatprep.subr.bf16.mxu0 %v22692_v39  ;;  %v22768_v58 = vld [vmem:[#allocation8 + $0x1aa0] ss:$16 sps:$4 sm:$0xff]   ;;  %v22771_v39 = vld [vmem:[#allocation8 + $0x1aa8] ss:$16 sps:$4 sm:$0xff]  }
 0xd07   : > { %15174 = vmatprep.subr.bf16.mxu1 %v22695_v3  ;;  %v22776_v3 = vld [vmem:[#allocation8 + $0x1ac4] ss:$16 sps:$4 sm:$0xff]  }
 0xd09   : > { %14487 = vmatpush1.bf16.msra.mxu0 %v22690_v26  ;;  %v22779_v26 = vld [vmem:[#allocation8 + $0x1acc] ss:$16 sps:$4 sm:$0xff]  }
 0xd0a   : > { %15175 = vmatpush1.bf16.msra.mxu1 %v22693_v15  ;;  %14488 = vmatprep.subr.bf16.mxu0 %v22698_v11  ;;  %v22774_v15 = vld [vmem:[#allocation8 + $0x1ac0] ss:$16 sps:$4 sm:$0xff]   ;;  %v22777_v11 = vld [vmem:[#allocation8 + $0x1ac8] ss:$16 sps:$4 sm:$0xff]  }
 0xd0b   : > { %15176 = vmatprep.subr.bf16.mxu1 %v22701_v1  ;;  %v22782_v1 = vld [vmem:[#allocation8 + $0x1ae4] ss:$16 sps:$4 sm:$0xff]  }
 0xd0d   : > { %14489 = vmatpush1.bf16.msra.mxu0 %v22696_v36  ;;  %v22785_v36 = vld [vmem:[#allocation8 + $0x1aec] ss:$16 sps:$4 sm:$0xff]  }
 0xd0e   : > { %15177 = vmatpush1.bf16.msra.mxu1 %v22699_v23  ;;  %14490 = vmatprep.subr.bf16.mxu0 %v22704_v49  ;;  %v22780_v23 = vld [vmem:[#allocation8 + $0x1ae0] ss:$16 sps:$4 sm:$0xff]   ;;  %v22783_v49 = vld [vmem:[#allocation8 + $0x1ae8] ss:$16 sps:$4 sm:$0xff]  }
 0xd0f   : > { %15178 = vmatprep.subr.bf16.mxu1 %v22707_v47  ;;  %v22788_v47 = vld [vmem:[#allocation8 + $0x1b04] ss:$16 sps:$4 sm:$0xff]  }
 0xd11   : > { %14491 = vmatpush1.bf16.msra.mxu0 %v22702_v35  ;;  %v22791_v35 = vld [vmem:[#allocation8 + $0x1b0c] ss:$16 sps:$4 sm:$0xff]  }
 0xd12   : > { %15179 = vmatpush1.bf16.msra.mxu1 %v22705_v44  ;;  %14492 = vmatprep.subr.bf16.mxu0 %v22710_v14  ;;  %v22786_v44 = vld [vmem:[#allocation8 + $0x1b00] ss:$16 sps:$4 sm:$0xff]   ;;  %v22789_v14 = vld [vmem:[#allocation8 + $0x1b08] ss:$16 sps:$4 sm:$0xff]  }
 0xd13   : > { %15180 = vmatprep.subr.bf16.mxu1 %v22713_v57  ;;  %v22794_v57 = vld [vmem:[#allocation8 + $0x1b24] ss:$16 sps:$4 sm:$0xff]  }
 0xd15   : > { %14493 = vmatpush1.bf16.msra.mxu0 %v22708_v61  ;;  %v22797_v61 = vld [vmem:[#allocation8 + $0x1b2c] ss:$16 sps:$4 sm:$0xff]  }
 0xd16   : > { %15181 = vmatpush1.bf16.msra.mxu1 %v22711_v20  ;;  %14494 = vmatprep.subr.bf16.mxu0 %v22716_v45  ;;  %v22792_v20 = vld [vmem:[#allocation8 + $0x1b20] ss:$16 sps:$4 sm:$0xff]   ;;  %v22795_v45 = vld [vmem:[#allocation8 + $0x1b28] ss:$16 sps:$4 sm:$0xff]  }
 0xd17   : > { %15182 = vmatprep.subr.bf16.mxu1 %v22719_v30  ;;  %v22800_v30 = vld [vmem:[#allocation8 + $0x1b44] ss:$16 sps:$4 sm:$0xff]  }
 0xd19   : > { %14495 = vmatpush1.bf16.msra.mxu0 %v22714_v62  ;;  %v22803_v62 = vld [vmem:[#allocation8 + $0x1b4c] ss:$16 sps:$4 sm:$0xff]  }
 0xd1a   : > { %15183 = vmatpush1.bf16.msra.mxu1 %v22717_v18  ;;  %14496 = vmatprep.subr.bf16.mxu0 %v22722_v12  ;;  %v22798_v18 = vld [vmem:[#allocation8 + $0x1b40] ss:$16 sps:$4 sm:$0xff]   ;;  %v22801_v12 = vld [vmem:[#allocation8 + $0x1b48] ss:$16 sps:$4 sm:$0xff]  }
 0xd1b   : > { %15184 = vmatprep.subr.bf16.mxu1 %v22725_v9  ;;  %v22806_v9 = vld [vmem:[#allocation8 + $0x1b64] ss:$16 sps:$4 sm:$0xff]  }
 0xd1d   : > { %14497 = vmatpush1.bf16.msra.mxu0 %v22720_v24  ;;  %v22809_v24 = vld [vmem:[#allocation8 + $0x1b6c] ss:$16 sps:$4 sm:$0xff]  }
 0xd1e   : > { %15185 = vmatpush1.bf16.msra.mxu1 %v22723_v25  ;;  %14498 = vmatprep.subr.bf16.mxu0 %v22728_v63  ;;  %v22804_v25 = vld [vmem:[#allocation8 + $0x1b60] ss:$16 sps:$4 sm:$0xff]   ;;  %v22807_v63 = vld [vmem:[#allocation8 + $0x1b68] ss:$16 sps:$4 sm:$0xff]  }
 0xd1f   : > { %15186 = vmatprep.subr.bf16.mxu1 %v22731_v59  ;;  %v22812_v59 = vld [vmem:[#allocation8 + $0x1b84] ss:$16 sps:$4 sm:$0xff]  }
 0xd21   : > { %14499 = vmatpush1.bf16.msra.mxu0 %v22726_v5  ;;  %v22815_v5 = vld [vmem:[#allocation8 + $0x1b8c] ss:$16 sps:$4 sm:$0xff]  }
 0xd22   : > { %15187 = vmatpush1.bf16.msra.mxu1 %v22729_v21  ;;  %14500 = vmatprep.subr.bf16.mxu0 %v22734_v6  ;;  %v22810_v21 = vld [vmem:[#allocation8 + $0x1b80] ss:$16 sps:$4 sm:$0xff]   ;;  %v22813_v6 = vld [vmem:[#allocation8 + $0x1b88] ss:$16 sps:$4 sm:$0xff]  }
 0xd23   : > { %15188 = vmatprep.subr.bf16.mxu1 %v22737_v52  ;;  %v22818_v52 = vld [vmem:[#allocation8 + $0x1ba4] ss:$16 sps:$4 sm:$0xff]  }
 0xd25   : > { %14501 = vmatpush1.bf16.msra.mxu0 %v22732_v8  ;;  %v22821_v8 = vld [vmem:[#allocation8 + $0x1bac] ss:$16 sps:$4 sm:$0xff]  }
 0xd26   : > { %15189 = vmatpush1.bf16.msra.mxu1 %v22735_v37  ;;  %14513 = vmatprep.subr.bf16.mxu0 %v22740_v27  ;;  %v22816_v37 = vld [vmem:[#allocation8 + $0x1ba0] ss:$16 sps:$4 sm:$0xff]   ;;  %v22819_v27 = vld [vmem:[#allocation8 + $0x1ba8] ss:$16 sps:$4 sm:$0xff]  }
 0xd27   : > { %15201 = vmatprep.subr.bf16.mxu1 %v22743_v43  ;;  %v22824_v43 = vld [vmem:[#allocation8 + $0x1bc4] ss:$16 sps:$4 sm:$0xff]  }
 0xd28   : > { %14503 = vmatmul.mubr.bf16.vlgmr.msra.gmra.mrb[20].mxu0 %v25153_v19 }
 0xd29   : > { %15191 = vmatmul.mubr.bf16.vlgmr.msra.gmra.mrb[212].mxu1 %v25153_v19  ;;  %14514 = vmatpush1.bf16.msra.mxu0 %v22738_v41  ;;  %v22761_v19 = vld [vmem:[#allocation8 + $0x1a6c] ss:$16 sps:$4 sm:$0xff]  }
 0xd2a   : > { %14545 = vmatprep.mubr.bf16.mxu0 %v25159_v17  ;;  %15202 = vmatpush1.bf16.msra.mxu1 %v22741_v53  ;;  %v22827_v41 = vld [vmem:[#allocation8 + $0x1bcc] ss:$16 sps:$4 sm:$0xff]   ;;  %v22822_v53 = vld [vmem:[#allocation8 + $0x1bc0] ss:$16 sps:$4 sm:$0xff]  }
 0xd2b   : > { %15233 = vmatprep.mubr.bf16.mxu1 %v25159_v17  ;;  %14515 = vmatprep.subr.bf16.mxu0 %v22746_v31  ;;  %v22762_v17 = vld [vmem:[#allocation8 + $0x1a80] ss:$16 sps:$4 sm:$0xff]   ;;  %v22825_v31 = vld [vmem:[#allocation8 + $0x1bc8] ss:$16 sps:$4 sm:$0xff]  }
 0xd2c   : > { %15203 = vmatprep.subr.bf16.mxu1 %v22749_v38  ;;  %v22830_v38 = vld [vmem:[#allocation8 + $0x1be4] ss:$16 sps:$4 sm:$0xff]  }
 0xd2d   : > { %14516 = vmatpush1.bf16.msra.mxu0 %v22744_v50  ;;  %v22833_v50 = vld [vmem:[#allocation8 + $0x1bec] ss:$16 sps:$4 sm:$0xff]  }
 0xd2e   : > { %15204 = vmatpush1.bf16.msra.mxu1 %v22747_v48  ;;  %14517 = vmatprep.subr.bf16.mxu0 %v22752_v22  ;;  %v22828_v48 = vld [vmem:[#allocation8 + $0x1be0] ss:$16 sps:$4 sm:$0xff]   ;;  %v22831_v22 = vld [vmem:[#allocation8 + $0x1be8] ss:$16 sps:$4 sm:$0xff]  }
 0xd2f   : > { %15205 = vmatprep.subr.bf16.mxu1 %v22755_v54  ;;  %v22836_v54 = vld [vmem:[#allocation8 + $0x1c04] ss:$16 sps:$4 sm:$0xff]  }
 0xd31   : > { %14518 = vmatpush1.bf16.msra.mxu0 %v22750_v16  ;;  %v22839_v16 = vld [vmem:[#allocation8 + $0x1c0c] ss:$16 sps:$4 sm:$0xff]  }
 0xd32   : > { %15206 = vmatpush1.bf16.msra.mxu1 %v22753_v42  ;;  %14519 = vmatprep.subr.bf16.mxu0 %v22758_v46  ;;  %v22834_v42 = vld [vmem:[#allocation8 + $0x1c00] ss:$16 sps:$4 sm:$0xff]   ;;  %v22837_v46 = vld [vmem:[#allocation8 + $0x1c08] ss:$16 sps:$4 sm:$0xff]  }
 0xd33   : > { %15207 = vmatprep.subr.bf16.mxu1 %v22761_v19  ;;  %v22842_v19 = vld [vmem:[#allocation8 + $0x1c24] ss:$16 sps:$4 sm:$0xff]  }
 0xd35   : > { %14520 = vmatpush1.bf16.msra.mxu0 %v22756_v7  ;;  %v22845_v7 = vld [vmem:[#allocation8 + $0x1c2c] ss:$16 sps:$4 sm:$0xff]  }
 0xd36   : > { %15208 = vmatpush1.bf16.msra.mxu1 %v22759_v51  ;;  %14521 = vmatprep.subr.bf16.mxu0 %v22764_v13  ;;  %v22840_v51 = vld [vmem:[#allocation8 + $0x1c20] ss:$16 sps:$4 sm:$0xff]   ;;  %v22843_v13 = vld [vmem:[#allocation8 + $0x1c28] ss:$16 sps:$4 sm:$0xff]  }
 0xd37   : > { %15209 = vmatprep.subr.bf16.mxu1 %v22767_v33  ;;  %v22848_v33 = vld [vmem:[#allocation8 + $0x1c44] ss:$16 sps:$4 sm:$0xff]  }
 0xd39   : > { %14522 = vmatpush1.bf16.msra.mxu0 %v22762_v17  ;;  %v22851_v17 = vld [vmem:[#allocation8 + $0x1c4c] ss:$16 sps:$4 sm:$0xff]  }
 0xd3a   : > { %15210 = vmatpush1.bf16.msra.mxu1 %v22765_v55  ;;  %14523 = vmatprep.subr.bf16.mxu0 %v22770_v29  ;;  %v22846_v55 = vld [vmem:[#allocation8 + $0x1c40] ss:$16 sps:$4 sm:$0xff]   ;;  %v22849_v29 = vld [vmem:[#allocation8 + $0x1c48] ss:$16 sps:$4 sm:$0xff]  }
 0xd3b   : > { %15211 = vmatprep.subr.bf16.mxu1 %v22773_v0  ;;  %v22854_v0 = vld [vmem:[#allocation8 + $0x1c64] ss:$16 sps:$4 sm:$0xff]  }
 0xd3d   : > { %14524 = vmatpush1.bf16.msra.mxu0 %v22768_v58  ;;  %v22852_v58 = vld [vmem:[#allocation8 + $0x1c60] ss:$16 sps:$4 sm:$0xff]  }
 0xd3e   : > { %15212 = vmatpush1.bf16.msra.mxu1 %v22771_v39  ;;  %14525 = vmatprep.subr.bf16.mxu0 %v22776_v3  ;;  %v22855_v39 = vld [vmem:[#allocation8 + $0x1c68] ss:$16 sps:$4 sm:$0xff]   ;;  %v22860_v3 = vld [vmem:[#allocation8 + $0x1c84] ss:$16 sps:$4 sm:$0xff]  }
 0xd3f   : > { %15213 = vmatprep.subr.bf16.mxu1 %v22779_v26  ;;  %v22863_v26 = vld [vmem:[#allocation8 + $0x1c8c] ss:$16 sps:$4 sm:$0xff]  }
 0xd41   : > { %14526 = vmatpush1.bf16.msra.mxu0 %v22774_v15  ;;  %v22861_v15 = vld [vmem:[#allocation8 + $0x1c88] ss:$16 sps:$4 sm:$0xff]  }
 0xd42   : > { %15214 = vmatpush1.bf16.msra.mxu1 %v22777_v11  ;;  %14527 = vmatprep.subr.bf16.mxu0 %v22782_v1  ;;  %v22866_v11 = vld [vmem:[#allocation8 + $0x1ca4] ss:$16 sps:$4 sm:$0xff]   ;;  %v22869_v1 = vld [vmem:[#allocation8 + $0x1cac] ss:$16 sps:$4 sm:$0xff]  }
 0xd43   : > { %15215 = vmatprep.subr.bf16.mxu1 %v22785_v36  ;;  %v22864_v36 = vld [vmem:[#allocation8 + $0x1ca0] ss:$16 sps:$4 sm:$0xff]  }
 0xd45   : > { %14528 = vmatpush1.bf16.msra.mxu0 %v22780_v23  ;;  %v22867_v23 = vld [vmem:[#allocation8 + $0x1ca8] ss:$16 sps:$4 sm:$0xff]  }
 0xd46   : > { %15216 = vmatpush1.bf16.msra.mxu1 %v22783_v49  ;;  %14529 = vmatprep.subr.bf16.mxu0 %v22788_v47  ;;  %v22872_v49 = vld [vmem:[#allocation8 + $0x1cc4] ss:$16 sps:$4 sm:$0xff]   ;;  %v22875_v47 = vld [vmem:[#allocation8 + $0x1ccc] ss:$16 sps:$4 sm:$0xff]  }
 0xd47   : > { %15217 = vmatprep.subr.bf16.mxu1 %v22791_v35  ;;  %v22870_v35 = vld [vmem:[#allocation8 + $0x1cc0] ss:$16 sps:$4 sm:$0xff]  }
 0xd49   : > { %14530 = vmatpush1.bf16.msra.mxu0 %v22786_v44  ;;  %v22873_v44 = vld [vmem:[#allocation8 + $0x1cc8] ss:$16 sps:$4 sm:$0xff]  }
 0xd4a   : > { %15218 = vmatpush1.bf16.msra.mxu1 %v22789_v14  ;;  %14531 = vmatprep.subr.bf16.mxu0 %v22794_v57  ;;  %v22878_v14 = vld [vmem:[#allocation8 + $0x1ce4] ss:$16 sps:$4 sm:$0xff]   ;;  %v22881_v57 = vld [vmem:[#allocation8 + $0x1cec] ss:$16 sps:$4 sm:$0xff]  }
 0xd4b   : > { %15219 = vmatprep.subr.bf16.mxu1 %v22797_v61  ;;  %v22876_v61 = vld [vmem:[#allocation8 + $0x1ce0] ss:$16 sps:$4 sm:$0xff]  }
 0xd4d   : > { %14532 = vmatpush1.bf16.msra.mxu0 %v22792_v20  ;;  %v22879_v20 = vld [vmem:[#allocation8 + $0x1ce8] ss:$16 sps:$4 sm:$0xff]  }
 0xd4e   : > { %15220 = vmatpush1.bf16.msra.mxu1 %v22795_v45  ;;  %14533 = vmatprep.subr.bf16.mxu0 %v22800_v30  ;;  %v22884_v45 = vld [vmem:[#allocation8 + $0x1d04] ss:$16 sps:$4 sm:$0xff]   ;;  %v22887_v30 = vld [vmem:[#allocation8 + $0x1d0c] ss:$16 sps:$4 sm:$0xff]  }
 0xd4f   : > { %15221 = vmatprep.subr.bf16.mxu1 %v22803_v62  ;;  %v22882_v62 = vld [vmem:[#allocation8 + $0x1d00] ss:$16 sps:$4 sm:$0xff]  }
 0xd51   : > { %14534 = vmatpush1.bf16.msra.mxu0 %v22798_v18  ;;  %v22885_v18 = vld [vmem:[#allocation8 + $0x1d08] ss:$16 sps:$4 sm:$0xff]  }
 0xd52   : > { %15222 = vmatpush1.bf16.msra.mxu1 %v22801_v12  ;;  %14535 = vmatprep.subr.bf16.mxu0 %v22806_v9  ;;  %v22890_v12 = vld [vmem:[#allocation8 + $0x1d24] ss:$16 sps:$4 sm:$0xff]   ;;  %v22893_v9 = vld [vmem:[#allocation8 + $0x1d2c] ss:$16 sps:$4 sm:$0xff]  }
 0xd53   : > { %15223 = vmatprep.subr.bf16.mxu1 %v22809_v24  ;;  %v22888_v24 = vld [vmem:[#allocation8 + $0x1d20] ss:$16 sps:$4 sm:$0xff]  }
 0xd55   : > { %14536 = vmatpush1.bf16.msra.mxu0 %v22804_v25  ;;  %v22891_v25 = vld [vmem:[#allocation8 + $0x1d28] ss:$16 sps:$4 sm:$0xff]  }
 0xd56   : > { %15224 = vmatpush1.bf16.msra.mxu1 %v22807_v63  ;;  %14537 = vmatprep.subr.bf16.mxu0 %v22812_v59  ;;  %v22896_v63 = vld [vmem:[#allocation8 + $0x1d44] ss:$16 sps:$4 sm:$0xff]   ;;  %v22899_v59 = vld [vmem:[#allocation8 + $0x1d4c] ss:$16 sps:$4 sm:$0xff]  }
 0xd57   : > { %15225 = vmatprep.subr.bf16.mxu1 %v22815_v5  ;;  %v22894_v5 = vld [vmem:[#allocation8 + $0x1d40] ss:$16 sps:$4 sm:$0xff]  }
 0xd59   : > { %14538 = vmatpush1.bf16.msra.mxu0 %v22810_v21  ;;  %v22897_v21 = vld [vmem:[#allocation8 + $0x1d48] ss:$16 sps:$4 sm:$0xff]  }
 0xd5a   : > { %15226 = vmatpush1.bf16.msra.mxu1 %v22813_v6  ;;  %14539 = vmatprep.subr.bf16.mxu0 %v22818_v52  ;;  %v22902_v6 = vld [vmem:[#allocation8 + $0x1d64] ss:$16 sps:$4 sm:$0xff]   ;;  %v22905_v52 = vld [vmem:[#allocation8 + $0x1d6c] ss:$16 sps:$4 sm:$0xff]  }
 0xd5b   : > { %15227 = vmatprep.subr.bf16.mxu1 %v22821_v8  ;;  %v22900_v8 = vld [vmem:[#allocation8 + $0x1d60] ss:$16 sps:$4 sm:$0xff]  }
 0xd5d   : > { %14540 = vmatpush1.bf16.msra.mxu0 %v22816_v37  ;;  %v22903_v37 = vld [vmem:[#allocation8 + $0x1d68] ss:$16 sps:$4 sm:$0xff]  }
 0xd5e   : > { %15228 = vmatpush1.bf16.msra.mxu1 %v22819_v27  ;;  %14541 = vmatprep.subr.bf16.mxu0 %v22824_v43  ;;  %v22908_v27 = vld [vmem:[#allocation8 + $0x1d84] ss:$16 sps:$4 sm:$0xff]   ;;  %v22911_v43 = vld [vmem:[#allocation8 + $0x1d8c] ss:$16 sps:$4 sm:$0xff]  }
 0xd5f   : > { %15229 = vmatprep.subr.bf16.mxu1 %v22827_v41  ;;  %v22906_v41 = vld [vmem:[#allocation8 + $0x1d80] ss:$16 sps:$4 sm:$0xff]  }
 0xd61   : > { %14542 = vmatpush1.bf16.msra.mxu0 %v22822_v53  ;;  %v22909_v53 = vld [vmem:[#allocation8 + $0x1d88] ss:$16 sps:$4 sm:$0xff]  }
 0xd62   : > { %15230 = vmatpush1.bf16.msra.mxu1 %v22825_v31  ;;  %14543 = vmatprep.subr.bf16.mxu0 %v22830_v38  ;;  %v22914_v31 = vld [vmem:[#allocation8 + $0x1da4] ss:$16 sps:$4 sm:$0xff]   ;;  %v22917_v38 = vld [vmem:[#allocation8 + $0x1dac] ss:$16 sps:$4 sm:$0xff]  }
 0xd63   : > { %15231 = vmatprep.subr.bf16.mxu1 %v22833_v50  ;;  %v22912_v50 = vld [vmem:[#allocation8 + $0x1da0] ss:$16 sps:$4 sm:$0xff]  }
 0xd65   : > { %14544 = vmatpush1.bf16.msra.mxu0 %v22828_v48  ;;  %v22915_v48 = vld [vmem:[#allocation8 + $0x1da8] ss:$16 sps:$4 sm:$0xff]  }
 0xd66   : > { %15232 = vmatpush1.bf16.msra.mxu1 %v22831_v22  ;;  %14556 = vmatprep.subr.bf16.mxu0 %v22836_v54  ;;  %v22920_v22 = vld [vmem:[#allocation8 + $0x1dc4] ss:$16 sps:$4 sm:$0xff]   ;;  %v22923_v54 = vld [vmem:[#allocation8 + $0x1dcc] ss:$16 sps:$4 sm:$0xff]  }
 0xd67   : > { %15244 = vmatprep.subr.bf16.mxu1 %v22839_v16  ;;  %v22918_v16 = vld [vmem:[#allocation8 + $0x1dc0] ss:$16 sps:$4 sm:$0xff]  }
 0xd68   : > { %14546 = vmatmul.mubr.bf16.vlgmr.msra.gmra.mrb[20].mxu0 %v25157_v56 }
 0xd69   : > { %15234 = vmatmul.mubr.bf16.vlgmr.msra.gmra.mrb[212].mxu1 %v25157_v56  ;;  %14557 = vmatpush1.bf16.msra.mxu0 %v22834_v42  ;;  %v22857_v56 = vld [vmem:[#allocation8 + $0x1c6c] ss:$16 sps:$4 sm:$0xff]   ;;  %v22921_v42 = vld [vmem:[#allocation8 + $0x1dc8] ss:$16 sps:$4 sm:$0xff]  }
 0xd6a   : > { %14588 = vmatprep.mubr.bf16.mxu0 %v25163_v2  ;;  %15245 = vmatpush1.bf16.msra.mxu1 %v22837_v46  ;;  %v22926_v46 = vld [vmem:[#allocation8 + $0x1de4] ss:$16 sps:$4 sm:$0xff]  }
 0xd6b   : > { %15276 = vmatprep.mubr.bf16.mxu1 %v25163_v2  ;;  %14558 = vmatprep.subr.bf16.mxu0 %v22842_v19  ;;  %v22858_v2 = vld [vmem:[#allocation8 + $0x1c80] ss:$16 sps:$4 sm:$0xff]   ;;  %v22929_v19 = vld [vmem:[#allocation8 + $0x1dec] ss:$16 sps:$4 sm:$0xff]  }
 0xd6c   : > { %15246 = vmatprep.subr.bf16.mxu1 %v22845_v7  ;;  %v22924_v7 = vld [vmem:[#allocation8 + $0x1de0] ss:$16 sps:$4 sm:$0xff]  }
 0xd6d   : > { %14559 = vmatpush1.bf16.msra.mxu0 %v22840_v51  ;;  %v22927_v51 = vld [vmem:[#allocation8 + $0x1de8] ss:$16 sps:$4 sm:$0xff]  }
 0xd6e   : > { %15247 = vmatpush1.bf16.msra.mxu1 %v22843_v13  ;;  %14560 = vmatprep.subr.bf16.mxu0 %v22848_v33  ;;  %v22932_v13 = vld [vmem:[#allocation8 + $0x1e04] ss:$16 sps:$4 sm:$0xff]   ;;  %v22935_v33 = vld [vmem:[#allocation8 + $0x1e0c] ss:$16 sps:$4 sm:$0xff]  }
 0xd6f   : > { %15248 = vmatprep.subr.bf16.mxu1 %v22851_v17  ;;  %v22930_v17 = vld [vmem:[#allocation8 + $0x1e00] ss:$16 sps:$4 sm:$0xff]  }
 0xd71   : > { %14561 = vmatpush1.bf16.msra.mxu0 %v22846_v55  ;;  %v22933_v55 = vld [vmem:[#allocation8 + $0x1e08] ss:$16 sps:$4 sm:$0xff]  }
 0xd72   : > { %15249 = vmatpush1.bf16.msra.mxu1 %v22849_v29  ;;  %14562 = vmatprep.subr.bf16.mxu0 %v22854_v0  ;;  %v22938_v29 = vld [vmem:[#allocation8 + $0x1e24] ss:$16 sps:$4 sm:$0xff]   ;;  %v22941_v0 = vld [vmem:[#allocation8 + $0x1e2c] ss:$16 sps:$4 sm:$0xff]  }
 0xd73   : > { %15250 = vmatprep.subr.bf16.mxu1 %v22857_v56  ;;  %v22936_v56 = vld [vmem:[#allocation8 + $0x1e20] ss:$16 sps:$4 sm:$0xff]  }
 0xd75   : > { %14563 = vmatpush1.bf16.msra.mxu0 %v22852_v58  ;;  %v22939_v58 = vld [vmem:[#allocation8 + $0x1e28] ss:$16 sps:$4 sm:$0xff]  }
 0xd76   : > { %15251 = vmatpush1.bf16.msra.mxu1 %v22855_v39  ;;  %14564 = vmatprep.subr.bf16.mxu0 %v22860_v3  ;;  %v22944_v39 = vld [vmem:[#allocation8 + $0x1e44] ss:$16 sps:$4 sm:$0xff]   ;;  %v22947_v3 = vld [vmem:[#allocation8 + $0x1e4c] ss:$16 sps:$4 sm:$0xff]  }
 0xd77   : > { %15252 = vmatprep.subr.bf16.mxu1 %v22863_v26  ;;  %v22942_v26 = vld [vmem:[#allocation8 + $0x1e40] ss:$16 sps:$4 sm:$0xff]  }
 0xd79   : > { %14565 = vmatpush1.bf16.msra.mxu0 %v22858_v2  ;;  %v22945_v2 = vld [vmem:[#allocation8 + $0x1e48] ss:$16 sps:$4 sm:$0xff]  }
 0xd7a   : > { %15253 = vmatpush1.bf16.msra.mxu1 %v22861_v15  ;;  %14566 = vmatprep.subr.bf16.mxu0 %v22866_v11  ;;  %v22950_v15 = vld [vmem:[#allocation8 + $0x1e64] ss:$16 sps:$4 sm:$0xff]   ;;  %v22948_v11 = vld [vmem:[#allocation8 + $0x1e60] ss:$16 sps:$4 sm:$0xff]  }
 0xd7b   : > { %15254 = vmatprep.subr.bf16.mxu1 %v22869_v1  ;;  %v22951_v1 = vld [vmem:[#allocation8 + $0x1e68] ss:$16 sps:$4 sm:$0xff]  }
 0xd7d   : > { %14567 = vmatpush1.bf16.msra.mxu0 %v22864_v36  ;;  %v22956_v36 = vld [vmem:[#allocation8 + $0x1e84] ss:$16 sps:$4 sm:$0xff]  }
 0xd7e   : > { %15255 = vmatpush1.bf16.msra.mxu1 %v22867_v23  ;;  %14568 = vmatprep.subr.bf16.mxu0 %v22872_v49  ;;  %v22959_v23 = vld [vmem:[#allocation8 + $0x1e8c] ss:$16 sps:$4 sm:$0xff]   ;;  %v22957_v49 = vld [vmem:[#allocation8 + $0x1e88] ss:$16 sps:$4 sm:$0xff]  }
 0xd7f   : > { %15256 = vmatprep.subr.bf16.mxu1 %v22875_v47  ;;  %v22962_v47 = vld [vmem:[#allocation8 + $0x1ea4] ss:$16 sps:$4 sm:$0xff]  }
 0xd81   : > { %14569 = vmatpush1.bf16.msra.mxu0 %v22870_v35  ;;  %v22965_v35 = vld [vmem:[#allocation8 + $0x1eac] ss:$16 sps:$4 sm:$0xff]  }
 0xd82   : > { %15257 = vmatpush1.bf16.msra.mxu1 %v22873_v44  ;;  %14570 = vmatprep.subr.bf16.mxu0 %v22878_v14  ;;  %v22960_v44 = vld [vmem:[#allocation8 + $0x1ea0] ss:$16 sps:$4 sm:$0xff]   ;;  %v22963_v14 = vld [vmem:[#allocation8 + $0x1ea8] ss:$16 sps:$4 sm:$0xff]  }
 0xd83   : > { %15258 = vmatprep.subr.bf16.mxu1 %v22881_v57  ;;  %v22968_v57 = vld [vmem:[#allocation8 + $0x1ec4] ss:$16 sps:$4 sm:$0xff]  }
 0xd85   : > { %14571 = vmatpush1.bf16.msra.mxu0 %v22876_v61  ;;  %v22971_v61 = vld [vmem:[#allocation8 + $0x1ecc] ss:$16 sps:$4 sm:$0xff]  }
 0xd86   : > { %15259 = vmatpush1.bf16.msra.mxu1 %v22879_v20  ;;  %14572 = vmatprep.subr.bf16.mxu0 %v22884_v45  ;;  %v22966_v20 = vld [vmem:[#allocation8 + $0x1ec0] ss:$16 sps:$4 sm:$0xff]   ;;  %v22969_v45 = vld [vmem:[#allocation8 + $0x1ec8] ss:$16 sps:$4 sm:$0xff]  }
 0xd87   : > { %15260 = vmatprep.subr.bf16.mxu1 %v22887_v30  ;;  %v22974_v30 = vld [vmem:[#allocation8 + $0x1ee4] ss:$16 sps:$4 sm:$0xff]  }
 0xd89   : > { %14573 = vmatpush1.bf16.msra.mxu0 %v22882_v62  ;;  %v22977_v62 = vld [vmem:[#allocation8 + $0x1eec] ss:$16 sps:$4 sm:$0xff]  }
 0xd8a   : > { %15261 = vmatpush1.bf16.msra.mxu1 %v22885_v18  ;;  %14574 = vmatprep.subr.bf16.mxu0 %v22890_v12  ;;  %v22972_v18 = vld [vmem:[#allocation8 + $0x1ee0] ss:$16 sps:$4 sm:$0xff]   ;;  %v22975_v12 = vld [vmem:[#allocation8 + $0x1ee8] ss:$16 sps:$4 sm:$0xff]  }
 0xd8b   : > { %15262 = vmatprep.subr.bf16.mxu1 %v22893_v9  ;;  %v22980_v9 = vld [vmem:[#allocation8 + $0x1f04] ss:$16 sps:$4 sm:$0xff]  }
 0xd8d   : > { %14575 = vmatpush1.bf16.msra.mxu0 %v22888_v24  ;;  %v22983_v24 = vld [vmem:[#allocation8 + $0x1f0c] ss:$16 sps:$4 sm:$0xff]  }
 0xd8e   : > { %15263 = vmatpush1.bf16.msra.mxu1 %v22891_v25  ;;  %14576 = vmatprep.subr.bf16.mxu0 %v22896_v63  ;;  %v22978_v25 = vld [vmem:[#allocation8 + $0x1f00] ss:$16 sps:$4 sm:$0xff]   ;;  %v22981_v63 = vld [vmem:[#allocation8 + $0x1f08] ss:$16 sps:$4 sm:$0xff]  }
 0xd8f   : > { %15264 = vmatprep.subr.bf16.mxu1 %v22899_v59  ;;  %v22986_v59 = vld [vmem:[#allocation8 + $0x1f24] ss:$16 sps:$4 sm:$0xff]  }
 0xd91   : > { %14577 = vmatpush1.bf16.msra.mxu0 %v22894_v5  ;;  %v22989_v5 = vld [vmem:[#allocation8 + $0x1f2c] ss:$16 sps:$4 sm:$0xff]  }
 0xd92   : > { %15265 = vmatpush1.bf16.msra.mxu1 %v22897_v21  ;;  %14578 = vmatprep.subr.bf16.mxu0 %v22902_v6  ;;  %v22984_v21 = vld [vmem:[#allocation8 + $0x1f20] ss:$16 sps:$4 sm:$0xff]   ;;  %v22987_v6 = vld [vmem:[#allocation8 + $0x1f28] ss:$16 sps:$4 sm:$0xff]  }
 0xd93   : > { %15266 = vmatprep.subr.bf16.mxu1 %v22905_v52  ;;  %v22992_v52 = vld [vmem:[#allocation8 + $0x1f44] ss:$16 sps:$4 sm:$0xff]  }
 0xd95   : > { %14579 = vmatpush1.bf16.msra.mxu0 %v22900_v8  ;;  %v22995_v8 = vld [vmem:[#allocation8 + $0x1f4c] ss:$16 sps:$4 sm:$0xff]  }
 0xd96   : > { %15267 = vmatpush1.bf16.msra.mxu1 %v22903_v37  ;;  %14580 = vmatprep.subr.bf16.mxu0 %v22908_v27  ;;  %v22990_v37 = vld [vmem:[#allocation8 + $0x1f40] ss:$16 sps:$4 sm:$0xff]   ;;  %v22993_v27 = vld [vmem:[#allocation8 + $0x1f48] ss:$16 sps:$4 sm:$0xff]  }
 0xd97   : > { %15268 = vmatprep.subr.bf16.mxu1 %v22911_v43  ;;  %v22998_v43 = vld [vmem:[#allocation8 + $0x1f64] ss:$16 sps:$4 sm:$0xff]  }
 0xd99   : > { %14581 = vmatpush1.bf16.msra.mxu0 %v22906_v41  ;;  %v23001_v41 = vld [vmem:[#allocation8 + $0x1f6c] ss:$16 sps:$4 sm:$0xff]  }
 0xd9a   : > { %15269 = vmatpush1.bf16.msra.mxu1 %v22909_v53  ;;  %14582 = vmatprep.subr.bf16.mxu0 %v22914_v31  ;;  %v22996_v53 = vld [vmem:[#allocation8 + $0x1f60] ss:$16 sps:$4 sm:$0xff]   ;;  %v22999_v31 = vld [vmem:[#allocation8 + $0x1f68] ss:$16 sps:$4 sm:$0xff]  }
 0xd9b   : > { %15270 = vmatprep.subr.bf16.mxu1 %v22917_v38  ;;  %v23004_v38 = vld [vmem:[#allocation8 + $0x1f84] ss:$16 sps:$4 sm:$0xff]  }
 0xd9d   : > { %14583 = vmatpush1.bf16.msra.mxu0 %v22912_v50  ;;  %v23007_v50 = vld [vmem:[#allocation8 + $0x1f8c] ss:$16 sps:$4 sm:$0xff]  }
 0xd9e   : > { %15271 = vmatpush1.bf16.msra.mxu1 %v22915_v48  ;;  %14584 = vmatprep.subr.bf16.mxu0 %v22920_v22  ;;  %v23002_v48 = vld [vmem:[#allocation8 + $0x1f80] ss:$16 sps:$4 sm:$0xff]   ;;  %v23005_v22 = vld [vmem:[#allocation8 + $0x1f88] ss:$16 sps:$4 sm:$0xff]  }
 0xd9f   : > { %15272 = vmatprep.subr.bf16.mxu1 %v22923_v54  ;;  %v23010_v54 = vld [vmem:[#allocation8 + $0x1fa4] ss:$16 sps:$4 sm:$0xff]  }
 0xda1   : > { %14585 = vmatpush1.bf16.msra.mxu0 %v22918_v16  ;;  %v23013_v16 = vld [vmem:[#allocation8 + $0x1fac] ss:$16 sps:$4 sm:$0xff]  }
 0xda2   : > { %15273 = vmatpush1.bf16.msra.mxu1 %v22921_v42  ;;  %14586 = vmatprep.subr.bf16.mxu0 %v22926_v46  ;;  %v23008_v42 = vld [vmem:[#allocation8 + $0x1fa0] ss:$16 sps:$4 sm:$0xff]   ;;  %v23011_v46 = vld [vmem:[#allocation8 + $0x1fa8] ss:$16 sps:$4 sm:$0xff]  }
 0xda3   : > { %15274 = vmatprep.subr.bf16.mxu1 %v22929_v19  ;;  %v23016_v19 = vld [vmem:[#allocation8 + $0x1fc4] ss:$16 sps:$4 sm:$0xff]  }
 0xda5   : > { %14587 = vmatpush1.bf16.msra.mxu0 %v22924_v7  ;;  %v23019_v7 = vld [vmem:[#allocation8 + $0x1fcc] ss:$16 sps:$4 sm:$0xff]  }
 0xda6   : > { %15275 = vmatpush1.bf16.msra.mxu1 %v22927_v51  ;;  %14599 = vmatprep.subr.bf16.mxu0 %v22932_v13  ;;  %v23014_v51 = vld [vmem:[#allocation8 + $0x1fc0] ss:$16 sps:$4 sm:$0xff]   ;;  %v23017_v13 = vld [vmem:[#allocation8 + $0x1fc8] ss:$16 sps:$4 sm:$0xff]  }
 0xda7   : > { %15287 = vmatprep.subr.bf16.mxu1 %v22935_v33  ;;  %v23022_v33 = vld [vmem:[#allocation8 + $0x1fe4] ss:$16 sps:$4 sm:$0xff]  }
 0xda8   : > { %14589 = vmatmul.mubr.bf16.vlgmr.msra.gmra.mrb[20].mxu0 %v25161_v34 }
 0xda9   : > { %15277 = vmatmul.mubr.bf16.vlgmr.msra.gmra.mrb[212].mxu1 %v25161_v34  ;;  %14600 = vmatpush1.bf16.msra.mxu0 %v22930_v17  ;;  %v22953_v34 = vld [vmem:[#allocation8 + $0x1e6c] ss:$16 sps:$4 sm:$0xff]  }
 0xdaa   : > { %14631 = vmatprep.mubr.bf16.mxu0 %v25167_v40  ;;  %15288 = vmatpush1.bf16.msra.mxu1 %v22933_v55  ;;  %v23025_v17 = vld [vmem:[#allocation8 + $0x1fec] ss:$16 sps:$4 sm:$0xff]   ;;  %v23020_v55 = vld [vmem:[#allocation8 + $0x1fe0] ss:$16 sps:$4 sm:$0xff]  }
 0xdab   : > { %15319 = vmatprep.mubr.bf16.mxu1 %v25167_v40  ;;  %14601 = vmatprep.subr.bf16.mxu0 %v22938_v29  ;;  %v22954_v40 = vld [vmem:[#allocation8 + $0x1e80] ss:$16 sps:$4 sm:$0xff]   ;;  %v23023_v29 = vld [vmem:[#allocation8 + $0x1fe8] ss:$16 sps:$4 sm:$0xff]  }
 0xdac   : > { %15289 = vmatprep.subr.bf16.mxu1 %v22941_v0  ;;  %v8812_v0 = vld [vmem:[#allocation16] sm:$0xf] }
 0xdad   : > { %14602 = vmatpush1.bf16.msra.mxu0 %v22936_v56  ;;  %v25225_v56 = vsub.s32 2, %v24979_v28 }
 0xdae   : > { %15290 = vmatpush1.bf16.msra.mxu1 %v22939_v58  ;;  %14603 = vmatprep.subr.bf16.mxu0 %v22944_v39  ;;  %v25228_v58 = vsub.s32 3, %v24979_v28  ;;  %v8817_v39 = vrot.slane %v8812_v0, %v24982_v10 }
 0xdaf   : > { %15291 = vmatprep.subr.bf16.mxu1 %v22947_v3  ;;  %v8825_v3 = vrot.slane %v8812_v0, %v25225_v56 }
 0xdb1   : > { %14604 = vmatpush1.bf16.msra.mxu0 %v22942_v26  ;;  %v8821_v26 = vrot.slane %v8812_v0, %v24985_v4 }
 0xdb2   : > { %15292 = vmatpush1.bf16.msra.mxu1 %v22945_v2  ;;  %14605 = vmatprep.subr.bf16.mxu0 %v22950_v15  ;;  %v8829_v2 = vrot.slane %v8812_v0, %v25228_v58 }
 0xdb3   : > { %15293 = vmatprep.subr.bf16.mxu1 %v22953_v34 }
 0xdb5   : > { %14606 = vmatpush1.bf16.msra.mxu0 %v22948_v11 }
 0xdb6   : > { %15294 = vmatpush1.bf16.msra.mxu1 %v22951_v1  ;;  %14607 = vmatprep.subr.bf16.mxu0 %v22956_v36 }
 0xdb7   : > { %15295 = vmatprep.subr.bf16.mxu1 %v22959_v23 }
 0xdb9   : > { %14608 = vmatpush1.bf16.msra.mxu0 %v22954_v40 }
 0xdba   : > { %15296 = vmatpush1.bf16.msra.mxu1 %v22957_v49  ;;  %14609 = vmatprep.subr.bf16.mxu0 %v22962_v47 }
 0xdbb   : > { %15297 = vmatprep.subr.bf16.mxu1 %v22965_v35 }
 0xdbd   : > { %14610 = vmatpush1.bf16.msra.mxu0 %v22960_v44 }
 0xdbe   : > { %15298 = vmatpush1.bf16.msra.mxu1 %v22963_v14  ;;  %14611 = vmatprep.subr.bf16.mxu0 %v22968_v57 }
 0xdbf   : > { %15299 = vmatprep.subr.bf16.mxu1 %v22971_v61 }
 0xdc1   : > { %14612 = vmatpush1.bf16.msra.mxu0 %v22966_v20 }
 0xdc2   : > { %15300 = vmatpush1.bf16.msra.mxu1 %v22969_v45  ;;  %14613 = vmatprep.subr.bf16.mxu0 %v22974_v30 }
 0xdc3   : > { %15301 = vmatprep.subr.bf16.mxu1 %v22977_v62 }
 0xdc5   : > { %14614 = vmatpush1.bf16.msra.mxu0 %v22972_v18 }
 0xdc6   : > { %15302 = vmatpush1.bf16.msra.mxu1 %v22975_v12  ;;  %14615 = vmatprep.subr.bf16.mxu0 %v22980_v9 }
 0xdc7   : > { %15303 = vmatprep.subr.bf16.mxu1 %v22983_v24 }
 0xdc9   : > { %14616 = vmatpush1.bf16.msra.mxu0 %v22978_v25 }
 0xdca   : > { %15304 = vmatpush1.bf16.msra.mxu1 %v22981_v63  ;;  %14617 = vmatprep.subr.bf16.mxu0 %v22986_v59 }
 0xdcb   : > { %15305 = vmatprep.subr.bf16.mxu1 %v22989_v5 }
 0xdcd   : > { %14618 = vmatpush1.bf16.msra.mxu0 %v22984_v21 }
 0xdce   : > { %15306 = vmatpush1.bf16.msra.mxu1 %v22987_v6  ;;  %14619 = vmatprep.subr.bf16.mxu0 %v22992_v52 }
 0xdcf   : > { %15307 = vmatprep.subr.bf16.mxu1 %v22995_v8 }
 0xdd1   : > { %14620 = vmatpush1.bf16.msra.mxu0 %v22990_v37 }
 0xdd2   : > { %15308 = vmatpush1.bf16.msra.mxu1 %v22993_v27  ;;  %14621 = vmatprep.subr.bf16.mxu0 %v22998_v43 }
 0xdd3   : > { %15309 = vmatprep.subr.bf16.mxu1 %v23001_v41 }
 0xdd5   : > { %14622 = vmatpush1.bf16.msra.mxu0 %v22996_v53 }
 0xdd6   : > { %15310 = vmatpush1.bf16.msra.mxu1 %v22999_v31  ;;  %14623 = vmatprep.subr.bf16.mxu0 %v23004_v38 }
 0xdd7   : > { %15311 = vmatprep.subr.bf16.mxu1 %v23007_v50 }
 0xdd9   : > { %14624 = vmatpush1.bf16.msra.mxu0 %v23002_v48 }
 0xdda   : > { %15312 = vmatpush1.bf16.msra.mxu1 %v23005_v22  ;;  %14625 = vmatprep.subr.bf16.mxu0 %v23010_v54 }
 0xddb   : > { %15313 = vmatprep.subr.bf16.mxu1 %v23013_v16 }
 0xddd   : > { %14626 = vmatpush1.bf16.msra.mxu0 %v23008_v42 }
 0xdde   : > { %15314 = vmatpush1.bf16.msra.mxu1 %v23011_v46  ;;  %14627 = vmatprep.subr.bf16.mxu0 %v23016_v19 }
 0xddf   : > { %15315 = vmatprep.subr.bf16.mxu1 %v23019_v7 }
 0xde1   : > { %14628 = vmatpush1.bf16.msra.mxu0 %v23014_v51 }
 0xde2   : > { %15316 = vmatpush1.bf16.msra.mxu1 %v23017_v13  ;;  %14629 = vmatprep.subr.bf16.mxu0 %v23022_v33 }
 0xde3   : > { %15317 = vmatprep.subr.bf16.mxu1 %v23025_v17 }
 0xde5   : > { %14630 = vmatpush1.bf16.msra.mxu0 %v23020_v55 }
 0xde6   : > { %15318 = vmatpush1.bf16.msra.mxu1 %v23023_v29 }
 0xde8   : > { %14632 = vmatmul.mubr.bf16.vlgmr.msra.gmra.mrb[20].mxu0 %v25165_v32 }
 0xde9   : > { %15320 = vmatmul.mubr.bf16.vlgmr.msra.gmra.mrb[212].mxu1 %v25165_v32  ;;  %15528 = vmatprep.mubr.bf16.mxu0 %v23400_v60 }
 0xebb   : > { %v14633_v15 = vpop.f32.mrb[20].mxu0 }
 0xebc   : > { %v25234_v34 = vadd.f32 %v14633_v15, %v8817_v39  ;;  %v15321_v32 = vpop.f32.mrb[212].mxu1  ;;  %v14635_v11 = vpop.f32.mrb[21].mxu0 }
 0xebd   : > { %v25236_v1 = vadd.f32 %v15321_v32, %v8825_v3  ;;  %v25238_v36 = vadd.f32 %v14635_v11, %v8821_v26  ;;  %v15323_v23 = vpop.f32.mrb[213].mxu1  ;;  %v14637_v40 = vpop.f32.mrb[22].mxu0 }
 0xebe   : > { %v15363_v49 = vmul.f32 %v25234_v34, %v25234_v34  ;;  %v25242_v47 = vadd.f32 %v15323_v23, %v8829_v2  ;;  %v25244_v35 = vadd.f32 %v14637_v40, %v8817_v39  ;;  %v15325_v44 = vpop.f32.mrb[214].mxu1  ;;  %v14639_v14 = vpop.f32.mrb[23].mxu0 }
 0xebf   : > { %v15365_v57 = vmul.f32 %v25236_v1, %v25236_v1  ;;  %v15364_v61 = vmul.f32 %v25238_v36, %v25238_v36  ;;  %v25250_v20 = vadd.f32 %v15325_v44, %v8825_v3  ;;  %v25252_v45 = vadd.f32 %v14639_v14, %v8821_v26  ;;  %v15327_v30 = vpop.f32.mrb[215].mxu1 }
 0xec0   : > { %v15366_v62 = vmul.f32 %v25242_v47, %v25242_v47  ;;  %v15331_v18 = vsel %vm15330_vm0, %v25244_v35, 0.0  ;;  %v15367_v12 = vmul.f32 %v25244_v35, %v25244_v35  ;;  %v25260_v9 = vadd.f32 %v15327_v30, %v8829_v2 }
 0xec1   : > { %v15332_v24 = vadd.f32 %v25234_v34, %v15331_v18  ;;  %v15347_v25 = vsel %vm15330_vm0, %v25250_v20, 0.0  ;;  %v15369_v63 = vmul.f32 %v25250_v20, %v25250_v20  ;;  %v15339_v59 = vsel %vm15330_vm0, %v25252_v45, 0.0 }
 0xec2   : > { %v15371_v5 = vsel %vm15330_vm0, %v15367_v12, 0.0  ;;  %v15348_v21 = vadd.f32 %v25236_v1, %v15347_v25  ;;  %v15340_v6 = vadd.f32 %v25238_v36, %v15339_v59  ;;  %v15368_v52 = vmul.f32 %v25252_v45, %v25252_v45 }
 0xec3   : > { %v15333_v8 = vrot.slane %v15332_v24, 4  ;;  %v15372_v37 = vadd.f32 %v15371_v5, %v15363_v49  ;;  %v15387_v27 = vsel %vm15330_vm0, %v15369_v63, 0.0  ;;  %v15355_v43 = vsel %vm15330_vm0, %v25260_v9, 0.0 }
 0xec4   : > { %v15349_v41 = vrot.slane %v15348_v21, 4  ;;  %v15388_v53 = vadd.f32 %v15387_v27, %v15365_v57  ;;  %v15341_v31 = vrot.slane %v15340_v6, 4  ;;  %v15379_v38 = vsel %vm15330_vm0, %v15368_v52, 0.0 }
 0xec5   : > { %v15334_v50 = vadd.f32 %v15333_v8, %v15332_v24  ;;  %v15373_v48 = vrot.slane %v15372_v37, 4  ;;  %v15380_v22 = vadd.f32 %v15379_v38, %v15364_v61  ;;  %v15356_v54 = vadd.f32 %v25242_v47, %v15355_v43 }
 0xec6   : > { %v15350_v16 = vadd.f32 %v15349_v41, %v15348_v21  ;;  %v15389_v42 = vrot.slane %v15388_v53, 4  ;;  %v15342_v46 = vadd.f32 %v15341_v31, %v15340_v6  ;;  %v15370_v19 = vmul.f32 %v25260_v9, %v25260_v9 }
 0xec7   : > { %v15335_v7 = vrot.slane %v15334_v50, 2  ;;  %v15374_v51 = vadd.f32 %v15373_v48, %v15372_v37  ;;  %v15381_v13 = vrot.slane %v15380_v22, 4  ;;  %v15357_v33 = vrot.slane %v15356_v54, 4 }
 0xec8   : > { %v15351_v17 = vrot.slane %v15350_v16, 2  ;;  %v15390_v55 = vadd.f32 %v15389_v42, %v15388_v53  ;;  %v15343_v29 = vrot.slane %v15342_v46, 2  ;;  %v15395_v0 = vsel %vm15330_vm0, %v15370_v19, 0.0 }
 0xec9   : > { %v15336_v39 = vadd.f32 %v15335_v7, %v15334_v50  ;;  %v15375_v3 = vrot.slane %v15374_v51, 2  ;;  %v15382_v26 = vadd.f32 %v15381_v13, %v15380_v22  ;;  %v15358_v2 = vadd.f32 %v15357_v33, %v15356_v54 }
 0xeca   : > { %v15352_v15 = vadd.f32 %v15351_v17, %v15350_v16  ;;  %v15391_v32 = vrot.slane %v15390_v55, 2  ;;  %v15344_v11 = vadd.f32 %v15343_v29, %v15342_v46  ;;  %v15396_v23 = vadd.f32 %v15395_v0, %v15366_v62 }
 0xecb   : > { %v15337_v40 = vrot.slane %v15336_v39, 1  ;;  %v15376_v49 = vadd.f32 %v15375_v3, %v15374_v51  ;;  %v15383_v44 = vrot.slane %v15382_v26, 2  ;;  %v15359_v14 = vrot.slane %v15358_v2, 2 }
 0xecc   : > { %v15353_v57 = vrot.slane %v15352_v15, 1  ;;  %v15392_v61 = vadd.f32 %v15391_v32, %v15390_v55  ;;  %v15345_v30 = vrot.slane %v15344_v11, 1  ;;  %v15397_v18 = vrot.slane %v15396_v23, 4 }
 0xecd   : > { %v15338_v12 = vadd.f32 %v15337_v40, %v15336_v39  ;;  %v15377_v24 = vrot.slane %v15376_v49, 1  ;;  %v15384_v25 = vadd.f32 %v15383_v44, %v15382_v26  ;;  %v15360_v63 = vadd.f32 %v15359_v14, %v15358_v2 }
 0xece   : > { %v15354_v59 = vadd.f32 %v15353_v57, %v15352_v15  ;;  %v15393_v5 = vrot.slane %v15392_v61, 1  ;;  %v15346_v21 = vadd.f32 %v15345_v30, %v15344_v11  ;;  %v15398_v6 = vadd.f32 %v15397_v18, %v15396_v23 }
 0xecf   : > { %v15378_v52 = vadd.f32 %v15377_v24, %v15376_v49  ;;  %v15403_v8 = vmul.f32 0.11111111, %v15338_v12  ;;  %v15385_v37 = vrot.slane %v15384_v25, 1  ;;  %v15361_v62 = vrot.slane %v15360_v63, 1 }
 0xed0   : > { %v15394_v27 = vadd.f32 %v15393_v5, %v15392_v61  ;;  %v15405_v43 = vmul.f32 0.11111111, %v15354_v59  ;;  %v15404_v41 = vmul.f32 0.11111111, %v15346_v21  ;;  %v15399_v53 = vrot.slane %v15398_v6, 2 }
 0xed1   : > { %v15407_v31 = vmul.f32 0.11111111, %v15378_v52  ;;  %v15411_v38 = vmul.f32 %v15403_v8, %v15403_v8  ;;  %v15423_v50 = vsub.f32 %v25234_v34, %v15403_v8  ;;  %v15427_v48 = vsub.f32 %v25244_v35, %v15403_v8 }
 0xed2   : > { %v15409_v22 = vmul.f32 0.11111111, %v15394_v27  ;;  %v15413_v54 = vmul.f32 %v15405_v43, %v15405_v43  ;;  %v15425_v16 = vsub.f32 %v25236_v1, %v15405_v43  ;;  %v15429_v42 = vsub.f32 %v25250_v20, %v15405_v43 }
 0xed3   : > { %v15415_v46 = vsub.f32 %v15407_v31, %v15411_v38  ;;  %v15386_v19 = vadd.f32 %v15385_v37, %v15384_v25  ;;  %v15412_v7 = vmul.f32 %v15404_v41, %v15404_v41  ;;  %v15424_v51 = vsub.f32 %v25238_v36, %v15404_v41 }
 0xed4   : > { %v15417_v13 = vsub.f32 %v15409_v22, %v15413_v54  ;;  %v15428_v33 = vsub.f32 %v25252_v45, %v15404_v41  ;;  %v15362_v17 = vadd.f32 %v15361_v62, %v15360_v63  ;;  %v15400_v55 = vadd.f32 %v15399_v53, %v15398_v6 }
 0xed5   : > { %v15419_v29 = vmax.f32 %v15415_v46, 0.0  ;;  %v15408_v34 = vmul.f32 0.11111111, %v15386_v19  ;;  %v23401_v52 = vmov 65535  }
 0xed6   : > { %v15421_v0 = vmax.f32 %v15417_v13, 0.0  ;;  %v15401_v35 = vrot.slane %v15400_v55, 1  ;;  %v15406_v39 = vmul.f32 0.11111111, %v15362_v17  ;;  %v15482_v8 = vsel %vm15480_vm1, 4294967295, %v23401_v52 }
 0xed7   : > { %v15431_v3 = vadd.f32 1e-05, %v15419_v29  ;;  %v15416_v26 = vsub.f32 %v15408_v34, %v15412_v7  ;;  %v15483_v38 = vsel %vm15481_vm2, %v15482_v8, 0  ;;  %v19332_v29 = vld [vmem:[%s25839_s18 + $0x1] sm:$0x1] }
 0xed8   : > { %v15433_v1 = vadd.f32 1e-05, %v15421_v0  ;;  %v15402_v2 = vadd.f32 %v15401_v35, %v15400_v55  ;;  %v15414_v20 = vmul.f32 %v15406_v39, %v15406_v39  ;;  %v15426_v15 = vsub.f32 %v25242_v47, %v15406_v39  ;;  %v19335_v34 = vld [vmem:[%s25839_s18 + $0x2] sm:$0x1]  ;;  %v19338_v0 = vld [vmem:[%s25839_s18 + $0x3] sm:$0x1] }
 0xed9   : > { %23032 = vrsqrt.f32 %v15431_v3  ;;  %v15420_v32 = vmax.f32 %v15416_v26, 0.0  ;;  %v15430_v36 = vsub.f32 %v25260_v9, %v15406_v39  ;;  %v19341_v35 = vld [vmem:[%s25839_s18 + $0x4] sm:$0x1]  ;;  %v19344_v39 = vld [vmem:[%s25839_s18 + $0x5] sm:$0x1] }
 0xeda   : > { %23034 = vrsqrt.f32 %v15433_v1  ;;  %v15410_v45 = vmul.f32 0.11111111, %v15402_v2  ;;  %v19347_v3 = vld [vmem:[%s25839_s18 + $0x6] sm:$0x1]  ;;  %v19350_v26 = vld [vmem:[%s25839_s18 + $0x7] sm:$0x1] }
 0xedb   : > { %v15432_v11 = vadd.f32 1e-05, %v15420_v32  ;;  %v19353_v1 = vld [vmem:[%s25839_s18 + $0x8] sm:$0x1]  ;;  %v19356_v2 = vld [vmem:[%s25839_s18 + $0x9] sm:$0x1] }
 0xedc   : > { %v15418_v23 = vsub.f32 %v15410_v45, %v15414_v20  ;;  %v19359_v20 = vld [vmem:[%s25839_s18 + $0xa] sm:$0x1]  ;;  %v19365_v32 = vld [vmem:[%s25839_s18 + $0xc] sm:$0x1]  ;;  %v25452_v45 = vld [vmem:[#allocation10] sm:$0xff] }
 0xedd   : > { %23036 = vrsqrt.f32 %v15432_v11  ;;  %v17042_v8 = vrot.slane %v25452_v45, %v25228_v58 }
 0xede   : > { %v15422_v40 = vmax.f32 %v15418_v23, 0.0 }
 0xee0   : > { %v15434_v49 = vadd.f32 1e-05, %v15422_v40  ;;  %v17030_v40 = vrot.slane %v25452_v45, %v24982_v10 }
 0xee2   : > { %23038 = vrsqrt.f32 %v15434_v49 }
 0xee3   : > { %v23033_v44 = vpop.eup %23032 }
 0xee4   : > { %v23035_v14 = vpop.eup %23034  ;;  %v15439_v57 = vmul.f32 %v23033_v44, %v15423_v50  ;;  %v15443_v61 = vmul.f32 %v23033_v44, %v15427_v48 }
 0xee5   : > { %v15441_v30 = vmul.f32 %v23035_v14, %v15425_v16  ;;  %v15445_v47 = vmul.f32 %v23035_v14, %v15429_v42  ;;  %v17034_v14 = vrot.slane %v25452_v45, %v24985_v4 }
 0xee6   : > { %vm15447_vm3 = vcmp.gt.f32.partialorder %v15439_v57, 0.0  ;;  %vm15451_vm4 = vcmp.gt.f32.partialorder %v15443_v61, 0.0  ;;  %v15455_v18 = vmul.f32 0.2, %v15439_v57  ;;  %v15459_v9 = vmul.f32 0.2, %v15443_v61 }
 0xee7   : > { %v23037_v12 = vpop.eup %23036  ;;  %vm15449_vm5 = vcmp.gt.f32.partialorder %v15441_v30, 0.0  ;;  %vm15453_vm6 = vcmp.gt.f32.partialorder %v15445_v47, 0.0  ;;  %v15457_v24 = vmul.f32 0.2, %v15441_v30  ;;  %v15461_v25 = vmul.f32 0.2, %v15445_v47 }
 0xee8   : > { %v15463_v63 = vsel %vm15447_vm3, %v15439_v57, %v15455_v18  ;;  %v15467_v59 = vsel %vm15451_vm4, %v15443_v61, %v15459_v9  ;;  %v15440_v5 = vmul.f32 %v23037_v12, %v15424_v51  ;;  %v15444_v21 = vmul.f32 %v23037_v12, %v15428_v33  ;;  %v15475_v33 = vld [vmem:[%s25838_s20] sm:$0x1]  ;;  %s642_s20 = scalar_lea.vmem %s25840_s19, %s25843_s21 }
 0xee9   : > { %v15471_v6 = vpack.c.bf16 %v15467_v59, %v15463_v63  ;;  %v15465_v37 = vsel %vm15449_vm5, %v15441_v30, %v15457_v24  ;;  %v15469_v62 = vsel %vm15453_vm6, %v15445_v47, %v15461_v25 }
 0xeea   : > { %v15473_v27 = vpack.c.bf16 %v15469_v62, %v15465_v37  ;;  %vm15448_vm7 = vcmp.gt.f32.partialorder %v15440_v5, 0.0  ;;  %vm15452_vm8 = vcmp.gt.f32.partialorder %v15444_v21, 0.0  ;;  %v15456_v43 = vmul.f32 0.2, %v15440_v5 }
 0xeeb   : > { %v15460_v41 = vmul.f32 0.2, %v15444_v21  ;;  %v25294_v19 = vand.u32 %v15483_v38, %v15471_v6  ;;  %v19371_v6 = vld [vmem:[%s25839_s18 + $0xe] sm:$0x1] }
 0xeec   : > { %v23039_v53 = vpop.eup %23038  ;;  %v15464_v31 = vsel %vm15448_vm7, %v15440_v5, %v15456_v43  ;;  %v25303_v55 = vand.u32 %v15483_v38, %v15473_v27  ;;  %v17038_v5 = vrot.slane %v25452_v45, %v25225_v56 }
 0xeed   : > { %v15468_v50 = vsel %vm15452_vm8, %v15444_v21, %v15460_v41  ;;  %v15442_v48 = vmul.f32 %v23039_v53, %v15426_v15  ;;  %v15446_v22 = vmul.f32 %v23039_v53, %v15430_v36  ;;  %v19362_v15 = vld [vmem:[%s25839_s18 + $0xb] sm:$0x1]  ;;  %v19368_v36 = vld [vmem:[%s25839_s18 + $0xd] sm:$0x1]  ;;  %v25474_v53 = vsub.s32 4, %v24979_v28 }
 0xeee   : > { %v15472_v54 = vpack.c.bf16 %v15468_v50, %v15464_v31 }
 0xeef   : > { %vm15450_vm9 = vcmp.gt.f32.partialorder %v15442_v48, 0.0  ;;  %vm15454_vm10 = vcmp.gt.f32.partialorder %v15446_v22, 0.0  ;;  %v15458_v16 = vmul.f32 0.2, %v15442_v48  ;;  %v15462_v42 = vmul.f32 0.2, %v15446_v22 }
 0xef0   : > { %v25292_v46 = vand.u32 %v15483_v38, %v15472_v54 }
 0xef1   : > { %v15466_v7 = vsel %vm15450_vm9, %v15442_v48, %v15458_v16  ;;  %v15470_v51 = vsel %vm15454_vm10, %v15446_v22, %v15462_v42  ;;  %v17046_v42 = vrot.slane %v25452_v45, %v25474_v53 }
 0xef2   : > { %v15474_v13 = vpack.c.bf16 %v15470_v51, %v15466_v7  ;;  %15496 = vmatprep.subr.bf16.mxu0 %v25292_v46 }
 0xef3   : > { %15497 = vmatpush1.bf16.msra.mxu0 %v25294_v19 }
 0xef4   : > { %v25301_v17 = vand.u32 %v15483_v38, %v15474_v13  ;;  %v25479_v38 = vsub.s32 5, %v24979_v28 }
 0xef6   : > { %15537 = vmatprep.subr.bf16.mxu0 %v25301_v17  ;;  %19330 = vmatmul.mubr.msk.bf16.vlgmr.msra.gmra.mrb[24].mxu0 %vm15476_vm11, %v15475_v33 }
 0xef7   : > { %15538 = vmatpush1.bf16.msra.mxu0 %v25303_v55  ;;  %15569 = vmatprep.mubr.bf16.mxu0 %v23400_v60 }
 0xef8   : > { %15587 = vmatprep.subr.bf16.mxu0 %v25292_v46 }
 0xefe   : > { %19331 = vmatmul.mubr.msk.bf16.vlgmr.msra.gmra.mrb[28].mxu0 %vm15476_vm11, %v15475_v33  ;;  %v17050_v33 = vrot.slane %v25452_v45, %v25479_v38 }
 0xeff   : > { %15588 = vmatpush1.bf16.msra.mxu0 %v25294_v19  ;;  %15619 = vmatprep.mubr.bf16.mxu0 %v23400_v60 }
 0xf00   : > { %15628 = vmatprep.subr.bf16.mxu0 %v25301_v17 }
 0xf06   : > { %19333 = vmatmul.mubr.msk.bf16.vlgmr.msra.gmra.mrb[32].mxu0 %vm15476_vm11, %v19332_v29 }
 0xf07   : > { %15629 = vmatpush1.bf16.msra.mxu0 %v25303_v55  ;;  %15660 = vmatprep.mubr.bf16.mxu0 %v23400_v60 }
 0xf08   : > { %15678 = vmatprep.subr.bf16.mxu0 %v25292_v46 }
 0xf0e   : > { %19334 = vmatmul.mubr.msk.bf16.vlgmr.msra.gmra.mrb[36].mxu0 %vm15476_vm11, %v19332_v29 }
 0xf0f   : > { %15679 = vmatpush1.bf16.msra.mxu0 %v25294_v19  ;;  %15710 = vmatprep.mubr.bf16.mxu0 %v23400_v60 }
 0xf10   : > { %15719 = vmatprep.subr.bf16.mxu0 %v25301_v17 }
 0xf16   : > { %19336 = vmatmul.mubr.msk.bf16.vlgmr.msra.gmra.mrb[40].mxu0 %vm15476_vm11, %v19335_v34 }
 0xf17   : > { %15720 = vmatpush1.bf16.msra.mxu0 %v25303_v55  ;;  %15751 = vmatprep.mubr.bf16.mxu0 %v23400_v60 }
 0xf18   : > { %15769 = vmatprep.subr.bf16.mxu0 %v25292_v46 }
 0xf1e   : > { %19337 = vmatmul.mubr.msk.bf16.vlgmr.msra.gmra.mrb[44].mxu0 %vm15476_vm11, %v19335_v34 }
 0xf1f   : > { %15770 = vmatpush1.bf16.msra.mxu0 %v25294_v19  ;;  %15801 = vmatprep.mubr.bf16.mxu0 %v23400_v60 }
 0xf20   : > { %15810 = vmatprep.subr.bf16.mxu0 %v25301_v17 }
 0xf26   : > { %19339 = vmatmul.mubr.msk.bf16.vlgmr.msra.gmra.mrb[48].mxu0 %vm15476_vm11, %v19338_v0 }
 0xf27   : > { %15811 = vmatpush1.bf16.msra.mxu0 %v25303_v55  ;;  %15842 = vmatprep.mubr.bf16.mxu0 %v23400_v60 }
 0xf28   : > { %15860 = vmatprep.subr.bf16.mxu0 %v25292_v46 }
 0xf2e   : > { %19340 = vmatmul.mubr.msk.bf16.vlgmr.msra.gmra.mrb[52].mxu0 %vm15476_vm11, %v19338_v0 }
 0xf2f   : > { %15861 = vmatpush1.bf16.msra.mxu0 %v25294_v19  ;;  %15892 = vmatprep.mubr.bf16.mxu0 %v23400_v60 }
 0xf30   : > { %15901 = vmatprep.subr.bf16.mxu0 %v25301_v17 }
 0xf36   : > { %19342 = vmatmul.mubr.msk.bf16.vlgmr.msra.gmra.mrb[56].mxu0 %vm15476_vm11, %v19341_v35 }
 0xf37   : > { %15902 = vmatpush1.bf16.msra.mxu0 %v25303_v55  ;;  %15933 = vmatprep.mubr.bf16.mxu0 %v23400_v60 }
 0xf38   : > { %15951 = vmatprep.subr.bf16.mxu0 %v25292_v46 }
 0xf3e   : > { %19343 = vmatmul.mubr.msk.bf16.vlgmr.msra.gmra.mrb[60].mxu0 %vm15476_vm11, %v19341_v35 }
 0xf3f   : > { %15952 = vmatpush1.bf16.msra.mxu0 %v25294_v19  ;;  %15983 = vmatprep.mubr.bf16.mxu0 %v23400_v60 }
 0xf40   : > { %15992 = vmatprep.subr.bf16.mxu0 %v25301_v17 }
 0xf46   : > { %19345 = vmatmul.mubr.msk.bf16.vlgmr.msra.gmra.mrb[64].mxu0 %vm15476_vm11, %v19344_v39 }
 0xf47   : > { %15993 = vmatpush1.bf16.msra.mxu0 %v25303_v55  ;;  %16024 = vmatprep.mubr.bf16.mxu0 %v23400_v60 }
 0xf48   : > { %16042 = vmatprep.subr.bf16.mxu0 %v25292_v46 }
 0xf4e   : > { %19346 = vmatmul.mubr.msk.bf16.vlgmr.msra.gmra.mrb[68].mxu0 %vm15476_vm11, %v19344_v39  ;;  %v25490_v39 = vsub.s32 6, %v24979_v28 }
 0xf4f   : > { %16043 = vmatpush1.bf16.msra.mxu0 %v25294_v19  ;;  %16074 = vmatprep.mubr.bf16.mxu0 %v23400_v60 }
 0xf50   : > { %16083 = vmatprep.subr.bf16.mxu0 %v25301_v17 }
 0xf56   : > { %19348 = vmatmul.mubr.msk.bf16.vlgmr.msra.gmra.mrb[72].mxu0 %vm15476_vm11, %v19347_v3 }
 0xf57   : > { %16084 = vmatpush1.bf16.msra.mxu0 %v25303_v55  ;;  %16115 = vmatprep.mubr.bf16.mxu0 %v23400_v60 }
 0xf58   : > { %16133 = vmatprep.subr.bf16.mxu0 %v25292_v46 }
 0xf5e   : > { %19349 = vmatmul.mubr.msk.bf16.vlgmr.msra.gmra.mrb[76].mxu0 %vm15476_vm11, %v19347_v3 }
 0xf5f   : > { %16134 = vmatpush1.bf16.msra.mxu0 %v25294_v19  ;;  %16165 = vmatprep.mubr.bf16.mxu0 %v23400_v60 }
 0xf60   : > { %16174 = vmatprep.subr.bf16.mxu0 %v25301_v17 }
 0xf66   : > { %19351 = vmatmul.mubr.msk.bf16.vlgmr.msra.gmra.mrb[80].mxu0 %vm15476_vm11, %v19350_v26 }
 0xf67   : > { %16175 = vmatpush1.bf16.msra.mxu0 %v25303_v55  ;;  %16206 = vmatprep.mubr.bf16.mxu0 %v23400_v60 }
 0xf68   : > { %16224 = vmatprep.subr.bf16.mxu0 %v25292_v46 }
 0xf6e   : > { %19352 = vmatmul.mubr.msk.bf16.vlgmr.msra.gmra.mrb[84].mxu0 %vm15476_vm11, %v19350_v26  ;;  %v25494_v26 = vsub.s32 7, %v24979_v28 }
 0xf6f   : > { %16225 = vmatpush1.bf16.msra.mxu0 %v25294_v19  ;;  %16256 = vmatprep.mubr.bf16.mxu0 %v23400_v60 }
 0xf70   : > { %16265 = vmatprep.subr.bf16.mxu0 %v25301_v17  ;;  %v17058_v28 = vrot.slane %v25452_v45, %v25494_v26 }
 0xf76   : > { %19354 = vmatmul.mubr.msk.bf16.vlgmr.msra.gmra.mrb[88].mxu0 %vm15476_vm11, %v19353_v1 }
 0xf77   : > { %16266 = vmatpush1.bf16.msra.mxu0 %v25303_v55  ;;  %16297 = vmatprep.mubr.bf16.mxu0 %v23400_v60 }
 0xf78   : > { %16315 = vmatprep.subr.bf16.mxu0 %v25292_v46 }
 0xf7e   : > { %19355 = vmatmul.mubr.msk.bf16.vlgmr.msra.gmra.mrb[92].mxu0 %vm15476_vm11, %v19353_v1 }
 0xf7f   : > { %16316 = vmatpush1.bf16.msra.mxu0 %v25294_v19  ;;  %16347 = vmatprep.mubr.bf16.mxu0 %v23400_v60 }
 0xf80   : > { %16356 = vmatprep.subr.bf16.mxu0 %v25301_v17 }
 0xf86   : > { %19357 = vmatmul.mubr.msk.bf16.vlgmr.msra.gmra.mrb[96].mxu0 %vm15476_vm11, %v19356_v2 }
 0xf87   : > { %16357 = vmatpush1.bf16.msra.mxu0 %v25303_v55  ;;  %16388 = vmatprep.mubr.bf16.mxu0 %v23400_v60 }
 0xf88   : > { %16406 = vmatprep.subr.bf16.mxu0 %v25292_v46 }
 0xf8e   : > { %19358 = vmatmul.mubr.msk.bf16.vlgmr.msra.gmra.mrb[100].mxu0 %vm15476_vm11, %v19356_v2 }
 0xf8f   : > { %16407 = vmatpush1.bf16.msra.mxu0 %v25294_v19  ;;  %16438 = vmatprep.mubr.bf16.mxu0 %v23400_v60 }
 0xf90   : > { %16447 = vmatprep.subr.bf16.mxu0 %v25301_v17 }
 0xf96   : > { %19360 = vmatmul.mubr.msk.bf16.vlgmr.msra.gmra.mrb[104].mxu0 %vm15476_vm11, %v19359_v20 }
 0xf97   : > { %16448 = vmatpush1.bf16.msra.mxu0 %v25303_v55  ;;  %16479 = vmatprep.mubr.bf16.mxu0 %v23400_v60 }
 0xf98   : > { %16497 = vmatprep.subr.bf16.mxu0 %v25292_v46 }
 0xf9e   : > { %19361 = vmatmul.mubr.msk.bf16.vlgmr.msra.gmra.mrb[108].mxu0 %vm15476_vm11, %v19359_v20 }
 0xf9f   : > { %16498 = vmatpush1.bf16.msra.mxu0 %v25294_v19  ;;  %16529 = vmatprep.mubr.bf16.mxu0 %v23400_v60 }
 0xfa0   : > { %16538 = vmatprep.subr.bf16.mxu0 %v25301_v17 }
 0xfa6   : > { %19363 = vmatmul.mubr.msk.bf16.vlgmr.msra.gmra.mrb[112].mxu0 %vm15476_vm11, %v19362_v15 }
 0xfa7   : > { %16539 = vmatpush1.bf16.msra.mxu0 %v25303_v55  ;;  %16570 = vmatprep.mubr.bf16.mxu0 %v23400_v60 }
 0xfa8   : > { %16588 = vmatprep.subr.bf16.mxu0 %v25292_v46 }
 0xfae   : > { %19364 = vmatmul.mubr.msk.bf16.vlgmr.msra.gmra.mrb[116].mxu0 %vm15476_vm11, %v19362_v15 }
 0xfaf   : > { %16589 = vmatpush1.bf16.msra.mxu0 %v25294_v19  ;;  %16620 = vmatprep.mubr.bf16.mxu0 %v23400_v60 }
 0xfb0   : > { %16629 = vmatprep.subr.bf16.mxu0 %v25301_v17 }
 0xfb6   : > { %19366 = vmatmul.mubr.msk.bf16.vlgmr.msra.gmra.mrb[120].mxu0 %vm15476_vm11, %v19365_v32 }
 0xfb7   : > { %16630 = vmatpush1.bf16.msra.mxu0 %v25303_v55  ;;  %16661 = vmatprep.mubr.bf16.mxu0 %v23400_v60 }
 0xfb8   : > { %16679 = vmatprep.subr.bf16.mxu0 %v25292_v46 }
 0xfbe   : > { %19367 = vmatmul.mubr.msk.bf16.vlgmr.msra.gmra.mrb[124].mxu0 %vm15476_vm11, %v19365_v32 }
 0xfbf   : > { %16680 = vmatpush1.bf16.msra.mxu0 %v25294_v19  ;;  %16711 = vmatprep.mubr.bf16.mxu0 %v23400_v60 }
 0xfc0   : > { %16720 = vmatprep.subr.bf16.mxu0 %v25301_v17 }
 0xfc6   : > { %19369 = vmatmul.mubr.msk.bf16.vlgmr.msra.gmra.mrb[128].mxu0 %vm15476_vm11, %v19368_v36 }
 0xfc7   : > { %16721 = vmatpush1.bf16.msra.mxu0 %v25303_v55  ;;  %16752 = vmatprep.mubr.bf16.mxu0 %v23400_v60 }
 0xfc8   : > { %16770 = vmatprep.subr.bf16.mxu0 %v25292_v46 }
 0xfc9   : > { %v15530_v11 = vpop.f32.mrb[24].mxu0 }
 0xfca   : > { %v15578_v23 = vpack.c.bf16 %v15530_v11, %v15530_v11  ;;  %v15532_v49 = vpop.f32.mrb[25].mxu0 }
 0xfcb   : > { %v15579_v44 = vpack.c.bf16 %v15532_v49, %v15532_v49  ;;  %v15534_v57 = vpop.f32.mrb[26].mxu0 }
 0xfcc   : > { %v16947_v61 = vunpack.c.l.bf16 %v15578_v23  ;;  %v15535_v30 = vpop.f32.mrb[27].mxu0 }
 0xfcd   : > { %v16948_v47 = vunpack.c.l.bf16 %v15579_v44  ;;  %v25509_v30 = vld [vmem:[#allocation10 + $0x8] sm:$0xff] }
 0xfce   : > { %19370 = vmatmul.mubr.msk.bf16.vlgmr.msra.gmra.mrb[132].mxu0 %vm15476_vm11, %v19368_v36  ;;  %v17347_v18 = vmul.f32 %v17030_v40, %v16947_v61  ;;  %v17054_v36 = vrot.slane %v25452_v45, %v25490_v39  ;;  %v19374_v40 = vld [vmem:[%s25839_s18 + $0xf] sm:$0x1] }
 0xfcf   : > { %16771 = vmatpush1.bf16.msra.mxu0 %v25294_v19  ;;  %16802 = vmatprep.mubr.bf16.mxu0 %v23400_v60  ;;  %v17348_v9 = vmul.f32 %v17034_v14, %v16948_v47 }
 0xfd0   : > { %16811 = vmatprep.subr.bf16.mxu0 %v25301_v17  ;;  %v17411_v12 = vsel %vm15330_vm0, %v17347_v18, 0.0 }
 0xfd1   : > { %v17412_v24 = vsel %vm15330_vm0, %v17348_v9, 0.0  ;;  %v15571_v25 = vpop.f32.mrb[28].mxu0 }
 0xfd2   : > { %v17413_v63 = vadd.f32 %v17412_v24, %v17411_v12  ;;  %v15580_v59 = vpack.c.bf16 %v15571_v25, %v15571_v25  ;;  %v15573_v21 = vpop.f32.mrb[29].mxu0  ;;  %v17062_v24 = vrot.slane %v25509_v30, %v24982_v10 }
 0xfd3   : > { %v15581_v52 = vpack.c.bf16 %v15573_v21, %v15573_v21  ;;  %v15575_v37 = vpop.f32.mrb[30].mxu0 }
 0xfd4   : > { %v16949_v62 = vunpack.c.l.bf16 %v15580_v59  ;;  %v15576_v27 = vpop.f32.mrb[31].mxu0 }
 0xfd5   : > { %v16950_v43 = vunpack.c.l.bf16 %v15581_v52 }
 0xfd6   : > { %19372 = vmatmul.mubr.msk.bf16.vlgmr.msra.gmra.mrb[136].mxu0 %vm15476_vm11, %v19371_v6  ;;  %v17349_v41 = vmul.f32 %v17038_v5, %v16949_v62 }
 0xfd7   : > { %16812 = vmatpush1.bf16.msra.mxu0 %v25303_v55  ;;  %v17350_v31 = vmul.f32 %v17042_v8, %v16950_v43  ;;  %16843 = vmatprep.mubr.bf16.mxu0 %v23400_v60 }
 0xfd8   : > { %16861 = vmatprep.subr.bf16.mxu0 %v25292_v46  ;;  %v17414_v50 = vsel %vm15330_vm0, %v17349_v41, 0.0 }
 0xfd9   : > { %v17415_v48 = vadd.f32 %v17414_v50, %v17413_v63  ;;  %v17416_v22 = vsel %vm15330_vm0, %v17350_v31, 0.0  ;;  %v15621_v54 = vpop.f32.mrb[32].mxu0  ;;  %v17070_v31 = vrot.slane %v25509_v30, %v25225_v56 }
 0xfda   : > { %v15669_v16 = vpack.c.bf16 %v15621_v54, %v15621_v54  ;;  %v15623_v7 = vpop.f32.mrb[33].mxu0  ;;  %v17074_v54 = vrot.slane %v25509_v30, %v25228_v58 }
 0xfdb   : > { %v17417_v51 = vadd.f32 %v17416_v22, %v17415_v48  ;;  %v15670_v13 = vpack.c.bf16 %v15623_v7, %v15623_v7  ;;  %v15625_v29 = vpop.f32.mrb[34].mxu0 }
 0xfdc   : > { %v16951_v34 = vunpack.c.l.bf16 %v15669_v16  ;;  %v15626_v0 = vpop.f32.mrb[35].mxu0 }
 0xfdd   : > { %v16952_v46 = vunpack.c.l.bf16 %v15670_v13 }
 0xfde   : > { %19373 = vmatmul.mubr.msk.bf16.vlgmr.msra.gmra.mrb[140].mxu0 %vm15476_vm11, %v19371_v6  ;;  %v17351_v35 = vmul.f32 %v17046_v42, %v16951_v34 }
 0xfdf   : > { %16862 = vmatpush1.bf16.msra.mxu0 %v25294_v19  ;;  %v17352_v3 = vmul.f32 %v17050_v33, %v16952_v46  ;;  %16893 = vmatprep.mubr.bf16.mxu0 %v23400_v60 }
 0xfe0   : > { %v17418_v1 = vsel %vm15330_vm0, %v17351_v35, 0.0  ;;  %16902 = vmatprep.subr.bf16.mxu0 %v25301_v17 }
 0xfe1   : > { %v17419_v2 = vadd.f32 %v17418_v1, %v17417_v51  ;;  %v17420_v20 = vsel %vm15330_vm0, %v17352_v3, 0.0  ;;  %v15662_v15 = vpop.f32.mrb[36].mxu0  ;;  %v17078_v3 = vrot.slane %v25509_v30, %v25474_v53 }
 0xfe2   : > { %v15671_v32 = vpack.c.bf16 %v15662_v15, %v15662_v15  ;;  %v15664_v11 = vpop.f32.mrb[37].mxu0  ;;  %v17082_v15 = vrot.slane %v25509_v30, %v25479_v38 }
 0xfe3   : > { %v17421_v19 = vadd.f32 %v17420_v20, %v17419_v2  ;;  %v15672_v23 = vpack.c.bf16 %v15664_v11, %v15664_v11  ;;  %v15666_v49 = vpop.f32.mrb[38].mxu0 }
 0xfe4   : > { %v16953_v17 = vunpack.c.l.bf16 %v15671_v32  ;;  %v15667_v44 = vpop.f32.mrb[39].mxu0 }
 0xfe5   : > { %v16954_v14 = vunpack.c.l.bf16 %v15672_v23 }
 0xfe6   : > { %v17353_v57 = vmul.f32 %v17054_v36, %v16953_v17  ;;  %19375 = vmatmul.mubr.msk.bf16.vlgmr.msra.gmra.mrb[144].mxu0 %vm15476_vm11, %v19374_v40 }
 0xfe7   : > { %v17354_v61 = vmul.f32 %v17058_v28, %v16954_v14  ;;  %16903 = vmatpush1.bf16.msra.mxu0 %v25303_v55  ;;  %16934 = vmatprep.mubr.bf16.mxu0 %v23400_v60  ;;  %v17066_v55 = vrot.slane %v25509_v30, %v24985_v4 }
 0xfe8   : > { %v17422_v45 = vsel %vm15330_vm0, %v17353_v57, 0.0  ;;  %v17086_v57 = vrot.slane %v25509_v30, %v25490_v39 }
 0xfe9   : > { %v17423_v47 = vadd.f32 %v17422_v45, %v17421_v19  ;;  %v17424_v18 = vsel %vm15330_vm0, %v17354_v61, 0.0  ;;  %v15712_v9 = vpop.f32.mrb[40].mxu0 }
 0xfea   : > { %v15760_v12 = vpack.c.bf16 %v15712_v9, %v15712_v9  ;;  %v15714_v25 = vpop.f32.mrb[41].mxu0 }
 0xfeb   : > { %v17425_v63 = vadd.f32 %v17424_v18, %v17423_v47  ;;  %v15761_v59 = vpack.c.bf16 %v15714_v25, %v15714_v25  ;;  %v15716_v5 = vpop.f32.mrb[42].mxu0  ;;  %v17090_v18 = vrot.slane %v25509_v30, %v25494_v26 }
 0xfec   : > { %v16955_v21 = vunpack.c.l.bf16 %v15760_v12  ;;  %v15717_v6 = vpop.f32.mrb[43].mxu0 }
 0xfed   : > { %v16956_v60 = vunpack.c.l.bf16 %v15761_v59 }
 0xfee   : > { %v17355_v52 = vmul.f32 %v17062_v24, %v16955_v21  ;;  %19376 = vmatmul.mubr.msk.bf16.vlgmr.msra.gmra.mrb[148].mxu0 %vm15476_vm11, %v19374_v40 }
 0xfef   : > { %v17356_v8 = vmul.f32 %v17066_v55, %v16956_v60  ;;  %v25537_v55 = vld [vmem:[#allocation10 + $0x10] sm:$0xff] }
 0xff0   : > { %v17426_v37 = vsel %vm15330_vm0, %v17355_v52, 0.0 }
 0xff1   : > { %v17427_v62 = vadd.f32 %v17426_v37, %v17425_v63  ;;  %v17428_v27 = vsel %vm15330_vm0, %v17356_v8, 0.0  ;;  %v15753_v43 = vpop.f32.mrb[44].mxu0  ;;  %v17094_v8 = vrot.slane %v25537_v55, %v24982_v10 }
 0xff2   : > { %v15762_v41 = vpack.c.bf16 %v15753_v43, %v15753_v43  ;;  %v15755_v50 = vpop.f32.mrb[45].mxu0 }
 0xff3   : > { %v17429_v48 = vadd.f32 %v17428_v27, %v17427_v62  ;;  %v15763_v22 = vpack.c.bf16 %v15755_v50, %v15755_v50  ;;  %v15757_v16 = vpop.f32.mrb[46].mxu0  ;;  %v17098_v27 = vrot.slane %v25537_v55, %v24985_v4 }
 0xff4   : > { %v16957_v42 = vunpack.c.l.bf16 %v15762_v41  ;;  %v15758_v7 = vpop.f32.mrb[47].mxu0 }
 0xff5   : > { %v16958_v51 = vunpack.c.l.bf16 %v15763_v22 }
 0xff6   : > { %v17357_v13 = vmul.f32 %v17070_v31, %v16957_v42 }
 0xff7   : > { %v17358_v33 = vmul.f32 %v17074_v54, %v16958_v51 }
 0xff8   : > { %v17430_v29 = vsel %vm15330_vm0, %v17357_v13, 0.0  ;;  %v17102_v13 = vrot.slane %v25537_v55, %v25225_v56 }
 0xff9   : > { %v17431_v34 = vadd.f32 %v17430_v29, %v17429_v48  ;;  %v17432_v0 = vsel %vm15330_vm0, %v17358_v33, 0.0  ;;  %v15803_v46 = vpop.f32.mrb[48].mxu0 }
 0xffa   : > { %v15851_v35 = vpack.c.bf16 %v15803_v46, %v15803_v46  ;;  %v15805_v1 = vpop.f32.mrb[49].mxu0 }
 0xffb   : > { %v17433_v2 = vadd.f32 %v17432_v0, %v17431_v34  ;;  %v15852_v20 = vpack.c.bf16 %v15805_v1, %v15805_v1  ;;  %v15807_v32 = vpop.f32.mrb[50].mxu0  ;;  %v17106_v0 = vrot.slane %v25537_v55, %v25228_v58 }
 0xffc   : > { %v16959_v36 = vunpack.c.l.bf16 %v15851_v35  ;;  %v15808_v11 = vpop.f32.mrb[51].mxu0 }
 0xffd   : > { %v16960_v19 = vunpack.c.l.bf16 %v15852_v20 }
 0xffe   : > { %v17359_v23 = vmul.f32 %v17078_v3, %v16959_v36 }
 0xfff   : > { %v17360_v28 = vmul.f32 %v17082_v15, %v16960_v19 }
0x1000   : > { %v17434_v40 = vsel %vm15330_vm0, %v17359_v23, 0.0  ;;  %v17110_v23 = vrot.slane %v25537_v55, %v25474_v53 }
0x1001   : > { %v17435_v49 = vadd.f32 %v17434_v40, %v17433_v2  ;;  %v17436_v17 = vsel %vm15330_vm0, %v17360_v28, 0.0  ;;  %v15844_v44 = vpop.f32.mrb[52].mxu0 }
0x1002   : > { %v15853_v14 = vpack.c.bf16 %v15844_v44, %v15844_v44  ;;  %v15846_v61 = vpop.f32.mrb[53].mxu0 }
0x1003   : > { %v17437_v45 = vadd.f32 %v17436_v17, %v17435_v49  ;;  %v15854_v47 = vpack.c.bf16 %v15846_v61, %v15846_v61  ;;  %v15848_v9 = vpop.f32.mrb[54].mxu0  ;;  %v17114_v17 = vrot.slane %v25537_v55, %v25479_v38 }
0x1004   : > { %v16961_v12 = vunpack.c.l.bf16 %v15853_v14  ;;  %v15849_v24 = vpop.f32.mrb[55].mxu0 }
0x1005   : > { %v16962_v25 = vunpack.c.l.bf16 %v15854_v47 }
0x1006   : > { %v17361_v63 = vmul.f32 %v17086_v57, %v16961_v12 }
0x1007   : > { %v17362_v59 = vmul.f32 %v17090_v18, %v16962_v25 }
0x1008   : > { %v17438_v5 = vsel %vm15330_vm0, %v17361_v63, 0.0  ;;  %v17118_v63 = vrot.slane %v25537_v55, %v25490_v39 }
0x1009   : > { %v17439_v21 = vadd.f32 %v17438_v5, %v17437_v45  ;;  %v17440_v6 = vsel %vm15330_vm0, %v17362_v59, 0.0  ;;  %v15894_v60 = vpop.f32.mrb[56].mxu0 }
0x100a   : > { %v15942_v52 = vpack.c.bf16 %v15894_v60, %v15894_v60  ;;  %v15896_v37 = vpop.f32.mrb[57].mxu0 }
0x100b   : > { %v17441_v30 = vadd.f32 %v17440_v6, %v17439_v21  ;;  %v15943_v62 = vpack.c.bf16 %v15896_v37, %v15896_v37  ;;  %v15898_v43 = vpop.f32.mrb[58].mxu0  ;;  %v17122_v6 = vrot.slane %v25537_v55, %v25494_v26 }
0x100c   : > { %v16963_v41 = vunpack.c.l.bf16 %v15942_v52  ;;  %v15899_v31 = vpop.f32.mrb[59].mxu0 }
0x100d   : > { %v16964_v50 = vunpack.c.l.bf16 %v15943_v62 }
0x100e   : > { %v17363_v48 = vmul.f32 %v17094_v8, %v16963_v41 }
0x100f   : > { %v17364_v22 = vmul.f32 %v17098_v27, %v16964_v50  ;;  %v25563_v27 = vld [vmem:[#allocation10 + $0x18] sm:$0xff] }
0x1010   : > { %v17442_v54 = vsel %vm15330_vm0, %v17363_v48, 0.0 }
0x1011   : > { %v17443_v16 = vadd.f32 %v17442_v54, %v17441_v30  ;;  %v17444_v42 = vsel %vm15330_vm0, %v17364_v22, 0.0  ;;  %v15935_v7 = vpop.f32.mrb[60].mxu0  ;;  %v17126_v22 = vrot.slane %v25563_v27, %v24982_v10 }
0x1012   : > { %v15944_v51 = vpack.c.bf16 %v15935_v7, %v15935_v7  ;;  %v15937_v33 = vpop.f32.mrb[61].mxu0 }
0x1013   : > { %v17445_v29 = vadd.f32 %v17444_v42, %v17443_v16  ;;  %v15945_v34 = vpack.c.bf16 %v15937_v33, %v15937_v33  ;;  %v15939_v46 = vpop.f32.mrb[62].mxu0  ;;  %v17130_v42 = vrot.slane %v25563_v27, %v24985_v4 }
0x1014   : > { %v16965_v35 = vunpack.c.l.bf16 %v15944_v51  ;;  %v15940_v3 = vpop.f32.mrb[63].mxu0 }
0x1015   : > { %v16966_v1 = vunpack.c.l.bf16 %v15945_v34 }
0x1016   : > { %v17365_v2 = vmul.f32 %v17102_v13, %v16965_v35 }
0x1017   : > { %v17366_v20 = vmul.f32 %v17106_v0, %v16966_v1 }
0x1018   : > { %v17446_v15 = vsel %vm15330_vm0, %v17365_v2, 0.0  ;;  %v17134_v2 = vrot.slane %v25563_v27, %v25225_v56 }
0x1019   : > { %v17447_v32 = vadd.f32 %v17446_v15, %v17445_v29  ;;  %v17448_v36 = vsel %vm15330_vm0, %v17366_v20, 0.0  ;;  %v15985_v11 = vpop.f32.mrb[64].mxu0 }
0x101a   : > { %v16033_v19 = vpack.c.bf16 %v15985_v11, %v15985_v11  ;;  %v15987_v28 = vpop.f32.mrb[65].mxu0 }
0x101b   : > { %v17449_v40 = vadd.f32 %v17448_v36, %v17447_v32  ;;  %v16034_v49 = vpack.c.bf16 %v15987_v28, %v15987_v28  ;;  %v15989_v44 = vpop.f32.mrb[66].mxu0  ;;  %v17138_v36 = vrot.slane %v25563_v27, %v25228_v58 }
0x101c   : > { %v16967_v14 = vunpack.c.l.bf16 %v16033_v19  ;;  %v15990_v57 = vpop.f32.mrb[67].mxu0 }
0x101d   : > { %v16968_v61 = vunpack.c.l.bf16 %v16034_v49 }
0x101e   : > { %v17367_v45 = vmul.f32 %v17110_v23, %v16967_v14 }
0x101f   : > { %v17368_v47 = vmul.f32 %v17114_v17, %v16968_v61 }
0x1020   : > { %v17450_v18 = vsel %vm15330_vm0, %v17367_v45, 0.0  ;;  %v17142_v45 = vrot.slane %v25563_v27, %v25474_v53 }
0x1021   : > { %v17451_v9 = vadd.f32 %v17450_v18, %v17449_v40  ;;  %v17452_v12 = vsel %vm15330_vm0, %v17368_v47, 0.0  ;;  %v16026_v24 = vpop.f32.mrb[68].mxu0 }
0x1022   : > { %v16035_v25 = vpack.c.bf16 %v16026_v24, %v16026_v24  ;;  %v16028_v59 = vpop.f32.mrb[69].mxu0 }
0x1023   : > { %v17453_v5 = vadd.f32 %v17452_v12, %v17451_v9  ;;  %v16036_v21 = vpack.c.bf16 %v16028_v59, %v16028_v59  ;;  %v16030_v60 = vpop.f32.mrb[70].mxu0  ;;  %v17146_v12 = vrot.slane %v25563_v27, %v25479_v38 }
0x1024   : > { %v16969_v52 = vunpack.c.l.bf16 %v16035_v25  ;;  %v16031_v8 = vpop.f32.mrb[71].mxu0 }
0x1025   : > { %v16970_v37 = vunpack.c.l.bf16 %v16036_v21 }
0x1026   : > { %v17369_v30 = vmul.f32 %v17118_v63, %v16969_v52 }
0x1027   : > { %v17370_v62 = vmul.f32 %v17122_v6, %v16970_v37 }
0x1028   : > { %v17454_v43 = vsel %vm15330_vm0, %v17369_v30, 0.0  ;;  %v17150_v30 = vrot.slane %v25563_v27, %v25490_v39 }
0x1029   : > { %v17455_v41 = vadd.f32 %v17454_v43, %v17453_v5  ;;  %v17456_v31 = vsel %vm15330_vm0, %v17370_v62, 0.0  ;;  %v16076_v50 = vpop.f32.mrb[72].mxu0 }
0x102a   : > { %v16124_v48 = vpack.c.bf16 %v16076_v50, %v16076_v50  ;;  %v16078_v54 = vpop.f32.mrb[73].mxu0 }
0x102b   : > { %v17457_v55 = vadd.f32 %v17456_v31, %v17455_v41  ;;  %v16125_v16 = vpack.c.bf16 %v16078_v54, %v16078_v54  ;;  %v16080_v7 = vpop.f32.mrb[74].mxu0  ;;  %v17154_v31 = vrot.slane %v25563_v27, %v25494_v26 }
0x102c   : > { %v16971_v51 = vunpack.c.l.bf16 %v16124_v48  ;;  %v16081_v13 = vpop.f32.mrb[75].mxu0 }
0x102d   : > { %v16972_v33 = vunpack.c.l.bf16 %v16125_v16 }
0x102e   : > { %v17371_v29 = vmul.f32 %v17126_v22, %v16971_v51 }
0x102f   : > { %v17372_v34 = vmul.f32 %v17130_v42, %v16972_v33  ;;  %v25589_v42 = vld [vmem:[#allocation10 + $0x20] sm:$0xff] }
0x1030   : > { %v17458_v0 = vsel %vm15330_vm0, %v17371_v29, 0.0 }
0x1031   : > { %v17459_v46 = vadd.f32 %v17458_v0, %v17457_v55  ;;  %v17460_v35 = vsel %vm15330_vm0, %v17372_v34, 0.0  ;;  %v16117_v3 = vpop.f32.mrb[76].mxu0  ;;  %v17158_v34 = vrot.slane %v25589_v42, %v24982_v10 }
0x1032   : > { %v16126_v1 = vpack.c.bf16 %v16117_v3, %v16117_v3  ;;  %v16119_v20 = vpop.f32.mrb[77].mxu0 }
0x1033   : > { %v17461_v15 = vadd.f32 %v17460_v35, %v17459_v46  ;;  %v16127_v32 = vpack.c.bf16 %v16119_v20, %v16119_v20  ;;  %v16121_v11 = vpop.f32.mrb[78].mxu0  ;;  %v17162_v35 = vrot.slane %v25589_v42, %v24985_v4 }
0x1034   : > { %v16973_v19 = vunpack.c.l.bf16 %v16126_v1  ;;  %v16122_v23 = vpop.f32.mrb[79].mxu0 }
0x1035   : > { %v16974_v28 = vunpack.c.l.bf16 %v16127_v32 }
0x1036   : > { %v17373_v40 = vmul.f32 %v17134_v2, %v16973_v19 }
0x1037   : > { %v17374_v49 = vmul.f32 %v17138_v36, %v16974_v28 }
0x1038   : > { %v17462_v17 = vsel %vm15330_vm0, %v17373_v40, 0.0  ;;  %v17166_v40 = vrot.slane %v25589_v42, %v25225_v56 }
0x1039   : > { %v17463_v44 = vadd.f32 %v17462_v17, %v17461_v15  ;;  %v17464_v14 = vsel %vm15330_vm0, %v17374_v49, 0.0  ;;  %v16167_v57 = vpop.f32.mrb[80].mxu0 }
0x103a   : > { %v16215_v61 = vpack.c.bf16 %v16167_v57, %v16167_v57  ;;  %v16169_v47 = vpop.f32.mrb[81].mxu0 }
0x103b   : > { %v17465_v18 = vadd.f32 %v17464_v14, %v17463_v44  ;;  %v16216_v9 = vpack.c.bf16 %v16169_v47, %v16169_v47  ;;  %v16171_v24 = vpop.f32.mrb[82].mxu0  ;;  %v17170_v14 = vrot.slane %v25589_v42, %v25228_v58 }
0x103c   : > { %v16975_v25 = vunpack.c.l.bf16 %v16215_v61  ;;  %v16172_v63 = vpop.f32.mrb[83].mxu0 }
0x103d   : > { %v16976_v59 = vunpack.c.l.bf16 %v16216_v9 }
0x103e   : > { %v17375_v5 = vmul.f32 %v17142_v45, %v16975_v25 }
0x103f   : > { %v17376_v21 = vmul.f32 %v17146_v12, %v16976_v59 }
0x1040   : > { %v17466_v6 = vsel %vm15330_vm0, %v17375_v5, 0.0  ;;  %v17174_v5 = vrot.slane %v25589_v42, %v25474_v53 }
0x1041   : > { %v17467_v60 = vadd.f32 %v17466_v6, %v17465_v18  ;;  %v17468_v52 = vsel %vm15330_vm0, %v17376_v21, 0.0  ;;  %v16208_v8 = vpop.f32.mrb[84].mxu0 }
0x1042   : > { %v16217_v37 = vpack.c.bf16 %v16208_v8, %v16208_v8  ;;  %v16210_v62 = vpop.f32.mrb[85].mxu0 }
0x1043   : > { %v17469_v43 = vadd.f32 %v17468_v52, %v17467_v60  ;;  %v16218_v41 = vpack.c.bf16 %v16210_v62, %v16210_v62  ;;  %v16212_v50 = vpop.f32.mrb[86].mxu0  ;;  %v17178_v52 = vrot.slane %v25589_v42, %v25479_v38 }
0x1044   : > { %v16977_v48 = vunpack.c.l.bf16 %v16217_v37  ;;  %v16213_v22 = vpop.f32.mrb[87].mxu0 }
0x1045   : > { %v16978_v54 = vunpack.c.l.bf16 %v16218_v41 }
0x1046   : > { %v17377_v55 = vmul.f32 %v17150_v30, %v16977_v48 }
0x1047   : > { %v17378_v16 = vmul.f32 %v17154_v31, %v16978_v54 }
0x1048   : > { %v17470_v7 = vsel %vm15330_vm0, %v17377_v55, 0.0  ;;  %v17182_v55 = vrot.slane %v25589_v42, %v25490_v39 }
0x1049   : > { %v17471_v51 = vadd.f32 %v17470_v7, %v17469_v43  ;;  %v17472_v13 = vsel %vm15330_vm0, %v17378_v16, 0.0  ;;  %v16258_v33 = vpop.f32.mrb[88].mxu0 }
0x104a   : > { %v16306_v29 = vpack.c.bf16 %v16258_v33, %v16258_v33  ;;  %v16260_v0 = vpop.f32.mrb[89].mxu0 }
0x104b   : > { %v17473_v27 = vadd.f32 %v17472_v13, %v17471_v51  ;;  %v16307_v46 = vpack.c.bf16 %v16260_v0, %v16260_v0  ;;  %v16262_v3 = vpop.f32.mrb[90].mxu0  ;;  %v17186_v13 = vrot.slane %v25589_v42, %v25494_v26 }
0x104c   : > { %v16979_v1 = vunpack.c.l.bf16 %v16306_v29  ;;  %v16263_v2 = vpop.f32.mrb[91].mxu0 }
0x104d   : > { %v16980_v20 = vunpack.c.l.bf16 %v16307_v46 }
0x104e   : > { %v17379_v15 = vmul.f32 %v17158_v34, %v16979_v1 }
0x104f   : > { %v17380_v32 = vmul.f32 %v17162_v35, %v16980_v20  ;;  %v25615_v35 = vld [vmem:[#allocation10 + $0x28] sm:$0xff] }
0x1050   : > { %v17474_v36 = vsel %vm15330_vm0, %v17379_v15, 0.0 }
0x1051   : > { %v17475_v11 = vadd.f32 %v17474_v36, %v17473_v27  ;;  %v17476_v19 = vsel %vm15330_vm0, %v17380_v32, 0.0  ;;  %v16299_v23 = vpop.f32.mrb[92].mxu0  ;;  %v17190_v32 = vrot.slane %v25615_v35, %v24982_v10 }
0x1052   : > { %v16308_v28 = vpack.c.bf16 %v16299_v23, %v16299_v23  ;;  %v16301_v49 = vpop.f32.mrb[93].mxu0 }
0x1053   : > { %v17477_v17 = vadd.f32 %v17476_v19, %v17475_v11  ;;  %v16309_v44 = vpack.c.bf16 %v16301_v49, %v16301_v49  ;;  %v16303_v57 = vpop.f32.mrb[94].mxu0  ;;  %v17194_v19 = vrot.slane %v25615_v35, %v24985_v4 }
0x1054   : > { %v16981_v61 = vunpack.c.l.bf16 %v16308_v28  ;;  %v16304_v45 = vpop.f32.mrb[95].mxu0 }
0x1055   : > { %v16982_v47 = vunpack.c.l.bf16 %v16309_v44 }
0x1056   : > { %v17381_v18 = vmul.f32 %v17166_v40, %v16981_v61 }
0x1057   : > { %v17382_v9 = vmul.f32 %v17170_v14, %v16982_v47 }
0x1058   : > { %v17478_v12 = vsel %vm15330_vm0, %v17381_v18, 0.0  ;;  %v17198_v18 = vrot.slane %v25615_v35, %v25225_v56 }
0x1059   : > { %v17479_v24 = vadd.f32 %v17478_v12, %v17477_v17  ;;  %v17480_v25 = vsel %vm15330_vm0, %v17382_v9, 0.0  ;;  %v16349_v63 = vpop.f32.mrb[96].mxu0 }
0x105a   : > { %v16397_v59 = vpack.c.bf16 %v16349_v63, %v16349_v63  ;;  %v16351_v21 = vpop.f32.mrb[97].mxu0 }
0x105b   : > { %v17481_v6 = vadd.f32 %v17480_v25, %v17479_v24  ;;  %v16398_v60 = vpack.c.bf16 %v16351_v21, %v16351_v21  ;;  %v16353_v8 = vpop.f32.mrb[98].mxu0  ;;  %v17202_v25 = vrot.slane %v25615_v35, %v25228_v58 }
0x105c   : > { %v16983_v37 = vunpack.c.l.bf16 %v16397_v59  ;;  %v16354_v30 = vpop.f32.mrb[99].mxu0 }
0x105d   : > { %v16984_v62 = vunpack.c.l.bf16 %v16398_v60 }
0x105e   : > { %v17383_v43 = vmul.f32 %v17174_v5, %v16983_v37 }
0x105f   : > { %v17384_v41 = vmul.f32 %v17178_v52, %v16984_v62 }
0x1060   : > { %v17482_v31 = vsel %vm15330_vm0, %v17383_v43, 0.0  ;;  %v17206_v43 = vrot.slane %v25615_v35, %v25474_v53 }
0x1061   : > { %v17483_v50 = vadd.f32 %v17482_v31, %v17481_v6  ;;  %v17484_v48 = vsel %vm15330_vm0, %v17384_v41, 0.0  ;;  %v16390_v22 = vpop.f32.mrb[100].mxu0 }
0x1062   : > { %v16399_v54 = vpack.c.bf16 %v16390_v22, %v16390_v22  ;;  %v16392_v16 = vpop.f32.mrb[101].mxu0 }
0x1063   : > { %v17485_v7 = vadd.f32 %v17484_v48, %v17483_v50  ;;  %v16400_v51 = vpack.c.bf16 %v16392_v16, %v16392_v16  ;;  %v16394_v33 = vpop.f32.mrb[102].mxu0  ;;  %v17210_v48 = vrot.slane %v25615_v35, %v25479_v38 }
0x1064   : > { %v16985_v29 = vunpack.c.l.bf16 %v16399_v54  ;;  %v16395_v34 = vpop.f32.mrb[103].mxu0 }
0x1065   : > { %v16986_v0 = vunpack.c.l.bf16 %v16400_v51 }
0x1066   : > { %v17385_v27 = vmul.f32 %v17182_v55, %v16985_v29 }
0x1067   : > { %v17386_v46 = vmul.f32 %v17186_v13, %v16986_v0 }
0x1068   : > { %v17486_v3 = vsel %vm15330_vm0, %v17385_v27, 0.0  ;;  %v17214_v27 = vrot.slane %v25615_v35, %v25490_v39 }
0x1069   : > { %v17487_v1 = vadd.f32 %v17486_v3, %v17485_v7  ;;  %v17488_v2 = vsel %vm15330_vm0, %v17386_v46, 0.0  ;;  %v16440_v20 = vpop.f32.mrb[104].mxu0 }
0x106a   : > { %v16488_v15 = vpack.c.bf16 %v16440_v20, %v16440_v20  ;;  %v16442_v36 = vpop.f32.mrb[105].mxu0 }
0x106b   : > { %v17489_v42 = vadd.f32 %v17488_v2, %v17487_v1  ;;  %v16489_v11 = vpack.c.bf16 %v16442_v36, %v16442_v36  ;;  %v16444_v23 = vpop.f32.mrb[106].mxu0  ;;  %v17218_v2 = vrot.slane %v25615_v35, %v25494_v26 }
0x106c   : > { %v16987_v28 = vunpack.c.l.bf16 %v16488_v15  ;;  %v16445_v40 = vpop.f32.mrb[107].mxu0 }
0x106d   : > { %v16988_v49 = vunpack.c.l.bf16 %v16489_v11 }
0x106e   : > { %v17387_v17 = vmul.f32 %v17190_v32, %v16987_v28 }
0x106f   : > { %v17388_v44 = vmul.f32 %v17194_v19, %v16988_v49  ;;  %v25641_v19 = vld [vmem:[#allocation10 + $0x30] sm:$0xff] }
0x1070   : > { %v17490_v14 = vsel %vm15330_vm0, %v17387_v17, 0.0 }
0x1071   : > { %v17491_v57 = vadd.f32 %v17490_v14, %v17489_v42  ;;  %v17492_v61 = vsel %vm15330_vm0, %v17388_v44, 0.0  ;;  %v16481_v45 = vpop.f32.mrb[108].mxu0  ;;  %v17222_v44 = vrot.slane %v25641_v19, %v24982_v10 }
0x1072   : > { %v16490_v47 = vpack.c.bf16 %v16481_v45, %v16481_v45  ;;  %v16483_v9 = vpop.f32.mrb[109].mxu0 }
0x1073   : > { %v17493_v12 = vadd.f32 %v17492_v61, %v17491_v57  ;;  %v16491_v24 = vpack.c.bf16 %v16483_v9, %v16483_v9  ;;  %v16485_v63 = vpop.f32.mrb[110].mxu0  ;;  %v17226_v61 = vrot.slane %v25641_v19, %v24985_v4 }
0x1074   : > { %v16989_v59 = vunpack.c.l.bf16 %v16490_v47  ;;  %v16486_v5 = vpop.f32.mrb[111].mxu0 }
0x1075   : > { %v16990_v21 = vunpack.c.l.bf16 %v16491_v24 }
0x1076   : > { %v17389_v6 = vmul.f32 %v17198_v18, %v16989_v59 }
0x1077   : > { %v17390_v60 = vmul.f32 %v17202_v25, %v16990_v21 }
0x1078   : > { %v17494_v52 = vsel %vm15330_vm0, %v17389_v6, 0.0  ;;  %v17230_v6 = vrot.slane %v25641_v19, %v25225_v56 }
0x1079   : > { %v17495_v8 = vadd.f32 %v17494_v52, %v17493_v12  ;;  %v17496_v37 = vsel %vm15330_vm0, %v17390_v60, 0.0  ;;  %v16531_v30 = vpop.f32.mrb[112].mxu0 }
0x107a   : > { %v16579_v62 = vpack.c.bf16 %v16531_v30, %v16531_v30  ;;  %v16533_v41 = vpop.f32.mrb[113].mxu0 }
0x107b   : > { %v17497_v31 = vadd.f32 %v17496_v37, %v17495_v8  ;;  %v16580_v50 = vpack.c.bf16 %v16533_v41, %v16533_v41  ;;  %v16535_v22 = vpop.f32.mrb[114].mxu0  ;;  %v17234_v37 = vrot.slane %v25641_v19, %v25228_v58 }
0x107c   : > { %v16991_v54 = vunpack.c.l.bf16 %v16579_v62  ;;  %v16536_v55 = vpop.f32.mrb[115].mxu0 }
0x107d   : > { %v16992_v16 = vunpack.c.l.bf16 %v16580_v50 }
0x107e   : > { %v17391_v7 = vmul.f32 %v17206_v43, %v16991_v54 }
0x107f   : > { %v17392_v51 = vmul.f32 %v17210_v48, %v16992_v16 }
0x1080   : > { %v17498_v13 = vsel %vm15330_vm0, %v17391_v7, 0.0  ;;  %v17238_v7 = vrot.slane %v25641_v19, %v25474_v53 }
0x1081   : > { %v17499_v33 = vadd.f32 %v17498_v13, %v17497_v31  ;;  %v17500_v29 = vsel %vm15330_vm0, %v17392_v51, 0.0  ;;  %v16572_v34 = vpop.f32.mrb[116].mxu0 }
0x1082   : > { %v16581_v0 = vpack.c.bf16 %v16572_v34, %v16572_v34  ;;  %v16574_v46 = vpop.f32.mrb[117].mxu0 }
0x1083   : > { %v17501_v3 = vadd.f32 %v17500_v29, %v17499_v33  ;;  %v16582_v1 = vpack.c.bf16 %v16574_v46, %v16574_v46  ;;  %v16576_v20 = vpop.f32.mrb[118].mxu0  ;;  %v17242_v29 = vrot.slane %v25641_v19, %v25479_v38 }
0x1084   : > { %v16993_v15 = vunpack.c.l.bf16 %v16581_v0  ;;  %v16577_v32 = vpop.f32.mrb[119].mxu0 }
0x1085   : > { %v16994_v36 = vunpack.c.l.bf16 %v16582_v1 }
0x1086   : > { %v17393_v42 = vmul.f32 %v17214_v27, %v16993_v15 }
0x1087   : > { %v17394_v11 = vmul.f32 %v17218_v2, %v16994_v36 }
0x1088   : > { %v17502_v23 = vsel %vm15330_vm0, %v17393_v42, 0.0  ;;  %v17246_v42 = vrot.slane %v25641_v19, %v25490_v39 }
0x1089   : > { %v17503_v28 = vadd.f32 %v17502_v23, %v17501_v3  ;;  %v17504_v40 = vsel %vm15330_vm0, %v17394_v11, 0.0  ;;  %v16622_v49 = vpop.f32.mrb[120].mxu0 }
0x108a   : > { %v16670_v17 = vpack.c.bf16 %v16622_v49, %v16622_v49  ;;  %v16624_v14 = vpop.f32.mrb[121].mxu0 }
0x108b   : > { %v17505_v35 = vadd.f32 %v17504_v40, %v17503_v28  ;;  %v16671_v57 = vpack.c.bf16 %v16624_v14, %v16624_v14  ;;  %v16626_v45 = vpop.f32.mrb[122].mxu0  ;;  %v17250_v40 = vrot.slane %v25641_v19, %v25494_v26 }
0x108c   : > { %v16995_v47 = vunpack.c.l.bf16 %v16670_v17  ;;  %v16627_v18 = vpop.f32.mrb[123].mxu0 }
0x108d   : > { %v16996_v9 = vunpack.c.l.bf16 %v16671_v57 }
0x108e   : > { %v17395_v12 = vmul.f32 %v17222_v44, %v16995_v47 }
0x108f   : > { %v17396_v24 = vmul.f32 %v17226_v61, %v16996_v9  ;;  %v25667_v61 = vld [vmem:[#allocation10 + $0x38] sm:$0xff] }
0x1090   : > { %v17506_v25 = vsel %vm15330_vm0, %v17395_v12, 0.0 }
0x1091   : > { %v17507_v63 = vadd.f32 %v17506_v25, %v17505_v35  ;;  %v17508_v59 = vsel %vm15330_vm0, %v17396_v24, 0.0  ;;  %v16663_v5 = vpop.f32.mrb[124].mxu0  ;;  %v17254_v24 = vrot.slane %v25667_v61, %v24982_v10  ;;  %v17262_v10 = vrot.slane %v25667_v61, %v25225_v56 }
0x1092   : > { %v16672_v21 = vpack.c.bf16 %v16663_v5, %v16663_v5  ;;  %v16665_v60 = vpop.f32.mrb[125].mxu0  ;;  %v17270_v56 = vrot.slane %v25667_v61, %v25474_v53  ;;  %v17278_v53 = vrot.slane %v25667_v61, %v25490_v39  ;;  %v17540_v39 = vld [vmem:[#allocation2] sm:$0x1] }
0x1093   : > { %v17509_v52 = vadd.f32 %v17508_v59, %v17507_v63  ;;  %v16673_v8 = vpack.c.bf16 %v16665_v60, %v16665_v60  ;;  %v16667_v30 = vpop.f32.mrb[126].mxu0  ;;  %v17258_v59 = vrot.slane %v25667_v61, %v24985_v4  ;;  %v17266_v4 = vrot.slane %v25667_v61, %v25228_v58 }
0x1094   : > { %v16997_v62 = vunpack.c.l.bf16 %v16672_v21  ;;  %v16668_v43 = vpop.f32.mrb[127].mxu0  ;;  %v17274_v58 = vrot.slane %v25667_v61, %v25479_v38  ;;  %v17282_v38 = vrot.slane %v25667_v61, %v25494_v26 }
0x1095   : > { %v16998_v41 = vunpack.c.l.bf16 %v16673_v8 }
0x1096   : > { %v17397_v31 = vmul.f32 %v17230_v6, %v16997_v62 }
0x1097   : > { %v17398_v50 = vmul.f32 %v17234_v37, %v16998_v41 }
0x1098   : > { %v17510_v48 = vsel %vm15330_vm0, %v17397_v31, 0.0 }
0x1099   : > { %v17511_v22 = vadd.f32 %v17510_v48, %v17509_v52  ;;  %v17512_v54 = vsel %vm15330_vm0, %v17398_v50, 0.0  ;;  %v16713_v55 = vpop.f32.mrb[128].mxu0 }
0x109a   : > { %v16761_v16 = vpack.c.bf16 %v16713_v55, %v16713_v55  ;;  %v16715_v51 = vpop.f32.mrb[129].mxu0 }
0x109b   : > { %v17513_v13 = vadd.f32 %v17512_v54, %v17511_v22  ;;  %v16762_v33 = vpack.c.bf16 %v16715_v51, %v16715_v51  ;;  %v16717_v34 = vpop.f32.mrb[130].mxu0 }
0x109c   : > { %v16999_v0 = vunpack.c.l.bf16 %v16761_v16  ;;  %v16718_v27 = vpop.f32.mrb[131].mxu0 }
0x109d   : > { %v17000_v46 = vunpack.c.l.bf16 %v16762_v33 }
0x109e   : > { %v17399_v3 = vmul.f32 %v17238_v7, %v16999_v0 }
0x109f   : > { %v17400_v1 = vmul.f32 %v17242_v29, %v17000_v46 }
0x10a0   : > { %v17514_v2 = vsel %vm15330_vm0, %v17399_v3, 0.0 }
0x10a1   : > { %v17515_v20 = vadd.f32 %v17514_v2, %v17513_v13  ;;  %v17516_v15 = vsel %vm15330_vm0, %v17400_v1, 0.0  ;;  %v16754_v32 = vpop.f32.mrb[132].mxu0 }
0x10a2   : > { %v16763_v36 = vpack.c.bf16 %v16754_v32, %v16754_v32  ;;  %v16756_v11 = vpop.f32.mrb[133].mxu0 }
0x10a3   : > { %v17517_v23 = vadd.f32 %v17516_v15, %v17515_v20  ;;  %v16764_v28 = vpack.c.bf16 %v16756_v11, %v16756_v11  ;;  %v16758_v49 = vpop.f32.mrb[134].mxu0 }
0x10a4   : > { %v17001_v17 = vunpack.c.l.bf16 %v16763_v36  ;;  %v16759_v44 = vpop.f32.mrb[135].mxu0 }
0x10a5   : > { %v17002_v14 = vunpack.c.l.bf16 %v16764_v28 }
0x10a6   : > { %v17401_v35 = vmul.f32 %v17246_v42, %v17001_v17 }
0x10a7   : > { %v17402_v57 = vmul.f32 %v17250_v40, %v17002_v14 }
0x10a8   : > { %v17518_v45 = vsel %vm15330_vm0, %v17401_v35, 0.0 }
0x10a9   : > { %v17519_v47 = vadd.f32 %v17518_v45, %v17517_v23  ;;  %v17520_v18 = vsel %vm15330_vm0, %v17402_v57, 0.0  ;;  %v16804_v9 = vpop.f32.mrb[136].mxu0 }
0x10aa   : > { %v16852_v12 = vpack.c.bf16 %v16804_v9, %v16804_v9  ;;  %v16806_v25 = vpop.f32.mrb[137].mxu0 }
0x10ab   : > { %v17521_v19 = vadd.f32 %v17520_v18, %v17519_v47  ;;  %v16853_v63 = vpack.c.bf16 %v16806_v25, %v16806_v25  ;;  %v16808_v5 = vpop.f32.mrb[138].mxu0 }
0x10ac   : > { %v17003_v21 = vunpack.c.l.bf16 %v16852_v12  ;;  %v16809_v6 = vpop.f32.mrb[139].mxu0 }
0x10ad   : > { %v17004_v60 = vunpack.c.l.bf16 %v16853_v63 }
0x10ae   : > { %v17403_v52 = vmul.f32 %v17254_v24, %v17003_v21 }
0x10af   : > { %v17404_v8 = vmul.f32 %v17258_v59, %v17004_v60 }
0x10b0   : > { %v17522_v37 = vsel %vm15330_vm0, %v17403_v52, 0.0 }
0x10b1   : > { %v17523_v30 = vadd.f32 %v17522_v37, %v17521_v19  ;;  %v17524_v62 = vsel %vm15330_vm0, %v17404_v8, 0.0  ;;  %v16845_v43 = vpop.f32.mrb[140].mxu0 }
0x10b2   : > { %v16854_v41 = vpack.c.bf16 %v16845_v43, %v16845_v43  ;;  %v16847_v31 = vpop.f32.mrb[141].mxu0 }
0x10b3   : > { %v17525_v50 = vadd.f32 %v17524_v62, %v17523_v30  ;;  %v16855_v48 = vpack.c.bf16 %v16847_v31, %v16847_v31  ;;  %v16849_v22 = vpop.f32.mrb[142].mxu0 }
0x10b4   : > { %v17005_v54 = vunpack.c.l.bf16 %v16854_v41  ;;  %v16850_v55 = vpop.f32.mrb[143].mxu0 }
0x10b5   : > { %v17006_v16 = vunpack.c.l.bf16 %v16855_v48 }
0x10b6   : > { %v17405_v7 = vmul.f32 %v17262_v10, %v17005_v54 }
0x10b7   : > { %v17406_v51 = vmul.f32 %v17266_v4, %v17006_v16 }
0x10b8   : > { %v17526_v13 = vsel %vm15330_vm0, %v17405_v7, 0.0 }
0x10b9   : > { %v17527_v33 = vadd.f32 %v17526_v13, %v17525_v50  ;;  %v17528_v29 = vsel %vm15330_vm0, %v17406_v51, 0.0  ;;  %v16895_v34 = vpop.f32.mrb[144].mxu0 }
0x10ba   : > { %v16943_v0 = vpack.c.bf16 %v16895_v34, %v16895_v34  ;;  %v16897_v27 = vpop.f32.mrb[145].mxu0 }
0x10bb   : > { %v17529_v46 = vadd.f32 %v17528_v29, %v17527_v33  ;;  %v16944_v3 = vpack.c.bf16 %v16897_v27, %v16897_v27  ;;  %v16899_v1 = vpop.f32.mrb[146].mxu0 }
0x10bc   : > { %v17007_v2 = vunpack.c.l.bf16 %v16943_v0  ;;  %v16900_v20 = vpop.f32.mrb[147].mxu0 }
0x10bd   : > { %v17008_v15 = vunpack.c.l.bf16 %v16944_v3 }
0x10be   : > { %v17407_v32 = vmul.f32 %v17270_v56, %v17007_v2 }
0x10bf   : > { %v17408_v36 = vmul.f32 %v17274_v58, %v17008_v15 }
0x10c0   : > { %v17530_v42 = vsel %vm15330_vm0, %v17407_v32, 0.0 }
0x10c1   : > { %v17531_v11 = vadd.f32 %v17530_v42, %v17529_v46  ;;  %v17532_v23 = vsel %vm15330_vm0, %v17408_v36, 0.0  ;;  %v16936_v28 = vpop.f32.mrb[148].mxu0 }
0x10c2   : > { %v16945_v40 = vpack.c.bf16 %v16936_v28, %v16936_v28  ;;  %v16938_v49 = vpop.f32.mrb[149].mxu0 }
0x10c3   : > { %v16946_v17 = vpack.c.bf16 %v16938_v49, %v16938_v49  ;;  %v17533_v44 = vadd.f32 %v17532_v23, %v17531_v11  ;;  %v16940_v14 = vpop.f32.mrb[150].mxu0 }
0x10c4   : > { %v17009_v35 = vunpack.c.l.bf16 %v16945_v40  ;;  %v16941_v57 = vpop.f32.mrb[151].mxu0 }
0x10c5   : > { %v17010_v45 = vunpack.c.l.bf16 %v16946_v17 }
0x10c6   : > { %v17409_v47 = vmul.f32 %v17278_v53, %v17009_v35 }
0x10c7   : > { %v17410_v18 = vmul.f32 %v17282_v38, %v17010_v45 }
0x10c8   : > { %v17534_v9 = vsel %vm15330_vm0, %v17409_v47, 0.0 }
0x10c9   : > { %v17535_v12 = vadd.f32 %v17534_v9, %v17533_v44  ;;  %v17536_v24 = vsel %vm15330_vm0, %v17410_v18, 0.0 }
0x10cb   : > { %v17537_v25 = vadd.f32 %v17536_v24, %v17535_v12 }
0x10cd   : > { %17538 = vadd.xlane.f32.xlu0 %v17537_v25 }
0x115a   : > { %v17539_v26 = vpop.xlane.xlu0 %17538 }
0x115b   : > { %v17541_v61 = vadd.f32 %v17540_v39, %v17539_v26 }
0x115d   : > { %17543 = vst.msk [vmem:[%s642_s20] sm:$0x1] %vm17542_vm12, %v17541_v61 }
0x115e PF: > { %s25841_s27 = sld [smem:[#allocation26_spill]] }
0x1164   : > { %s33_s20 = sadd.s32 1, %s25841_s27  }
0x1165   : > { %p30_p11 = scmp.ge.s32.totalorder %s33_s20, 4  }
0x1167   :  { %32 = sbr.rel (!%p30_p11) target bundleno = 10 (0xa), region = 215 }
0x116e   :  { %17561 = vsyncpa [#allocation4], 1 }
0x116f   :  { %17563 = vsyncpa [#allocation4 + $0x1], 1 }
0x1170   :  { %17564 = vsyncpa [#allocation6], 1 }
0x1171   :  { %17565 = vsyncpa [#allocation9], 1 }
0x1172   :  { %17566 = vsyncpa [#allocation12], 1 }
0x1173   :  { %17567 = vsyncpa [#allocation15], 1 }
0x1174   :  { %17568 = vsyncpa [#allocation18], 1 }

</bundles_post_ra>
